<compile_context>
chip_gen: v5e
topology: v5e:2x2
jax: 0.10.0
libtpu: 0.0.40
codegen_flags: <defaults>
</compile_context>

<pallas_src>
import functools

import jax
import jax.numpy as jnp
from jax.experimental import pallas as pl
from jax.experimental.pallas import tpu as pltpu


FILTERS = [32, 64, 32, 16]
KERNEL_SIZE = (3, 5)     # (KH, KW)
STRIDE = (2, 1)          # (sH, sW)
PADDING = (0, 2)         # (pH, pW)


# ----------------------------------------------------------------------------
# Fused kernel: whole ConvSegment forward for one batch element per grid step.
# ----------------------------------------------------------------------------
def _fused_convsegment_kernel(x_ref, w0_ref, b0_ref, w1_ref, b1_ref,
                              w2_ref, b2_ref, w3_ref, b3_ref, w4_ref, b4_ref,
                              o_ref, buf0, buf1, buf2, buf3,
                              *, heights, width, chans):
    KH, KW = KERNEL_SIZE
    W = width
    WP = W + 2 * PADDING[1]                       # padded width
    H0, H1, H2, H3, H4 = heights                  # 31, 15, 7, 3, 1
    _, C1, C2, C3, _ = chans                      # 1, 32, 64, 32, 16

    def leaky(v):                                 # nn.LeakyReLU(0.1)
        return jnp.where(v > 0, v, 0.1 * v)

    # Zero the padded activation buffers (W-padding columns / spare row must be 0).
    buf0[...] = jnp.zeros(buf0.shape, jnp.float32)
    buf1[...] = jnp.zeros(buf1.shape, jnp.float32)
    buf2[...] = jnp.zeros(buf2.shape, jnp.float32)
    buf3[...] = jnp.zeros(buf3.shape, jnp.float32)

    # Stage-0 input (this batch element) into its padded buffer interior.
    buf0[0:H0, 2:2 + W, :] = x_ref[0]             # (H0, W, 1)

    # ---- layer 0: Cin = 1 -> pure VPU broadcast conv -----------------------
    v0 = buf0[...]                                # (H0 + 1, WP, 1)
    w0 = w0_ref[...]                              # (KH, KW, C1)
    acc0 = jnp.zeros((H1, W, C1), jnp.float32)
    for kh in range(KH):
        # rows kh, kh+2, ... (stride-2 deinterleave via leading-dim reshape)
        d = v0[kh:kh + 2 * H1].reshape(H1, 2, WP, 1)[:, 0]        # (H1, WP, 1)
        for kw in range(KW):
            acc0 = acc0 + d[:, kw:kw + W, :] * w0[kh:kh + 1, kw:kw + 1, :]
    acc0 = leaky(acc0 + b0_ref[...])              # (H1, W, C1)
    buf1[0:H1, 2:2 + W, :] = acc0

    # ---- layers 1..3: in-kernel im2col taps + MXU matmul accumulation ------
    def conv_layer(buf, w_ref, b_ref, Ho):
        v = buf[...]                              # (Hin + 1, WP, Ci), f32
        Ci = v.shape[-1]
        wk = w_ref[...]                           # (KH, KW, Ci, Co), bf16
        acc = None
        for kh in range(KH):
            d = v[kh:kh + 2 * Ho].reshape(Ho, 2, WP, Ci)[:, 0]    # (Ho, WP, Ci)
            for kw in range(KW):
                p = d[:, kw:kw + W, :].reshape(Ho * W, Ci).astype(jnp.bfloat16)
                t = jnp.dot(p, wk[kh, kw], preferred_element_type=jnp.float32)
                acc = t if acc is None else acc + t
        return leaky(acc + b_ref[...])            # (Ho * W, Co)

    a1 = conv_layer(buf1, w1_ref, b1_ref, H2)     # (H2*W, C2)
    buf2[0:H2, 2:2 + W, :] = a1.reshape(H2, W, C2)
    a2 = conv_layer(buf2, w2_ref, b2_ref, H3)     # (H3*W, C3)
    buf3[0:H3, 2:2 + W, :] = a2.reshape(H3, W, C3)
    a3 = conv_layer(buf3, w3_ref, b3_ref, H4)     # (H4*W, C4)

    # ---- fused last_conv (1x1, Cout=1) + sigmoid epilogue -------------------
    z = jnp.sum(a3 * w4_ref[...], axis=-1, keepdims=True) + b4_ref[...]   # (H4*W, 1)
    o_ref[...] = jax.nn.sigmoid(z).reshape(1, H4 * W, 1)


# ----------------------------------------------------------------------------
# Host wrapper
# ----------------------------------------------------------------------------
def _prep_params(params):
    """PyTorch-shaped Conv2d params -> kernel-ready layouts."""
    (w0, b0), (w1, b1), (w2, b2), (w3, b3), (w4, b4) = params
    KH, KW = KERNEL_SIZE

    def prep_mm(w):  # (Co, Ci, KH, KW) -> (KH, KW, Ci, Co), bf16 for the MXU
        return jnp.transpose(w, (2, 3, 1, 0)).astype(jnp.bfloat16)

    w0p = jnp.transpose(w0, (2, 3, 1, 0)).reshape(KH, KW, w0.shape[0])   # (3,5,32) f32
    w4p = w4.reshape(1, w4.shape[1])                                     # (1,16)  f32
    return (w0p, b0.reshape(1, -1),
            prep_mm(w1), b1.reshape(1, -1),
            prep_mm(w2), b2.reshape(1, -1),
            prep_mm(w3), b3.reshape(1, -1),
            w4p, b4.reshape(1, 1))


@jax.jit
def conv_segment_forward(x, params):
    """x: (B, H, W) -> (B, 1, H_out, W)  (matches PyTorch NCHW output)."""
    B, H, W = x.shape
    KH, KW = KERNEL_SIZE
    chans = [1] + FILTERS

    heights = [H]
    for _ in FILTERS:
        assert heights[-1] >= KH, "input height too small for the conv stack"
        heights.append((heights[-1] - KH) // STRIDE[0] + 1)
    H4 = heights[-1]

    (w0p, b0p, w1p, b1p, w2p, b2p, w3p, b3p, w4p, b4p) = _prep_params(params)
    xin = x[..., None]                            # (B, H, W, 1): channel on lanes

    kernel = functools.partial(
        _fused_convsegment_kernel,
        heights=tuple(heights), width=W, chans=tuple(chans))

    spec2 = lambda a: pl.BlockSpec(a.shape, lambda b: (0, 0))
    spec3 = lambda a: pl.BlockSpec(a.shape, lambda b: (0, 0, 0))
    spec4 = lambda a: pl.BlockSpec(a.shape, lambda b: (0, 0, 0, 0))

    out = pl.pallas_call(
        kernel,
        out_shape=jax.ShapeDtypeStruct((B, H4 * W, 1), jnp.float32),
        grid_spec=pltpu.PrefetchScalarGridSpec(
            num_scalar_prefetch=0,
            grid=(B,),
            in_specs=[
                pl.BlockSpec((1, H, W, 1), lambda b: (b, 0, 0, 0)),   # x (one batch elem)
                spec3(w0p), spec2(b0p),
                spec4(w1p), spec2(b1p),
                spec4(w2p), spec2(b2p),
                spec4(w3p), spec2(b3p),
                spec2(w4p), spec2(b4p),
            ],
            out_specs=pl.BlockSpec((1, H4 * W, 1), lambda b: (b, 0, 0)),
            scratch_shapes=[
                pltpu.VMEM((heights[0] + 1, W + 4, chans[0]), jnp.float32),
                pltpu.VMEM((heights[1] + 1, W + 4, chans[1]), jnp.float32),
                pltpu.VMEM((heights[2] + 1, W + 4, chans[2]), jnp.float32),
                pltpu.VMEM((heights[3] + 1, W + 4, chans[3]), jnp.float32),
            ],
        ),
        compiler_params=pltpu.CompilerParams(
            dimension_semantics=("parallel",)),
    )(xin, w0p, b0p, w1p, b1p, w2p, b2p, w3p, b3p, w4p, b4p)

    return out.reshape(B, 1, H4, W)


# ----------------------------------------------------------------------------
# Params (PyTorch Conv2d shapes) and pure-XLA reference for verification
# ----------------------------------------------------------------------------
def init_params(key):
    chans = [1] + FILTERS
    params = []
    for cin, cout in zip(chans[:-1], chans[1:]):
        key, k1, k2 = jax.random.split(key, 3)
        fan_in = cin * KERNEL_SIZE[0] * KERNEL_SIZE[1]
        bound = 1.0 / (fan_in ** 0.5)
        w = jax.random.uniform(k1, (cout, cin, *KERNEL_SIZE), jnp.float32, -bound, bound)
        bb = jax.random.uniform(k2, (cout,), jnp.float32, -bound, bound)
        params.append((w, bb))
    key, k1, k2 = jax.random.split(key, 3)
    cin = chans[-1]
    bound = 1.0 / (cin ** 0.5)
    w = jax.random.uniform(k1, (1, cin, 1, 1), jnp.float32, -bound, bound)
    bb = jax.random.uniform(k2, (1,), jnp.float32, -bound, bound)
    params.append((w, bb))
    return params


def _reference_forward(x, params):
    """Pure-JAX (XLA conv) reference of ConvSegment.forward, no Pallas."""
    dn = ('NCHW', 'OIHW', 'NCHW')
    h = x[:, None, :, :]
    for (w, b) in params[:-1]:
        h = jax.lax.conv_general_dilated(
            h, w, window_strides=STRIDE,
            padding=((PADDING[0], PADDING[0]), (PADDING[1], PADDING[1])),
            dimension_numbers=dn, precision=jax.lax.Precision.HIGHEST)
        h = h + b[None, :, None, None]
        h = jnp.where(h > 0, h, 0.1 * h)
    w, b = params[-1]
    h = jax.lax.conv_general_dilated(
        h, w, (1, 1), ((0, 0), (0, 0)),
        dimension_numbers=dn, precision=jax.lax.Precision.HIGHEST)
    return jax.nn.sigmoid(h + b[None, :, None, None])


if __name__ == "__main__":
    key = jax.random.PRNGKey(0)
    kp, kx = jax.random.split(key)
    params = init_params(kp)

    # H must survive 4 convs with kernel_h=3, stride_h=2, pad_h=0: 31 -> 15 -> 7 -> 3 -> 1
    B, H, W = 2, 31, 16
    x = jax.random.normal(kx, (B, H, W), jnp.float32)

    y = conv_segment_forward(x, params)
    y = jax.block_until_ready(y)
    assert y.shape == (B, 1, 1, W), y.shape
    assert bool(jnp.all((y >= 0.0) & (y <= 1.0))), "sigmoid output out of range"

    y_ref = _reference_forward(x, params)
    max_err = float(jnp.max(jnp.abs(y - y_ref)))
    assert max_err < 3e-2, f"mismatch vs XLA reference: max_err={max_err}"

    print("KERNEL_OK")
</pallas_src>

<mosaic_0001>
module attributes {stable_mosaic.version = 11 : i64} {
  func.func @_fused_convsegment_kernel(%arg0: i32, %arg1: memref<1x31x16x1xf32, #tpu.memory_space<vmem>>, %arg2: memref<3x5x32xf32, #tpu.memory_space<vmem>>, %arg3: memref<1x32xf32, #tpu.memory_space<vmem>>, %arg4: memref<3x5x32x64xbf16, #tpu.memory_space<vmem>>, %arg5: memref<1x64xf32, #tpu.memory_space<vmem>>, %arg6: memref<3x5x64x32xbf16, #tpu.memory_space<vmem>>, %arg7: memref<1x32xf32, #tpu.memory_space<vmem>>, %arg8: memref<3x5x32x16xbf16, #tpu.memory_space<vmem>>, %arg9: memref<1x16xf32, #tpu.memory_space<vmem>>, %arg10: memref<1x16xf32, #tpu.memory_space<vmem>>, %arg11: memref<1x1xf32, #tpu.memory_space<vmem>>, %arg12: memref<1x16x1xf32, #tpu.memory_space<vmem>>, %arg13: memref<32x20x1xf32, #tpu.memory_space<vmem>>, %arg14: memref<16x20x32xf32, #tpu.memory_space<vmem>>, %arg15: memref<8x20x64xf32, #tpu.memory_space<vmem>>, %arg16: memref<4x20x32xf32, #tpu.memory_space<vmem>>) attributes {dimension_semantics = [#tpu.dimension_semantics<parallel>], iteration_bounds = array<i64: 2>, scalar_prefetch = 0 : i64, scratch_operands = 4 : i64, tpu.core_type = #tpu.core_type<tc>, window_params = [{transform_indices = @transform_0, window_bounds = array<i64: 1, 31, 16, 1>}, {pipeline_mode = #tpu.pipeline_mode<synchronous>, transform_indices = @transform_1, window_bounds = array<i64: 3, 5, 32>}, {pipeline_mode = #tpu.pipeline_mode<synchronous>, transform_indices = @transform_2, window_bounds = array<i64: 1, 32>}, {pipeline_mode = #tpu.pipeline_mode<synchronous>, transform_indices = @transform_3, window_bounds = array<i64: 3, 5, 32, 64>}, {pipeline_mode = #tpu.pipeline_mode<synchronous>, transform_indices = @transform_4, window_bounds = array<i64: 1, 64>}, {pipeline_mode = #tpu.pipeline_mode<synchronous>, transform_indices = @transform_5, window_bounds = array<i64: 3, 5, 64, 32>}, {pipeline_mode = #tpu.pipeline_mode<synchronous>, transform_indices = @transform_6, window_bounds = array<i64: 1, 32>}, {pipeline_mode = #tpu.pipeline_mode<synchronous>, transform_indices = @transform_7, window_bounds = array<i64: 3, 5, 32, 16>}, {pipeline_mode = #tpu.pipeline_mode<synchronous>, transform_indices = @transform_8, window_bounds = array<i64: 1, 16>}, {pipeline_mode = #tpu.pipeline_mode<synchronous>, transform_indices = @transform_9, window_bounds = array<i64: 1, 16>}, {pipeline_mode = #tpu.pipeline_mode<synchronous>, transform_indices = @transform_10, window_bounds = array<i64: 1, 1>}, {transform_indices = @transform_11, window_bounds = array<i64: 1, 16, 1>}]} {
    %cst = arith.constant 0.000000e+00 : f32
    %0 = vector.broadcast %cst : f32 to vector<32x20x1xf32>
    %c0 = arith.constant 0 : index
    %c0_0 = arith.constant 0 : index
    %c0_1 = arith.constant 0 : index
    %1 = vector.load %arg13[%c0, %c0_0, %c0_1] : memref<32x20x1xf32, #tpu.memory_space<vmem>>, vector<32x20x1xf32>
    tpu.vector_store %arg13[%c0, %c0_0, %c0_1], %0 {strides = array<i32>} : memref<32x20x1xf32, #tpu.memory_space<vmem>>, vector<32x20x1xf32>,
    %cst_2 = arith.constant 0.000000e+00 : f32
    %2 = vector.broadcast %cst_2 : f32 to vector<16x20x32xf32>
    %c0_3 = arith.constant 0 : index
    %c0_4 = arith.constant 0 : index
    %c0_5 = arith.constant 0 : index
    %3 = vector.load %arg14[%c0_3, %c0_4, %c0_5] : memref<16x20x32xf32, #tpu.memory_space<vmem>>, vector<16x20x32xf32>
    tpu.vector_store %arg14[%c0_3, %c0_4, %c0_5], %2 {strides = array<i32>} : memref<16x20x32xf32, #tpu.memory_space<vmem>>, vector<16x20x32xf32>,
    %cst_6 = arith.constant 0.000000e+00 : f32
    %4 = vector.broadcast %cst_6 : f32 to vector<8x20x64xf32>
    %c0_7 = arith.constant 0 : index
    %c0_8 = arith.constant 0 : index
    %c0_9 = arith.constant 0 : index
    %5 = vector.load %arg15[%c0_7, %c0_8, %c0_9] : memref<8x20x64xf32, #tpu.memory_space<vmem>>, vector<8x20x64xf32>
    tpu.vector_store %arg15[%c0_7, %c0_8, %c0_9], %4 {strides = array<i32>} : memref<8x20x64xf32, #tpu.memory_space<vmem>>, vector<8x20x64xf32>,
    %cst_10 = arith.constant 0.000000e+00 : f32
    %6 = vector.broadcast %cst_10 : f32 to vector<4x20x32xf32>
    %c0_11 = arith.constant 0 : index
    %c0_12 = arith.constant 0 : index
    %c0_13 = arith.constant 0 : index
    %7 = vector.load %arg16[%c0_11, %c0_12, %c0_13] : memref<4x20x32xf32, #tpu.memory_space<vmem>>, vector<4x20x32xf32>
    tpu.vector_store %arg16[%c0_11, %c0_12, %c0_13], %6 {strides = array<i32>} : memref<4x20x32xf32, #tpu.memory_space<vmem>>, vector<4x20x32xf32>,
    %c0_14 = arith.constant 0 : index
    %c0_15 = arith.constant 0 : index
    %c0_16 = arith.constant 0 : index
    %c0_17 = arith.constant 0 : index
    %8 = vector.load %arg1[%c0_14, %c0_15, %c0_16, %c0_17] : memref<1x31x16x1xf32, #tpu.memory_space<vmem>>, vector<1x31x16x1xf32>
    %9 = vector.shape_cast %8 : vector<1x31x16x1xf32> to vector<31x16x1xf32>
    %c0_18 = arith.constant 0 : index
    %c2 = arith.constant 2 : index
    %c0_19 = arith.constant 0 : index
    %10 = vector.load %arg13[%c0_18, %c2, %c0_19] : memref<32x20x1xf32, #tpu.memory_space<vmem>>, vector<31x16x1xf32>
    tpu.vector_store %arg13[%c0_18, %c2, %c0_19], %9 {strides = array<i32>} : memref<32x20x1xf32, #tpu.memory_space<vmem>>, vector<31x16x1xf32>,
    %c0_20 = arith.constant 0 : index
    %c0_21 = arith.constant 0 : index
    %c0_22 = arith.constant 0 : index
    %11 = vector.load %arg13[%c0_20, %c0_21, %c0_22] : memref<32x20x1xf32, #tpu.memory_space<vmem>>, vector<32x20x1xf32>
    %c0_23 = arith.constant 0 : index
    %c0_24 = arith.constant 0 : index
    %c0_25 = arith.constant 0 : index
    %12 = vector.load %arg2[%c0_23, %c0_24, %c0_25] : memref<3x5x32xf32, #tpu.memory_space<vmem>>, vector<3x5x32xf32>
    %cst_26 = arith.constant 0.000000e+00 : f32
    %13 = vector.broadcast %cst_26 : f32 to vector<15x16x32xf32>
    %14 = vector.extract_strided_slice %11 {offsets = [0, 0, 0], sizes = [30, 20, 1], strides = [1, 1, 1]} : vector<32x20x1xf32> to vector<30x20x1xf32>
    %15 = vector.shape_cast %14 : vector<30x20x1xf32> to vector<15x2x20x1xf32>
    %16 = vector.extract_strided_slice %15 {offsets = [0, 0, 0, 0], sizes = [15, 1, 20, 1], strides = [1, 1, 1, 1]} : vector<15x2x20x1xf32> to vector<15x1x20x1xf32>
    %17 = vector.shape_cast %16 : vector<15x1x20x1xf32> to vector<15x20x1xf32>
    %18 = vector.extract_strided_slice %17 {offsets = [0, 0, 0], sizes = [15, 16, 1], strides = [1, 1, 1]} : vector<15x20x1xf32> to vector<15x16x1xf32>
    %19 = vector.extract_strided_slice %12 {offsets = [0, 0, 0], sizes = [1, 1, 32], strides = [1, 1, 1]} : vector<3x5x32xf32> to vector<1x1x32xf32>
    %20 = vector.broadcast %18 : vector<15x16x1xf32> to vector<15x16x32xf32>
    %21 = vector.broadcast %19 : vector<1x1x32xf32> to vector<15x16x32xf32>
    %22 = arith.mulf %20, %21 : vector<15x16x32xf32>
    %23 = arith.addf %13, %22 : vector<15x16x32xf32>
    %24 = vector.extract_strided_slice %17 {offsets = [0, 1, 0], sizes = [15, 16, 1], strides = [1, 1, 1]} : vector<15x20x1xf32> to vector<15x16x1xf32>
    %25 = vector.extract_strided_slice %12 {offsets = [0, 1, 0], sizes = [1, 1, 32], strides = [1, 1, 1]} : vector<3x5x32xf32> to vector<1x1x32xf32>
    %26 = vector.broadcast %24 : vector<15x16x1xf32> to vector<15x16x32xf32>
    %27 = vector.broadcast %25 : vector<1x1x32xf32> to vector<15x16x32xf32>
    %28 = arith.mulf %26, %27 : vector<15x16x32xf32>
    %29 = arith.addf %23, %28 : vector<15x16x32xf32>
    %30 = vector.extract_strided_slice %17 {offsets = [0, 2, 0], sizes = [15, 16, 1], strides = [1, 1, 1]} : vector<15x20x1xf32> to vector<15x16x1xf32>
    %31 = vector.extract_strided_slice %12 {offsets = [0, 2, 0], sizes = [1, 1, 32], strides = [1, 1, 1]} : vector<3x5x32xf32> to vector<1x1x32xf32>
    %32 = vector.broadcast %30 : vector<15x16x1xf32> to vector<15x16x32xf32>
    %33 = vector.broadcast %31 : vector<1x1x32xf32> to vector<15x16x32xf32>
    %34 = arith.mulf %32, %33 : vector<15x16x32xf32>
    %35 = arith.addf %29, %34 : vector<15x16x32xf32>
    %36 = vector.extract_strided_slice %17 {offsets = [0, 3, 0], sizes = [15, 16, 1], strides = [1, 1, 1]} : vector<15x20x1xf32> to vector<15x16x1xf32>
    %37 = vector.extract_strided_slice %12 {offsets = [0, 3, 0], sizes = [1, 1, 32], strides = [1, 1, 1]} : vector<3x5x32xf32> to vector<1x1x32xf32>
    %38 = vector.broadcast %36 : vector<15x16x1xf32> to vector<15x16x32xf32>
    %39 = vector.broadcast %37 : vector<1x1x32xf32> to vector<15x16x32xf32>
    %40 = arith.mulf %38, %39 : vector<15x16x32xf32>
    %41 = arith.addf %35, %40 : vector<15x16x32xf32>
    %42 = vector.extract_strided_slice %17 {offsets = [0, 4, 0], sizes = [15, 16, 1], strides = [1, 1, 1]} : vector<15x20x1xf32> to vector<15x16x1xf32>
    %43 = vector.extract_strided_slice %12 {offsets = [0, 4, 0], sizes = [1, 1, 32], strides = [1, 1, 1]} : vector<3x5x32xf32> to vector<1x1x32xf32>
    %44 = vector.broadcast %42 : vector<15x16x1xf32> to vector<15x16x32xf32>
    %45 = vector.broadcast %43 : vector<1x1x32xf32> to vector<15x16x32xf32>
    %46 = arith.mulf %44, %45 : vector<15x16x32xf32>
    %47 = arith.addf %41, %46 : vector<15x16x32xf32>
    %48 = vector.extract_strided_slice %11 {offsets = [1, 0, 0], sizes = [30, 20, 1], strides = [1, 1, 1]} : vector<32x20x1xf32> to vector<30x20x1xf32>
    %49 = vector.shape_cast %48 : vector<30x20x1xf32> to vector<15x2x20x1xf32>
    %50 = vector.extract_strided_slice %49 {offsets = [0, 0, 0, 0], sizes = [15, 1, 20, 1], strides = [1, 1, 1, 1]} : vector<15x2x20x1xf32> to vector<15x1x20x1xf32>
    %51 = vector.shape_cast %50 : vector<15x1x20x1xf32> to vector<15x20x1xf32>
    %52 = vector.extract_strided_slice %51 {offsets = [0, 0, 0], sizes = [15, 16, 1], strides = [1, 1, 1]} : vector<15x20x1xf32> to vector<15x16x1xf32>
    %53 = vector.extract_strided_slice %12 {offsets = [1, 0, 0], sizes = [1, 1, 32], strides = [1, 1, 1]} : vector<3x5x32xf32> to vector<1x1x32xf32>
    %54 = vector.broadcast %52 : vector<15x16x1xf32> to vector<15x16x32xf32>
    %55 = vector.broadcast %53 : vector<1x1x32xf32> to vector<15x16x32xf32>
    %56 = arith.mulf %54, %55 : vector<15x16x32xf32>
    %57 = arith.addf %47, %56 : vector<15x16x32xf32>
    %58 = vector.extract_strided_slice %51 {offsets = [0, 1, 0], sizes = [15, 16, 1], strides = [1, 1, 1]} : vector<15x20x1xf32> to vector<15x16x1xf32>
    %59 = vector.extract_strided_slice %12 {offsets = [1, 1, 0], sizes = [1, 1, 32], strides = [1, 1, 1]} : vector<3x5x32xf32> to vector<1x1x32xf32>
    %60 = vector.broadcast %58 : vector<15x16x1xf32> to vector<15x16x32xf32>
    %61 = vector.broadcast %59 : vector<1x1x32xf32> to vector<15x16x32xf32>
    %62 = arith.mulf %60, %61 : vector<15x16x32xf32>
    %63 = arith.addf %57, %62 : vector<15x16x32xf32>
    %64 = vector.extract_strided_slice %51 {offsets = [0, 2, 0], sizes = [15, 16, 1], strides = [1, 1, 1]} : vector<15x20x1xf32> to vector<15x16x1xf32>
    %65 = vector.extract_strided_slice %12 {offsets = [1, 2, 0], sizes = [1, 1, 32], strides = [1, 1, 1]} : vector<3x5x32xf32> to vector<1x1x32xf32>
    %66 = vector.broadcast %64 : vector<15x16x1xf32> to vector<15x16x32xf32>
    %67 = vector.broadcast %65 : vector<1x1x32xf32> to vector<15x16x32xf32>
    %68 = arith.mulf %66, %67 : vector<15x16x32xf32>
    %69 = arith.addf %63, %68 : vector<15x16x32xf32>
    %70 = vector.extract_strided_slice %51 {offsets = [0, 3, 0], sizes = [15, 16, 1], strides = [1, 1, 1]} : vector<15x20x1xf32> to vector<15x16x1xf32>
    %71 = vector.extract_strided_slice %12 {offsets = [1, 3, 0], sizes = [1, 1, 32], strides = [1, 1, 1]} : vector<3x5x32xf32> to vector<1x1x32xf32>
    %72 = vector.broadcast %70 : vector<15x16x1xf32> to vector<15x16x32xf32>
    %73 = vector.broadcast %71 : vector<1x1x32xf32> to vector<15x16x32xf32>
    %74 = arith.mulf %72, %73 : vector<15x16x32xf32>
    %75 = arith.addf %69, %74 : vector<15x16x32xf32>
    %76 = vector.extract_strided_slice %51 {offsets = [0, 4, 0], sizes = [15, 16, 1], strides = [1, 1, 1]} : vector<15x20x1xf32> to vector<15x16x1xf32>
    %77 = vector.extract_strided_slice %12 {offsets = [1, 4, 0], sizes = [1, 1, 32], strides = [1, 1, 1]} : vector<3x5x32xf32> to vector<1x1x32xf32>
    %78 = vector.broadcast %76 : vector<15x16x1xf32> to vector<15x16x32xf32>
    %79 = vector.broadcast %77 : vector<1x1x32xf32> to vector<15x16x32xf32>
    %80 = arith.mulf %78, %79 : vector<15x16x32xf32>
    %81 = arith.addf %75, %80 : vector<15x16x32xf32>
    %82 = vector.extract_strided_slice %11 {offsets = [2, 0, 0], sizes = [30, 20, 1], strides = [1, 1, 1]} : vector<32x20x1xf32> to vector<30x20x1xf32>
    %83 = vector.shape_cast %82 : vector<30x20x1xf32> to vector<15x2x20x1xf32>
    %84 = vector.extract_strided_slice %83 {offsets = [0, 0, 0, 0], sizes = [15, 1, 20, 1], strides = [1, 1, 1, 1]} : vector<15x2x20x1xf32> to vector<15x1x20x1xf32>
    %85 = vector.shape_cast %84 : vector<15x1x20x1xf32> to vector<15x20x1xf32>
    %86 = vector.extract_strided_slice %85 {offsets = [0, 0, 0], sizes = [15, 16, 1], strides = [1, 1, 1]} : vector<15x20x1xf32> to vector<15x16x1xf32>
    %87 = vector.extract_strided_slice %12 {offsets = [2, 0, 0], sizes = [1, 1, 32], strides = [1, 1, 1]} : vector<3x5x32xf32> to vector<1x1x32xf32>
    %88 = vector.broadcast %86 : vector<15x16x1xf32> to vector<15x16x32xf32>
    %89 = vector.broadcast %87 : vector<1x1x32xf32> to vector<15x16x32xf32>
    %90 = arith.mulf %88, %89 : vector<15x16x32xf32>
    %91 = arith.addf %81, %90 : vector<15x16x32xf32>
    %92 = vector.extract_strided_slice %85 {offsets = [0, 1, 0], sizes = [15, 16, 1], strides = [1, 1, 1]} : vector<15x20x1xf32> to vector<15x16x1xf32>
    %93 = vector.extract_strided_slice %12 {offsets = [2, 1, 0], sizes = [1, 1, 32], strides = [1, 1, 1]} : vector<3x5x32xf32> to vector<1x1x32xf32>
    %94 = vector.broadcast %92 : vector<15x16x1xf32> to vector<15x16x32xf32>
    %95 = vector.broadcast %93 : vector<1x1x32xf32> to vector<15x16x32xf32>
    %96 = arith.mulf %94, %95 : vector<15x16x32xf32>
    %97 = arith.addf %91, %96 : vector<15x16x32xf32>
    %98 = vector.extract_strided_slice %85 {offsets = [0, 2, 0], sizes = [15, 16, 1], strides = [1, 1, 1]} : vector<15x20x1xf32> to vector<15x16x1xf32>
    %99 = vector.extract_strided_slice %12 {offsets = [2, 2, 0], sizes = [1, 1, 32], strides = [1, 1, 1]} : vector<3x5x32xf32> to vector<1x1x32xf32>
    %100 = vector.broadcast %98 : vector<15x16x1xf32> to vector<15x16x32xf32>
    %101 = vector.broadcast %99 : vector<1x1x32xf32> to vector<15x16x32xf32>
    %102 = arith.mulf %100, %101 : vector<15x16x32xf32>
    %103 = arith.addf %97, %102 : vector<15x16x32xf32>
    %104 = vector.extract_strided_slice %85 {offsets = [0, 3, 0], sizes = [15, 16, 1], strides = [1, 1, 1]} : vector<15x20x1xf32> to vector<15x16x1xf32>
    %105 = vector.extract_strided_slice %12 {offsets = [2, 3, 0], sizes = [1, 1, 32], strides = [1, 1, 1]} : vector<3x5x32xf32> to vector<1x1x32xf32>
    %106 = vector.broadcast %104 : vector<15x16x1xf32> to vector<15x16x32xf32>
    %107 = vector.broadcast %105 : vector<1x1x32xf32> to vector<15x16x32xf32>
    %108 = arith.mulf %106, %107 : vector<15x16x32xf32>
    %109 = arith.addf %103, %108 : vector<15x16x32xf32>
    %110 = vector.extract_strided_slice %85 {offsets = [0, 4, 0], sizes = [15, 16, 1], strides = [1, 1, 1]} : vector<15x20x1xf32> to vector<15x16x1xf32>
    %111 = vector.extract_strided_slice %12 {offsets = [2, 4, 0], sizes = [1, 1, 32], strides = [1, 1, 1]} : vector<3x5x32xf32> to vector<1x1x32xf32>
    %112 = vector.broadcast %110 : vector<15x16x1xf32> to vector<15x16x32xf32>
    %113 = vector.broadcast %111 : vector<1x1x32xf32> to vector<15x16x32xf32>
    %114 = arith.mulf %112, %113 : vector<15x16x32xf32>
    %115 = arith.addf %109, %114 : vector<15x16x32xf32>
    %c0_27 = arith.constant 0 : index
    %c0_28 = arith.constant 0 : index
    %116 = vector.load %arg3[%c0_27, %c0_28] : memref<1x32xf32, #tpu.memory_space<vmem>>, vector<1x32xf32>
    %117 = vector.shape_cast %116 : vector<1x32xf32> to vector<1x1x32xf32>
    %118 = vector.broadcast %117 : vector<1x1x32xf32> to vector<15x16x32xf32>
    %119 = arith.addf %115, %118 : vector<15x16x32xf32>
    %cst_29 = arith.constant 0.000000e+00 : f32
    %120 = vector.broadcast %cst_29 : f32 to vector<15x16x32xf32>
    %121 = arith.cmpf ogt, %119, %120 : vector<15x16x32xf32>
    %cst_30 = arith.constant 1.000000e-01 : f32
    %122 = vector.broadcast %cst_30 : f32 to vector<15x16x32xf32>
    %123 = arith.mulf %122, %119 : vector<15x16x32xf32>
    %124 = arith.select %121, %119, %123 : vector<15x16x32xi1>, vector<15x16x32xf32>
    %c0_31 = arith.constant 0 : index
    %c2_32 = arith.constant 2 : index
    %c0_33 = arith.constant 0 : index
    %125 = vector.load %arg14[%c0_31, %c2_32, %c0_33] : memref<16x20x32xf32, #tpu.memory_space<vmem>>, vector<15x16x32xf32>
    tpu.vector_store %arg14[%c0_31, %c2_32, %c0_33], %124 {strides = array<i32>} : memref<16x20x32xf32, #tpu.memory_space<vmem>>, vector<15x16x32xf32>,
    %c0_34 = arith.constant 0 : index
    %c0_35 = arith.constant 0 : index
    %c0_36 = arith.constant 0 : index
    %126 = vector.load %arg14[%c0_34, %c0_35, %c0_36] : memref<16x20x32xf32, #tpu.memory_space<vmem>>, vector<16x20x32xf32>
    %c0_37 = arith.constant 0 : index
    %c0_38 = arith.constant 0 : index
    %c0_39 = arith.constant 0 : index
    %c0_40 = arith.constant 0 : index
    %127 = vector.load %arg4[%c0_37, %c0_38, %c0_39, %c0_40] : memref<3x5x32x64xbf16, #tpu.memory_space<vmem>>, vector<3x5x32x64xbf16>
    %128 = vector.extract_strided_slice %126 {offsets = [0, 0, 0], sizes = [14, 20, 32], strides = [1, 1, 1]} : vector<16x20x32xf32> to vector<14x20x32xf32>
    %129 = vector.shape_cast %128 : vector<14x20x32xf32> to vector<7x2x20x32xf32>
    %130 = vector.extract_strided_slice %129 {offsets = [0, 0, 0, 0], sizes = [7, 1, 20, 32], strides = [1, 1, 1, 1]} : vector<7x2x20x32xf32> to vector<7x1x20x32xf32>
    %131 = vector.shape_cast %130 : vector<7x1x20x32xf32> to vector<7x20x32xf32>
    %132 = vector.extract_strided_slice %131 {offsets = [0, 0, 0], sizes = [7, 16, 32], strides = [1, 1, 1]} : vector<7x20x32xf32> to vector<7x16x32xf32>
    %133 = vector.shape_cast %132 : vector<7x16x32xf32> to vector<112x32xf32>
    %134 = arith.truncf %133 : vector<112x32xf32> to vector<112x32xbf16>
    %135 = vector.extract_strided_slice %127 {offsets = [0, 0, 0, 0], sizes = [1, 1, 32, 64], strides = [1, 1, 1, 1]} : vector<3x5x32x64xbf16> to vector<1x1x32x64xbf16>
    %136 = vector.shape_cast %135 : vector<1x1x32x64xbf16> to vector<32x64xbf16>
    %cst_41 = arith.constant dense<0.000000e+00> : vector<112x64xf32>
    %137 = tpu.matmul %134, %136, %cst_41 {dimension_numbers = #tpu.dot_dimension_numbers<[1], [0], [0], [1], [0, 0, 1, 1], [], []>} : vector<112x32xbf16>, vector<32x64xbf16>, vector<112x64xf32> -> vector<112x64xf32>
    %138 = vector.extract_strided_slice %131 {offsets = [0, 1, 0], sizes = [7, 16, 32], strides = [1, 1, 1]} : vector<7x20x32xf32> to vector<7x16x32xf32>
    %139 = vector.shape_cast %138 : vector<7x16x32xf32> to vector<112x32xf32>
    %140 = arith.truncf %139 : vector<112x32xf32> to vector<112x32xbf16>
    %141 = vector.extract_strided_slice %127 {offsets = [0, 1, 0, 0], sizes = [1, 1, 32, 64], strides = [1, 1, 1, 1]} : vector<3x5x32x64xbf16> to vector<1x1x32x64xbf16>
    %142 = vector.shape_cast %141 : vector<1x1x32x64xbf16> to vector<32x64xbf16>
    %cst_42 = arith.constant dense<0.000000e+00> : vector<112x64xf32>
    %143 = tpu.matmul %140, %142, %cst_42 {dimension_numbers = #tpu.dot_dimension_numbers<[1], [0], [0], [1], [0, 0, 1, 1], [], []>} : vector<112x32xbf16>, vector<32x64xbf16>, vector<112x64xf32> -> vector<112x64xf32>
    %144 = arith.addf %137, %143 : vector<112x64xf32>
    %145 = vector.extract_strided_slice %131 {offsets = [0, 2, 0], sizes = [7, 16, 32], strides = [1, 1, 1]} : vector<7x20x32xf32> to vector<7x16x32xf32>
    %146 = vector.shape_cast %145 : vector<7x16x32xf32> to vector<112x32xf32>
    %147 = arith.truncf %146 : vector<112x32xf32> to vector<112x32xbf16>
    %148 = vector.extract_strided_slice %127 {offsets = [0, 2, 0, 0], sizes = [1, 1, 32, 64], strides = [1, 1, 1, 1]} : vector<3x5x32x64xbf16> to vector<1x1x32x64xbf16>
    %149 = vector.shape_cast %148 : vector<1x1x32x64xbf16> to vector<32x64xbf16>
    %cst_43 = arith.constant dense<0.000000e+00> : vector<112x64xf32>
    %150 = tpu.matmul %147, %149, %cst_43 {dimension_numbers = #tpu.dot_dimension_numbers<[1], [0], [0], [1], [0, 0, 1, 1], [], []>} : vector<112x32xbf16>, vector<32x64xbf16>, vector<112x64xf32> -> vector<112x64xf32>
    %151 = arith.addf %144, %150 : vector<112x64xf32>
    %152 = vector.extract_strided_slice %131 {offsets = [0, 3, 0], sizes = [7, 16, 32], strides = [1, 1, 1]} : vector<7x20x32xf32> to vector<7x16x32xf32>
    %153 = vector.shape_cast %152 : vector<7x16x32xf32> to vector<112x32xf32>
    %154 = arith.truncf %153 : vector<112x32xf32> to vector<112x32xbf16>
    %155 = vector.extract_strided_slice %127 {offsets = [0, 3, 0, 0], sizes = [1, 1, 32, 64], strides = [1, 1, 1, 1]} : vector<3x5x32x64xbf16> to vector<1x1x32x64xbf16>
    %156 = vector.shape_cast %155 : vector<1x1x32x64xbf16> to vector<32x64xbf16>
    %cst_44 = arith.constant dense<0.000000e+00> : vector<112x64xf32>
    %157 = tpu.matmul %154, %156, %cst_44 {dimension_numbers = #tpu.dot_dimension_numbers<[1], [0], [0], [1], [0, 0, 1, 1], [], []>} : vector<112x32xbf16>, vector<32x64xbf16>, vector<112x64xf32> -> vector<112x64xf32>
    %158 = arith.addf %151, %157 : vector<112x64xf32>
    %159 = vector.extract_strided_slice %131 {offsets = [0, 4, 0], sizes = [7, 16, 32], strides = [1, 1, 1]} : vector<7x20x32xf32> to vector<7x16x32xf32>
    %160 = vector.shape_cast %159 : vector<7x16x32xf32> to vector<112x32xf32>
    %161 = arith.truncf %160 : vector<112x32xf32> to vector<112x32xbf16>
    %162 = vector.extract_strided_slice %127 {offsets = [0, 4, 0, 0], sizes = [1, 1, 32, 64], strides = [1, 1, 1, 1]} : vector<3x5x32x64xbf16> to vector<1x1x32x64xbf16>
    %163 = vector.shape_cast %162 : vector<1x1x32x64xbf16> to vector<32x64xbf16>
    %cst_45 = arith.constant dense<0.000000e+00> : vector<112x64xf32>
    %164 = tpu.matmul %161, %163, %cst_45 {dimension_numbers = #tpu.dot_dimension_numbers<[1], [0], [0], [1], [0, 0, 1, 1], [], []>} : vector<112x32xbf16>, vector<32x64xbf16>, vector<112x64xf32> -> vector<112x64xf32>
    %165 = arith.addf %158, %164 : vector<112x64xf32>
    %166 = vector.extract_strided_slice %126 {offsets = [1, 0, 0], sizes = [14, 20, 32], strides = [1, 1, 1]} : vector<16x20x32xf32> to vector<14x20x32xf32>
    %167 = vector.shape_cast %166 : vector<14x20x32xf32> to vector<7x2x20x32xf32>
    %168 = vector.extract_strided_slice %167 {offsets = [0, 0, 0, 0], sizes = [7, 1, 20, 32], strides = [1, 1, 1, 1]} : vector<7x2x20x32xf32> to vector<7x1x20x32xf32>
    %169 = vector.shape_cast %168 : vector<7x1x20x32xf32> to vector<7x20x32xf32>
    %170 = vector.extract_strided_slice %169 {offsets = [0, 0, 0], sizes = [7, 16, 32], strides = [1, 1, 1]} : vector<7x20x32xf32> to vector<7x16x32xf32>
    %171 = vector.shape_cast %170 : vector<7x16x32xf32> to vector<112x32xf32>
    %172 = arith.truncf %171 : vector<112x32xf32> to vector<112x32xbf16>
    %173 = vector.extract_strided_slice %127 {offsets = [1, 0, 0, 0], sizes = [1, 1, 32, 64], strides = [1, 1, 1, 1]} : vector<3x5x32x64xbf16> to vector<1x1x32x64xbf16>
    %174 = vector.shape_cast %173 : vector<1x1x32x64xbf16> to vector<32x64xbf16>
    %cst_46 = arith.constant dense<0.000000e+00> : vector<112x64xf32>
    %175 = tpu.matmul %172, %174, %cst_46 {dimension_numbers = #tpu.dot_dimension_numbers<[1], [0], [0], [1], [0, 0, 1, 1], [], []>} : vector<112x32xbf16>, vector<32x64xbf16>, vector<112x64xf32> -> vector<112x64xf32>
    %176 = arith.addf %165, %175 : vector<112x64xf32>
    %177 = vector.extract_strided_slice %169 {offsets = [0, 1, 0], sizes = [7, 16, 32], strides = [1, 1, 1]} : vector<7x20x32xf32> to vector<7x16x32xf32>
    %178 = vector.shape_cast %177 : vector<7x16x32xf32> to vector<112x32xf32>
    %179 = arith.truncf %178 : vector<112x32xf32> to vector<112x32xbf16>
    %180 = vector.extract_strided_slice %127 {offsets = [1, 1, 0, 0], sizes = [1, 1, 32, 64], strides = [1, 1, 1, 1]} : vector<3x5x32x64xbf16> to vector<1x1x32x64xbf16>
    %181 = vector.shape_cast %180 : vector<1x1x32x64xbf16> to vector<32x64xbf16>
    %cst_47 = arith.constant dense<0.000000e+00> : vector<112x64xf32>
    %182 = tpu.matmul %179, %181, %cst_47 {dimension_numbers = #tpu.dot_dimension_numbers<[1], [0], [0], [1], [0, 0, 1, 1], [], []>} : vector<112x32xbf16>, vector<32x64xbf16>, vector<112x64xf32> -> vector<112x64xf32>
    %183 = arith.addf %176, %182 : vector<112x64xf32>
    %184 = vector.extract_strided_slice %169 {offsets = [0, 2, 0], sizes = [7, 16, 32], strides = [1, 1, 1]} : vector<7x20x32xf32> to vector<7x16x32xf32>
    %185 = vector.shape_cast %184 : vector<7x16x32xf32> to vector<112x32xf32>
    %186 = arith.truncf %185 : vector<112x32xf32> to vector<112x32xbf16>
    %187 = vector.extract_strided_slice %127 {offsets = [1, 2, 0, 0], sizes = [1, 1, 32, 64], strides = [1, 1, 1, 1]} : vector<3x5x32x64xbf16> to vector<1x1x32x64xbf16>
    %188 = vector.shape_cast %187 : vector<1x1x32x64xbf16> to vector<32x64xbf16>
    %cst_48 = arith.constant dense<0.000000e+00> : vector<112x64xf32>
    %189 = tpu.matmul %186, %188, %cst_48 {dimension_numbers = #tpu.dot_dimension_numbers<[1], [0], [0], [1], [0, 0, 1, 1], [], []>} : vector<112x32xbf16>, vector<32x64xbf16>, vector<112x64xf32> -> vector<112x64xf32>
    %190 = arith.addf %183, %189 : vector<112x64xf32>
    %191 = vector.extract_strided_slice %169 {offsets = [0, 3, 0], sizes = [7, 16, 32], strides = [1, 1, 1]} : vector<7x20x32xf32> to vector<7x16x32xf32>
    %192 = vector.shape_cast %191 : vector<7x16x32xf32> to vector<112x32xf32>
    %193 = arith.truncf %192 : vector<112x32xf32> to vector<112x32xbf16>
    %194 = vector.extract_strided_slice %127 {offsets = [1, 3, 0, 0], sizes = [1, 1, 32, 64], strides = [1, 1, 1, 1]} : vector<3x5x32x64xbf16> to vector<1x1x32x64xbf16>
    %195 = vector.shape_cast %194 : vector<1x1x32x64xbf16> to vector<32x64xbf16>
    %cst_49 = arith.constant dense<0.000000e+00> : vector<112x64xf32>
    %196 = tpu.matmul %193, %195, %cst_49 {dimension_numbers = #tpu.dot_dimension_numbers<[1], [0], [0], [1], [0, 0, 1, 1], [], []>} : vector<112x32xbf16>, vector<32x64xbf16>, vector<112x64xf32> -> vector<112x64xf32>
    %197 = arith.addf %190, %196 : vector<112x64xf32>
    %198 = vector.extract_strided_slice %169 {offsets = [0, 4, 0], sizes = [7, 16, 32], strides = [1, 1, 1]} : vector<7x20x32xf32> to vector<7x16x32xf32>
    %199 = vector.shape_cast %198 : vector<7x16x32xf32> to vector<112x32xf32>
    %200 = arith.truncf %199 : vector<112x32xf32> to vector<112x32xbf16>
    %201 = vector.extract_strided_slice %127 {offsets = [1, 4, 0, 0], sizes = [1, 1, 32, 64], strides = [1, 1, 1, 1]} : vector<3x5x32x64xbf16> to vector<1x1x32x64xbf16>
    %202 = vector.shape_cast %201 : vector<1x1x32x64xbf16> to vector<32x64xbf16>
    %cst_50 = arith.constant dense<0.000000e+00> : vector<112x64xf32>
    %203 = tpu.matmul %200, %202, %cst_50 {dimension_numbers = #tpu.dot_dimension_numbers<[1], [0], [0], [1], [0, 0, 1, 1], [], []>} : vector<112x32xbf16>, vector<32x64xbf16>, vector<112x64xf32> -> vector<112x64xf32>
    %204 = arith.addf %197, %203 : vector<112x64xf32>
    %205 = vector.extract_strided_slice %126 {offsets = [2, 0, 0], sizes = [14, 20, 32], strides = [1, 1, 1]} : vector<16x20x32xf32> to vector<14x20x32xf32>
    %206 = vector.shape_cast %205 : vector<14x20x32xf32> to vector<7x2x20x32xf32>
    %207 = vector.extract_strided_slice %206 {offsets = [0, 0, 0, 0], sizes = [7, 1, 20, 32], strides = [1, 1, 1, 1]} : vector<7x2x20x32xf32> to vector<7x1x20x32xf32>
    %208 = vector.shape_cast %207 : vector<7x1x20x32xf32> to vector<7x20x32xf32>
    %209 = vector.extract_strided_slice %208 {offsets = [0, 0, 0], sizes = [7, 16, 32], strides = [1, 1, 1]} : vector<7x20x32xf32> to vector<7x16x32xf32>
    %210 = vector.shape_cast %209 : vector<7x16x32xf32> to vector<112x32xf32>
    %211 = arith.truncf %210 : vector<112x32xf32> to vector<112x32xbf16>
    %212 = vector.extract_strided_slice %127 {offsets = [2, 0, 0, 0], sizes = [1, 1, 32, 64], strides = [1, 1, 1, 1]} : vector<3x5x32x64xbf16> to vector<1x1x32x64xbf16>
    %213 = vector.shape_cast %212 : vector<1x1x32x64xbf16> to vector<32x64xbf16>
    %cst_51 = arith.constant dense<0.000000e+00> : vector<112x64xf32>
    %214 = tpu.matmul %211, %213, %cst_51 {dimension_numbers = #tpu.dot_dimension_numbers<[1], [0], [0], [1], [0, 0, 1, 1], [], []>} : vector<112x32xbf16>, vector<32x64xbf16>, vector<112x64xf32> -> vector<112x64xf32>
    %215 = arith.addf %204, %214 : vector<112x64xf32>
    %216 = vector.extract_strided_slice %208 {offsets = [0, 1, 0], sizes = [7, 16, 32], strides = [1, 1, 1]} : vector<7x20x32xf32> to vector<7x16x32xf32>
    %217 = vector.shape_cast %216 : vector<7x16x32xf32> to vector<112x32xf32>
    %218 = arith.truncf %217 : vector<112x32xf32> to vector<112x32xbf16>
    %219 = vector.extract_strided_slice %127 {offsets = [2, 1, 0, 0], sizes = [1, 1, 32, 64], strides = [1, 1, 1, 1]} : vector<3x5x32x64xbf16> to vector<1x1x32x64xbf16>
    %220 = vector.shape_cast %219 : vector<1x1x32x64xbf16> to vector<32x64xbf16>
    %cst_52 = arith.constant dense<0.000000e+00> : vector<112x64xf32>
    %221 = tpu.matmul %218, %220, %cst_52 {dimension_numbers = #tpu.dot_dimension_numbers<[1], [0], [0], [1], [0, 0, 1, 1], [], []>} : vector<112x32xbf16>, vector<32x64xbf16>, vector<112x64xf32> -> vector<112x64xf32>
    %222 = arith.addf %215, %221 : vector<112x64xf32>
    %223 = vector.extract_strided_slice %208 {offsets = [0, 2, 0], sizes = [7, 16, 32], strides = [1, 1, 1]} : vector<7x20x32xf32> to vector<7x16x32xf32>
    %224 = vector.shape_cast %223 : vector<7x16x32xf32> to vector<112x32xf32>
    %225 = arith.truncf %224 : vector<112x32xf32> to vector<112x32xbf16>
    %226 = vector.extract_strided_slice %127 {offsets = [2, 2, 0, 0], sizes = [1, 1, 32, 64], strides = [1, 1, 1, 1]} : vector<3x5x32x64xbf16> to vector<1x1x32x64xbf16>
    %227 = vector.shape_cast %226 : vector<1x1x32x64xbf16> to vector<32x64xbf16>
    %cst_53 = arith.constant dense<0.000000e+00> : vector<112x64xf32>
    %228 = tpu.matmul %225, %227, %cst_53 {dimension_numbers = #tpu.dot_dimension_numbers<[1], [0], [0], [1], [0, 0, 1, 1], [], []>} : vector<112x32xbf16>, vector<32x64xbf16>, vector<112x64xf32> -> vector<112x64xf32>
    %229 = arith.addf %222, %228 : vector<112x64xf32>
    %230 = vector.extract_strided_slice %208 {offsets = [0, 3, 0], sizes = [7, 16, 32], strides = [1, 1, 1]} : vector<7x20x32xf32> to vector<7x16x32xf32>
    %231 = vector.shape_cast %230 : vector<7x16x32xf32> to vector<112x32xf32>
    %232 = arith.truncf %231 : vector<112x32xf32> to vector<112x32xbf16>
    %233 = vector.extract_strided_slice %127 {offsets = [2, 3, 0, 0], sizes = [1, 1, 32, 64], strides = [1, 1, 1, 1]} : vector<3x5x32x64xbf16> to vector<1x1x32x64xbf16>
    %234 = vector.shape_cast %233 : vector<1x1x32x64xbf16> to vector<32x64xbf16>
    %cst_54 = arith.constant dense<0.000000e+00> : vector<112x64xf32>
    %235 = tpu.matmul %232, %234, %cst_54 {dimension_numbers = #tpu.dot_dimension_numbers<[1], [0], [0], [1], [0, 0, 1, 1], [], []>} : vector<112x32xbf16>, vector<32x64xbf16>, vector<112x64xf32> -> vector<112x64xf32>
    %236 = arith.addf %229, %235 : vector<112x64xf32>
    %237 = vector.extract_strided_slice %208 {offsets = [0, 4, 0], sizes = [7, 16, 32], strides = [1, 1, 1]} : vector<7x20x32xf32> to vector<7x16x32xf32>
    %238 = vector.shape_cast %237 : vector<7x16x32xf32> to vector<112x32xf32>
    %239 = arith.truncf %238 : vector<112x32xf32> to vector<112x32xbf16>
    %240 = vector.extract_strided_slice %127 {offsets = [2, 4, 0, 0], sizes = [1, 1, 32, 64], strides = [1, 1, 1, 1]} : vector<3x5x32x64xbf16> to vector<1x1x32x64xbf16>
    %241 = vector.shape_cast %240 : vector<1x1x32x64xbf16> to vector<32x64xbf16>
    %cst_55 = arith.constant dense<0.000000e+00> : vector<112x64xf32>
    %242 = tpu.matmul %239, %241, %cst_55 {dimension_numbers = #tpu.dot_dimension_numbers<[1], [0], [0], [1], [0, 0, 1, 1], [], []>} : vector<112x32xbf16>, vector<32x64xbf16>, vector<112x64xf32> -> vector<112x64xf32>
    %243 = arith.addf %236, %242 : vector<112x64xf32>
    %c0_56 = arith.constant 0 : index
    %c0_57 = arith.constant 0 : index
    %244 = vector.load %arg5[%c0_56, %c0_57] : memref<1x64xf32, #tpu.memory_space<vmem>>, vector<1x64xf32>
    %245 = vector.broadcast %244 : vector<1x64xf32> to vector<112x64xf32>
    %246 = arith.addf %243, %245 : vector<112x64xf32>
    %cst_58 = arith.constant 0.000000e+00 : f32
    %247 = vector.broadcast %cst_58 : f32 to vector<112x64xf32>
    %248 = arith.cmpf ogt, %246, %247 : vector<112x64xf32>
    %cst_59 = arith.constant 1.000000e-01 : f32
    %249 = vector.broadcast %cst_59 : f32 to vector<112x64xf32>
    %250 = arith.mulf %249, %246 : vector<112x64xf32>
    %251 = arith.select %248, %246, %250 : vector<112x64xi1>, vector<112x64xf32>
    %252 = vector.shape_cast %251 : vector<112x64xf32> to vector<7x16x64xf32>
    %c0_60 = arith.constant 0 : index
    %c2_61 = arith.constant 2 : index
    %c0_62 = arith.constant 0 : index
    %253 = vector.load %arg15[%c0_60, %c2_61, %c0_62] : memref<8x20x64xf32, #tpu.memory_space<vmem>>, vector<7x16x64xf32>
    tpu.vector_store %arg15[%c0_60, %c2_61, %c0_62], %252 {strides = array<i32>} : memref<8x20x64xf32, #tpu.memory_space<vmem>>, vector<7x16x64xf32>,
    %c0_63 = arith.constant 0 : index
    %c0_64 = arith.constant 0 : index
    %c0_65 = arith.constant 0 : index
    %254 = vector.load %arg15[%c0_63, %c0_64, %c0_65] : memref<8x20x64xf32, #tpu.memory_space<vmem>>, vector<8x20x64xf32>
    %c0_66 = arith.constant 0 : index
    %c0_67 = arith.constant 0 : index
    %c0_68 = arith.constant 0 : index
    %c0_69 = arith.constant 0 : index
    %255 = vector.load %arg6[%c0_66, %c0_67, %c0_68, %c0_69] : memref<3x5x64x32xbf16, #tpu.memory_space<vmem>>, vector<3x5x64x32xbf16>
    %256 = vector.extract_strided_slice %254 {offsets = [0, 0, 0], sizes = [6, 20, 64], strides = [1, 1, 1]} : vector<8x20x64xf32> to vector<6x20x64xf32>
    %257 = vector.shape_cast %256 : vector<6x20x64xf32> to vector<3x2x20x64xf32>
    %258 = vector.extract_strided_slice %257 {offsets = [0, 0, 0, 0], sizes = [3, 1, 20, 64], strides = [1, 1, 1, 1]} : vector<3x2x20x64xf32> to vector<3x1x20x64xf32>
    %259 = vector.shape_cast %258 : vector<3x1x20x64xf32> to vector<3x20x64xf32>
    %260 = vector.extract_strided_slice %259 {offsets = [0, 0, 0], sizes = [3, 16, 64], strides = [1, 1, 1]} : vector<3x20x64xf32> to vector<3x16x64xf32>
    %261 = vector.shape_cast %260 : vector<3x16x64xf32> to vector<48x64xf32>
    %262 = arith.truncf %261 : vector<48x64xf32> to vector<48x64xbf16>
    %263 = vector.extract_strided_slice %255 {offsets = [0, 0, 0, 0], sizes = [1, 1, 64, 32], strides = [1, 1, 1, 1]} : vector<3x5x64x32xbf16> to vector<1x1x64x32xbf16>
    %264 = vector.shape_cast %263 : vector<1x1x64x32xbf16> to vector<64x32xbf16>
    %cst_70 = arith.constant dense<0.000000e+00> : vector<48x32xf32>
    %265 = tpu.matmul %262, %264, %cst_70 {dimension_numbers = #tpu.dot_dimension_numbers<[1], [0], [0], [1], [0, 0, 1, 1], [], []>} : vector<48x64xbf16>, vector<64x32xbf16>, vector<48x32xf32> -> vector<48x32xf32>
    %266 = vector.extract_strided_slice %259 {offsets = [0, 1, 0], sizes = [3, 16, 64], strides = [1, 1, 1]} : vector<3x20x64xf32> to vector<3x16x64xf32>
    %267 = vector.shape_cast %266 : vector<3x16x64xf32> to vector<48x64xf32>
    %268 = arith.truncf %267 : vector<48x64xf32> to vector<48x64xbf16>
    %269 = vector.extract_strided_slice %255 {offsets = [0, 1, 0, 0], sizes = [1, 1, 64, 32], strides = [1, 1, 1, 1]} : vector<3x5x64x32xbf16> to vector<1x1x64x32xbf16>
    %270 = vector.shape_cast %269 : vector<1x1x64x32xbf16> to vector<64x32xbf16>
    %cst_71 = arith.constant dense<0.000000e+00> : vector<48x32xf32>
    %271 = tpu.matmul %268, %270, %cst_71 {dimension_numbers = #tpu.dot_dimension_numbers<[1], [0], [0], [1], [0, 0, 1, 1], [], []>} : vector<48x64xbf16>, vector<64x32xbf16>, vector<48x32xf32> -> vector<48x32xf32>
    %272 = arith.addf %265, %271 : vector<48x32xf32>
    %273 = vector.extract_strided_slice %259 {offsets = [0, 2, 0], sizes = [3, 16, 64], strides = [1, 1, 1]} : vector<3x20x64xf32> to vector<3x16x64xf32>
    %274 = vector.shape_cast %273 : vector<3x16x64xf32> to vector<48x64xf32>
    %275 = arith.truncf %274 : vector<48x64xf32> to vector<48x64xbf16>
    %276 = vector.extract_strided_slice %255 {offsets = [0, 2, 0, 0], sizes = [1, 1, 64, 32], strides = [1, 1, 1, 1]} : vector<3x5x64x32xbf16> to vector<1x1x64x32xbf16>
    %277 = vector.shape_cast %276 : vector<1x1x64x32xbf16> to vector<64x32xbf16>
    %cst_72 = arith.constant dense<0.000000e+00> : vector<48x32xf32>
    %278 = tpu.matmul %275, %277, %cst_72 {dimension_numbers = #tpu.dot_dimension_numbers<[1], [0], [0], [1], [0, 0, 1, 1], [], []>} : vector<48x64xbf16>, vector<64x32xbf16>, vector<48x32xf32> -> vector<48x32xf32>
    %279 = arith.addf %272, %278 : vector<48x32xf32>
    %280 = vector.extract_strided_slice %259 {offsets = [0, 3, 0], sizes = [3, 16, 64], strides = [1, 1, 1]} : vector<3x20x64xf32> to vector<3x16x64xf32>
    %281 = vector.shape_cast %280 : vector<3x16x64xf32> to vector<48x64xf32>
    %282 = arith.truncf %281 : vector<48x64xf32> to vector<48x64xbf16>
    %283 = vector.extract_strided_slice %255 {offsets = [0, 3, 0, 0], sizes = [1, 1, 64, 32], strides = [1, 1, 1, 1]} : vector<3x5x64x32xbf16> to vector<1x1x64x32xbf16>
    %284 = vector.shape_cast %283 : vector<1x1x64x32xbf16> to vector<64x32xbf16>
    %cst_73 = arith.constant dense<0.000000e+00> : vector<48x32xf32>
    %285 = tpu.matmul %282, %284, %cst_73 {dimension_numbers = #tpu.dot_dimension_numbers<[1], [0], [0], [1], [0, 0, 1, 1], [], []>} : vector<48x64xbf16>, vector<64x32xbf16>, vector<48x32xf32> -> vector<48x32xf32>
    %286 = arith.addf %279, %285 : vector<48x32xf32>
    %287 = vector.extract_strided_slice %259 {offsets = [0, 4, 0], sizes = [3, 16, 64], strides = [1, 1, 1]} : vector<3x20x64xf32> to vector<3x16x64xf32>
    %288 = vector.shape_cast %287 : vector<3x16x64xf32> to vector<48x64xf32>
    %289 = arith.truncf %288 : vector<48x64xf32> to vector<48x64xbf16>
    %290 = vector.extract_strided_slice %255 {offsets = [0, 4, 0, 0], sizes = [1, 1, 64, 32], strides = [1, 1, 1, 1]} : vector<3x5x64x32xbf16> to vector<1x1x64x32xbf16>
    %291 = vector.shape_cast %290 : vector<1x1x64x32xbf16> to vector<64x32xbf16>
    %cst_74 = arith.constant dense<0.000000e+00> : vector<48x32xf32>
    %292 = tpu.matmul %289, %291, %cst_74 {dimension_numbers = #tpu.dot_dimension_numbers<[1], [0], [0], [1], [0, 0, 1, 1], [], []>} : vector<48x64xbf16>, vector<64x32xbf16>, vector<48x32xf32> -> vector<48x32xf32>
    %293 = arith.addf %286, %292 : vector<48x32xf32>
    %294 = vector.extract_strided_slice %254 {offsets = [1, 0, 0], sizes = [6, 20, 64], strides = [1, 1, 1]} : vector<8x20x64xf32> to vector<6x20x64xf32>
    %295 = vector.shape_cast %294 : vector<6x20x64xf32> to vector<3x2x20x64xf32>
    %296 = vector.extract_strided_slice %295 {offsets = [0, 0, 0, 0], sizes = [3, 1, 20, 64], strides = [1, 1, 1, 1]} : vector<3x2x20x64xf32> to vector<3x1x20x64xf32>
    %297 = vector.shape_cast %296 : vector<3x1x20x64xf32> to vector<3x20x64xf32>
    %298 = vector.extract_strided_slice %297 {offsets = [0, 0, 0], sizes = [3, 16, 64], strides = [1, 1, 1]} : vector<3x20x64xf32> to vector<3x16x64xf32>
    %299 = vector.shape_cast %298 : vector<3x16x64xf32> to vector<48x64xf32>
    %300 = arith.truncf %299 : vector<48x64xf32> to vector<48x64xbf16>
    %301 = vector.extract_strided_slice %255 {offsets = [1, 0, 0, 0], sizes = [1, 1, 64, 32], strides = [1, 1, 1, 1]} : vector<3x5x64x32xbf16> to vector<1x1x64x32xbf16>
    %302 = vector.shape_cast %301 : vector<1x1x64x32xbf16> to vector<64x32xbf16>
    %cst_75 = arith.constant dense<0.000000e+00> : vector<48x32xf32>
    %303 = tpu.matmul %300, %302, %cst_75 {dimension_numbers = #tpu.dot_dimension_numbers<[1], [0], [0], [1], [0, 0, 1, 1], [], []>} : vector<48x64xbf16>, vector<64x32xbf16>, vector<48x32xf32> -> vector<48x32xf32>
    %304 = arith.addf %293, %303 : vector<48x32xf32>
    %305 = vector.extract_strided_slice %297 {offsets = [0, 1, 0], sizes = [3, 16, 64], strides = [1, 1, 1]} : vector<3x20x64xf32> to vector<3x16x64xf32>
    %306 = vector.shape_cast %305 : vector<3x16x64xf32> to vector<48x64xf32>
    %307 = arith.truncf %306 : vector<48x64xf32> to vector<48x64xbf16>
    %308 = vector.extract_strided_slice %255 {offsets = [1, 1, 0, 0], sizes = [1, 1, 64, 32], strides = [1, 1, 1, 1]} : vector<3x5x64x32xbf16> to vector<1x1x64x32xbf16>
    %309 = vector.shape_cast %308 : vector<1x1x64x32xbf16> to vector<64x32xbf16>
    %cst_76 = arith.constant dense<0.000000e+00> : vector<48x32xf32>
    %310 = tpu.matmul %307, %309, %cst_76 {dimension_numbers = #tpu.dot_dimension_numbers<[1], [0], [0], [1], [0, 0, 1, 1], [], []>} : vector<48x64xbf16>, vector<64x32xbf16>, vector<48x32xf32> -> vector<48x32xf32>
    %311 = arith.addf %304, %310 : vector<48x32xf32>
    %312 = vector.extract_strided_slice %297 {offsets = [0, 2, 0], sizes = [3, 16, 64], strides = [1, 1, 1]} : vector<3x20x64xf32> to vector<3x16x64xf32>
    %313 = vector.shape_cast %312 : vector<3x16x64xf32> to vector<48x64xf32>
    %314 = arith.truncf %313 : vector<48x64xf32> to vector<48x64xbf16>
    %315 = vector.extract_strided_slice %255 {offsets = [1, 2, 0, 0], sizes = [1, 1, 64, 32], strides = [1, 1, 1, 1]} : vector<3x5x64x32xbf16> to vector<1x1x64x32xbf16>
    %316 = vector.shape_cast %315 : vector<1x1x64x32xbf16> to vector<64x32xbf16>
    %cst_77 = arith.constant dense<0.000000e+00> : vector<48x32xf32>
    %317 = tpu.matmul %314, %316, %cst_77 {dimension_numbers = #tpu.dot_dimension_numbers<[1], [0], [0], [1], [0, 0, 1, 1], [], []>} : vector<48x64xbf16>, vector<64x32xbf16>, vector<48x32xf32> -> vector<48x32xf32>
    %318 = arith.addf %311, %317 : vector<48x32xf32>
    %319 = vector.extract_strided_slice %297 {offsets = [0, 3, 0], sizes = [3, 16, 64], strides = [1, 1, 1]} : vector<3x20x64xf32> to vector<3x16x64xf32>
    %320 = vector.shape_cast %319 : vector<3x16x64xf32> to vector<48x64xf32>
    %321 = arith.truncf %320 : vector<48x64xf32> to vector<48x64xbf16>
    %322 = vector.extract_strided_slice %255 {offsets = [1, 3, 0, 0], sizes = [1, 1, 64, 32], strides = [1, 1, 1, 1]} : vector<3x5x64x32xbf16> to vector<1x1x64x32xbf16>
    %323 = vector.shape_cast %322 : vector<1x1x64x32xbf16> to vector<64x32xbf16>
    %cst_78 = arith.constant dense<0.000000e+00> : vector<48x32xf32>
    %324 = tpu.matmul %321, %323, %cst_78 {dimension_numbers = #tpu.dot_dimension_numbers<[1], [0], [0], [1], [0, 0, 1, 1], [], []>} : vector<48x64xbf16>, vector<64x32xbf16>, vector<48x32xf32> -> vector<48x32xf32>
    %325 = arith.addf %318, %324 : vector<48x32xf32>
    %326 = vector.extract_strided_slice %297 {offsets = [0, 4, 0], sizes = [3, 16, 64], strides = [1, 1, 1]} : vector<3x20x64xf32> to vector<3x16x64xf32>
    %327 = vector.shape_cast %326 : vector<3x16x64xf32> to vector<48x64xf32>
    %328 = arith.truncf %327 : vector<48x64xf32> to vector<48x64xbf16>
    %329 = vector.extract_strided_slice %255 {offsets = [1, 4, 0, 0], sizes = [1, 1, 64, 32], strides = [1, 1, 1, 1]} : vector<3x5x64x32xbf16> to vector<1x1x64x32xbf16>
    %330 = vector.shape_cast %329 : vector<1x1x64x32xbf16> to vector<64x32xbf16>
    %cst_79 = arith.constant dense<0.000000e+00> : vector<48x32xf32>
    %331 = tpu.matmul %328, %330, %cst_79 {dimension_numbers = #tpu.dot_dimension_numbers<[1], [0], [0], [1], [0, 0, 1, 1], [], []>} : vector<48x64xbf16>, vector<64x32xbf16>, vector<48x32xf32> -> vector<48x32xf32>
    %332 = arith.addf %325, %331 : vector<48x32xf32>
    %333 = vector.extract_strided_slice %254 {offsets = [2, 0, 0], sizes = [6, 20, 64], strides = [1, 1, 1]} : vector<8x20x64xf32> to vector<6x20x64xf32>
    %334 = vector.shape_cast %333 : vector<6x20x64xf32> to vector<3x2x20x64xf32>
    %335 = vector.extract_strided_slice %334 {offsets = [0, 0, 0, 0], sizes = [3, 1, 20, 64], strides = [1, 1, 1, 1]} : vector<3x2x20x64xf32> to vector<3x1x20x64xf32>
    %336 = vector.shape_cast %335 : vector<3x1x20x64xf32> to vector<3x20x64xf32>
    %337 = vector.extract_strided_slice %336 {offsets = [0, 0, 0], sizes = [3, 16, 64], strides = [1, 1, 1]} : vector<3x20x64xf32> to vector<3x16x64xf32>
    %338 = vector.shape_cast %337 : vector<3x16x64xf32> to vector<48x64xf32>
    %339 = arith.truncf %338 : vector<48x64xf32> to vector<48x64xbf16>
    %340 = vector.extract_strided_slice %255 {offsets = [2, 0, 0, 0], sizes = [1, 1, 64, 32], strides = [1, 1, 1, 1]} : vector<3x5x64x32xbf16> to vector<1x1x64x32xbf16>
    %341 = vector.shape_cast %340 : vector<1x1x64x32xbf16> to vector<64x32xbf16>
    %cst_80 = arith.constant dense<0.000000e+00> : vector<48x32xf32>
    %342 = tpu.matmul %339, %341, %cst_80 {dimension_numbers = #tpu.dot_dimension_numbers<[1], [0], [0], [1], [0, 0, 1, 1], [], []>} : vector<48x64xbf16>, vector<64x32xbf16>, vector<48x32xf32> -> vector<48x32xf32>
    %343 = arith.addf %332, %342 : vector<48x32xf32>
    %344 = vector.extract_strided_slice %336 {offsets = [0, 1, 0], sizes = [3, 16, 64], strides = [1, 1, 1]} : vector<3x20x64xf32> to vector<3x16x64xf32>
    %345 = vector.shape_cast %344 : vector<3x16x64xf32> to vector<48x64xf32>
    %346 = arith.truncf %345 : vector<48x64xf32> to vector<48x64xbf16>
    %347 = vector.extract_strided_slice %255 {offsets = [2, 1, 0, 0], sizes = [1, 1, 64, 32], strides = [1, 1, 1, 1]} : vector<3x5x64x32xbf16> to vector<1x1x64x32xbf16>
    %348 = vector.shape_cast %347 : vector<1x1x64x32xbf16> to vector<64x32xbf16>
    %cst_81 = arith.constant dense<0.000000e+00> : vector<48x32xf32>
    %349 = tpu.matmul %346, %348, %cst_81 {dimension_numbers = #tpu.dot_dimension_numbers<[1], [0], [0], [1], [0, 0, 1, 1], [], []>} : vector<48x64xbf16>, vector<64x32xbf16>, vector<48x32xf32> -> vector<48x32xf32>
    %350 = arith.addf %343, %349 : vector<48x32xf32>
    %351 = vector.extract_strided_slice %336 {offsets = [0, 2, 0], sizes = [3, 16, 64], strides = [1, 1, 1]} : vector<3x20x64xf32> to vector<3x16x64xf32>
    %352 = vector.shape_cast %351 : vector<3x16x64xf32> to vector<48x64xf32>
    %353 = arith.truncf %352 : vector<48x64xf32> to vector<48x64xbf16>
    %354 = vector.extract_strided_slice %255 {offsets = [2, 2, 0, 0], sizes = [1, 1, 64, 32], strides = [1, 1, 1, 1]} : vector<3x5x64x32xbf16> to vector<1x1x64x32xbf16>
    %355 = vector.shape_cast %354 : vector<1x1x64x32xbf16> to vector<64x32xbf16>
    %cst_82 = arith.constant dense<0.000000e+00> : vector<48x32xf32>
    %356 = tpu.matmul %353, %355, %cst_82 {dimension_numbers = #tpu.dot_dimension_numbers<[1], [0], [0], [1], [0, 0, 1, 1], [], []>} : vector<48x64xbf16>, vector<64x32xbf16>, vector<48x32xf32> -> vector<48x32xf32>
    %357 = arith.addf %350, %356 : vector<48x32xf32>
    %358 = vector.extract_strided_slice %336 {offsets = [0, 3, 0], sizes = [3, 16, 64], strides = [1, 1, 1]} : vector<3x20x64xf32> to vector<3x16x64xf32>
    %359 = vector.shape_cast %358 : vector<3x16x64xf32> to vector<48x64xf32>
    %360 = arith.truncf %359 : vector<48x64xf32> to vector<48x64xbf16>
    %361 = vector.extract_strided_slice %255 {offsets = [2, 3, 0, 0], sizes = [1, 1, 64, 32], strides = [1, 1, 1, 1]} : vector<3x5x64x32xbf16> to vector<1x1x64x32xbf16>
    %362 = vector.shape_cast %361 : vector<1x1x64x32xbf16> to vector<64x32xbf16>
    %cst_83 = arith.constant dense<0.000000e+00> : vector<48x32xf32>
    %363 = tpu.matmul %360, %362, %cst_83 {dimension_numbers = #tpu.dot_dimension_numbers<[1], [0], [0], [1], [0, 0, 1, 1], [], []>} : vector<48x64xbf16>, vector<64x32xbf16>, vector<48x32xf32> -> vector<48x32xf32>
    %364 = arith.addf %357, %363 : vector<48x32xf32>
    %365 = vector.extract_strided_slice %336 {offsets = [0, 4, 0], sizes = [3, 16, 64], strides = [1, 1, 1]} : vector<3x20x64xf32> to vector<3x16x64xf32>
    %366 = vector.shape_cast %365 : vector<3x16x64xf32> to vector<48x64xf32>
    %367 = arith.truncf %366 : vector<48x64xf32> to vector<48x64xbf16>
    %368 = vector.extract_strided_slice %255 {offsets = [2, 4, 0, 0], sizes = [1, 1, 64, 32], strides = [1, 1, 1, 1]} : vector<3x5x64x32xbf16> to vector<1x1x64x32xbf16>
    %369 = vector.shape_cast %368 : vector<1x1x64x32xbf16> to vector<64x32xbf16>
    %cst_84 = arith.constant dense<0.000000e+00> : vector<48x32xf32>
    %370 = tpu.matmul %367, %369, %cst_84 {dimension_numbers = #tpu.dot_dimension_numbers<[1], [0], [0], [1], [0, 0, 1, 1], [], []>} : vector<48x64xbf16>, vector<64x32xbf16>, vector<48x32xf32> -> vector<48x32xf32>
    %371 = arith.addf %364, %370 : vector<48x32xf32>
    %c0_85 = arith.constant 0 : index
    %c0_86 = arith.constant 0 : index
    %372 = vector.load %arg7[%c0_85, %c0_86] : memref<1x32xf32, #tpu.memory_space<vmem>>, vector<1x32xf32>
    %373 = vector.broadcast %372 : vector<1x32xf32> to vector<48x32xf32>
    %374 = arith.addf %371, %373 : vector<48x32xf32>
    %cst_87 = arith.constant 0.000000e+00 : f32
    %375 = vector.broadcast %cst_87 : f32 to vector<48x32xf32>
    %376 = arith.cmpf ogt, %374, %375 : vector<48x32xf32>
    %cst_88 = arith.constant 1.000000e-01 : f32
    %377 = vector.broadcast %cst_88 : f32 to vector<48x32xf32>
    %378 = arith.mulf %377, %374 : vector<48x32xf32>
    %379 = arith.select %376, %374, %378 : vector<48x32xi1>, vector<48x32xf32>
    %380 = vector.shape_cast %379 : vector<48x32xf32> to vector<3x16x32xf32>
    %c0_89 = arith.constant 0 : index
    %c2_90 = arith.constant 2 : index
    %c0_91 = arith.constant 0 : index
    %381 = vector.load %arg16[%c0_89, %c2_90, %c0_91] : memref<4x20x32xf32, #tpu.memory_space<vmem>>, vector<3x16x32xf32>
    tpu.vector_store %arg16[%c0_89, %c2_90, %c0_91], %380 {strides = array<i32>} : memref<4x20x32xf32, #tpu.memory_space<vmem>>, vector<3x16x32xf32>,
    %c0_92 = arith.constant 0 : index
    %c0_93 = arith.constant 0 : index
    %c0_94 = arith.constant 0 : index
    %382 = vector.load %arg16[%c0_92, %c0_93, %c0_94] : memref<4x20x32xf32, #tpu.memory_space<vmem>>, vector<4x20x32xf32>
    %c0_95 = arith.constant 0 : index
    %c0_96 = arith.constant 0 : index
    %c0_97 = arith.constant 0 : index
    %c0_98 = arith.constant 0 : index
    %383 = vector.load %arg8[%c0_95, %c0_96, %c0_97, %c0_98] : memref<3x5x32x16xbf16, #tpu.memory_space<vmem>>, vector<3x5x32x16xbf16>
    %384 = vector.extract_strided_slice %382 {offsets = [0, 0, 0], sizes = [2, 20, 32], strides = [1, 1, 1]} : vector<4x20x32xf32> to vector<2x20x32xf32>
    %385 = vector.shape_cast %384 : vector<2x20x32xf32> to vector<1x2x20x32xf32>
    %386 = vector.extract_strided_slice %385 {offsets = [0, 0, 0, 0], sizes = [1, 1, 20, 32], strides = [1, 1, 1, 1]} : vector<1x2x20x32xf32> to vector<1x1x20x32xf32>
    %387 = vector.shape_cast %386 : vector<1x1x20x32xf32> to vector<1x20x32xf32>
    %388 = vector.extract_strided_slice %387 {offsets = [0, 0, 0], sizes = [1, 16, 32], strides = [1, 1, 1]} : vector<1x20x32xf32> to vector<1x16x32xf32>
    %389 = vector.shape_cast %388 : vector<1x16x32xf32> to vector<16x32xf32>
    %390 = arith.truncf %389 : vector<16x32xf32> to vector<16x32xbf16>
    %391 = vector.extract_strided_slice %383 {offsets = [0, 0, 0, 0], sizes = [1, 1, 32, 16], strides = [1, 1, 1, 1]} : vector<3x5x32x16xbf16> to vector<1x1x32x16xbf16>
    %392 = vector.shape_cast %391 : vector<1x1x32x16xbf16> to vector<32x16xbf16>
    %cst_99 = arith.constant dense<0.000000e+00> : vector<16x16xf32>
    %393 = tpu.matmul %390, %392, %cst_99 {dimension_numbers = #tpu.dot_dimension_numbers<[1], [0], [0], [1], [0, 0, 1, 1], [], []>} : vector<16x32xbf16>, vector<32x16xbf16>, vector<16x16xf32> -> vector<16x16xf32>
    %394 = vector.extract_strided_slice %387 {offsets = [0, 1, 0], sizes = [1, 16, 32], strides = [1, 1, 1]} : vector<1x20x32xf32> to vector<1x16x32xf32>
    %395 = vector.shape_cast %394 : vector<1x16x32xf32> to vector<16x32xf32>
    %396 = arith.truncf %395 : vector<16x32xf32> to vector<16x32xbf16>
    %397 = vector.extract_strided_slice %383 {offsets = [0, 1, 0, 0], sizes = [1, 1, 32, 16], strides = [1, 1, 1, 1]} : vector<3x5x32x16xbf16> to vector<1x1x32x16xbf16>
    %398 = vector.shape_cast %397 : vector<1x1x32x16xbf16> to vector<32x16xbf16>
    %cst_100 = arith.constant dense<0.000000e+00> : vector<16x16xf32>
    %399 = tpu.matmul %396, %398, %cst_100 {dimension_numbers = #tpu.dot_dimension_numbers<[1], [0], [0], [1], [0, 0, 1, 1], [], []>} : vector<16x32xbf16>, vector<32x16xbf16>, vector<16x16xf32> -> vector<16x16xf32>
    %400 = arith.addf %393, %399 : vector<16x16xf32>
    %401 = vector.extract_strided_slice %387 {offsets = [0, 2, 0], sizes = [1, 16, 32], strides = [1, 1, 1]} : vector<1x20x32xf32> to vector<1x16x32xf32>
    %402 = vector.shape_cast %401 : vector<1x16x32xf32> to vector<16x32xf32>
    %403 = arith.truncf %402 : vector<16x32xf32> to vector<16x32xbf16>
    %404 = vector.extract_strided_slice %383 {offsets = [0, 2, 0, 0], sizes = [1, 1, 32, 16], strides = [1, 1, 1, 1]} : vector<3x5x32x16xbf16> to vector<1x1x32x16xbf16>
    %405 = vector.shape_cast %404 : vector<1x1x32x16xbf16> to vector<32x16xbf16>
    %cst_101 = arith.constant dense<0.000000e+00> : vector<16x16xf32>
    %406 = tpu.matmul %403, %405, %cst_101 {dimension_numbers = #tpu.dot_dimension_numbers<[1], [0], [0], [1], [0, 0, 1, 1], [], []>} : vector<16x32xbf16>, vector<32x16xbf16>, vector<16x16xf32> -> vector<16x16xf32>
    %407 = arith.addf %400, %406 : vector<16x16xf32>
    %408 = vector.extract_strided_slice %387 {offsets = [0, 3, 0], sizes = [1, 16, 32], strides = [1, 1, 1]} : vector<1x20x32xf32> to vector<1x16x32xf32>
    %409 = vector.shape_cast %408 : vector<1x16x32xf32> to vector<16x32xf32>
    %410 = arith.truncf %409 : vector<16x32xf32> to vector<16x32xbf16>
    %411 = vector.extract_strided_slice %383 {offsets = [0, 3, 0, 0], sizes = [1, 1, 32, 16], strides = [1, 1, 1, 1]} : vector<3x5x32x16xbf16> to vector<1x1x32x16xbf16>
    %412 = vector.shape_cast %411 : vector<1x1x32x16xbf16> to vector<32x16xbf16>
    %cst_102 = arith.constant dense<0.000000e+00> : vector<16x16xf32>
    %413 = tpu.matmul %410, %412, %cst_102 {dimension_numbers = #tpu.dot_dimension_numbers<[1], [0], [0], [1], [0, 0, 1, 1], [], []>} : vector<16x32xbf16>, vector<32x16xbf16>, vector<16x16xf32> -> vector<16x16xf32>
    %414 = arith.addf %407, %413 : vector<16x16xf32>
    %415 = vector.extract_strided_slice %387 {offsets = [0, 4, 0], sizes = [1, 16, 32], strides = [1, 1, 1]} : vector<1x20x32xf32> to vector<1x16x32xf32>
    %416 = vector.shape_cast %415 : vector<1x16x32xf32> to vector<16x32xf32>
    %417 = arith.truncf %416 : vector<16x32xf32> to vector<16x32xbf16>
    %418 = vector.extract_strided_slice %383 {offsets = [0, 4, 0, 0], sizes = [1, 1, 32, 16], strides = [1, 1, 1, 1]} : vector<3x5x32x16xbf16> to vector<1x1x32x16xbf16>
    %419 = vector.shape_cast %418 : vector<1x1x32x16xbf16> to vector<32x16xbf16>
    %cst_103 = arith.constant dense<0.000000e+00> : vector<16x16xf32>
    %420 = tpu.matmul %417, %419, %cst_103 {dimension_numbers = #tpu.dot_dimension_numbers<[1], [0], [0], [1], [0, 0, 1, 1], [], []>} : vector<16x32xbf16>, vector<32x16xbf16>, vector<16x16xf32> -> vector<16x16xf32>
    %421 = arith.addf %414, %420 : vector<16x16xf32>
    %422 = vector.extract_strided_slice %382 {offsets = [1, 0, 0], sizes = [2, 20, 32], strides = [1, 1, 1]} : vector<4x20x32xf32> to vector<2x20x32xf32>
    %423 = vector.shape_cast %422 : vector<2x20x32xf32> to vector<1x2x20x32xf32>
    %424 = vector.extract_strided_slice %423 {offsets = [0, 0, 0, 0], sizes = [1, 1, 20, 32], strides = [1, 1, 1, 1]} : vector<1x2x20x32xf32> to vector<1x1x20x32xf32>
    %425 = vector.shape_cast %424 : vector<1x1x20x32xf32> to vector<1x20x32xf32>
    %426 = vector.extract_strided_slice %425 {offsets = [0, 0, 0], sizes = [1, 16, 32], strides = [1, 1, 1]} : vector<1x20x32xf32> to vector<1x16x32xf32>
    %427 = vector.shape_cast %426 : vector<1x16x32xf32> to vector<16x32xf32>
    %428 = arith.truncf %427 : vector<16x32xf32> to vector<16x32xbf16>
    %429 = vector.extract_strided_slice %383 {offsets = [1, 0, 0, 0], sizes = [1, 1, 32, 16], strides = [1, 1, 1, 1]} : vector<3x5x32x16xbf16> to vector<1x1x32x16xbf16>
    %430 = vector.shape_cast %429 : vector<1x1x32x16xbf16> to vector<32x16xbf16>
    %cst_104 = arith.constant dense<0.000000e+00> : vector<16x16xf32>
    %431 = tpu.matmul %428, %430, %cst_104 {dimension_numbers = #tpu.dot_dimension_numbers<[1], [0], [0], [1], [0, 0, 1, 1], [], []>} : vector<16x32xbf16>, vector<32x16xbf16>, vector<16x16xf32> -> vector<16x16xf32>
    %432 = arith.addf %421, %431 : vector<16x16xf32>
    %433 = vector.extract_strided_slice %425 {offsets = [0, 1, 0], sizes = [1, 16, 32], strides = [1, 1, 1]} : vector<1x20x32xf32> to vector<1x16x32xf32>
    %434 = vector.shape_cast %433 : vector<1x16x32xf32> to vector<16x32xf32>
    %435 = arith.truncf %434 : vector<16x32xf32> to vector<16x32xbf16>
    %436 = vector.extract_strided_slice %383 {offsets = [1, 1, 0, 0], sizes = [1, 1, 32, 16], strides = [1, 1, 1, 1]} : vector<3x5x32x16xbf16> to vector<1x1x32x16xbf16>
    %437 = vector.shape_cast %436 : vector<1x1x32x16xbf16> to vector<32x16xbf16>
    %cst_105 = arith.constant dense<0.000000e+00> : vector<16x16xf32>
    %438 = tpu.matmul %435, %437, %cst_105 {dimension_numbers = #tpu.dot_dimension_numbers<[1], [0], [0], [1], [0, 0, 1, 1], [], []>} : vector<16x32xbf16>, vector<32x16xbf16>, vector<16x16xf32> -> vector<16x16xf32>
    %439 = arith.addf %432, %438 : vector<16x16xf32>
    %440 = vector.extract_strided_slice %425 {offsets = [0, 2, 0], sizes = [1, 16, 32], strides = [1, 1, 1]} : vector<1x20x32xf32> to vector<1x16x32xf32>
    %441 = vector.shape_cast %440 : vector<1x16x32xf32> to vector<16x32xf32>
    %442 = arith.truncf %441 : vector<16x32xf32> to vector<16x32xbf16>
    %443 = vector.extract_strided_slice %383 {offsets = [1, 2, 0, 0], sizes = [1, 1, 32, 16], strides = [1, 1, 1, 1]} : vector<3x5x32x16xbf16> to vector<1x1x32x16xbf16>
    %444 = vector.shape_cast %443 : vector<1x1x32x16xbf16> to vector<32x16xbf16>
    %cst_106 = arith.constant dense<0.000000e+00> : vector<16x16xf32>
    %445 = tpu.matmul %442, %444, %cst_106 {dimension_numbers = #tpu.dot_dimension_numbers<[1], [0], [0], [1], [0, 0, 1, 1], [], []>} : vector<16x32xbf16>, vector<32x16xbf16>, vector<16x16xf32> -> vector<16x16xf32>
    %446 = arith.addf %439, %445 : vector<16x16xf32>
    %447 = vector.extract_strided_slice %425 {offsets = [0, 3, 0], sizes = [1, 16, 32], strides = [1, 1, 1]} : vector<1x20x32xf32> to vector<1x16x32xf32>
    %448 = vector.shape_cast %447 : vector<1x16x32xf32> to vector<16x32xf32>
    %449 = arith.truncf %448 : vector<16x32xf32> to vector<16x32xbf16>
    %450 = vector.extract_strided_slice %383 {offsets = [1, 3, 0, 0], sizes = [1, 1, 32, 16], strides = [1, 1, 1, 1]} : vector<3x5x32x16xbf16> to vector<1x1x32x16xbf16>
    %451 = vector.shape_cast %450 : vector<1x1x32x16xbf16> to vector<32x16xbf16>
    %cst_107 = arith.constant dense<0.000000e+00> : vector<16x16xf32>
    %452 = tpu.matmul %449, %451, %cst_107 {dimension_numbers = #tpu.dot_dimension_numbers<[1], [0], [0], [1], [0, 0, 1, 1], [], []>} : vector<16x32xbf16>, vector<32x16xbf16>, vector<16x16xf32> -> vector<16x16xf32>
    %453 = arith.addf %446, %452 : vector<16x16xf32>
    %454 = vector.extract_strided_slice %425 {offsets = [0, 4, 0], sizes = [1, 16, 32], strides = [1, 1, 1]} : vector<1x20x32xf32> to vector<1x16x32xf32>
    %455 = vector.shape_cast %454 : vector<1x16x32xf32> to vector<16x32xf32>
    %456 = arith.truncf %455 : vector<16x32xf32> to vector<16x32xbf16>
    %457 = vector.extract_strided_slice %383 {offsets = [1, 4, 0, 0], sizes = [1, 1, 32, 16], strides = [1, 1, 1, 1]} : vector<3x5x32x16xbf16> to vector<1x1x32x16xbf16>
    %458 = vector.shape_cast %457 : vector<1x1x32x16xbf16> to vector<32x16xbf16>
    %cst_108 = arith.constant dense<0.000000e+00> : vector<16x16xf32>
    %459 = tpu.matmul %456, %458, %cst_108 {dimension_numbers = #tpu.dot_dimension_numbers<[1], [0], [0], [1], [0, 0, 1, 1], [], []>} : vector<16x32xbf16>, vector<32x16xbf16>, vector<16x16xf32> -> vector<16x16xf32>
    %460 = arith.addf %453, %459 : vector<16x16xf32>
    %461 = vector.extract_strided_slice %382 {offsets = [2, 0, 0], sizes = [2, 20, 32], strides = [1, 1, 1]} : vector<4x20x32xf32> to vector<2x20x32xf32>
    %462 = vector.shape_cast %461 : vector<2x20x32xf32> to vector<1x2x20x32xf32>
    %463 = vector.extract_strided_slice %462 {offsets = [0, 0, 0, 0], sizes = [1, 1, 20, 32], strides = [1, 1, 1, 1]} : vector<1x2x20x32xf32> to vector<1x1x20x32xf32>
    %464 = vector.shape_cast %463 : vector<1x1x20x32xf32> to vector<1x20x32xf32>
    %465 = vector.extract_strided_slice %464 {offsets = [0, 0, 0], sizes = [1, 16, 32], strides = [1, 1, 1]} : vector<1x20x32xf32> to vector<1x16x32xf32>
    %466 = vector.shape_cast %465 : vector<1x16x32xf32> to vector<16x32xf32>
    %467 = arith.truncf %466 : vector<16x32xf32> to vector<16x32xbf16>
    %468 = vector.extract_strided_slice %383 {offsets = [2, 0, 0, 0], sizes = [1, 1, 32, 16], strides = [1, 1, 1, 1]} : vector<3x5x32x16xbf16> to vector<1x1x32x16xbf16>
    %469 = vector.shape_cast %468 : vector<1x1x32x16xbf16> to vector<32x16xbf16>
    %cst_109 = arith.constant dense<0.000000e+00> : vector<16x16xf32>
    %470 = tpu.matmul %467, %469, %cst_109 {dimension_numbers = #tpu.dot_dimension_numbers<[1], [0], [0], [1], [0, 0, 1, 1], [], []>} : vector<16x32xbf16>, vector<32x16xbf16>, vector<16x16xf32> -> vector<16x16xf32>
    %471 = arith.addf %460, %470 : vector<16x16xf32>
    %472 = vector.extract_strided_slice %464 {offsets = [0, 1, 0], sizes = [1, 16, 32], strides = [1, 1, 1]} : vector<1x20x32xf32> to vector<1x16x32xf32>
    %473 = vector.shape_cast %472 : vector<1x16x32xf32> to vector<16x32xf32>
    %474 = arith.truncf %473 : vector<16x32xf32> to vector<16x32xbf16>
    %475 = vector.extract_strided_slice %383 {offsets = [2, 1, 0, 0], sizes = [1, 1, 32, 16], strides = [1, 1, 1, 1]} : vector<3x5x32x16xbf16> to vector<1x1x32x16xbf16>
    %476 = vector.shape_cast %475 : vector<1x1x32x16xbf16> to vector<32x16xbf16>
    %cst_110 = arith.constant dense<0.000000e+00> : vector<16x16xf32>
    %477 = tpu.matmul %474, %476, %cst_110 {dimension_numbers = #tpu.dot_dimension_numbers<[1], [0], [0], [1], [0, 0, 1, 1], [], []>} : vector<16x32xbf16>, vector<32x16xbf16>, vector<16x16xf32> -> vector<16x16xf32>
    %478 = arith.addf %471, %477 : vector<16x16xf32>
    %479 = vector.extract_strided_slice %464 {offsets = [0, 2, 0], sizes = [1, 16, 32], strides = [1, 1, 1]} : vector<1x20x32xf32> to vector<1x16x32xf32>
    %480 = vector.shape_cast %479 : vector<1x16x32xf32> to vector<16x32xf32>
    %481 = arith.truncf %480 : vector<16x32xf32> to vector<16x32xbf16>
    %482 = vector.extract_strided_slice %383 {offsets = [2, 2, 0, 0], sizes = [1, 1, 32, 16], strides = [1, 1, 1, 1]} : vector<3x5x32x16xbf16> to vector<1x1x32x16xbf16>
    %483 = vector.shape_cast %482 : vector<1x1x32x16xbf16> to vector<32x16xbf16>
    %cst_111 = arith.constant dense<0.000000e+00> : vector<16x16xf32>
    %484 = tpu.matmul %481, %483, %cst_111 {dimension_numbers = #tpu.dot_dimension_numbers<[1], [0], [0], [1], [0, 0, 1, 1], [], []>} : vector<16x32xbf16>, vector<32x16xbf16>, vector<16x16xf32> -> vector<16x16xf32>
    %485 = arith.addf %478, %484 : vector<16x16xf32>
    %486 = vector.extract_strided_slice %464 {offsets = [0, 3, 0], sizes = [1, 16, 32], strides = [1, 1, 1]} : vector<1x20x32xf32> to vector<1x16x32xf32>
    %487 = vector.shape_cast %486 : vector<1x16x32xf32> to vector<16x32xf32>
    %488 = arith.truncf %487 : vector<16x32xf32> to vector<16x32xbf16>
    %489 = vector.extract_strided_slice %383 {offsets = [2, 3, 0, 0], sizes = [1, 1, 32, 16], strides = [1, 1, 1, 1]} : vector<3x5x32x16xbf16> to vector<1x1x32x16xbf16>
    %490 = vector.shape_cast %489 : vector<1x1x32x16xbf16> to vector<32x16xbf16>
    %cst_112 = arith.constant dense<0.000000e+00> : vector<16x16xf32>
    %491 = tpu.matmul %488, %490, %cst_112 {dimension_numbers = #tpu.dot_dimension_numbers<[1], [0], [0], [1], [0, 0, 1, 1], [], []>} : vector<16x32xbf16>, vector<32x16xbf16>, vector<16x16xf32> -> vector<16x16xf32>
    %492 = arith.addf %485, %491 : vector<16x16xf32>
    %493 = vector.extract_strided_slice %464 {offsets = [0, 4, 0], sizes = [1, 16, 32], strides = [1, 1, 1]} : vector<1x20x32xf32> to vector<1x16x32xf32>
    %494 = vector.shape_cast %493 : vector<1x16x32xf32> to vector<16x32xf32>
    %495 = arith.truncf %494 : vector<16x32xf32> to vector<16x32xbf16>
    %496 = vector.extract_strided_slice %383 {offsets = [2, 4, 0, 0], sizes = [1, 1, 32, 16], strides = [1, 1, 1, 1]} : vector<3x5x32x16xbf16> to vector<1x1x32x16xbf16>
    %497 = vector.shape_cast %496 : vector<1x1x32x16xbf16> to vector<32x16xbf16>
    %cst_113 = arith.constant dense<0.000000e+00> : vector<16x16xf32>
    %498 = tpu.matmul %495, %497, %cst_113 {dimension_numbers = #tpu.dot_dimension_numbers<[1], [0], [0], [1], [0, 0, 1, 1], [], []>} : vector<16x32xbf16>, vector<32x16xbf16>, vector<16x16xf32> -> vector<16x16xf32>
    %499 = arith.addf %492, %498 : vector<16x16xf32>
    %c0_114 = arith.constant 0 : index
    %c0_115 = arith.constant 0 : index
    %500 = vector.load %arg9[%c0_114, %c0_115] : memref<1x16xf32, #tpu.memory_space<vmem>>, vector<1x16xf32>
    %501 = vector.broadcast %500 : vector<1x16xf32> to vector<16x16xf32>
    %502 = arith.addf %499, %501 : vector<16x16xf32>
    %cst_116 = arith.constant 0.000000e+00 : f32
    %503 = vector.broadcast %cst_116 : f32 to vector<16x16xf32>
    %504 = arith.cmpf ogt, %502, %503 : vector<16x16xf32>
    %cst_117 = arith.constant 1.000000e-01 : f32
    %505 = vector.broadcast %cst_117 : f32 to vector<16x16xf32>
    %506 = arith.mulf %505, %502 : vector<16x16xf32>
    %507 = arith.select %504, %502, %506 : vector<16x16xi1>, vector<16x16xf32>
    %c0_118 = arith.constant 0 : index
    %c0_119 = arith.constant 0 : index
    %508 = vector.load %arg10[%c0_118, %c0_119] : memref<1x16xf32, #tpu.memory_space<vmem>>, vector<1x16xf32>
    %509 = vector.broadcast %508 : vector<1x16xf32> to vector<16x16xf32>
    %510 = arith.mulf %507, %509 : vector<16x16xf32>
    %cst_120 = arith.constant dense<0.000000e+00> : vector<16xf32>
    %511 = vector.multi_reduction <add>, %510, %cst_120 [1] : vector<16x16xf32> to vector<16xf32>
    %512 = vector.shape_cast %511 : vector<16xf32> to vector<16x1xf32>
    %c0_121 = arith.constant 0 : index
    %c0_122 = arith.constant 0 : index
    %513 = vector.load %arg11[%c0_121, %c0_122] : memref<1x1xf32, #tpu.memory_space<vmem>>, vector<1x1xf32>
    %514 = vector.broadcast %513 : vector<1x1xf32> to vector<16x1xf32>
    %515 = arith.addf %512, %514 : vector<16x1xf32>
    %516 = arith.negf %515 : vector<16x1xf32>
    %517 = math.exp %516 : vector<16x1xf32>
    %cst_123 = arith.constant 1.000000e+00 : f32
    %518 = vector.broadcast %cst_123 : f32 to vector<16x1xf32>
    %519 = arith.addf %518, %517 : vector<16x1xf32>
    %520 = arith.divf %518, %519 : vector<16x1xf32>
    %521 = vector.shape_cast %520 : vector<16x1xf32> to vector<1x16x1xf32>
    %c0_124 = arith.constant 0 : index
    %c0_125 = arith.constant 0 : index
    %c0_126 = arith.constant 0 : index
    %522 = vector.load %arg12[%c0_124, %c0_125, %c0_126] : memref<1x16x1xf32, #tpu.memory_space<vmem>>, vector<1x16x1xf32>
    tpu.vector_store %arg12[%c0_124, %c0_125, %c0_126], %521 {strides = array<i32>} : memref<1x16x1xf32, #tpu.memory_space<vmem>>, vector<1x16x1xf32>,
    return
  }
  func.func @transform_0(%arg0: i32) -> (i32, i32, i32, i32) {
    %c0_i32 = arith.constant 0 : i32
    %c0_i32_0 = arith.constant 0 : i32
    %c0_i32_1 = arith.constant 0 : i32
    %c0_i32_2 = arith.constant 0 : i32
    return %arg0, %c0_i32, %c0_i32_0, %c0_i32_1 : i32, i32, i32, i32
  }
  func.func @transform_1(%arg0: i32) -> (i32, i32, i32) {
    %c0_i32 = arith.constant 0 : i32
    %c0_i32_0 = arith.constant 0 : i32
    %c0_i32_1 = arith.constant 0 : i32
    %c0_i32_2 = arith.constant 0 : i32
    return %c0_i32, %c0_i32_0, %c0_i32_1 : i32, i32, i32
  }
  func.func @transform_2(%arg0: i32) -> (i32, i32) {
    %c0_i32 = arith.constant 0 : i32
    %c0_i32_0 = arith.constant 0 : i32
    %c0_i32_1 = arith.constant 0 : i32
    return %c0_i32, %c0_i32_0 : i32, i32
  }
  func.func @transform_3(%arg0: i32) -> (i32, i32, i32, i32) {
    %c0_i32 = arith.constant 0 : i32
    %c0_i32_0 = arith.constant 0 : i32
    %c0_i32_1 = arith.constant 0 : i32
    %c0_i32_2 = arith.constant 0 : i32
    %c0_i32_3 = arith.constant 0 : i32
    return %c0_i32, %c0_i32_0, %c0_i32_1, %c0_i32_2 : i32, i32, i32, i32
  }
  func.func @transform_4(%arg0: i32) -> (i32, i32) {
    %c0_i32 = arith.constant 0 : i32
    %c0_i32_0 = arith.constant 0 : i32
    %c0_i32_1 = arith.constant 0 : i32
    return %c0_i32, %c0_i32_0 : i32, i32
  }
  func.func @transform_5(%arg0: i32) -> (i32, i32, i32, i32) {
    %c0_i32 = arith.constant 0 : i32
    %c0_i32_0 = arith.constant 0 : i32
    %c0_i32_1 = arith.constant 0 : i32
    %c0_i32_2 = arith.constant 0 : i32
    %c0_i32_3 = arith.constant 0 : i32
    return %c0_i32, %c0_i32_0, %c0_i32_1, %c0_i32_2 : i32, i32, i32, i32
  }
  func.func @transform_6(%arg0: i32) -> (i32, i32) {
    %c0_i32 = arith.constant 0 : i32
    %c0_i32_0 = arith.constant 0 : i32
    %c0_i32_1 = arith.constant 0 : i32
    return %c0_i32, %c0_i32_0 : i32, i32
  }
  func.func @transform_7(%arg0: i32) -> (i32, i32, i32, i32) {
    %c0_i32 = arith.constant 0 : i32
    %c0_i32_0 = arith.constant 0 : i32
    %c0_i32_1 = arith.constant 0 : i32
    %c0_i32_2 = arith.constant 0 : i32
    %c0_i32_3 = arith.constant 0 : i32
    return %c0_i32, %c0_i32_0, %c0_i32_1, %c0_i32_2 : i32, i32, i32, i32
  }
  func.func @transform_8(%arg0: i32) -> (i32, i32) {
    %c0_i32 = arith.constant 0 : i32
    %c0_i32_0 = arith.constant 0 : i32
    %c0_i32_1 = arith.constant 0 : i32
    return %c0_i32, %c0_i32_0 : i32, i32
  }
  func.func @transform_9(%arg0: i32) -> (i32, i32) {
    %c0_i32 = arith.constant 0 : i32
    %c0_i32_0 = arith.constant 0 : i32
    %c0_i32_1 = arith.constant 0 : i32
    return %c0_i32, %c0_i32_0 : i32, i32
  }
  func.func @transform_10(%arg0: i32) -> (i32, i32) {
    %c0_i32 = arith.constant 0 : i32
    %c0_i32_0 = arith.constant 0 : i32
    %c0_i32_1 = arith.constant 0 : i32
    return %c0_i32, %c0_i32_0 : i32, i32
  }
  func.func @transform_11(%arg0: i32) -> (i32, i32, i32) {
    %c0_i32 = arith.constant 0 : i32
    %c0_i32_0 = arith.constant 0 : i32
    %c0_i32_1 = arith.constant 0 : i32
    return %arg0, %c0_i32, %c0_i32_0 : i32, i32, i32
  }
}

</mosaic_0001>

<bundles_post_ra>
// kernel: conv_segment_forward.1
= control target key start
LH: loop header
LB: loop body
LE: loop exit
PB: predicated region body
PF: predicated region fallthrough
CT: control target
= control target key end

     0   :  { %s9266_s19 = smov 0   ;;  %s14855_s0 = inlined_call_operand.vmem [shape: f32[2,31,16,1], index: 0, kind: input, shape index: {}]   ;;  %s14856_s1 = inlined_call_operand.vmem [shape: f32[3,5,32], index: 1, kind: input, shape index: {}]   ;;  %s14857_s2 = inlined_call_operand.vmem [shape: f32[1,32], index: 2, kind: input, shape index: {}]   ;;  %s14858_s3 = inlined_call_operand.vmem [shape: bf16[3,5,32,64], index: 3, kind: input, shape index: {}]   ;;  %s14859_s4 = inlined_call_operand.vmem [shape: f32[1,64], index: 4, kind: input, shape index: {}]   ;;  %s14860_s5 = inlined_call_operand.vmem [shape: bf16[3,5,64,32], index: 5, kind: input, shape index: {}]   ;;  %s14861_s6 = inlined_call_operand.vmem [shape: f32[1,32], index: 6, kind: input, shape index: {}]   ;;  %s14862_s7 = inlined_call_operand.vmem [shape: bf16[3,5,32,16], index: 7, kind: input, shape index: {}]   ;;  %s14863_s8 = inlined_call_operand.vmem [shape: f32[1,16], index: 8, kind: input, shape index: {}]   ;;  %s14864_s9 = inlined_call_operand.vmem [shape: f32[1,16], index: 9, kind: input, shape index: {}]   ;;  %s14865_s10 = inlined_call_operand.<no memory space> [shape: f32[1,1], index: 10, kind: input, shape index: {}]   ;;  %s14866_s11 = inlined_call_operand.vmem [shape: f32[2,16,1], index: 11, kind: output, shape index: {}]  }
   0x1   :  { %v16_v0 = vstv %s14865_s10 }
   0x2   :  { %17 = vst [vmem:[#allocation6] sm:$0x1] %v16_v0 }
   0x3 LB: > { %s8360_s20 = sadd.s32 4294967295, %s9199_s19   ;;  %p8364_p0 = scmp.ge.s32.totalorder %s9199_s19, 1  ;;  %s9199_s19 = sphi %s9266_s19, %s23_s19  }
   0x4   : > { %p339_p1 = scmp.lt.s32.totalorder %s9199_s19, 3 }
   0x6   : > { %p340_p2 = pnand %p8364_p0, %p339_p1 }
   0x8   : > { %343 = sbr.rel (%p340_p2) target bundleno = 2008 (0x7d8), region = 64 }
   0xd   : > { %p379_p3 = scmp.lt.s32.totalorder %s8360_s20, 1  ;;  %vm390_vm0 = vcmask 7168   ;;  %vm393_vm1 = vcmask 3072   ;;  %v9201_v1 = vmov 0   ;;  %v14867_v2 = vmov 0.0  }
   0xe   : > { %9151 = vset.pattern.permute.xlu2 %v9201_v1  ;;  %9150 = vset.pattern.permute.xlu1 %v9201_v1  ;;  %395 = vst.msk [vmem:[#allocation2 + $0x18] sm:$0xff] %vm390_vm0, %v14867_v2  ;;  %vm1173_vm2 = vcmask 1046528   ;;  %vm1400_vm3 = vcmask 1045504   ;;  %vm1627_vm4 = vcmask 1044480   ;;  %vm1854_vm5 = vcmask 1043456  }
   0xf   : > { %9149 = vset.pattern.permute.xlu0 %v9201_v1  ;;  %s15655_s20 = smov (!%p379_p3, %s8360_s20), 1  ;;  %396 = vst.msk [vmem:[#allocation2 + $0x20] sm:$0xff] %vm390_vm0, %v14867_v2  ;;  %vm488_vm8 = vcmask 261120   ;;  %vm491_vm9 = vcmask 257024  }
  0x10   : > { %397 = vst.msk [vmem:[#allocation2 + $0x28] sm:$0xf] %vm393_vm1, %v14867_v2  ;;  %s9138_s10 = smul.u32 496, %s15655_s20  ;;  %s9017_s18 = sshll.u32 %s15655_s20, 4 }
  0x11   : > { %391 = vst.msk [vmem:[#allocation2] sm:$0xff] %vm390_vm0, %v14867_v2  ;;  %s388_s21 = scalar_lea.vmem %s14866_s11, %s9017_s18 }
  0x12   : > { %392 = vst.msk [vmem:[#allocation2 + $0x8] sm:$0xff] %vm390_vm0, %v14867_v2  ;;  %s9290_s23 = scalar_lea.vmem %s14855_s0, %s9138_s10 }
  0x13   : > { %394 = vst.msk [vmem:[#allocation2 + $0x10] sm:$0xf] %vm393_vm1, %v14867_v2  ;;  %v578_v3 = vld [vmem:[%s9290_s23 + $0x10] sm:$0xff]  ;;  %v579_v4 = vld [vmem:[%s9290_s23 + $0x18] sm:$0xff]  ;;  %v577_v7 = vld [vmem:[%s9290_s23 + $0x8] sm:$0xff] }
  0x14   : > { %398 = vst.msk [vmem:[#allocation2 + $0x30] sm:$0xff] %vm390_vm0, %v14867_v2  ;;  %v576_v8 = vld [vmem:[%s9290_s23] sm:$0xff]  ;;  %v585_v9 = vld [vmem:[%s9290_s23 + $0x48] sm:$0xff]  ;;  %v587_v13 = vld [vmem:[%s9290_s23 + $0x58] sm:$0xff] }
  0x15   : > { %640 = vst.msk [vmem:[#allocation2 + $0x1a] sm:$0xff] %vm390_vm0, %v578_v3  ;;  %v584_v10 = vld [vmem:[%s9290_s23 + $0x40] sm:$0xff]  ;;  %v581_v11 = vld [vmem:[%s9290_s23 + $0x28] sm:$0xff]  ;;  %v586_v14 = vld [vmem:[%s9290_s23 + $0x50] sm:$0xff] }
  0x16   : > { %641 = vst.msk [vmem:[#allocation2 + $0x22] sm:$0xff] %vm390_vm0, %v579_v4  ;;  %v580_v12 = vld [vmem:[%s9290_s23 + $0x20] sm:$0xff]  ;;  %v593_v17 = vld [vmem:[%s9290_s23 + $0x88] sm:$0xff]  ;;  %v595_v28 = vld [vmem:[%s9290_s23 + $0x98] sm:$0xff] }
  0x17   : > { %399 = vst.msk [vmem:[#allocation2 + $0x38] sm:$0xff] %vm390_vm0, %v14867_v2  ;;  %v592_v19 = vld [vmem:[%s9290_s23 + $0x80] sm:$0xff]  ;;  %v589_v23 = vld [vmem:[%s9290_s23 + $0x68] sm:$0xff]  ;;  %v594_v29 = vld [vmem:[%s9290_s23 + $0x90] sm:$0xff] }
  0x18   : > { %400 = vst.msk [vmem:[#allocation2 + $0x40] sm:$0xf] %vm393_vm1, %v14867_v2  ;;  %v588_v24 = vld [vmem:[%s9290_s23 + $0x60] sm:$0xff]  ;;  %v601_v33 = vld [vmem:[%s9290_s23 + $0xc8] sm:$0xff]  ;;  %v603_v43 = vld [vmem:[%s9290_s23 + $0xd8] sm:$0xff] }
  0x19   : > { %401 = vst.msk [vmem:[#allocation2 + $0x48] sm:$0xff] %vm390_vm0, %v14867_v2  ;;  %v600_v34 = vld [vmem:[%s9290_s23 + $0xc0] sm:$0xff]  ;;  %v597_v38 = vld [vmem:[%s9290_s23 + $0xa8] sm:$0xff]  ;;  %v602_v44 = vld [vmem:[%s9290_s23 + $0xd0] sm:$0xff] }
  0x1a   : > { %402 = vst.msk [vmem:[#allocation2 + $0x50] sm:$0xff] %vm390_vm0, %v14867_v2  ;;  %v596_v39 = vld [vmem:[%s9290_s23 + $0xa0] sm:$0xff]  ;;  %v609_v48 = vld [vmem:[%s9290_s23 + $0x108] sm:$0xff]  ;;  %v611_v58 = vld [vmem:[%s9290_s23 + $0x118] sm:$0xff] }
  0x1b   : > { %403 = vst.msk [vmem:[#allocation2 + $0x58] sm:$0xf] %vm393_vm1, %v14867_v2  ;;  %v608_v49 = vld [vmem:[%s9290_s23 + $0x100] sm:$0xff]  ;;  %v605_v53 = vld [vmem:[%s9290_s23 + $0xe8] sm:$0xff]  ;;  %v610_v59 = vld [vmem:[%s9290_s23 + $0x110] sm:$0xff] }
  0x1c   : > { %404 = vst.msk [vmem:[#allocation2 + $0x60] sm:$0xff] %vm390_vm0, %v14867_v2  ;;  %v703_v20 = vld [vmem:[#allocation2 + $0x18] sm:$0xff]  ;;  %v604_v54 = vld [vmem:[%s9290_s23 + $0xe0] sm:$0xff]  ;;  %v617_v63 = vld [vmem:[%s9290_s23 + $0x148] sm:$0xff] }
  0x1d   : > { %v704_v5 = vld [vmem:[#allocation2 + $0x20] sm:$0xff]  ;;  %405 = vst.msk [vmem:[#allocation2 + $0x68] sm:$0xff] %vm390_vm0, %v14867_v2  ;;  %v705_v6 = vld [vmem:[#allocation2 + $0x28] sm:$0xf] }
  0x1e   : > { %1997 = vperm.xlu2 %9151, %v704_v5   ;;  %406 = vst.msk [vmem:[#allocation2 + $0x70] sm:$0xf] %vm393_vm1, %v14867_v2  ;;  %v616_v0 = vld [vmem:[%s9290_s23 + $0x140] sm:$0xff]  ;;  %v613_v5 = vld [vmem:[%s9290_s23 + $0x128] sm:$0xff] }
  0x1f   : > { %407 = vst.msk [vmem:[#allocation2 + $0x78] sm:$0xff] %vm390_vm0, %v14867_v2 }
  0x20   : > { %408 = vst.msk [vmem:[#allocation2 + $0x80] sm:$0xff] %vm390_vm0, %v14867_v2 }
  0x21   : > { %409 = vst.msk [vmem:[#allocation2 + $0x88] sm:$0xf] %vm393_vm1, %v14867_v2 }
  0x22   : > { %410 = vst.msk [vmem:[#allocation2 + $0x90] sm:$0xff] %vm390_vm0, %v14867_v2 }
  0x23   : > { %411 = vst.msk [vmem:[#allocation2 + $0x98] sm:$0xff] %vm390_vm0, %v14867_v2 }
  0x24   : > { %412 = vst.msk [vmem:[#allocation2 + $0xa0] sm:$0xf] %vm393_vm1, %v14867_v2 }
  0x25   : > { %413 = vst.msk [vmem:[#allocation2 + $0xa8] sm:$0xff] %vm390_vm0, %v14867_v2 }
  0x26   : > { %414 = vst.msk [vmem:[#allocation2 + $0xb0] sm:$0xff] %vm390_vm0, %v14867_v2  ;;  %2203 = vperm.xlu2 %9151, %v705_v6   ;;  %v612_v6 = vld [vmem:[%s9290_s23 + $0x120] sm:$0xff] }
  0x27   : > { %415 = vst.msk [vmem:[#allocation2 + $0xb8] sm:$0xf] %vm393_vm1, %v14867_v2 }
  0x28   : > { %416 = vst.msk [vmem:[#allocation2 + $0xc0] sm:$0xff] %vm390_vm0, %v14867_v2 }
  0x29   : > { %417 = vst.msk [vmem:[#allocation2 + $0xc8] sm:$0xff] %vm390_vm0, %v14867_v2 }
  0x2a   : > { %418 = vst.msk [vmem:[#allocation2 + $0xd0] sm:$0xf] %vm393_vm1, %v14867_v2 }
  0x2b   : > { %419 = vst.msk [vmem:[#allocation2 + $0xd8] sm:$0xff] %vm390_vm0, %v14867_v2 }
  0x2c   : > { %420 = vst.msk [vmem:[#allocation2 + $0xe0] sm:$0xff] %vm390_vm0, %v14867_v2 }
  0x2d   : > { %421 = vst.msk [vmem:[#allocation2 + $0xe8] sm:$0xf] %vm393_vm1, %v14867_v2 }
  0x2e   : > { %422 = vst.msk [vmem:[#allocation2 + $0xf0] sm:$0xff] %vm390_vm0, %v14867_v2 }
  0x2f   : > { %423 = vst.msk [vmem:[#allocation2 + $0xf8] sm:$0xff] %vm390_vm0, %v14867_v2 }
  0x30   : > { %424 = vst.msk [vmem:[#allocation2 + $0x100] sm:$0xf] %vm393_vm1, %v14867_v2 }
  0x31   : > { %425 = vst.msk [vmem:[#allocation2 + $0x108] sm:$0xff] %vm390_vm0, %v14867_v2 }
  0x32   : > { %426 = vst.msk [vmem:[#allocation2 + $0x110] sm:$0xff] %vm390_vm0, %v14867_v2 }
  0x33   : > { %427 = vst.msk [vmem:[#allocation2 + $0x118] sm:$0xf] %vm393_vm1, %v14867_v2 }
  0x34   : > { %428 = vst.msk [vmem:[#allocation2 + $0x120] sm:$0xff] %vm390_vm0, %v14867_v2 }
  0x35   : > { %429 = vst.msk [vmem:[#allocation2 + $0x128] sm:$0xff] %vm390_vm0, %v14867_v2 }
  0x36   : > { %430 = vst.msk [vmem:[#allocation2 + $0x130] sm:$0xf] %vm393_vm1, %v14867_v2 }
  0x37   : > { %431 = vst.msk [vmem:[#allocation2 + $0x138] sm:$0xff] %vm390_vm0, %v14867_v2 }
  0x38   : > { %432 = vst.msk [vmem:[#allocation2 + $0x140] sm:$0xff] %vm390_vm0, %v14867_v2 }
  0x39   : > { %433 = vst.msk [vmem:[#allocation2 + $0x148] sm:$0xf] %vm393_vm1, %v14867_v2 }
  0x3a   : > { %434 = vst.msk [vmem:[#allocation2 + $0x150] sm:$0xff] %vm390_vm0, %v14867_v2 }
  0x3b   : > { %435 = vst.msk [vmem:[#allocation2 + $0x158] sm:$0xff] %vm390_vm0, %v14867_v2 }
  0x3c   : > { %436 = vst.msk [vmem:[#allocation2 + $0x160] sm:$0xf] %vm393_vm1, %v14867_v2 }
  0x3d   : > { %437 = vst.msk [vmem:[#allocation2 + $0x168] sm:$0xff] %vm390_vm0, %v14867_v2 }
  0x3e   : > { %438 = vst.msk [vmem:[#allocation2 + $0x170] sm:$0xff] %vm390_vm0, %v14867_v2 }
  0x3f   : > { %439 = vst.msk [vmem:[#allocation2 + $0x178] sm:$0xf] %vm393_vm1, %v14867_v2 }
  0x40   : > { %440 = vst.msk [vmem:[#allocation2 + $0x180] sm:$0xff] %vm390_vm0, %v14867_v2 }
  0x41   : > { %441 = vst.msk [vmem:[#allocation2 + $0x188] sm:$0xff] %vm390_vm0, %v14867_v2 }
  0x42   : > { %442 = vst.msk [vmem:[#allocation2 + $0x190] sm:$0xf] %vm393_vm1, %v14867_v2 }
  0x43   : > { %443 = vst.msk [vmem:[#allocation2 + $0x198] sm:$0xff] %vm390_vm0, %v14867_v2 }
  0x44   : > { %444 = vst.msk [vmem:[#allocation2 + $0x1a0] sm:$0xff] %vm390_vm0, %v14867_v2 }
  0x45   : > { %445 = vst.msk [vmem:[#allocation2 + $0x1a8] sm:$0xf] %vm393_vm1, %v14867_v2 }
  0x46   : > { %446 = vst.msk [vmem:[#allocation2 + $0x1b0] sm:$0xff] %vm390_vm0, %v14867_v2 }
  0x47   : > { %447 = vst.msk [vmem:[#allocation2 + $0x1b8] sm:$0xff] %vm390_vm0, %v14867_v2 }
  0x48   : > { %448 = vst.msk [vmem:[#allocation2 + $0x1c0] sm:$0xf] %vm393_vm1, %v14867_v2 }
  0x49   : > { %449 = vst.msk [vmem:[#allocation2 + $0x1c8] sm:$0xff] %vm390_vm0, %v14867_v2 }
  0x4a   : > { %450 = vst.msk [vmem:[#allocation2 + $0x1d0] sm:$0xff] %vm390_vm0, %v14867_v2 }
  0x4b   : > { %451 = vst.msk [vmem:[#allocation2 + $0x1d8] sm:$0xf] %vm393_vm1, %v14867_v2 }
  0x4c   : > { %452 = vst.msk [vmem:[#allocation2 + $0x1e0] sm:$0xff] %vm390_vm0, %v14867_v2 }
  0x4d   : > { %453 = vst.msk [vmem:[#allocation2 + $0x1e8] sm:$0xff] %vm390_vm0, %v14867_v2 }
  0x4e   : > { %454 = vst.msk [vmem:[#allocation2 + $0x1f0] sm:$0xf] %vm393_vm1, %v14867_v2 }
  0x4f   : > { %455 = vst.msk [vmem:[#allocation2 + $0x1f8] sm:$0xff] %vm390_vm0, %v14867_v2 }
  0x50   : > { %456 = vst.msk [vmem:[#allocation2 + $0x200] sm:$0xff] %vm390_vm0, %v14867_v2 }
  0x51   : > { %457 = vst.msk [vmem:[#allocation2 + $0x208] sm:$0xf] %vm393_vm1, %v14867_v2 }
  0x52   : > { %458 = vst.msk [vmem:[#allocation2 + $0x210] sm:$0xff] %vm390_vm0, %v14867_v2 }
  0x53   : > { %459 = vst.msk [vmem:[#allocation2 + $0x218] sm:$0xff] %vm390_vm0, %v14867_v2 }
  0x54   : > { %460 = vst.msk [vmem:[#allocation2 + $0x220] sm:$0xf] %vm393_vm1, %v14867_v2 }
  0x55   : > { %461 = vst.msk [vmem:[#allocation2 + $0x228] sm:$0xff] %vm390_vm0, %v14867_v2 }
  0x56   : > { %462 = vst.msk [vmem:[#allocation2 + $0x230] sm:$0xff] %vm390_vm0, %v14867_v2 }
  0x57   : > { %463 = vst.msk [vmem:[#allocation2 + $0x238] sm:$0xf] %vm393_vm1, %v14867_v2 }
  0x58   : > { %464 = vst.msk [vmem:[#allocation2 + $0x240] sm:$0xff] %vm390_vm0, %v14867_v2 }
  0x59   : > { %465 = vst.msk [vmem:[#allocation2 + $0x248] sm:$0xff] %vm390_vm0, %v14867_v2 }
  0x5a   : > { %466 = vst.msk [vmem:[#allocation2 + $0x250] sm:$0xf] %vm393_vm1, %v14867_v2 }
  0x5b   : > { %467 = vst.msk [vmem:[#allocation2 + $0x258] sm:$0xff] %vm390_vm0, %v14867_v2 }
  0x5c   : > { %468 = vst.msk [vmem:[#allocation2 + $0x260] sm:$0xff] %vm390_vm0, %v14867_v2 }
  0x5d   : > { %469 = vst.msk [vmem:[#allocation2 + $0x268] sm:$0xf] %vm393_vm1, %v14867_v2 }
  0x5e   : > { %470 = vst.msk [vmem:[#allocation2 + $0x270] sm:$0xff] %vm390_vm0, %v14867_v2 }
  0x5f   : > { %471 = vst.msk [vmem:[#allocation2 + $0x278] sm:$0xff] %vm390_vm0, %v14867_v2 }
  0x60   : > { %472 = vst.msk [vmem:[#allocation2 + $0x280] sm:$0xf] %vm393_vm1, %v14867_v2 }
  0x61   : > { %473 = vst.msk [vmem:[#allocation2 + $0x288] sm:$0xff] %vm390_vm0, %v14867_v2 }
  0x62   : > { %474 = vst.msk [vmem:[#allocation2 + $0x290] sm:$0xff] %vm390_vm0, %v14867_v2 }
  0x63   : > { %475 = vst.msk [vmem:[#allocation2 + $0x298] sm:$0xf] %vm393_vm1, %v14867_v2 }
  0x64   : > { %476 = vst.msk [vmem:[#allocation2 + $0x2a0] sm:$0xff] %vm390_vm0, %v14867_v2 }
  0x65   : > { %477 = vst.msk [vmem:[#allocation2 + $0x2a8] sm:$0xff] %vm390_vm0, %v14867_v2 }
  0x66   : > { %478 = vst.msk [vmem:[#allocation2 + $0x2b0] sm:$0xf] %vm393_vm1, %v14867_v2 }
  0x67   : > { %479 = vst.msk [vmem:[#allocation2 + $0x2b8] sm:$0xff] %vm390_vm0, %v14867_v2 }
  0x68   : > { %480 = vst.msk [vmem:[#allocation2 + $0x2c0] sm:$0xff] %vm390_vm0, %v14867_v2 }
  0x69   : > { %481 = vst.msk [vmem:[#allocation2 + $0x2c8] sm:$0xf] %vm393_vm1, %v14867_v2 }
  0x6a   : > { %482 = vst.msk [vmem:[#allocation2 + $0x2d0] sm:$0xff] %vm390_vm0, %v14867_v2 }
  0x6b   : > { %483 = vst.msk [vmem:[#allocation2 + $0x2d8] sm:$0xff] %vm390_vm0, %v14867_v2 }
  0x6c   : > { %484 = vst.msk [vmem:[#allocation2 + $0x2e0] sm:$0xf] %vm393_vm1, %v14867_v2 }
  0x6d   : > { %639 = vst.msk [vmem:[#allocation2 + $0xa] sm:$0xff] %vm390_vm0, %v577_v7 }
  0x6e   : > { %638 = vst.msk [vmem:[#allocation2 + $0x2] sm:$0xff] %vm390_vm0, %v576_v8 }
  0x6f   : > { %647 = vst.msk [vmem:[#allocation2 + $0x6a] sm:$0xff] %vm390_vm0, %v585_v9 }
  0x70   : > { %646 = vst.msk [vmem:[#allocation2 + $0x62] sm:$0xff] %vm390_vm0, %v584_v10  ;;  %v619_v10 = vld [vmem:[%s9290_s23 + $0x158] sm:$0xff] }
  0x71   : > { %643 = vst.msk [vmem:[#allocation2 + $0x3a] sm:$0xff] %vm390_vm0, %v581_v11  ;;  %v618_v11 = vld [vmem:[%s9290_s23 + $0x150] sm:$0xff] }
  0x72   : > { %642 = vst.msk [vmem:[#allocation2 + $0x32] sm:$0xff] %vm390_vm0, %v580_v12 }
  0x73   : > { %649 = vst.msk [vmem:[#allocation2 + $0x82] sm:$0xff] %vm390_vm0, %v587_v13 }
  0x74   : > { %v702_v15 = vld [vmem:[#allocation2 + $0x10] sm:$0xf]  ;;  %648 = vst.msk [vmem:[#allocation2 + $0x7a] sm:$0xff] %vm390_vm0, %v586_v14 }
  0x75   : > { %1009 = vperm.xlu1 %9150, %v702_v15   ;;  %v700_v16 = vld [vmem:[#allocation2] sm:$0xff]  ;;  %655 = vst.msk [vmem:[#allocation2 + $0xca] sm:$0xff] %vm390_vm0, %v593_v17  ;;  %v701_v21 = vld [vmem:[#allocation2 + $0x8] sm:$0xff] }
  0x76   : > { %798 = vperm.xlu0 %9149, %v700_v16   ;;  %v714_v18 = vld [vmem:[#allocation2 + $0x70] sm:$0xf]  ;;  %654 = vst.msk [vmem:[#allocation2 + $0xc2] sm:$0xff] %vm390_vm0, %v592_v19  ;;  %v625_v15 = vld [vmem:[%s9290_s23 + $0x188] sm:$0xff]  ;;  %v624_v16 = vld [vmem:[%s9290_s23 + $0x180] sm:$0xff] }
  0x77   : > { %1019 = vperm.xlu2 %9151, %v714_v18   ;;  %651 = vst.msk [vmem:[#allocation2 + $0x9a] sm:$0xff] %vm390_vm0, %v589_v23  ;;  %v713_v25 = vld [vmem:[#allocation2 + $0x68] sm:$0xff]  ;;  %v712_v26 = vld [vmem:[#allocation2 + $0x60] sm:$0xff] }
  0x78   : > { %v708_v22 = vld [vmem:[#allocation2 + $0x40] sm:$0xf]  ;;  %650 = vst.msk [vmem:[#allocation2 + $0x92] sm:$0xff] %vm390_vm0, %v588_v24  ;;  %v621_v23 = vld [vmem:[%s9290_s23 + $0x168] sm:$0xff] }
  0x79   : > { %657 = vst.msk [vmem:[#allocation2 + $0xe2] sm:$0xff] %vm390_vm0, %v595_v28  ;;  %v707_v30 = vld [vmem:[#allocation2 + $0x38] sm:$0xff]  ;;  %v706_v31 = vld [vmem:[#allocation2 + $0x30] sm:$0xff]  ;;  %v620_v24 = vld [vmem:[%s9290_s23 + $0x160] sm:$0xff] }
  0x7a   : > { %v717_v27 = vld [vmem:[#allocation2 + $0x88] sm:$0xf]  ;;  %656 = vst.msk [vmem:[#allocation2 + $0xda] sm:$0xff] %vm390_vm0, %v594_v29 }
  0x7b   : > { %663 = vst.msk [vmem:[#allocation2 + $0x12a] sm:$0xff] %vm390_vm0, %v601_v33  ;;  %v716_v35 = vld [vmem:[#allocation2 + $0x80] sm:$0xff]  ;;  %v715_v36 = vld [vmem:[#allocation2 + $0x78] sm:$0xff] }
  0x7c   : > { %v726_v32 = vld [vmem:[#allocation2 + $0xd0] sm:$0xf]  ;;  %662 = vst.msk [vmem:[#allocation2 + $0x122] sm:$0xff] %vm390_vm0, %v600_v34 }
  0x7d   : > { %1992 = vperm.xlu1 %9150, %v703_v20   ;;  %659 = vst.msk [vmem:[#allocation2 + $0xfa] sm:$0xff] %vm390_vm0, %v597_v38  ;;  %v725_v40 = vld [vmem:[#allocation2 + $0xc8] sm:$0xff]  ;;  %v724_v41 = vld [vmem:[#allocation2 + $0xc0] sm:$0xff]  ;;  %v1998_v20 = vpop.permute.xlu2 %1997 }
  0x7e   : > { %803 = vperm.xlu0 %9149, %v701_v21   ;;  %v720_v37 = vld [vmem:[#allocation2 + $0xa0] sm:$0xf]  ;;  %658 = vst.msk [vmem:[#allocation2 + $0xf2] sm:$0xff] %vm390_vm0, %v596_v39 }
  0x7f   : > { %1014 = vperm.xlu2 %9151, %v708_v22   ;;  %665 = vst.msk [vmem:[#allocation2 + $0x142] sm:$0xff] %vm390_vm0, %v603_v43  ;;  %v719_v45 = vld [vmem:[#allocation2 + $0x98] sm:$0xff]  ;;  %v718_v46 = vld [vmem:[#allocation2 + $0x90] sm:$0xff] }
  0x80   : > { %v729_v42 = vld [vmem:[#allocation2 + $0xe8] sm:$0xf]  ;;  %664 = vst.msk [vmem:[#allocation2 + $0x13a] sm:$0xff] %vm390_vm0, %v602_v44 }
  0x81   : > { %671 = vst.msk [vmem:[#allocation2 + $0x18a] sm:$0xff] %vm390_vm0, %v609_v48  ;;  %v728_v50 = vld [vmem:[#allocation2 + $0xe0] sm:$0xff]  ;;  %v727_v51 = vld [vmem:[#allocation2 + $0xd8] sm:$0xff] }
  0x82   : > { %v738_v47 = vld [vmem:[#allocation2 + $0x130] sm:$0xf]  ;;  %670 = vst.msk [vmem:[#allocation2 + $0x182] sm:$0xff] %vm390_vm0, %v608_v49 }
  0x83   : > { %667 = vst.msk [vmem:[#allocation2 + $0x15a] sm:$0xff] %vm390_vm0, %v605_v53  ;;  %v737_v55 = vld [vmem:[#allocation2 + $0x128] sm:$0xff]  ;;  %v736_v56 = vld [vmem:[#allocation2 + $0x120] sm:$0xff] }
  0x84   : > { %v732_v52 = vld [vmem:[#allocation2 + $0x100] sm:$0xf]  ;;  %666 = vst.msk [vmem:[#allocation2 + $0x152] sm:$0xff] %vm390_vm0, %v604_v54 }
  0x85   : > { %823 = vperm.xlu1 %9150, %v713_v25   ;;  %673 = vst.msk [vmem:[#allocation2 + $0x1a2] sm:$0xff] %vm390_vm0, %v611_v58  ;;  %v731_v60 = vld [vmem:[#allocation2 + $0xf8] sm:$0xff]  ;;  %v730_v61 = vld [vmem:[#allocation2 + $0xf0] sm:$0xff]  ;;  %v9546_v28 = vpop.permute.xlu2 %2203 }
  0x86   : > { %818 = vperm.xlu0 %9149, %v712_v26   ;;  %v741_v57 = vld [vmem:[#allocation2 + $0x148] sm:$0xf]  ;;  %672 = vst.msk [vmem:[#allocation2 + $0x19a] sm:$0xff] %vm390_vm0, %v610_v59 }
  0x87   : > { %2213 = vperm.xlu2 %9151, %v717_v27   ;;  %679 = vst.msk [vmem:[#allocation2 + $0x1ea] sm:$0xff] %vm390_vm0, %v617_v63  ;;  %v740_v1 = vld [vmem:[#allocation2 + $0x140] sm:$0xff]  ;;  %v739_v3 = vld [vmem:[#allocation2 + $0x138] sm:$0xff] }
  0x88   : > { %v750_v62 = vld [vmem:[#allocation2 + $0x190] sm:$0xf]  ;;  %678 = vst.msk [vmem:[#allocation2 + $0x1e2] sm:$0xff] %vm390_vm0, %v616_v0 }
  0x89   : > { %675 = vst.msk [vmem:[#allocation2 + $0x1ba] sm:$0xff] %vm390_vm0, %v613_v5  ;;  %v749_v7 = vld [vmem:[#allocation2 + $0x188] sm:$0xff]  ;;  %v748_v8 = vld [vmem:[#allocation2 + $0x180] sm:$0xff] }
  0x8a   : > { %v744_v4 = vld [vmem:[#allocation2 + $0x160] sm:$0xf]  ;;  %674 = vst.msk [vmem:[#allocation2 + $0x1b2] sm:$0xff] %vm390_vm0, %v612_v6 }
  0x8b   : > { %v743_v12 = vld [vmem:[#allocation2 + $0x158] sm:$0xff]  ;;  %681 = vst.msk [vmem:[#allocation2 + $0x202] sm:$0xff] %vm390_vm0, %v619_v10  ;;  %v742_v13 = vld [vmem:[#allocation2 + $0x150] sm:$0xff] }
  0x8c   : > { %v753_v9 = vld [vmem:[#allocation2 + $0x1a8] sm:$0xf]  ;;  %680 = vst.msk [vmem:[#allocation2 + $0x1fa] sm:$0xff] %vm390_vm0, %v618_v11 }
  0x8d   : > { %813 = vperm.xlu1 %9150, %v707_v30   ;;  %v752_v17 = vld [vmem:[#allocation2 + $0x1a0] sm:$0xff]  ;;  %687 = vst.msk [vmem:[#allocation2 + $0x24a] sm:$0xff] %vm390_vm0, %v625_v15  ;;  %v751_v18 = vld [vmem:[#allocation2 + $0x198] sm:$0xff] }
  0x8e   : > { %808 = vperm.xlu0 %9149, %v706_v31   ;;  %v762_v14 = vld [vmem:[#allocation2 + $0x1f0] sm:$0xf]  ;;  %686 = vst.msk [vmem:[#allocation2 + $0x242] sm:$0xff] %vm390_vm0, %v624_v16  ;;  %v793_v31 = vld [vmem:[%s14856_s1] sm:$0x1f]  ;;  %v627_v15 = vld [vmem:[%s9290_s23 + $0x198] sm:$0xff] }
  0x8f   : > { %1029 = vperm.xlu2 %9151, %v726_v32   ;;  %v761_v21 = vld [vmem:[#allocation2 + $0x1e8] sm:$0xff]  ;;  %v760_v22 = vld [vmem:[#allocation2 + $0x1e0] sm:$0xff]  ;;  %683 = vst.msk [vmem:[#allocation2 + $0x21a] sm:$0xff] %vm390_vm0, %v621_v23  ;;  %v9583_v53 = vperm.slane %v793_v31, 0  ;;  %v9593_v59 = vperm.slane %v793_v31, 3  ;;  %v9618_v11 = vperm.slane %v793_v31, 4 }
  0x90   : > { %v756_v19 = vld [vmem:[#allocation2 + $0x1c0] sm:$0xf]  ;;  %682 = vst.msk [vmem:[#allocation2 + $0x212] sm:$0xff] %vm390_vm0, %v620_v24  ;;  %v626_v16 = vld [vmem:[%s9290_s23 + $0x190] sm:$0xff] }
  0x91   : > { %v755_v27 = vld [vmem:[#allocation2 + $0x1b8] sm:$0xff]  ;;  %v754_v29 = vld [vmem:[#allocation2 + $0x1b0] sm:$0xff]  ;;  %15066 = vst [vmem:[#allocation7_spill] sm:$0xff] %v9583_v53 }
  0x92   : > { %v765_v25 = vld [vmem:[#allocation2 + $0x208] sm:$0xf]  ;;  %689 = vst.msk [vmem:[#allocation2 + $0x262] sm:$0xff] %vm390_vm0, %v627_v15 }
  0x93   : > { %v764_v32 = vld [vmem:[#allocation2 + $0x200] sm:$0xff]  ;;  %v763_v33 = vld [vmem:[#allocation2 + $0x1f8] sm:$0xff]  ;;  %688 = vst.msk [vmem:[#allocation2 + $0x25a] sm:$0xff] %vm390_vm0, %v626_v16 }
  0x94   : > { %v774_v30 = vld [vmem:[#allocation2 + $0x250] sm:$0xf] }
  0x95   : > { %2017 = vperm.xlu1 %9150, %v716_v35   ;;  %v772_v49 = vld [vmem:[#allocation2 + $0x240] sm:$0xff] }
  0x96   : > { %2012 = vperm.xlu0 %9149, %v715_v36   ;;  %v768_v35 = vld [vmem:[#allocation2 + $0x220] sm:$0xf]  ;;  %v794_v36 = vld [vmem:[%s14856_s1 + $0x8] sm:$0x1f] }
  0x97   : > { %1024 = vperm.xlu2 %9151, %v720_v37   ;;  %v9556_v37 = vperm.slane %v793_v31, 1 }
  0x9a   : > { %v775_v15 = vld [vmem:[#allocation2 + $0x258] sm:$0xff] }
  0x9d   : > { %843 = vperm.xlu1 %9150, %v725_v40  }
  0x9e   : > { %838 = vperm.xlu0 %9149, %v724_v41   ;;  %v9564_v41 = vperm.slane %v794_v36, 1 }
  0x9f   : > { %2223 = vperm.xlu2 %9151, %v729_v42   ;;  %v9566_v42 = vperm.slane %v794_v36, 2 }
  0xa0   : > { %v2279_v23 = vmul.f32 %v9564_v41, %v9546_v28 }
  0xa1   : > { %v9586_v54 = vmul.f32 %v9566_v42, %v1998_v20  ;;  %v2505_v24 = vmul.f32 %v9566_v42, %v9546_v28 }
  0xa5   : > { %833 = vperm.xlu1 %9150, %v719_v45   ;;  %v9572_v45 = vperm.slane %v794_v36, 3 }
  0xa6   : > { %828 = vperm.xlu0 %9149, %v718_v46   ;;  %v773_v46 = vld [vmem:[#allocation2 + $0x248] sm:$0xff] }
  0xa7   : > { %1039 = vperm.xlu2 %9151, %v738_v47   ;;  %v9574_v47 = vperm.slane %v793_v31, 2  ;;  %v9591_v58 = vmul.f32 %v9572_v45, %v1998_v20 }
  0xa9   : > { %v2820_v10 = vrot.slane %v9591_v58, 3 }
  0xad   : > { %2037 = vperm.xlu1 %9150, %v728_v50   ;;  %v9576_v50 = vperm.slane %v794_v36, 0 }
  0xae   : > { %2032 = vperm.xlu0 %9149, %v727_v51   ;;  %v9578_v51 = vperm.slane %v794_v36, 4 }
  0xaf   : > { %1034 = vperm.xlu2 %9151, %v732_v52   ;;  %v9581_v52 = vmul.f32 %v9564_v41, %v1998_v20 }
  0xb1   : > { %v2368_v6 = vrot.slane %v9581_v52, 1 }
  0xb5   : > { %863 = vperm.xlu1 %9150, %v737_v55  }
  0xb6   : > { %858 = vperm.xlu0 %9149, %v736_v56  }
  0xb7   : > { %2233 = vperm.xlu2 %9151, %v741_v57  }
  0xbd   : > { %853 = vperm.xlu1 %9150, %v731_v60  }
  0xbe   : > { %848 = vperm.xlu0 %9149, %v730_v61  }
  0xbf   : > { %1049 = vperm.xlu2 %9151, %v750_v62  }
  0xc5   : > { %2057 = vperm.xlu1 %9150, %v740_v1   ;;  %v9604_v1 = vmul.f32 %v9576_v50, %v1998_v20 }
  0xc6   : > { %2052 = vperm.xlu0 %9149, %v739_v3   ;;  %v9607_v3 = vmul.f32 %v9578_v51, %v1998_v20 }
  0xc7   : > { %1044 = vperm.xlu2 %9151, %v744_v4  }
  0xcd   : > { %883 = vperm.xlu1 %9150, %v749_v7   ;;  %v2594_v7 = vrot.slane %v9586_v54, 2 }
  0xce   : > { %878 = vperm.xlu0 %9149, %v748_v8  }
  0xcf   : > { %2243 = vperm.xlu2 %9151, %v753_v9  }
  0xd1   : > { %v9558_v38 = vpop.permute.xlu2 %1019 }
  0xd5   : > { %873 = vperm.xlu1 %9150, %v743_v12  }
  0xd6   : > { %868 = vperm.xlu0 %9149, %v742_v13  }
  0xd7   : > { %1059 = vperm.xlu2 %9151, %v762_v14   ;;  %v767_v14 = vld [vmem:[#allocation2 + $0x218] sm:$0xff] }
  0xd9   : > { %v9595_v60 = vpop.permute.xlu2 %1014 }
  0xda   : > { %15067 = vst [vmem:[#allocation8_spill] sm:$0xff] %v9595_v60 }
  0xdd   : > { %2077 = vperm.xlu1 %9150, %v752_v17  }
  0xde   : > { %2072 = vperm.xlu0 %9149, %v751_v18  }
  0xdf   : > { %1054 = vperm.xlu2 %9151, %v756_v19  }
  0xe5   : > { %903 = vperm.xlu1 %9150, %v761_v21   ;;  %v766_v21 = vld [vmem:[#allocation2 + $0x210] sm:$0xff] }
  0xe6   : > { %898 = vperm.xlu0 %9149, %v760_v22   ;;  %v14869_v22 = vrot.slane %v9607_v3, 4 }
  0xe7   : > { %2253 = vperm.xlu2 %9151, %v765_v25   ;;  %v9560_v39 = vpop.permute.xlu1 %1009  ;;  %v9636_v25 = vld [vmem:[%s14856_s1 + $0x10] sm:$0x1f] }
  0xe8   : > { %v9544_v26 = vpop.permute.xlu0 %798  ;;  %v1085_v43 = vmul.f32 %v9556_v37, %v9560_v39  ;;  %v1312_v61 = vmul.f32 %v9574_v47, %v9560_v39  ;;  %v1539_v18 = vmul.f32 %v9593_v59, %v9560_v39  ;;  %v9670_v16 = vperm.slane %v9636_v25, 4 }
  0xe9   : > { %v1083_v44 = vmul.f32 %v9556_v37, %v9544_v26  ;;  %v1310_v62 = vmul.f32 %v9574_v47, %v9544_v26  ;;  %v947_v4 = vmul.f32 %v9583_v53, %v9544_v26  ;;  %v1537_v20 = vmul.f32 %v9593_v59, %v9544_v26 }
  0xea   : > { %v1177_v55 = vrot.slane %v1085_v43, 1  ;;  %v1404_v17 = vrot.slane %v1312_v61, 2  ;;  %v1766_v43 = vmul.f32 %v9618_v11, %v9560_v39  ;;  %15068 = vst [vmem:[#allocation9_spill] sm:$0xff] %v9670_v16 }
  0xeb   : > { %v1174_v56 = vrot.slane %v1083_v44, 1  ;;  %v1401_v19 = vrot.slane %v1310_v62, 2  ;;  %v1628_v44 = vrot.slane %v1537_v20, 3 }
  0xed   : > { %893 = vperm.xlu1 %9150, %v755_v27  }
  0xee   : > { %888 = vperm.xlu0 %9149, %v754_v29  }
  0xef   : > { %1069 = vperm.xlu2 %9151, %v774_v30  }
  0xf0   : > { %v9551_v34 = vpop.permute.xlu0 %803 }
  0xf1   : > { %v1084_v40 = vmul.f32 %v9556_v37, %v9551_v34  ;;  %v1311_v57 = vmul.f32 %v9574_v47, %v9551_v34  ;;  %v948_v5 = vmul.f32 %v9583_v53, %v9551_v34  ;;  %v1538_v9 = vmul.f32 %v9593_v59, %v9551_v34 }
  0xf2   : > { %v1765_v31 = vmul.f32 %v9618_v11, %v9551_v34  ;;  %v2370_v34 = vrot.slane %v2279_v23, 1 }
  0xf3   : > { %v1175_v48 = vrot.slane %v1084_v40, 1  ;;  %v1402_v8 = vrot.slane %v1311_v57, 2  ;;  %v1629_v30 = vrot.slane %v1538_v9, 3  ;;  %v1631_v40 = vrot.slane %v1539_v18, 3 }
  0xf4   : > { %v1856_v61 = vrot.slane %v1765_v31, 4  ;;  %v9667_v9 = vperm.slane %v9636_v25, 3  ;;  %v9678_v18 = vmul.f32 %v9574_v47, %v9558_v38 }
  0xf5   : > { %2097 = vperm.xlu1 %9150, %v764_v32   ;;  %v1176_v63 = vsel %vm1173_vm2, %v1174_v56, %v1175_v48  ;;  %v1178_v0 = vsel %vm1173_vm2, %v1175_v48, %v1177_v55  ;;  %v1403_v27 = vsel %vm1400_vm3, %v1401_v19, %v1402_v8  ;;  %v1405_v29 = vsel %vm1400_vm3, %v1402_v8, %v1404_v17  ;;  %v628_v55 = vld [vmem:[%s9290_s23 + $0x1a0] sm:$0xff]  ;;  %v9658_v56 = vpop.permute.xlu2 %2213 }
  0xf6   : > { %2092 = vperm.xlu0 %9149, %v763_v33   ;;  %v1279_v12 = vadd.f32 %v1176_v63, %v947_v4  ;;  %v1280_v13 = vadd.f32 %v1178_v0, %v948_v5  ;;  %v2731_v32 = vmul.f32 %v9572_v45, %v9546_v28  ;;  %v2957_v33 = vmul.f32 %v9578_v51, %v9546_v28  ;;  %v9663_v63 = vpop.permute.xlu1 %1992  ;;  %v777_v5 = vld [vmem:[#allocation2 + $0x268] sm:$0xf] }
  0xf7   : > { %1064 = vperm.xlu2 %9151, %v768_v35   ;;  %v9651_v48 = vperm.slane %v9636_v25, 1  ;;  %v9656_v28 = vperm.slane %v9636_v25, 2  ;;  %v1630_v57 = vsel %vm1627_vm4, %v1628_v44, %v1629_v30  ;;  %v1632_v39 = vsel %vm1627_vm4, %v1629_v30, %v1631_v40  ;;  %690 = vst.msk [vmem:[#allocation2 + $0x272] sm:$0xff] %vm390_vm0, %v628_v55 }
  0xf8   : > { %v1506_v35 = vadd.f32 %v1403_v27, %v1279_v12  ;;  %v1507_v36 = vadd.f32 %v1405_v29, %v1280_v13  ;;  %v2822_v62 = vrot.slane %v2731_v32, 3  ;;  %v3048_v8 = vrot.slane %v2957_v33, 4 }
  0xf9   : > { %v1858_v12 = vrot.slane %v1766_v43, 4  ;;  %v9674_v17 = vmul.f32 %v9556_v37, %v9558_v38  ;;  %v9682_v19 = vmul.f32 %v9651_v48, %v9558_v38  ;;  %v9686_v20 = vmul.f32 %v9656_v28, %v9558_v38  ;;  %v9018_v43 = vld [vmem:[%s14858_s3] sm:$0xff] }
  0xfa   : > { %v1733_v0 = vadd.f32 %v1630_v57, %v1506_v35  ;;  %v1734_v4 = vadd.f32 %v1632_v39, %v1507_v36  ;;  %v2371_v27 = vsel %vm1173_vm2, %v2368_v6, %v2370_v34  ;;  %v9703_v32 = vsel %vm1627_vm4, %v2820_v10, %v2822_v62 }
  0xfb   : > { %15069 = vst [vmem:[#allocation10_spill] sm:$0xff] %v9682_v19  ;;  %v9708_v33 = vsel %vm1854_vm5, %v14869_v22, %v3048_v8  ;;  %v9712_v35 = vmul.f32 %v9593_v59, %v9558_v38  ;;  %v9716_v36 = vmul.f32 %v9667_v9, %v9558_v38  ;;  %v9722_v44 = vmul.f32 %v9670_v16, %v9558_v38 }
  0xfc   : > { %15070 = vst [vmem:[#allocation11_spill] sm:$0xff] %v9686_v20  ;;  %v2503_v39 = vmul.f32 %v9566_v42, %v9663_v63  ;;  %v2729_v8 = vmul.f32 %v9572_v45, %v9663_v63  ;;  %v9778_v55 = vperm.slane %v9636_v25, 0  ;;  %v9797_v2 = vmul.f32 %v9566_v42, %v9658_v56 }
  0xfd   : > { %923 = vperm.xlu1 %9150, %v773_v46   ;;  %v1764_v46 = vmul.f32 %v9618_v11, %v9544_v26  ;;  %v2596_v26 = vrot.slane %v2505_v24, 2  ;;  %v1859_v24 = vsel %vm1854_vm5, %v1856_v61, %v1858_v12  ;;  %15071 = vst [vmem:[#allocation12_spill] sm:$0xff] %v9716_v36  ;;  %v9743_v12 = vmul.f32 %v9651_v48, %v9595_v60 }
  0xfe   : > { %918 = vperm.xlu0 %9149, %v772_v49   ;;  %v629_v49 = vld [vmem:[%s9290_s23 + $0x1a8] sm:$0xff]  ;;  %v1961_v31 = vadd.f32 %v1859_v24, %v1734_v4  ;;  %15072 = vst [vmem:[#allocation13_spill] sm:$0xff] %v9722_v44  ;;  %v9762_v24 = vmul.f32 %v9670_v16, %v9595_v60  ;;  %v2819_v52 = vrot.slane %v2729_v8, 3 }
  0xff   : > { %691 = vst.msk [vmem:[#allocation2 + $0x27a] sm:$0xff] %vm390_vm0, %v629_v49  ;;  %v1855_v13 = vrot.slane %v1764_v46, 4  ;;  %2263 = vperm.xlu2 %9151, %v777_v5   ;;  %v9698_v29 = vsel %vm1400_vm3, %v2594_v7, %v2596_v26  ;;  %v2141_v46 = vmul.f32 %v9576_v50, %v9663_v63  ;;  %v9736_v26 = vmul.f32 %v9574_v47, %v9595_v60  ;;  %v583_v5 = vld [vmem:[%s9290_s23 + $0x38] sm:$0xff]  ;;  %v9019_v49 = vld [vmem:[%s14858_s3 + $0x8] sm:$0xff] }
 0x100   : > { %15078 = vst [vmem:[#allocation19_spill] sm:$0xff] %v9778_v55  ;;  %4619 = vmatpush.bf16.msra.mxu1 %v9019_v49  ;;  %v9023_v49 = vld [vmem:[%s14858_s3 + $0x28] sm:$0xff] }
 0x101   : > { %v1857_v23 = vsel %vm1854_vm5, %v1855_v13, %v1856_v61  ;;  %v9732_v61 = vmul.f32 %v9556_v37, %v9595_v60  ;;  %15074 = vst [vmem:[#allocation15_spill] sm:$0xff] %v9736_v26  ;;  %v9747_v13 = vmul.f32 %v9656_v28, %v9595_v60  ;;  %4752 = vmatpush.bf16.msra.mxu2 %v9023_v49 }
 0x102   : > { %v1960_v30 = vadd.f32 %v1857_v23, %v1733_v0  ;;  %v2172_v0 = vadd.f32 %v9604_v1, %v1961_v31  ;;  %v778_v1 = vld [vmem:[#allocation2 + $0x270] sm:$0xff]  ;;  %v9758_v23 = vmul.f32 %v9593_v59, %v9595_v60  ;;  %v9766_v31 = vpop.permute.xlu0 %818  ;;  %645 = vst.msk [vmem:[#allocation2 + $0x52] sm:$0xff] %vm390_vm0, %v583_v5  ;;  %v9793_v5 = vmul.f32 %v9564_v41, %v9658_v56 }
 0x103   : > { %15073 = vst [vmem:[#allocation14_spill] sm:$0xff] %v9732_v61  ;;  %v1089_v44 = vmul.f32 %v9556_v37, %v9766_v31 }
 0x104   : > { %v2171_v62 = vadd.f32 %v2141_v46, %v1960_v30  ;;  %15075 = vst [vmem:[#allocation16_spill] sm:$0xff] %v9758_v23  ;;  %v9764_v30 = vpop.permute.xlu1 %823  ;;  %v9770_v46 = vmul.f32 %v9618_v11, %v9558_v38  ;;  %v582_v38 = vld [vmem:[%s9290_s23 + $0x30] sm:$0xff]  ;;  %4620 = vmatpush.bf16.msra.mxu1 %v9018_v43  ;;  %v2821_v43 = vsel %vm1627_vm4, %v2819_v52, %v2820_v10 }
 0x105   : > { %913 = vperm.xlu1 %9150, %v767_v14   ;;  %v776_v14 = vld [vmem:[#allocation2 + $0x260] sm:$0xff]  ;;  %15076 = vst [vmem:[#allocation17_spill] sm:$0xff] %v9764_v30  ;;  %v9908_v10 = vmul.f32 %v9670_v16, %v9764_v30  ;;  %v9937_v61 = vmul.f32 %v9618_v11, %v9764_v30 }
 0x106   : > { %908 = vperm.xlu0 %9149, %v766_v21   ;;  %v2277_v21 = vmul.f32 %v9564_v41, %v9663_v63  ;;  %v780_v34 = vld [vmem:[#allocation2 + $0x280] sm:$0xf]  ;;  %v779_v4 = vld [vmem:[#allocation2 + $0x278] sm:$0xff]  ;;  %15077 = vst [vmem:[#allocation18_spill] sm:$0xff] %v9766_v31 }
 0x107   : > { %1074 = vperm.xlu2 %9151, %v780_v34   ;;  %644 = vst.msk [vmem:[#allocation2 + $0x4a] sm:$0xff] %vm390_vm0, %v582_v38 }
 0x108   : > { %v2367_v57 = vrot.slane %v2277_v21, 1  ;;  %v2593_v21 = vrot.slane %v2503_v39, 2  ;;  %15090 = vst [vmem:[#allocation29_spill] sm:$0xff] %v9908_v10  ;;  %v1184_v10 = vrot.slane %v1089_v44, 1  ;;  %v1316_v44 = vmul.f32 %v9574_v47, %v9766_v31 }
 0x109   : > { %v711_v49 = vld [vmem:[#allocation2 + $0x58] sm:$0xf] }
 0x10a   : > { %v2369_v34 = vsel %vm1173_vm2, %v2367_v57, %v2368_v6  ;;  %v2473_v57 = vadd.f32 %v2371_v27, %v2172_v0  ;;  %v9801_v27 = vmul.f32 %v9572_v45, %v9658_v56  ;;  %v9021_v0 = vld [vmem:[%s14858_s3 + $0x18] sm:$0xff] }
 0x10b   : > { %v2472_v6 = vadd.f32 %v2369_v34, %v2171_v62  ;;  %v2955_v62 = vmul.f32 %v9578_v51, %v9663_v63  ;;  %v9817_v34 = vmul.f32 %v9578_v51, %v9658_v56  ;;  %v2595_v63 = vsel %vm1400_vm3, %v2593_v21, %v2594_v7  ;;  %4542 = vmatpush.bf16.msra.mxu0 %v9021_v0 }
 0x10c   : > { %v2699_v39 = vadd.f32 %v9698_v29, %v2473_v57  ;;  %v9833_v56 = vmul.f32 %v9556_v37, %v9764_v30  ;;  %v9870_v22 = vpop.permute.xlu1 %813 }
 0x10d   : > { %2117 = vperm.xlu1 %9150, %v776_v14   ;;  %v9751_v14 = vmul.f32 %v9667_v9, %v9595_v60  ;;  %v2698_v38 = vadd.f32 %v2595_v63, %v2472_v6  ;;  %v3045_v6 = vrot.slane %v2955_v62, 4  ;;  %15084 = vst [vmem:[#allocation25_spill] sm:$0xff] %v9870_v22  ;;  %v9872_v63 = vpop.permute.xlu0 %808  ;;  %v3484_v58 = vmul.f32 %v9656_v28, %v9870_v22 }
 0x10e   : > { %2112 = vperm.xlu0 %9149, %v775_v15   ;;  %v9753_v15 = vpop.permute.xlu2 %1029  ;;  %v2925_v21 = vadd.f32 %v9703_v32, %v2699_v39  ;;  %15085 = vst [vmem:[#allocation26_spill] sm:$0xff] %v9872_v63  ;;  %v1185_v29 = vrot.slane %v9833_v56, 1  ;;  %v709_v32 = vld [vmem:[#allocation2 + $0x48] sm:$0xff]  ;;  %v15086_v39 = vrot.slane %v9607_v3, 4  ;;  %v9886_v56 = vmul.f32 %v9574_v47, %v9764_v30 }
 0x10f   : > { %v9837_v54 = vmul.f32 %v9574_v47, %v9753_v15  ;;  %v9841_v7 = vmul.f32 %v9651_v48, %v9753_v15  ;;  %v9845_v8 = vmul.f32 %v9656_v28, %v9753_v15  ;;  %v9851_v57 = vmul.f32 %v9667_v9, %v9753_v15  ;;  %2208 = vperm.xlu2 %9151, %v711_v49   ;;  %v710_v49 = vld [vmem:[#allocation2 + $0x50] sm:$0xff] }
 0x110   : > { %v9855_v0 = vmul.f32 %v9670_v16, %v9753_v15  ;;  %v9868_v40 = vmul.f32 %v9593_v59, %v9753_v15  ;;  %v3258_v3 = vmul.f32 %v9651_v48, %v9870_v22  ;;  %v3151_v25 = vadd.f32 %v9708_v33, %v2925_v21 }
 0x111   : > { %15079 = vst [vmem:[#allocation20_spill] sm:$0xff] %v9841_v7  ;;  %v952_v33 = vmul.f32 %v9583_v53, %v9764_v30  ;;  %v3191_v21 = vmul.f32 %v9778_v55, %v9872_v63  ;;  %v3710_v20 = vmul.f32 %v9667_v9, %v9870_v22  ;;  %v3574_v26 = vrot.slane %v3484_v58, 2 }
 0x112   : > { %15080 = vst [vmem:[#allocation21_spill] sm:$0xff] %v9845_v8 }
 0x113   : > { %15081 = vst [vmem:[#allocation22_spill] sm:$0xff] %v9851_v57  ;;  %v3483_v57 = vmul.f32 %v9656_v28, %v9872_v63 }
 0x114   : > { %15082 = vst [vmem:[#allocation23_spill] sm:$0xff] %v9855_v0  ;;  %v3348_v0 = vrot.slane %v3258_v3, 1  ;;  %v3936_v3 = vmul.f32 %v9670_v16, %v9870_v22 }
 0x115   : > { %933 = vperm.xlu1 %9150, %v779_v4   ;;  %v9824_v4 = vmul.f32 %v9556_v37, %v9753_v15  ;;  %v3573_v23 = vrot.slane %v3483_v57, 2 }
 0x116   : > { %928 = vperm.xlu0 %9149, %v778_v1   ;;  %v9025_v1 = vld [vmem:[%s14858_s3 + $0x38] sm:$0xff]  ;;  %v9863_v62 = vpop.permute.xlu2 %1024 }
 0x117   : > { %4899 = vmatpush.bf16.msra.mxu3 %v9025_v1  ;;  %15083 = vst [vmem:[#allocation24_spill] sm:$0xff] %v9863_v62  ;;  %v2924_v1 = vadd.f32 %v2821_v43, %v2698_v38  ;;  %v3047_v43 = vsel %vm1854_vm5, %v3045_v6, %v15086_v39  ;;  %v9890_v52 = vmul.f32 %v9556_v37, %v9863_v62 }
 0x118   : > { %v9894_v38 = vmul.f32 %v9574_v47, %v9863_v62  ;;  %v3257_v6 = vmul.f32 %v9651_v48, %v9872_v63 }
 0x119   : > { %15087 = vst [vmem:[#allocation27_spill] sm:$0xff] %v9890_v52  ;;  %v3150_v39 = vadd.f32 %v3047_v43, %v2924_v1  ;;  %v1412_v1 = vrot.slane %v9886_v56, 2  ;;  %v9923_v43 = vmul.f32 %v9593_v59, %v9764_v30  ;;  %v9933_v56 = vmul.f32 %v9670_v16, %v9766_v31 }
 0x11a   : > { %15088 = vst [vmem:[#allocation28_spill] sm:$0xff] %v9894_v38  ;;  %v3347_v8 = vrot.slane %v3257_v6, 1 }
 0x11b   : > { %v3221_v19 = vadd.f32 %v3191_v21, %v3150_v39  ;;  %15092 = vst [vmem:[#allocation31_spill] sm:$0xff] %v9933_v56  ;;  %v1639_v39 = vrot.slane %v9923_v43, 3  ;;  %v9953_v21 = vpop.permute.xlu1 %2017  ;;  %v1186_v43 = vsel %vm1173_vm2, %v1184_v10, %v1185_v29  ;;  %v15095_v56 = vrot.slane %v9747_v13, 2 }
 0x11c   : > { %v3349_v58 = vsel %vm1173_vm2, %v3347_v8, %v3348_v0  ;;  %v951_v8 = vmul.f32 %v9583_v53, %v9766_v31 }
 0x11d   : > { %2007 = vperm.xlu1 %9150, %v710_v49   ;;  %v15089_v49 = vrot.slane %v9674_v17, 1  ;;  %v3192_v17 = vmul.f32 %v9778_v55, %v9870_v22  ;;  %v3577_v30 = vsel %vm1400_vm3, %v3574_v26, %v15095_v56 }
 0x11e   : > { %2002 = vperm.xlu0 %9149, %v709_v32  }
 0x11f   : > { %v1188_v32 = vsel %vm1173_vm2, %v1185_v29, %v15089_v49  ;;  %v9927_v49 = vmul.f32 %v9593_v59, %v9863_v62  ;;  %v3222_v36 = vadd.f32 %v3192_v17, %v3151_v25  ;;  %v15093_v25 = vrot.slane %v9678_v18, 2 }
 0x120   : > { %v1284_v7 = vadd.f32 %v1188_v32, %v952_v33  ;;  %v15094_v32 = vrot.slane %v9743_v12, 1  ;;  %v3709_v33 = vmul.f32 %v9667_v9, %v9872_v63  ;;  %v3575_v12 = vsel %vm1400_vm3, %v3573_v23, %v3574_v26 }
 0x121   : > { %15091 = vst [vmem:[#allocation30_spill] sm:$0xff] %v9927_v49  ;;  %v1415_v6 = vsel %vm1400_vm3, %v1412_v1, %v15093_v25  ;;  %v3800_v49 = vrot.slane %v3710_v20, 3  ;;  %v3452_v25 = vadd.f32 %v3349_v58, %v3221_v19  ;;  %v9968_v19 = vmul.f32 %v9564_v41, %v9953_v21 }
 0x122   : > { %v3351_v57 = vsel %vm1173_vm2, %v3348_v0, %v15094_v32  ;;  %v1511_v17 = vadd.f32 %v1415_v6, %v1284_v7  ;;  %v1866_v32 = vrot.slane %v9937_v61, 4  ;;  %v15096_v7 = vrot.slane %v9712_v35, 3  ;;  %v9020_v6 = vld [vmem:[%s14858_s3 + $0x10] sm:$0xff]  ;;  %v2224_v35 = vpop.permute.xlu2 %2223 }
 0x123   : > { %v3453_v18 = vadd.f32 %v3351_v57, %v3222_v36  ;;  %v1411_v20 = vrot.slane %v1316_v44, 2  ;;  %v1543_v36 = vmul.f32 %v9593_v59, %v9766_v31  ;;  %v3799_v13 = vrot.slane %v3709_v33, 3  ;;  %4543 = vmatpush.bf16.msra.mxu0 %v9020_v6 }
 0x124   : > { %v1642_v0 = vsel %vm1627_vm4, %v1639_v39, %v15096_v7  ;;  %v3935_v26 = vmul.f32 %v9670_v16, %v9872_v63  ;;  %v1283_v23 = vadd.f32 %v1186_v43, %v951_v8  ;;  %v3678_v56 = vadd.f32 %v3575_v12, %v3452_v25  ;;  %v2013_v8 = vpop.permute.xlu0 %2012 }
 0x125   : > { %v1738_v61 = vadd.f32 %v1642_v0, %v1511_v17  ;;  %v3679_v10 = vadd.f32 %v3577_v30, %v3453_v18  ;;  %v15097_v44 = vrot.slane %v9751_v14, 3  ;;  %v4026_v58 = vrot.slane %v3936_v3, 4 }
 0x126   : > { %v15098_v33 = vrot.slane %v9770_v46, 4  ;;  %v2146_v43 = vmul.f32 %v9576_v50, %v9953_v21  ;;  %v2378_v30 = vrot.slane %v9968_v19, 1  ;;  %v1413_v18 = vsel %vm1400_vm3, %v1411_v20, %v1412_v1 }
 0x127   : > { %v3803_v57 = vsel %vm1627_vm4, %v3800_v49, %v15097_v44  ;;  %v1638_v25 = vrot.slane %v1543_v36, 3  ;;  %v1770_v12 = vmul.f32 %v9618_v11, %v9766_v31  ;;  %v3801_v14 = vsel %vm1627_vm4, %v3799_v13, %v3800_v49 }
 0x128   : > { %v1869_v17 = vsel %vm1854_vm5, %v1866_v32, %v15098_v33  ;;  %v4025_v3 = vrot.slane %v3935_v26, 4  ;;  %v1510_v46 = vadd.f32 %v1413_v18, %v1283_v23  ;;  %v9994_v0 = vmul.f32 %v9651_v48, %v9863_v62 }
 0x129   : > { %v1965_v7 = vadd.f32 %v1869_v17, %v1738_v61  ;;  %v3905_v44 = vadd.f32 %v3803_v57, %v3679_v10  ;;  %v3904_v33 = vadd.f32 %v3801_v14, %v3678_v56  ;;  %v9998_v1 = vmul.f32 %v9566_v42, %v9953_v21  ;;  %v10017_v56 = vpop.permute.xlu1 %843 }
 0x12a   : > { %v10002_v19 = vmul.f32 %v9656_v28, %v9863_v62  ;;  %v10006_v49 = vmul.f32 %v9667_v9, %v9863_v62  ;;  %v10010_v20 = vmul.f32 %v9670_v16, %v9863_v62  ;;  %v15099_v13 = vrot.slane %v9793_v5, 1  ;;  %15100 = vst [vmem:[#allocation32_spill] sm:$0xff] %v10017_v56 }
 0x12b   : > { %v2176_v36 = vadd.f32 %v2146_v43, %v1965_v7  ;;  %v1640_v61 = vsel %vm1627_vm4, %v1638_v25, %v1639_v39  ;;  %v1865_v23 = vrot.slane %v1770_v12, 4  ;;  %v2283_v10 = vmul.f32 %v9564_v41, %v2013_v8  ;;  %v10030_v39 = vld [vmem:[%s14857_s2] ss:$0 sm:$0xff] }
 0x12c   : > { %v2381_v26 = vsel %vm1173_vm2, %v2378_v30, %v15099_v13  ;;  %v15101_v6 = vrot.slane %v9762_v24, 4  ;;  %v4027_v17 = vsel %vm1854_vm5, %v4025_v3, %v4026_v58  ;;  %v10025_v43 = vmul.f32 %v9572_v45, %v9953_v21 }
 0x12d   : > { %v1737_v5 = vadd.f32 %v1640_v61, %v1510_v46  ;;  %v4130_v25 = vadd.f32 %v4027_v17, %v3904_v33  ;;  %v10033_v12 = vmul.f32 %v9564_v41, %v2224_v35  ;;  %v2604_v24 = vrot.slane %v9998_v1, 2  ;;  %v10050_v17 = vpop.permute.xlu0 %838  ;;  %v10069_v46 = vpop.permute.xlu2 %1039 }
 0x12e   : > { %v4029_v57 = vsel %vm1854_vm5, %v4026_v58, %v15101_v6  ;;  %v10038_v58 = vmul.f32 %v9566_v42, %v2224_v35  ;;  %v2477_v3 = vadd.f32 %v2381_v26, %v2176_v36  ;;  %v2145_v7 = vmul.f32 %v9576_v50, %v2013_v8  ;;  %15102 = vst [vmem:[#allocation33_spill] sm:$0xff] %v10050_v17  ;;  %v9022_v36 = vld [vmem:[%s14858_s3 + $0x20] sm:$0xff] }
 0x12f   : > { %v4131_v18 = vadd.f32 %v4029_v57, %v3905_v44  ;;  %v1867_v44 = vsel %vm1854_vm5, %v1865_v23, %v1866_v32  ;;  %v2377_v33 = vrot.slane %v2283_v10, 1  ;;  %v10045_v61 = vmul.f32 %v9572_v45, %v2224_v35  ;;  %4753 = vmatpush.bf16.msra.mxu2 %v9022_v36 }
 0x130   : > { %v2830_v1 = vrot.slane %v10025_v43, 3  ;;  %v2962_v6 = vmul.f32 %v9578_v51, %v9953_v21  ;;  %v1964_v57 = vadd.f32 %v1867_v44, %v1737_v5  ;;  %v4164_v32 = vadd.f32 %v10030_v39, %v4130_v25 }
 0x131   : > { %v4165_v26 = vadd.f32 %v10030_v39, %v4131_v18  ;;  %v15103_v23 = vrot.slane %v9797_v2, 2  ;;  %v2509_v43 = vmul.f32 %v9566_v42, %v2013_v8  ;;  %v10064_v13 = vmul.f32 %v9578_v51, %v2224_v35 }
 0x132   : > { %v2175_v44 = vadd.f32 %v2145_v7, %v1964_v57  ;;  %v2379_v18 = vsel %vm1173_vm2, %v2377_v33, %v2378_v30  ;;  %v2735_v25 = vmul.f32 %v9572_v45, %v2013_v8  ;;  %v2961_v2 = vmul.f32 %v9578_v51, %v2013_v8  ;;  %v10076_v30 = vpop.permute.xlu1 %833 }
 0x133   : > { %v2607_v10 = vsel %vm1400_vm3, %v2604_v24, %v15103_v23  ;;  %v15104_v21 = vrot.slane %v9801_v27, 3  ;;  %v3056_v7 = vrot.slane %v2962_v6, 4  ;;  %vm4195_vm6 = vcmp.gt.f32.partialorder %v4165_v26, 0.0  ;;  %15105 = vst [vmem:[#allocation34_spill] sm:$0xff] %v10076_v30 }
 0x134   : > { %v2703_v5 = vadd.f32 %v2607_v10, %v2477_v3  ;;  %v4225_v35 = vmul.f32 0.1, %v4165_v26  ;;  %v4224_v57 = vmul.f32 0.1, %v4164_v32  ;;  %v2603_v36 = vrot.slane %v2509_v43, 2 }
 0x135   : > { %v2833_v3 = vsel %vm1627_vm4, %v2830_v1, %v15104_v21  ;;  %vm4194_vm7 = vcmp.gt.f32.partialorder %v4164_v32, 0.0  ;;  %v2476_v8 = vadd.f32 %v2379_v18, %v2175_v44  ;;  %v10080_v10 = vmul.f32 %v9556_v37, %v10069_v46  ;;  %v10105_v14 = vpop.permute.xlu0 %828 }
 0x136   : > { %v2929_v33 = vadd.f32 %v2833_v3, %v2703_v5  ;;  %v2829_v23 = vrot.slane %v2735_v25, 3  ;;  %v3055_v27 = vrot.slane %v2961_v2, 4  ;;  %v15107_v6 = vrot.slane %v9817_v34, 4  ;;  %15111 = vst [vmem:[#allocation38_spill] sm:$0xff] %v10105_v14 }
 0x137   : > { %15106 = vst [vmem:[#allocation35_spill] sm:$0xff] %v10080_v10  ;;  %v10088_v43 = vmul.f32 %v9574_v47, %v10069_v46  ;;  %v10092_v5 = vmul.f32 %v9651_v48, %v10076_v30  ;;  %v15109_v44 = vmov 0.0   ;;  %v4255_v18 = vsel %vm4195_vm6, %v4165_v26, %v4225_v35 }
 0x138   : > { %v3059_v21 = vsel %vm1854_vm5, %v3056_v7, %v15107_v6  ;;  %489 = vst.msk [vmem:[#allocation3] sm:$0xff] %vm488_vm8, %v15109_v44  ;;  %v4254_v25 = vsel %vm4194_vm7, %v4164_v32, %v4224_v57  ;;  %v2605_v2 = vsel %vm1400_vm3, %v2603_v36, %v2604_v24  ;;  %v10100_v34 = vmul.f32 %v9651_v48, %v10069_v46 }
 0x139   : > { %15108 = vst [vmem:[#allocation36_spill] sm:$0xff] %v10088_v43  ;;  %v3155_v3 = vadd.f32 %v3059_v21, %v2929_v33  ;;  %v2702_v6 = vadd.f32 %v2605_v2, %v2476_v8  ;;  %v1096_v38 = vmul.f32 %v9556_v37, %v10017_v56  ;;  %v2831_v24 = vsel %vm1627_vm4, %v2829_v23, %v2830_v1 }
 0x13a   : > { %15110 = vst [vmem:[#allocation37_spill] sm:$0xff] %v10100_v34  ;;  %v3057_v26 = vsel %vm1854_vm5, %v3055_v27, %v3056_v7  ;;  %v3196_v32 = vmul.f32 %v9778_v55, %v10076_v30  ;;  %v10117_v35 = vmul.f32 %v9656_v28, %v10076_v30  ;;  %v10122_v36 = vmul.f32 %v9593_v59, %v10069_v46 }
 0x13b   : > { %490 = vst.msk [vmem:[#allocation3 + $0x8] sm:$0xff] %vm488_vm8, %v15109_v44  ;;  %v10126_v33 = vmul.f32 %v9656_v28, %v10069_v46  ;;  %v3358_v1 = vrot.slane %v10092_v5, 1  ;;  %v10132_v7 = vmul.f32 %v9667_v9, %v10069_v46  ;;  %v10136_v8 = vmul.f32 %v9670_v16, %v10069_v46 }
 0x13c   : > { %492 = vst.msk [vmem:[#allocation3 + $0x10] sm:$0xf] %vm491_vm9, %v15109_v44  ;;  %v3263_v27 = vmul.f32 %v9651_v48, %v10105_v14  ;;  %v2928_v21 = vadd.f32 %v2831_v24, %v2702_v6  ;;  %v10143_v2 = vmul.f32 %v9670_v16, %v10017_v56  ;;  %v1195_v5 = vrot.slane %v1096_v38, 1 }
 0x13d   : > { %15112 = vst [vmem:[#allocation39_spill] sm:$0xff] %v10126_v33  ;;  %v1095_v23 = vmul.f32 %v9556_v37, %v10050_v17  ;;  %v10150_v57 = vmul.f32 %v9670_v16, %v10050_v17  ;;  %v3226_v29 = vadd.f32 %v3196_v32, %v3155_v3  ;;  %v3584_v34 = vrot.slane %v10117_v35, 2 }
 0x13e   : > { %15113 = vst [vmem:[#allocation40_spill] sm:$0xff] %v10132_v7  ;;  %v15117_v38 = vrot.slane %v9994_v0, 1  ;;  %v3489_v24 = vmul.f32 %v9656_v28, %v10105_v14  ;;  %v10168_v3 = vmul.f32 %v9667_v9, %v10105_v14  ;;  %v10174_v32 = vmul.f32 %v9670_v16, %v10076_v30 }
 0x13f   : > { %15114 = vst [vmem:[#allocation41_spill] sm:$0xff] %v10136_v8  ;;  %v3357_v0 = vrot.slane %v3263_v27, 1  ;;  %v1323_v35 = vmul.f32 %v9574_v47, %v10017_v56  ;;  %v1194_v62 = vrot.slane %v1095_v23, 1  ;;  %v15119_v31 = vrot.slane %v10002_v19, 2 }
 0x140   : > { %4284 = vst.msk [vmem:[#allocation3 + $0x2] sm:$0xff] %vm488_vm8, %v4254_v25  ;;  %v10155_v25 = vmul.f32 %v9667_v9, %v10076_v30  ;;  %v3361_v6 = vsel %vm1173_vm2, %v3358_v1, %v15117_v38  ;;  %v10180_v38 = vmul.f32 %v9593_v59, %v10017_v56  ;;  %v1322_v30 = vmul.f32 %v9574_v47, %v10050_v17 }
 0x141   : > { %15115 = vst [vmem:[#allocation42_spill] sm:$0xff] %v10143_v2  ;;  %v15118_v2 = vrot.slane %v9824_v4, 1  ;;  %v3457_v27 = vadd.f32 %v3361_v6, %v3226_v29  ;;  %v3587_v63 = vsel %vm1400_vm3, %v3584_v34, %v15119_v31  ;;  %v3583_v23 = vrot.slane %v3489_v24, 2 }
 0x142   : > { %4285 = vst.msk [vmem:[#allocation3 + $0xa] sm:$0xff] %vm488_vm8, %v4255_v18  ;;  %v3195_v18 = vmul.f32 %v9778_v55, %v10105_v14  ;;  %v3359_v31 = vsel %vm1173_vm2, %v3357_v0, %v3358_v1  ;;  %v1422_v6 = vrot.slane %v1323_v35, 2  ;;  %v1649_v60 = vrot.slane %v10180_v38, 3 }
 0x143   : > { %15116 = vst [vmem:[#allocation43_spill] sm:$0xff] %v10150_v57  ;;  %v3154_v57 = vadd.f32 %v3057_v26, %v2928_v21  ;;  %v1198_v52 = vsel %vm1173_vm2, %v1195_v5, %v15118_v2  ;;  %v956_v26 = vmul.f32 %v9583_v53, %v10017_v56  ;;  %v10202_v2 = vmul.f32 %v9618_v11, %v10017_v56 }
 0x144   : > { %493 = vst.msk [vmem:[#allocation3 + $0x18] sm:$0xff] %vm488_vm8, %v15109_v44  ;;  %v1421_v24 = vrot.slane %v1322_v30, 2  ;;  %v1549_v21 = vmul.f32 %v9593_v59, %v10050_v17  ;;  %v10221_v1 = vmul.f32 %v9670_v16, %v10105_v14  ;;  %v1651_v0 = vrot.slane %v9868_v40, 3 }
 0x145   : > { %494 = vst.msk [vmem:[#allocation3 + $0x20] sm:$0xff] %vm488_vm8, %v15109_v44  ;;  %v3225_v4 = vadd.f32 %v3195_v18, %v3154_v57  ;;  %v1288_v19 = vadd.f32 %v1198_v52, %v956_v26  ;;  %v10210_v57 = vpop.permute.xlu1 %2037  ;;  %v1196_v18 = vsel %vm1173_vm2, %v1194_v62, %v1195_v5  ;;  %v10217_v52 = vadd.f32 %v3587_v63, %v3457_v27 }
 0x146   : > { %495 = vst.msk [vmem:[#allocation3 + $0x28] sm:$0xf] %vm491_vm9, %v15109_v44  ;;  %v955_v35 = vmul.f32 %v9583_v53, %v10050_v17  ;;  %v3585_v30 = vsel %vm1400_vm3, %v3583_v23, %v3584_v34  ;;  %v1778_v5 = vmul.f32 %v9618_v11, %v9753_v15  ;;  %v15120_v40 = vrot.slane %v9837_v54, 2 }
 0x147   : > { %496 = vst.msk [vmem:[#allocation3 + $0x30] sm:$0xff] %vm488_vm8, %v15109_v44  ;;  %v4314_v29 = vld [vmem:[#allocation3] sm:$0xff]  ;;  %v3456_v62 = vadd.f32 %v3359_v31, %v3225_v4  ;;  %v1652_v27 = vsel %vm1627_vm4, %v1649_v60, %v1651_v0  ;;  %v10241_v26 = vmul.f32 %v9564_v41, %v10210_v57  ;;  %v1648_v4 = vrot.slane %v1549_v21, 3  ;;  %v9024_v31 = vld [vmem:[%s14858_s3 + $0x30] sm:$0xff] }
 0x148   : > { %497 = vst.msk [vmem:[#allocation3 + $0x38] sm:$0xff] %vm488_vm8, %v15109_v44  ;;  %v1425_v38 = vsel %vm1400_vm3, %v1422_v6, %v15120_v40  ;;  %v1287_v34 = vadd.f32 %v1196_v18, %v955_v35  ;;  %v1776_v23 = vmul.f32 %v9618_v11, %v10050_v17  ;;  %v4447_v18 = vrot.slane %v4314_v29, 1  ;;  %v10259_v17 = vpop.permute.xlu0 %2032  ;;  %4900 = vmatpush.bf16.msra.mxu3 %v9024_v31 }
 0x149   : > { %498 = vst.msk [vmem:[#allocation3 + $0x40] sm:$0xf] %vm491_vm9, %v15109_v44  ;;  %v4315_v22 = vld [vmem:[#allocation3 + $0x8] sm:$0xff]  ;;  %v1515_v15 = vadd.f32 %v1425_v38, %v1288_v19  ;;  %v4316_v54 = vld [vmem:[#allocation3 + $0x10] sm:$0xf]  ;;  %v4657_v35 = vrot.slane %v4314_v29, 2  ;;  %v10257_v38 = vpop.permute.xlu2 %1034 }
 0x14a   : > { %499 = vst.msk [vmem:[#allocation3 + $0x48] sm:$0xff] %vm488_vm8, %v15109_v44  ;;  %v4419_v56 = vpack.c.bf16 %v4315_v22, %v4314_v29  ;;  %v4448_v0 = vrot.slane %v4315_v22, 1  ;;  %v4450_v19 = vrot.slane %v4316_v54, 1  ;;  %v4658_v21 = vrot.slane %v4315_v22, 2 }
 0x14b   : > { %500 = vst.msk [vmem:[#allocation3 + $0x50] sm:$0xff] %vm488_vm8, %v15109_v44  ;;  %v4805_v40 = vrot.slane %v4315_v22, 3  ;;  %v4807_v10 = vrot.slane %v4316_v54, 3  ;;  %v1878_v53 = vrot.slane %v1778_v5, 4 }
 0x14c   : > { %501 = vst.msk [vmem:[#allocation3 + $0x58] sm:$0xf] %vm491_vm9, %v15109_v44  ;;  %8391 = vmatmul.msk.bf16.vlgmr.msra.gmra.mxu1 %vm488_vm8, %v4419_v56  ;;  %v1423_v56 = vsel %vm1400_vm3, %v1421_v24, %v1422_v6  ;;  %v4660_v6 = vrot.slane %v4316_v54, 2  ;;  %v4804_v24 = vrot.slane %v4314_v29, 3  ;;  %v4449_v14 = vsel %vm1173_vm2, %v4447_v18, %v4448_v0 }
 0x14d   : > { %502 = vst.msk [vmem:[#allocation3 + $0x60] sm:$0xff] %vm488_vm8, %v15109_v44  ;;  %v1514_v63 = vadd.f32 %v1423_v56, %v1287_v34  ;;  %v4451_v43 = vsel %vm1173_vm2, %v4448_v0, %v4450_v19  ;;  %v4659_v22 = vsel %vm1400_vm3, %v4657_v35, %v4658_v21  ;;  %v1742_v56 = vadd.f32 %v1652_v27, %v1515_v15 }
 0x14e   : > { %503 = vst.msk [vmem:[#allocation3 + $0x68] sm:$0xff] %vm488_vm8, %v15109_v44  ;;  %v4496_v55 = vpack.c.bf16 %v4451_v43, %v4449_v14  ;;  %v4661_v29 = vsel %vm1400_vm3, %v4658_v21, %v4660_v6  ;;  %v4806_v34 = vsel %vm1627_vm4, %v4804_v24, %v4805_v40  ;;  %v4808_v18 = vsel %vm1627_vm4, %v4805_v40, %v4807_v10 }
 0x14f   : > { %504 = vst.msk [vmem:[#allocation3 + $0x70] sm:$0xf] %vm491_vm9, %v15109_v44  ;;  %v4706_v31 = vpack.c.bf16 %v4661_v29, %v4659_v22  ;;  %v1650_v54 = vsel %vm1627_vm4, %v1648_v4, %v1649_v60  ;;  %v1875_v0 = vrot.slane %v1776_v23, 4  ;;  %v2289_v14 = vmul.f32 %v9564_v41, %v10259_v17 }
 0x150   : > { %505 = vst.msk [vmem:[#allocation3 + $0x78] sm:$0xff] %vm488_vm8, %v15109_v44  ;;  %8376 = vmatmul.msk.bf16.vlgmr.msra.gmra.mxu0 %vm488_vm8, %v4496_v55  ;;  %v4853_v43 = vpack.c.bf16 %v4808_v18, %v4806_v34  ;;  %v3682_v27 = vadd.f32 %v3585_v30, %v3456_v62  ;;  %v2150_v15 = vmul.f32 %v9576_v50, %v10210_v57  ;;  %v4036_v10 = vrot.slane %v10174_v32, 4 }
 0x151   : > { %506 = vst.msk [vmem:[#allocation3 + $0x80] sm:$0xff] %vm488_vm8, %v15109_v44  ;;  %v1741_v19 = vadd.f32 %v1650_v54, %v1514_v63  ;;  %8406 = vmatmul.msk.bf16.vlgmr.msra.gmra.mxu2 %vm488_vm8, %v4706_v31  ;;  %v15122_v4 = vrot.slane %v10202_v2, 4  ;;  %v2388_v23 = vrot.slane %v10241_v26, 1  ;;  %v15123_v62 = vrot.slane %v10006_v49, 3 }
 0x152   : > { %15121 = vst [vmem:[#allocation44_spill] sm:$0xff] %v10257_v38  ;;  %8421 = vmatmul.msk.bf16.vlgmr.msra.gmra.mxu3 %vm488_vm8, %v4853_v43  ;;  %v15124_v30 = vrot.slane %v10155_v25, 3  ;;  %v15126_v32 = vrot.slane %v10168_v3, 3  ;;  %v2149_v26 = vmul.f32 %v9576_v50, %v10259_v17  ;;  %v4035_v6 = vrot.slane %v10221_v1, 4 }
 0x153   : > { %507 = vst.msk [vmem:[#allocation3 + $0x88] sm:$0xf] %vm491_vm9, %v15109_v44  ;;  %v1879_v55 = vsel %vm1854_vm5, %v15122_v4, %v1878_v53  ;;  %v2516_v49 = vmul.f32 %v9566_v42, %v10210_v57  ;;  %v15127_v24 = vmov %v15122_v4  ;;  %v2387_v40 = vrot.slane %v2289_v14, 1  ;;  %v2234_v14 = vpop.permute.xlu2 %2233 }
 0x154   : > { %508 = vst.msk [vmem:[#allocation3 + $0x90] sm:$0xff] %vm488_vm8, %v15109_v44  ;;  %v3813_v63 = vsel %vm1627_vm4, %v15124_v30, %v15123_v62  ;;  %v15125_v35 = vmov %v15124_v30  ;;  %v1969_v53 = vadd.f32 %v1879_v55, %v1742_v56  ;;  %v1877_v25 = vsel %vm1854_vm5, %v1875_v0, %v15127_v24 }
 0x155   : > { %509 = vst.msk [vmem:[#allocation3 + $0x98] sm:$0xff] %vm488_vm8, %v15109_v44  ;;  %v3811_v21 = vsel %vm1627_vm4, %v15126_v32, %v15125_v35  ;;  %v3909_v3 = vadd.f32 %v3813_v63, %v10217_v52  ;;  %v1968_v34 = vadd.f32 %v1877_v25, %v1741_v19  ;;  %v10322_v56 = vmul.f32 %v9556_v37, %v10257_v38 }
 0x156   : > { %510 = vst.msk [vmem:[#allocation3 + $0xa0] sm:$0xf] %vm491_vm9, %v15109_v44  ;;  %v3908_v22 = vadd.f32 %v3811_v21, %v3682_v27  ;;  %v2180_v29 = vadd.f32 %v2150_v15, %v1969_v53  ;;  %v15129_v2 = vrot.slane %v10033_v12, 1  ;;  %v2515_v18 = vmul.f32 %v9566_v42, %v10259_v17 }
 0x157   : > { %511 = vst.msk [vmem:[#allocation3 + $0xa8] sm:$0xff] %vm488_vm8, %v15109_v44  ;;  %v10333_v52 = vmul.f32 %v9574_v47, %v10257_v38  ;;  %v10337_v54 = vmul.f32 %v9651_v48, %v10257_v38  ;;  %v15131_v0 = vrot.slane %v10010_v20, 4  ;;  %v2179_v43 = vadd.f32 %v2149_v26, %v1968_v34 }
 0x158   : > { %512 = vst.msk [vmem:[#allocation3 + $0xb0] sm:$0xff] %vm488_vm8, %v15109_v44  ;;  %v2391_v31 = vsel %vm1173_vm2, %v2388_v23, %v15129_v2  ;;  %v4037_v27 = vsel %vm1854_vm5, %v4035_v6, %v4036_v10  ;;  %v2614_v15 = vrot.slane %v2516_v49, 2  ;;  %v2742_v19 = vmul.f32 %v9572_v45, %v10210_v57 }
 0x159   : > { %513 = vst.msk [vmem:[#allocation3 + $0xb8] sm:$0xf] %vm491_vm9, %v15109_v44  ;;  %v4039_v12 = vsel %vm1854_vm5, %v4036_v10, %v15131_v0  ;;  %v2389_v4 = vsel %vm1173_vm2, %v2387_v40, %v2388_v23  ;;  %v10352_v20 = vmul.f32 %v9593_v59, %v10257_v38  ;;  %v4134_v62 = vadd.f32 %v4037_v27, %v3908_v22 }
 0x15a   : > { %514 = vst.msk [vmem:[#allocation3 + $0xc0] sm:$0xff] %vm488_vm8, %v15109_v44  ;;  %v4135_v55 = vadd.f32 %v4039_v12, %v3909_v3  ;;  %v2481_v30 = vadd.f32 %v2391_v31, %v2180_v29  ;;  %v10359_v63 = vmul.f32 %v9656_v28, %v10257_v38  ;;  %v2613_v23 = vrot.slane %v2515_v18, 2 }
 0x15b   : > { %515 = vst.msk [vmem:[#allocation3 + $0xc8] sm:$0xff] %vm488_vm8, %v15109_v44  ;;  %v2741_v35 = vmul.f32 %v9572_v45, %v10259_v17  ;;  %v10369_v53 = vmul.f32 %v9667_v9, %v10257_v38  ;;  %v2480_v26 = vadd.f32 %v2389_v4, %v2179_v43  ;;  %v10375_v6 = vmul.f32 %v9670_v16, %v10257_v38 }
 0x15c   : > { %15128 = vst [vmem:[#allocation45_spill] sm:$0xff] %v10322_v56  ;;  %v15133_v49 = vrot.slane %v10038_v58, 2  ;;  %v2840_v25 = vrot.slane %v2742_v19, 3  ;;  %v2968_v40 = vmul.f32 %v9578_v51, %v10210_v57  ;;  %v4169_v3 = vadd.f32 %v10030_v39, %v4135_v55 }
 0x15d   : > { %516 = vst.msk [vmem:[#allocation3 + $0xd0] sm:$0xf] %vm491_vm9, %v15109_v44  ;;  %v4168_v22 = vadd.f32 %v10030_v39, %v4134_v62  ;;  %v10387_v29 = vmul.f32 %v9564_v41, %v2234_v14  ;;  %v2615_v2 = vsel %vm1400_vm3, %v2613_v23, %v2614_v15  ;;  %v2839_v31 = vrot.slane %v2741_v35, 3  ;;  %v10418_v35 = vpop.permute.xlu2 %1049 }
 0x15e   : > { %15130 = vst [vmem:[#allocation46_spill] sm:$0xff] %v10333_v52  ;;  %v2617_v24 = vsel %vm1400_vm3, %v2614_v15, %v15133_v49  ;;  %v2967_v57 = vmul.f32 %v9578_v51, %v10259_v17  ;;  %v10399_v0 = vmul.f32 %v9566_v42, %v2234_v14  ;;  %v10402_v12 = vmul.f32 %v9572_v45, %v2234_v14  ;;  %v10425_v49 = vpop.permute.xlu0 %858 }
 0x15f   : > { %517 = vst.msk [vmem:[#allocation3 + $0xd8] sm:$0xff] %vm488_vm8, %v15109_v44  ;;  %v2707_v34 = vadd.f32 %v2617_v24, %v2481_v30  ;;  %v2706_v43 = vadd.f32 %v2615_v2, %v2480_v26  ;;  %v10408_v15 = vmul.f32 %v9578_v51, %v2234_v14  ;;  %v15134_v17 = vrot.slane %v10045_v61, 3  ;;  %v10420_v14 = vpop.permute.xlu1 %863  ;;  %v15148_v30 = vld [vmem:[#allocation19_spill] sm:$0xff] }
 0x160   : > { %518 = vst.msk [vmem:[#allocation3 + $0xe0] sm:$0xff] %vm488_vm8, %v15109_v44  ;;  %v3066_v4 = vrot.slane %v2968_v40, 4  ;;  %v4229_v55 = vmul.f32 0.1, %v4169_v3  ;;  %v4228_v62 = vmul.f32 0.1, %v4168_v22  ;;  %v2841_v61 = vsel %vm1627_vm4, %v2839_v31, %v2840_v25 }
 0x161   : > { %15132 = vst [vmem:[#allocation47_spill] sm:$0xff] %v10352_v20  ;;  %v2843_v19 = vsel %vm1627_vm4, %v2840_v25, %v15134_v17  ;;  %vm4199_vm10 = vcmp.gt.f32.partialorder %v4169_v3, 0.0  ;;  %vm4198_vm11 = vcmp.gt.f32.partialorder %v4168_v22, 0.0  ;;  %v3065_v26 = vrot.slane %v2967_v57, 4  ;;  %v15147_v40 = vld [vmem:[#allocation7_spill] sm:$0xff] }
 0x162   : > { %519 = vst.msk [vmem:[#allocation3 + $0xe8] sm:$0xf] %vm491_vm9, %v15109_v44  ;;  %v2933_v23 = vadd.f32 %v2843_v19, %v2707_v34  ;;  %v2932_v34 = vadd.f32 %v2841_v61, %v2706_v43  ;;  %v10433_v2 = vmul.f32 %v9618_v11, %v10069_v46  ;;  %v15137_v31 = vrot.slane %v10064_v13, 4 }
 0x163   : > { %520 = vst.msk [vmem:[#allocation3 + $0xf0] sm:$0xff] %vm488_vm8, %v15109_v44  ;;  %v10443_v17 = vmul.f32 %v9556_v37, %v10418_v35  ;;  %v10447_v43 = vmul.f32 %v9574_v47, %v10418_v35  ;;  %v10450_v46 = vsel %vm4199_vm10, %v4169_v3, %v4229_v55  ;;  %v10453_v19 = vsel %vm4198_vm11, %v4168_v22, %v4228_v62 }
 0x164   : > { %521 = vst.msk [vmem:[#allocation3 + $0xf8] sm:$0xff] %vm488_vm8, %v15109_v44  ;;  %v3069_v57 = vsel %vm1854_vm5, %v3066_v4, %v15137_v31  ;;  %v10459_v61 = vmul.f32 %v9651_v48, %v10418_v35  ;;  %v3067_v31 = vsel %vm1854_vm5, %v3065_v26, %v3066_v4  ;;  %v10466_v3 = vmul.f32 %v9656_v28, %v10418_v35 }
 0x165   : > { %522 = vst.msk [vmem:[#allocation3 + $0x100] sm:$0xf] %vm491_vm9, %v15109_v44  ;;  %v3159_v13 = vadd.f32 %v3069_v57, %v2933_v23  ;;  %v10470_v22 = vmul.f32 %v9667_v9, %v10418_v35  ;;  %v10474_v55 = vmul.f32 %v9670_v16, %v10418_v35  ;;  %v3158_v62 = vadd.f32 %v3067_v31, %v2932_v34 }
 0x166   : > { %523 = vst.msk [vmem:[#allocation3 + $0x108] sm:$0xff] %vm488_vm8, %v15109_v44  ;;  %v10480_v4 = vmul.f32 %v9593_v59, %v10418_v35  ;;  %v10490_v34 = vmul.f32 %v9670_v16, %v10420_v14  ;;  %v10494_v31 = vmul.f32 %v9556_v37, %v10420_v14  ;;  %v10499_v5 = vmul.f32 %v9670_v16, %v10425_v49  ;;  %v10538_v27 = vpop.permute.xlu0 %848 }
 0x167   : > { %524 = vst.msk [vmem:[#allocation3 + $0x110] sm:$0xff] %vm488_vm8, %v15109_v44  ;;  %v10501_v32 = vpop.permute.xlu1 %853  ;;  %v10505_v10 = vmul.f32 %v9574_v47, %v10420_v14  ;;  %v10509_v1 = vmul.f32 %v9593_v59, %v10420_v14  ;;  %v10516_v24 = vmul.f32 %v15147_v40, %v10420_v14  ;;  %v10524_v23 = vmul.f32 %v9618_v11, %v10420_v14 }
 0x168   : > { %525 = vst.msk [vmem:[#allocation3 + $0x118] sm:$0xf] %vm491_vm9, %v15109_v44  ;;  %v3200_v26 = vmul.f32 %v15148_v30, %v10501_v32  ;;  %v10528_v57 = vmul.f32 %v15147_v40, %v10425_v49  ;;  %v10532_v25 = vmul.f32 %v9556_v37, %v10425_v49  ;;  %v3270_v60 = vmul.f32 %v9651_v48, %v10501_v32 }
 0x169   : > { %526 = vst.msk [vmem:[#allocation3 + $0x120] sm:$0xff] %vm488_vm8, %v15109_v44  ;;  %v10543_v58 = vmul.f32 %v9574_v47, %v10425_v49  ;;  %v10547_v21 = vmul.f32 %v9593_v59, %v10425_v49  ;;  %v3722_v8 = vmul.f32 %v9667_v9, %v10501_v32  ;;  %v3721_v7 = vmul.f32 %v9667_v9, %v10538_v27 }
 0x16a   : > { %527 = vst.msk [vmem:[#allocation3 + $0x128] sm:$0xff] %vm488_vm8, %v15109_v44  ;;  %v3368_v18 = vrot.slane %v3270_v60, 1  ;;  %v3269_v60 = vmul.f32 %v9651_v48, %v10538_v27  ;;  %v15151_v33 = vrot.slane %v10337_v54, 1 }
 0x16b   : > { %15135 = vst [vmem:[#allocation48_spill] sm:$0xff] %v10420_v14  ;;  %v3820_v14 = vrot.slane %v3722_v8, 3  ;;  %v15158_v8 = vld [vmem:[#allocation35_spill] sm:$0xff] }
 0x16c   : > { %528 = vst.msk [vmem:[#allocation3 + $0x130] sm:$0xf] %vm491_vm9, %v15109_v44  ;;  %v3367_v56 = vrot.slane %v3269_v60, 1  ;;  %v591_v60 = vld [vmem:[%s9290_s23 + $0x78] sm:$0xff]  ;;  %v15159_v20 = vrot.slane %v15158_v8, 1 }
 0x16d   : > { %15136 = vst [vmem:[#allocation49_spill] sm:$0xff] %v10425_v49 }
 0x16e   : > { %529 = vst.msk [vmem:[#allocation3 + $0x138] sm:$0xff] %vm488_vm8, %v15109_v44 }
 0x16f   : > { %530 = vst.msk [vmem:[#allocation3 + $0x140] sm:$0xff] %vm488_vm8, %v15109_v44 }
 0x170   : > { %15138 = vst [vmem:[#allocation50_spill] sm:$0xff] %v10447_v43  ;;  %v631_v43 = vld [vmem:[%s9290_s23 + $0x1b8] sm:$0xff] }
 0x171   : > { %531 = vst.msk [vmem:[#allocation3 + $0x148] sm:$0xf] %vm491_vm9, %v15109_v44 }
 0x172   : > { %15139 = vst [vmem:[#allocation51_spill] sm:$0xff] %v10459_v61  ;;  %v10555_v61 = vmul.f32 %v9618_v11, %v10425_v49  ;;  %v3371_v49 = vsel %vm1173_vm2, %v3368_v18, %v15151_v33 }
 0x173   : > { %532 = vst.msk [vmem:[#allocation3 + $0x150] sm:$0xff] %vm488_vm8, %v15109_v44 }
 0x174   : > { %15140 = vst [vmem:[#allocation52_spill] sm:$0xff] %v10466_v3  ;;  %v3495_v3 = vmul.f32 %v9656_v28, %v10538_v27 }
 0x175   : > { %15141 = vst [vmem:[#allocation53_spill] sm:$0xff] %v10470_v22  ;;  %v3230_v22 = vadd.f32 %v3200_v26, %v3159_v13  ;;  %v3948_v13 = vmul.f32 %v9670_v16, %v10501_v32  ;;  %v10567_v26 = vpop.permute.xlu2 %1044 }
 0x176   : > { %15142 = vst [vmem:[#allocation54_spill] sm:$0xff] %v10474_v55  ;;  %v3199_v55 = vmul.f32 %v15148_v30, %v10538_v27 }
 0x177   : > { %533 = vst.msk [vmem:[#allocation3 + $0x158] sm:$0xff] %vm488_vm8, %v15109_v44  ;;  %v3461_v52 = vadd.f32 %v3371_v49, %v3230_v22  ;;  %v4046_v33 = vrot.slane %v3948_v13, 4  ;;  %v3369_v22 = vsel %vm1173_vm2, %v3367_v56, %v3368_v18 }
 0x178   : > { %15143 = vst [vmem:[#allocation55_spill] sm:$0xff] %v10480_v4  ;;  %v3229_v38 = vadd.f32 %v3199_v55, %v3158_v62  ;;  %v15152_v4 = vrot.slane %v10359_v63, 2  ;;  %v3947_v55 = vmul.f32 %v9670_v16, %v10538_v27  ;;  %v10599_v63 = vmul.f32 %v9556_v37, %v10567_v26 }
 0x179   : > { %534 = vst.msk [vmem:[#allocation3 + $0x160] sm:$0xf] %vm491_vm9, %v15109_v44  ;;  %v10603_v62 = vmul.f32 %v9574_v47, %v10567_v26 }
 0x17a   : > { %15144 = vst [vmem:[#allocation56_spill] sm:$0xff] %v10490_v34 }
 0x17b   : > { %15145 = vst [vmem:[#allocation57_spill] sm:$0xff] %v10499_v5  ;;  %v3496_v5 = vmul.f32 %v9656_v28, %v10501_v32 }
 0x17c   : > { %15146 = vst [vmem:[#allocation58_spill] sm:$0xff] %v10501_v32  ;;  %v3593_v32 = vrot.slane %v3495_v3, 2  ;;  %v3819_v3 = vrot.slane %v3721_v7, 3  ;;  %v10611_v7 = vmul.f32 %v9593_v59, %v10567_v26 }
 0x17d   : > { %564 = vst.msk [vmem:[#allocation5] sm:$0xff] %vm488_vm8, %v15109_v44  ;;  %v3594_v34 = vrot.slane %v3496_v5, 2  ;;  %v590_v5 = vld [vmem:[%s9290_s23 + $0x70] sm:$0xff] }
 0x17e   : > { %565 = vst.msk [vmem:[#allocation5 + $0x8] sm:$0xff] %vm488_vm8, %v15109_v44 }
 0x17f   : > { %15149 = vst [vmem:[#allocation7_spill] sm:$0xff] %v10538_v27  ;;  %v3597_v54 = vsel %vm1400_vm3, %v3594_v34, %v15152_v4  ;;  %v15155_v4 = vrot.slane %v10369_v53, 3  ;;  %v3595_v18 = vsel %vm1400_vm3, %v3593_v32, %v3594_v34  ;;  %v10619_v53 = vmul.f32 %v9651_v48, %v10567_v26  ;;  %v10629_v34 = vpop.permute.xlu1 %2057 }
 0x180   : > { %566 = vst.msk [vmem:[#allocation5 + $0x10] sm:$0xf] %vm491_vm9, %v15109_v44  ;;  %v3687_v49 = vadd.f32 %v3597_v54, %v3461_v52  ;;  %v3460_v52 = vadd.f32 %v3369_v22, %v3229_v38  ;;  %v4045_v54 = vrot.slane %v3947_v55, 4  ;;  %v15157_v38 = vrot.slane %v10375_v6, 4 }
 0x181   : > { %567 = vst.msk [vmem:[#allocation5 + $0x18] sm:$0xff] %vm488_vm8, %v15109_v44  ;;  %v3823_v13 = vsel %vm1627_vm4, %v3820_v14, %v15155_v4  ;;  %v10636_v55 = vmul.f32 %v9656_v28, %v10567_v26  ;;  %v10640_v6 = vmul.f32 %v9667_v9, %v10567_v26 }
 0x182   : > { %568 = vst.msk [vmem:[#allocation5 + $0x20] sm:$0xff] %vm488_vm8, %v15109_v44  ;;  %v3913_v56 = vadd.f32 %v3823_v13, %v3687_v49  ;;  %v4049_v22 = vsel %vm1854_vm5, %v4046_v33, %v15157_v38  ;;  %v3686_v4 = vadd.f32 %v3595_v18, %v3460_v52  ;;  %v15160_v49 = vrot.slane %v10494_v31, 1 }
 0x183   : > { %15150 = vst [vmem:[#allocation19_spill] sm:$0xff] %v10567_v26  ;;  %v3821_v13 = vsel %vm1627_vm4, %v3819_v3, %v3820_v14  ;;  %v607_v14 = vld [vmem:[%s9290_s23 + $0xf8] sm:$0xff]  ;;  %v10655_v3 = vpop.permute.xlu2 %2243  ;;  %v15163_v52 = vrot.slane %v10505_v10, 2 }
 0x184   : > { %569 = vst.msk [vmem:[#allocation5 + $0x28] sm:$0xf] %vm491_vm9, %v15109_v44  ;;  %v1208_v32 = vsel %vm1173_vm2, %v15160_v49, %v15159_v20  ;;  %v4139_v8 = vadd.f32 %v4049_v22, %v3913_v56  ;;  %v598_v20 = vld [vmem:[%s9290_s23 + $0xb0] sm:$0xff]  ;;  %v3912_v18 = vadd.f32 %v3821_v13, %v3686_v4  ;;  %v4047_v56 = vsel %vm1854_vm5, %v4045_v54, %v4046_v33  ;;  %v10707_v33 = vpop.permute.xlu0 %2052 }
 0x185   : > { %570 = vst.msk [vmem:[#allocation5 + $0x30] sm:$0xff] %vm488_vm8, %v15109_v44  ;;  %v1292_v38 = vadd.f32 %v1208_v32, %v10516_v24  ;;  %v10664_v4 = vmul.f32 %v9564_v41, %v10629_v34  ;;  %v606_v54 = vld [vmem:[%s9290_s23 + $0xf0] sm:$0xff]  ;;  %v15164_v13 = vrot.slane %v10122_v36, 3  ;;  %v615_v36 = vld [vmem:[%s9290_s23 + $0x138] sm:$0xff]  ;;  %v15169_v24 = vrot.slane %v10532_v25, 1 }
 0x186   : > { %571 = vst.msk [vmem:[#allocation5 + $0x38] sm:$0xff] %vm488_vm8, %v15109_v44  ;;  %v4173_v49 = vadd.f32 %v10030_v39, %v4139_v8 }
 0x187   : > { %572 = vst.msk [vmem:[#allocation5 + $0x40] sm:$0xf] %vm491_vm9, %v15109_v44 }
 0x188   : > { %15153 = vst [vmem:[#allocation59_spill] sm:$0xff] %v10599_v63  ;;  %vm4203_vm12 = vcmp.gt.f32.partialorder %v4173_v49, 0.0  ;;  %v4233_v8 = vmul.f32 0.1, %v4173_v49 }
 0x189   : > { %15154 = vst [vmem:[#allocation60_spill] sm:$0xff] %v10603_v62  ;;  %v15171_v62 = vrot.slane %v10387_v29, 1 }
 0x18a   : > { %15156 = vst [vmem:[#allocation61_spill] sm:$0xff] %v10611_v7 }
 0x18b   : > { %4288 = vst.msk [vmem:[#allocation3 + $0x32] sm:$0xff] %vm488_vm8, %v10453_v19  ;;  %v599_v19 = vld [vmem:[%s9290_s23 + $0xb8] sm:$0xff] }
 0x18c   : > { %4289 = vst.msk [vmem:[#allocation3 + $0x3a] sm:$0xff] %vm488_vm8, %v10450_v46  ;;  %v10648_v46 = vmul.f32 %v9670_v16, %v10567_v26 }
 0x18d   : > { %653 = vst.msk [vmem:[#allocation2 + $0xb2] sm:$0xff] %vm390_vm0, %v591_v60  ;;  %v15161_v60 = vld [vmem:[#allocation36_spill] sm:$0xff] }
 0x18e   : > { %652 = vst.msk [vmem:[#allocation2 + $0xaa] sm:$0xff] %vm390_vm0, %v590_v5  ;;  %v15162_v22 = vrot.slane %v15161_v60, 2  ;;  %v4138_v5 = vadd.f32 %v4047_v56, %v3912_v18  ;;  %v2154_v18 = vmul.f32 %v9576_v50, %v10629_v34 }
 0x18f   : > { %661 = vst.msk [vmem:[#allocation2 + $0x112] sm:$0xff] %vm390_vm0, %v599_v19 }
 0x190   : > { %v1435_v44 = vsel %vm1400_vm3, %v15163_v52, %v15162_v22  ;;  %660 = vst.msk [vmem:[#allocation2 + $0x10a] sm:$0xff] %vm390_vm0, %v598_v20  ;;  %v15165_v52 = vrot.slane %v10509_v1, 3  ;;  %v4172_v22 = vadd.f32 %v10030_v39, %v4138_v5  ;;  %v15166_v39 = vrot.slane %v10433_v2, 4 }
 0x191   : > { %v1519_v32 = vadd.f32 %v1435_v44, %v1292_v38  ;;  %669 = vst.msk [vmem:[#allocation2 + $0x172] sm:$0xff] %vm390_vm0, %v607_v14  ;;  %v10681_v44 = vmul.f32 %v9564_v41, %v10655_v3  ;;  %v4263_v38 = vsel %vm4203_vm12, %v4173_v49, %v4233_v8  ;;  %v15167_v14 = vrot.slane %v10524_v23, 4 }
 0x192   : > { %v1662_v60 = vsel %vm1627_vm4, %v15165_v52, %v15164_v13  ;;  %v4320_v56 = vld [vmem:[#allocation3 + $0x30] sm:$0xff]  ;;  %668 = vst.msk [vmem:[#allocation2 + $0x16a] sm:$0xff] %vm390_vm0, %v606_v54  ;;  %v10689_v13 = vmul.f32 %v9566_v42, %v10655_v3  ;;  %vm4202_vm13 = vcmp.gt.f32.partialorder %v4172_v22, 0.0  ;;  %v4232_v49 = vmul.f32 0.1, %v4172_v22 }
 0x193   : > { %v1746_v20 = vadd.f32 %v1662_v60, %v1519_v32  ;;  %v1889_v5 = vsel %vm1854_vm5, %v15167_v14, %v15166_v39  ;;  %v10698_v32 = vmul.f32 %v9566_v42, %v10629_v34  ;;  %v614_v52 = vld [vmem:[%s9290_s23 + $0x130] sm:$0xff]  ;;  %4293 = vst.msk [vmem:[#allocation3 + $0x6a] sm:$0xff] %vm488_vm8, %v4263_v38  ;;  %v4321_v54 = vld [vmem:[#allocation3 + $0x38] sm:$0xff]  ;;  %v15168_v60 = vrot.slane %v10494_v31, 1  ;;  %v4322_v25 = vld [vmem:[#allocation3 + $0x40] sm:$0xf] }
 0x194   : > { %v623_v39 = vld [vmem:[%s9290_s23 + $0x178] sm:$0xff]  ;;  %v10710_v19 = vpack.c.bf16 %v4321_v54, %v4320_v56  ;;  %v15172_v38 = vrot.slane %v10664_v4, 1  ;;  %v10719_v31 = vmul.f32 %v9572_v45, %v10629_v34  ;;  %677 = vst.msk [vmem:[#allocation2 + $0x1d2] sm:$0xff] %vm390_vm0, %v615_v36  ;;  %v4453_v29 = vrot.slane %v4321_v54, 1 }
 0x195   : > { %v1973_v8 = vadd.f32 %v1889_v5, %v1746_v20  ;;  %v1206_v2 = vsel %vm1173_vm2, %v15169_v24, %v15168_v60  ;;  %v723_v14 = vld [vmem:[#allocation2 + $0xb8] sm:$0xf]  ;;  %v4452_v20 = vrot.slane %v4320_v56, 1  ;;  %v722_v24 = vld [vmem:[#allocation2 + $0xb0] sm:$0xff]  ;;  %v721_v5 = vld [vmem:[#allocation2 + $0xa8] sm:$0xff]  ;;  %v4262_v60 = vsel %vm4202_vm13, %v4172_v22, %v4232_v49  ;;  %676 = vst.msk [vmem:[#allocation2 + $0x1ca] sm:$0xff] %vm390_vm0, %v614_v52 }
 0x196   : > { %15170 = vst [vmem:[#allocation35_spill] sm:$0xff] %v10710_v19  ;;  %v2401_v7 = vsel %vm1173_vm2, %v15172_v38, %v15171_v62  ;;  %2218 = vperm.xlu2 %9151, %v723_v14   ;;  %v4455_v26 = vrot.slane %v4322_v25, 1  ;;  %v622_v62 = vld [vmem:[%s9290_s23 + $0x170] sm:$0xff]  ;;  %2027 = vperm.xlu1 %9150, %v722_v24   ;;  %v4662_v38 = vrot.slane %v4320_v56, 2  ;;  %v4663_v27 = vrot.slane %v4321_v54, 2 }
 0x197   : > { %v2184_v63 = vadd.f32 %v2154_v18, %v1973_v8  ;;  %2022 = vperm.xlu0 %9149, %v721_v5   ;;  %4292 = vst.msk [vmem:[#allocation3 + $0x62] sm:$0xff] %vm488_vm8, %v4262_v60  ;;  %v4665_v36 = vrot.slane %v4322_v25, 2  ;;  %v1291_v14 = vadd.f32 %v1206_v2, %v10528_v57  ;;  %8392 = vmatmul.msk.bf16.gmra.mxu1 %vm488_vm8, %v10710_v19  ;;  %v4809_v49 = vrot.slane %v4320_v56, 3  ;;  %v630_v8 = vld [vmem:[%s9290_s23 + $0x1b0] sm:$0xff] }
 0x198   : > { %v4454_v18 = vsel %vm1173_vm2, %v4452_v20, %v4453_v29  ;;  %v4456_v52 = vsel %vm1173_vm2, %v4453_v29, %v4455_v26  ;;  %685 = vst.msk [vmem:[#allocation2 + $0x232] sm:$0xff] %vm390_vm0, %v623_v39  ;;  %v4664_v5 = vsel %vm1400_vm3, %v4662_v38, %v4663_v27  ;;  %v4810_v2 = vrot.slane %v4321_v54, 3  ;;  %v735_v39 = vld [vmem:[#allocation2 + $0x118] sm:$0xf] }
 0x199   : > { %v10735_v24 = vpack.c.bf16 %v4456_v52, %v4454_v18  ;;  %v4666_v57 = vsel %vm1400_vm3, %v4663_v27, %v4665_v36  ;;  %684 = vst.msk [vmem:[#allocation2 + $0x22a] sm:$0xff] %vm390_vm0, %v622_v62  ;;  %v2485_v60 = vadd.f32 %v2401_v7, %v2184_v63  ;;  %v4812_v22 = vrot.slane %v4322_v25, 3  ;;  %v10753_v25 = vpop.permute.xlu1 %883 }
 0x19a   : > { %v10740_v19 = vpack.c.bf16 %v4666_v57, %v4664_v5  ;;  %v15175_v20 = vrot.slane %v10505_v10, 2  ;;  %v15176_v26 = vrot.slane %v10543_v58, 2  ;;  %693 = vst.msk [vmem:[#allocation2 + $0x292] sm:$0xff] %vm390_vm0, %v631_v43  ;;  %v4811_v27 = vsel %vm1627_vm4, %v4809_v49, %v4810_v2  ;;  %v734_v10 = vld [vmem:[#allocation2 + $0x110] sm:$0xff]  ;;  %v733_v58 = vld [vmem:[#allocation2 + $0x108] sm:$0xff]  ;;  %v10783_v57 = vpop.permute.xlu0 %878 }
 0x19b   : > { %15173 = vst [vmem:[#allocation36_spill] sm:$0xff] %v10735_v24  ;;  %8377 = vmatmul.msk.bf16.gmra.mxu0 %vm488_vm8, %v10735_v24  ;;  %v1658_v63 = vrot.slane %v10547_v21, 3  ;;  %v1885_v7 = vrot.slane %v10555_v61, 4  ;;  %v2850_v29 = vrot.slane %v10719_v31, 3  ;;  %v10759_v43 = vmul.f32 %v9578_v51, %v10629_v34 }
 0x19c   : > { %15174 = vst [vmem:[#allocation62_spill] sm:$0xff] %v10740_v19  ;;  %v1433_v56 = vsel %vm1400_vm3, %v15176_v26, %v15175_v20  ;;  %8407 = vmatmul.msk.bf16.gmra.mxu2 %vm488_vm8, %v10740_v19  ;;  %v4813_v62 = vsel %vm1627_vm4, %v4810_v2, %v4812_v22  ;;  %v2295_v21 = vmul.f32 %v9564_v41, %v10707_v33  ;;  %v15177_v61 = vrot.slane %v10399_v0, 2  ;;  %v9031_v22 = vld [vmem:[%s14858_s3 + $0x68] sm:$0xff] }
 0x19d   : > { %v1518_v54 = vadd.f32 %v1433_v56, %v1291_v14  ;;  %692 = vst.msk [vmem:[#allocation2 + $0x28a] sm:$0xff] %vm390_vm0, %v630_v8  ;;  %v15178_v38 = vrot.slane %v10698_v32, 2  ;;  %v10771_v14 = vpack.c.bf16 %v4813_v62, %v4811_v27  ;;  %v15180_v18 = vrot.slane %v10509_v1, 3  ;;  %v9027_v1 = vld [vmem:[%s14858_s3 + $0x48] sm:$0xff]  ;;  %v9029_v27 = vld [vmem:[%s14858_s3 + $0x58] sm:$0xff]  ;;  %5312 = vmatpush.bf16.msrb.mxu2 %v9031_v22 }
 0x19e   : > { %v2521_v52 = vmul.f32 %v9566_v42, %v10707_v33  ;;  %2228 = vperm.xlu2 %9151, %v735_v39   ;;  %v2153_v8 = vmul.f32 %v9576_v50, %v10707_v33  ;;  %v2397_v5 = vrot.slane %v2295_v21, 1  ;;  %15181 = vst [vmem:[#allocation64_spill] sm:$0xff] %v10783_v57  ;;  %2047 = vperm.xlu1 %9150, %v734_v10   ;;  %v15182_v20 = vrot.slane %v10524_v23, 4  ;;  %v10796_v39 = vpop.permute.xlu2 %1059 }
 0x19f   : > { %v2627_v36 = vsel %vm1400_vm3, %v15178_v38, %v15177_v61  ;;  %15179 = vst [vmem:[#allocation63_spill] sm:$0xff] %v10771_v14  ;;  %v1660_v34 = vsel %vm1627_vm4, %v1658_v63, %v15180_v18  ;;  %2042 = vperm.xlu0 %9149, %v733_v58   ;;  %v2973_v56 = vmul.f32 %v9578_v51, %v10707_v33  ;;  %v3076_v58 = vrot.slane %v10759_v43, 4  ;;  %v747_v18 = vld [vmem:[#allocation2 + $0x178] sm:$0xf] }
 0x1a0   : > { %v2711_v49 = vadd.f32 %v2627_v36, %v2485_v60  ;;  %v1745_v0 = vadd.f32 %v1660_v34, %v1518_v54  ;;  %v1887_v26 = vsel %vm1854_vm5, %v1885_v7, %v15182_v20  ;;  %v2747_v60 = vmul.f32 %v9572_v45, %v10707_v33  ;;  %8422 = vmatmul.msk.bf16.gmra.mxu3 %vm488_vm8, %v10771_v14 }
 0x1a1   : > { %v10804_v63 = vmul.f32 %v9572_v45, %v10655_v3  ;;  %v10808_v23 = vmul.f32 %v9578_v51, %v10655_v3  ;;  %v15183_v7 = vrot.slane %v10402_v12, 3  ;;  %v15184_v62 = vrot.slane %v10664_v4, 1  ;;  %5046 = vmatpush.bf16.msrb.mxu0 %v9027_v1  ;;  %5144 = vmatpush.bf16.msrb.mxu1 %v9029_v27 }
 0x1a2   : > { %v1972_v33 = vadd.f32 %v1887_v26, %v1745_v0  ;;  %v2623_v61 = vrot.slane %v2521_v52, 2  ;;  %v10824_v12 = vmul.f32 %v9556_v37, %v10796_v39  ;;  %v2849_v22 = vrot.slane %v2747_v60, 3  ;;  %v746_v52 = vld [vmem:[#allocation2 + $0x170] sm:$0xff]  ;;  %v745_v0 = vld [vmem:[#allocation2 + $0x168] sm:$0xff] }
 0x1a3   : > { %v2853_v10 = vsel %vm1627_vm4, %v2850_v29, %v15183_v7  ;;  %v2399_v21 = vsel %vm1173_vm2, %v2397_v5, %v15184_v62  ;;  %v3075_v43 = vrot.slane %v2973_v56, 4  ;;  %v10829_v4 = vmul.f32 %v9574_v47, %v10796_v39  ;;  %v10848_v7 = vpop.permute.xlu1 %873 }
 0x1a4   : > { %v2937_v38 = vadd.f32 %v2853_v10, %v2711_v49  ;;  %v2183_v36 = vadd.f32 %v2153_v8, %v1972_v33  ;;  %v15185_v20 = vrot.slane %v10408_v15, 4  ;;  %v15186_v60 = vrot.slane %v10698_v32, 2  ;;  %v757_v49 = vld [vmem:[#allocation2 + $0x1c8] sm:$0xff] }
 0x1a5   : > { %v10842_v27 = vmul.f32 %v9651_v48, %v10796_v39  ;;  %v10846_v33 = vmul.f32 %v9656_v28, %v10796_v39  ;;  %v10853_v32 = vmul.f32 %v9593_v59, %v10796_v39  ;;  %v3204_v31 = vmul.f32 %v15148_v30, %v10848_v7 }
 0x1a6   : > { %v2484_v1 = vadd.f32 %v2399_v21, %v2183_v36  ;;  %v3079_v26 = vsel %vm1854_vm5, %v3076_v58, %v15185_v20  ;;  %v2625_v56 = vsel %vm1400_vm3, %v2623_v61, %v15186_v60  ;;  %2238 = vperm.xlu2 %9151, %v747_v18   ;;  %2067 = vperm.xlu1 %9150, %v746_v52   ;;  %v15196_v5 = vrot.slane %v10619_v53, 1 }
 0x1a7   : > { %15187 = vst [vmem:[#allocation65_spill] sm:$0xff] %v10842_v27  ;;  %v3163_v10 = vadd.f32 %v3079_v26, %v2937_v38  ;;  %2062 = vperm.xlu0 %9149, %v745_v0   ;;  %v2851_v21 = vsel %vm1627_vm4, %v2849_v22, %v2850_v29  ;;  %v3077_v61 = vsel %vm1854_vm5, %v3075_v43, %v3076_v58  ;;  %v10874_v29 = vpop.permute.xlu0 %868  ;;  %v10878_v43 = vpop.permute.xlu2 %1054  ;;  %v758_v58 = vld [vmem:[#allocation2 + $0x1d0] sm:$0xff]  ;;  %v15197_v14 = vrot.slane %v10636_v55, 2 }
 0x1a8   : > { %15188 = vst [vmem:[#allocation66_spill] sm:$0xff] %v10846_v33  ;;  %v2710_v62 = vadd.f32 %v2625_v56, %v2484_v1  ;;  %v10862_v38 = vmul.f32 %v9667_v9, %v10796_v39  ;;  %v10866_v1 = vmul.f32 %v9670_v16, %v10796_v39  ;;  %v10870_v52 = vmul.f32 %v9670_v16, %v10753_v25 }
 0x1a9   : > { %15192 = vst [vmem:[#allocation70_spill] sm:$0xff] %v10874_v29  ;;  %v3276_v0 = vmul.f32 %v9651_v48, %v10848_v7  ;;  %v3502_v20 = vmul.f32 %v9656_v28, %v10848_v7  ;;  %v3234_v60 = vadd.f32 %v3204_v31, %v3163_v10  ;;  %v3728_v56 = vmul.f32 %v9667_v9, %v10848_v7 }
 0x1aa   : > { %15189 = vst [vmem:[#allocation67_spill] sm:$0xff] %v10862_v38  ;;  %v2936_v18 = vadd.f32 %v2851_v21, %v2710_v62  ;;  %v3954_v62 = vmul.f32 %v9670_v16, %v10848_v7  ;;  %v759_v21 = vld [vmem:[#allocation2 + $0x1d8] sm:$0xf]  ;;  %v3203_v15 = vmul.f32 %v15148_v30, %v10874_v29  ;;  %v3275_v8 = vmul.f32 %v9651_v48, %v10874_v29 }
 0x1ab   : > { %15190 = vst [vmem:[#allocation68_spill] sm:$0xff] %v10866_v1  ;;  %v3378_v36 = vrot.slane %v3276_v0, 1  ;;  %v3604_v22 = vrot.slane %v3502_v20, 2  ;;  %v10894_v10 = vmul.f32 %v9670_v16, %v10783_v57  ;;  %v3727_v31 = vmul.f32 %v9667_v9, %v10874_v29  ;;  %v10904_v0 = vld [vmem:[#allocation3 + $0x60] sm:$0xff]  ;;  %v10906_v20 = vld [vmem:[#allocation3 + $0x68] sm:$0xff] }
 0x1ac   : > { %15191 = vst [vmem:[#allocation69_spill] sm:$0xff] %v10870_v52  ;;  %v3162_v26 = vadd.f32 %v3077_v61, %v2936_v18  ;;  %v10898_v61 = vmul.f32 %v9556_v37, %v10878_v43  ;;  %v3501_v18 = vmul.f32 %v9656_v28, %v10874_v29  ;;  %v3830_v3 = vrot.slane %v3728_v56, 3  ;;  %v781_v1 = vld [vmem:[#allocation2 + $0x288] sm:$0xff] }
 0x1ad   : > { %15193 = vst [vmem:[#allocation71_spill] sm:$0xff] %v10878_v43  ;;  %v3381_v34 = vsel %vm1173_vm2, %v3378_v36, %v15196_v5  ;;  %v3377_v2 = vrot.slane %v3275_v8, 1  ;;  %v3607_v24 = vsel %vm1400_vm3, %v3604_v22, %v15197_v14  ;;  %v4056_v33 = vrot.slane %v3954_v62, 4 }
 0x1ae   : > { %15194 = vst [vmem:[#allocation72_spill] sm:$0xff] %v10894_v10  ;;  %v3233_v54 = vadd.f32 %v3203_v15, %v3162_v26  ;;  %2248 = vperm.xlu2 %9151, %v759_v21   ;;  %v3465_v19 = vadd.f32 %v3381_v34, %v3234_v60  ;;  %v3603_v27 = vrot.slane %v3501_v18, 2  ;;  %2087 = vperm.xlu1 %9150, %v758_v58   ;;  %v3829_v52 = vrot.slane %v3727_v31, 3  ;;  %v771_v60 = vld [vmem:[#allocation2 + $0x238] sm:$0xf]  ;;  %v770_v21 = vld [vmem:[#allocation2 + $0x230] sm:$0xff] }
 0x1af   : > { %15195 = vst [vmem:[#allocation73_spill] sm:$0xff] %v10898_v61  ;;  %2082 = vperm.xlu0 %9149, %v757_v49   ;;  %v3379_v10 = vsel %vm1173_vm2, %v3377_v2, %v3378_v36  ;;  %v3953_v53 = vmul.f32 %v9670_v16, %v10874_v29  ;;  %v10919_v5 = vpack.c.bf16 %v10906_v20, %v10904_v0  ;;  %v15200_v2 = vrot.slane %v10640_v6, 3  ;;  %v15204_v34 = vld [vmem:[#allocation50_spill] sm:$0xff]  ;;  %v15206_v6 = vld [vmem:[#allocation55_spill] sm:$0xff] }
 0x1b0   : > { %v10924_v55 = vmul.f32 %v9574_v47, %v10878_v43  ;;  %v3691_v14 = vadd.f32 %v3607_v24, %v3465_v19  ;;  %v3464_v8 = vadd.f32 %v3379_v10, %v3233_v54  ;;  %v3605_v36 = vsel %vm1400_vm3, %v3603_v27, %v3604_v22  ;;  %v769_v10 = vld [vmem:[#allocation2 + $0x228] sm:$0xff] }
 0x1b1   : > { %15198 = vst [vmem:[#allocation74_spill] sm:$0xff] %v10919_v5  ;;  %v3833_v15 = vsel %vm1627_vm4, %v3830_v3, %v15200_v2  ;;  %v4055_v58 = vrot.slane %v3953_v53, 4  ;;  %8393 = vmatmul.msk.bf16.gmra.mxu1 %vm488_vm8, %v10919_v5  ;;  %v10935_v26 = vmul.f32 %v9593_v59, %v10878_v43  ;;  %v10939_v19 = vmul.f32 %v9651_v48, %v10878_v43 }
 0x1b2   : > { %15199 = vst [vmem:[#allocation75_spill] sm:$0xff] %v10924_v55  ;;  %v3917_v24 = vadd.f32 %v3833_v15, %v3691_v14  ;;  %v3690_v54 = vadd.f32 %v3605_v36, %v3464_v8  ;;  %v10944_v27 = vmul.f32 %v9656_v28, %v10878_v43  ;;  %v15202_v22 = vrot.slane %v10648_v46, 4 }
 0x1b3   : > { %15201 = vst [vmem:[#allocation76_spill] sm:$0xff] %v10935_v26  ;;  %v3831_v62 = vsel %vm1627_vm4, %v3829_v52, %v3830_v3  ;;  %v10953_v14 = vmul.f32 %v9556_v37, %v10753_v25  ;;  %v4057_v8 = vsel %vm1854_vm5, %v4055_v58, %v4056_v33  ;;  %v10958_v2 = vmul.f32 %v9574_v47, %v10753_v25 }
 0x1b4   : > { %v4059_v56 = vsel %vm1854_vm5, %v4056_v33, %v15202_v22  ;;  %v3916_v53 = vadd.f32 %v3831_v62, %v3690_v54  ;;  %v10962_v46 = vmul.f32 %v9593_v59, %v10753_v25  ;;  %v10966_v3 = vmul.f32 %v9618_v11, %v10753_v25  ;;  %v10975_v33 = vld [vmem:[%s14857_s2] ss:$0 sm:$0xff] }
 0x1b5   : > { %v4143_v31 = vadd.f32 %v4059_v56, %v3917_v24  ;;  %v10970_v52 = vmul.f32 %v9667_v9, %v10878_v43  ;;  %v14941_v58 = vrot.slane %v10953_v14, 1  ;;  %v964_v24 = vmul.f32 %v15147_v40, %v10753_v25  ;;  %v10985_v56 = vpop.permute.xlu1 %2077 }
 0x1b6   : > { %2258 = vperm.xlu2 %9151, %v771_v60   ;;  %v4142_v36 = vadd.f32 %v4057_v8, %v3916_v53  ;;  %2107 = vperm.xlu1 %9150, %v770_v21   ;;  %v14942_v54 = vrot.slane %v10958_v2, 2  ;;  %v1790_v22 = vmul.f32 %v9618_v11, %v10418_v35  ;;  %v15203_v21 = vrot.slane %v10443_v17, 1  ;;  %v633_v53 = vld [vmem:[%s9290_s23 + $0x1c8] sm:$0xff]  ;;  %v632_v8 = vld [vmem:[%s9290_s23 + $0x1c0] sm:$0xff]  ;;  %v635_v17 = vld [vmem:[%s9290_s23 + $0x1d8] sm:$0xff] }
 0x1b7   : > { %v4177_v15 = vadd.f32 %v10975_v33, %v4143_v31  ;;  %2102 = vperm.xlu0 %9149, %v769_v10   ;;  %v15205_v18 = vrot.slane %v15204_v34, 2  ;;  %v1671_v60 = vrot.slane %v15206_v6, 3  ;;  %695 = vst.msk [vmem:[#allocation2 + $0x2aa] sm:$0xff] %vm390_vm0, %v633_v53  ;;  %v11012_v6 = vmul.f32 %v9670_v16, %v10878_v43  ;;  %v634_v53 = vld [vmem:[%s9290_s23 + $0x1d0] sm:$0xff] }
 0x1b8   : > { %v4176_v31 = vadd.f32 %v10975_v33, %v4142_v36  ;;  %v1218_v10 = vsel %vm1173_vm2, %v14941_v58, %v15203_v21  ;;  %v783_v58 = vld [vmem:[#allocation2 + $0x298] sm:$0xf]  ;;  %694 = vst.msk [vmem:[#allocation2 + $0x2a2] sm:$0xff] %vm390_vm0, %v632_v8  ;;  %v782_v36 = vld [vmem:[#allocation2 + $0x290] sm:$0xff]  ;;  %v1898_v38 = vrot.slane %v1790_v22, 4  ;;  %v4457_v34 = vrot.slane %v10904_v0, 1 }
 0x1b9   : > { %vm4207_vm14 = vcmp.gt.f32.partialorder %v4177_v15, 0.0  ;;  %v4237_v62 = vmul.f32 0.1, %v4177_v15  ;;  %v1296_v49 = vadd.f32 %v1218_v10, %v964_v24  ;;  %v1445_v35 = vsel %vm1400_vm3, %v14942_v54, %v15205_v18  ;;  %v4328_v10 = vld [vmem:[#allocation3 + $0x70] sm:$0xf]  ;;  %697 = vst.msk [vmem:[#allocation2 + $0x2c2] sm:$0xff] %vm390_vm0, %v635_v17 }
 0x1ba   : > { %vm4206_vm15 = vcmp.gt.f32.partialorder %v4176_v31, 0.0  ;;  %v4236_v21 = vmul.f32 0.1, %v4176_v31  ;;  %v11006_v24 = vmul.f32 %v9564_v41, %v10985_v56  ;;  %v4460_v17 = vrot.slane %v4328_v10, 1  ;;  %696 = vst.msk [vmem:[#allocation2 + $0x2ba] sm:$0xff] %vm390_vm0, %v634_v53 }
 0x1bb   : > { %v4267_v5 = vsel %vm4207_vm14, %v4177_v15, %v4237_v62  ;;  %v1523_v18 = vadd.f32 %v1445_v35, %v1296_v49  ;;  %v15207_v15 = vrot.slane %v10962_v46, 3  ;;  %v2158_v49 = vmul.f32 %v9576_v50, %v10985_v56 }
 0x1bc   : > { %4297 = vst.msk [vmem:[#allocation3 + $0x9a] sm:$0xff] %vm488_vm8, %v4267_v5  ;;  %v4266_v54 = vsel %vm4206_vm15, %v4176_v31, %v4236_v21  ;;  %v14951_v8 = vrot.slane %v11006_v24, 1  ;;  %v15208_v31 = vrot.slane %v10966_v3, 4  ;;  %v11032_v35 = vmul.f32 %v9566_v42, %v10985_v56 }
 0x1bd   : > { %v1672_v62 = vsel %vm1627_vm4, %v15207_v15, %v1671_v60  ;;  %4296 = vst.msk [vmem:[#allocation3 + $0x92] sm:$0xff] %vm488_vm8, %v4266_v54  ;;  %v4458_v60 = vrot.slane %v10906_v20, 1  ;;  %v4667_v21 = vrot.slane %v10904_v0, 2  ;;  %v11035_v15 = vpop.permute.xlu0 %2072  ;;  %v4814_v55 = vrot.slane %v10904_v0, 3 }
 0x1be   : > { %v1750_v5 = vadd.f32 %v1672_v62, %v1523_v18  ;;  %2268 = vperm.xlu2 %9151, %v783_v58   ;;  %v1899_v22 = vsel %vm1854_vm5, %v15208_v31, %v1898_v38  ;;  %2127 = vperm.xlu1 %9150, %v782_v36   ;;  %v11041_v18 = vmul.f32 %v9572_v45, %v10985_v56  ;;  %v4668_v38 = vrot.slane %v10906_v20, 2  ;;  %v11044_v62 = vpop.permute.xlu2 %2253  ;;  %v786_v0 = vld [vmem:[#allocation2 + $0x2b0] sm:$0xf] }
 0x1bf   : > { %2122 = vperm.xlu0 %9149, %v781_v1   ;;  %v15209_v31 = vrot.slane %v10681_v44, 1  ;;  %v4459_v53 = vsel %vm1173_vm2, %v4457_v34, %v4458_v60  ;;  %v4461_v36 = vsel %vm1173_vm2, %v4458_v60, %v4460_v17  ;;  %v4670_v1 = vrot.slane %v4328_v10, 2 }
 0x1c0   : > { %v1977_v58 = vadd.f32 %v1899_v22, %v1750_v5  ;;  %v11053_v22 = vpack.c.bf16 %v4461_v36, %v4459_v53  ;;  %v4669_v54 = vsel %vm1400_vm3, %v4667_v21, %v4668_v38  ;;  %v14950_v43 = vrot.slane %v11032_v35, 2  ;;  %v785_v53 = vld [vmem:[#allocation2 + $0x2a8] sm:$0xff]  ;;  %v784_v36 = vld [vmem:[#allocation2 + $0x2a0] sm:$0xff] }
 0x1c1   : > { %v2411_v26 = vsel %vm1173_vm2, %v14951_v8, %v15209_v31  ;;  %v4671_v44 = vsel %vm1400_vm3, %v4668_v38, %v4670_v1  ;;  %v4815_v61 = vrot.slane %v10906_v20, 3  ;;  %v4817_v29 = vrot.slane %v4328_v10, 3  ;;  %v11082_v1 = vpop.permute.xlu1 %903 }
 0x1c2   : > { %v2188_v5 = vadd.f32 %v2158_v49, %v1977_v58  ;;  %15210 = vst [vmem:[#allocation50_spill] sm:$0xff] %v11053_v22  ;;  %8378 = vmatmul.msk.bf16.gmra.mxu0 %vm488_vm8, %v11053_v22  ;;  %v11062_v34 = vpack.c.bf16 %v4671_v44, %v4669_v54  ;;  %v1107_v49 = vmul.f32 %v9556_v37, %v10783_v57 }
 0x1c3   : > { %v1334_v60 = vmul.f32 %v9574_v47, %v10783_v57  ;;  %v11070_v17 = vmul.f32 %v9564_v41, %v11044_v62  ;;  %v4816_v20 = vsel %vm1627_vm4, %v4814_v55, %v4815_v61  ;;  %v1561_v10 = vmul.f32 %v9593_v59, %v10783_v57  ;;  %15213 = vst [vmem:[#allocation78_spill] sm:$0xff] %v11082_v1 }
 0x1c4   : > { %v2489_v31 = vadd.f32 %v2411_v26, %v2188_v5  ;;  %15211 = vst [vmem:[#allocation55_spill] sm:$0xff] %v11062_v34  ;;  %v4818_v26 = vsel %vm1627_vm4, %v4815_v61, %v4817_v29  ;;  %8408 = vmatmul.msk.bf16.gmra.mxu2 %vm488_vm8, %v11062_v34  ;;  %v1214_v54 = vrot.slane %v1107_v49, 1  ;;  %v1788_v38 = vmul.f32 %v9618_v11, %v10783_v57 }
 0x1c5   : > { %v11078_v21 = vpack.c.bf16 %v4818_v26, %v4816_v20  ;;  %v1441_v58 = vrot.slane %v1334_v60, 2  ;;  %v15214_v55 = vrot.slane %v10689_v13, 2  ;;  %v2860_v61 = vrot.slane %v11041_v18, 3 }
 0x1c6   : > { %v11092_v5 = vmul.f32 %v9578_v51, %v10985_v56  ;;  %v963_v44 = vmul.f32 %v15147_v40, %v10783_v57  ;;  %1079 = vperm.xlu2 %9151, %v786_v0   ;;  %v15215_v13 = vrot.slane %v10953_v14, 1  ;;  %v1668_v20 = vrot.slane %v1561_v10, 3  ;;  %943 = vperm.xlu1 %9150, %v785_v53   ;;  %v11110_v14 = vpop.permute.xlu0 %898  ;;  %v11128_v8 = vpop.permute.xlu2 %1069 }
 0x1c7   : > { %15212 = vst [vmem:[#allocation77_spill] sm:$0xff] %v11078_v21  ;;  %v2637_v29 = vsel %vm1400_vm3, %v14950_v43, %v15214_v55  ;;  %8423 = vmatmul.msk.bf16.gmra.mxu3 %vm488_vm8, %v11078_v21  ;;  %v2301_v18 = vmul.f32 %v9564_v41, %v11035_v15  ;;  %v11106_v26 = vmul.f32 %v9566_v42, %v11044_v62 }
 0x1c8   : > { %v2715_v49 = vadd.f32 %v2637_v29, %v2489_v31  ;;  %v1216_v60 = vsel %vm1173_vm2, %v1214_v54, %v15215_v13  ;;  %v2527_v31 = vmul.f32 %v9566_v42, %v11035_v15  ;;  %938 = vperm.xlu0 %9149, %v784_v36   ;;  %15216 = vst [vmem:[#allocation79_spill] sm:$0xff] %v11110_v14  ;;  %v15217_v54 = vrot.slane %v10958_v2, 2  ;;  %v637_v13 = vld [vmem:[%s9290_s23 + $0x1e8] sm:$0xff]  ;;  %v636_v2 = vld [vmem:[%s9290_s23 + $0x1e0] sm:$0xff] }
 0x1c9   : > { %v1295_v0 = vadd.f32 %v1216_v60, %v963_v44  ;;  %v11114_v10 = vmul.f32 %v9572_v45, %v11044_v62  ;;  %v1895_v29 = vrot.slane %v1788_v38, 4  ;;  %v2753_v44 = vmul.f32 %v9572_v45, %v11035_v15  ;;  %699 = vst.msk [vmem:[#allocation2 + $0x2da] sm:$0xff] %vm390_vm0, %v637_v13  ;;  %v11166_v21 = vpop.permute.xlu1 %893 }
 0x1ca   : > { %v1443_v55 = vsel %vm1400_vm3, %v1441_v58, %v15217_v54  ;;  %v15218_v60 = vrot.slane %v10804_v63, 3  ;;  %v3086_v36 = vrot.slane %v11092_v5, 4  ;;  %v2979_v43 = vmul.f32 %v9578_v51, %v11035_v15  ;;  %698 = vst.msk [vmem:[#allocation2 + $0x2d2] sm:$0xff] %vm390_vm0, %v636_v2 }
 0x1cb   : > { %v1522_v56 = vadd.f32 %v1443_v55, %v1295_v0  ;;  %v15219_v54 = vrot.slane %v10962_v46, 3  ;;  %v2407_v34 = vrot.slane %v2301_v18, 1  ;;  %v11139_v5 = vmul.f32 %v9578_v51, %v11044_v62  ;;  %v788_v62 = vld [vmem:[#allocation2 + $0x2c0] sm:$0xff]  ;;  %15224 = vst [vmem:[#allocation81_spill] sm:$0xff] %v11166_v21 }
 0x1cc   : > { %v2863_v53 = vsel %vm1627_vm4, %v2860_v61, %v15218_v60  ;;  %v789_v60 = vld [vmem:[#allocation2 + $0x2c8] sm:$0xf]  ;;  %v2157_v55 = vmul.f32 %v9576_v50, %v11035_v15  ;;  %v2633_v13 = vrot.slane %v2527_v31, 2  ;;  %v15220_v58 = vrot.slane %v10966_v3, 4 }
 0x1cd   : > { %v2941_v38 = vadd.f32 %v2863_v53, %v2715_v49  ;;  %v1670_v63 = vsel %vm1627_vm4, %v1668_v20, %v15219_v54  ;;  %v2859_v46 = vrot.slane %v2753_v44, 3  ;;  %v11148_v20 = vmul.f32 %v9556_v37, %v11128_v8  ;;  %v787_v53 = vld [vmem:[#allocation2 + $0x2b8] sm:$0xff] }
 0x1ce   : > { %v1749_v0 = vadd.f32 %v1670_v63, %v1522_v56  ;;  %v1897_v49 = vsel %vm1854_vm5, %v1895_v29, %v15220_v58  ;;  %v11152_v18 = vmul.f32 %v9574_v47, %v11128_v8  ;;  %v15221_v15 = vrot.slane %v10808_v23, 4  ;;  %2273 = vperm.xlu2 %9151, %v789_v60   ;;  %2137 = vperm.xlu1 %9150, %v788_v62  }
 0x1cf   : > { %v3085_v2 = vrot.slane %v2979_v43, 4  ;;  %v15222_v58 = vrot.slane %v11006_v24, 1  ;;  %v11164_v63 = vmul.f32 %v9651_v48, %v11128_v8  ;;  %v2861_v24 = vsel %vm1627_vm4, %v2859_v46, %v2860_v61 }
 0x1d0   : > { %v3089_v31 = vsel %vm1854_vm5, %v3086_v36, %v15221_v15  ;;  %v1976_v3 = vadd.f32 %v1897_v49, %v1749_v0  ;;  %v15225_v0 = vrot.slane %v11032_v35, 2  ;;  %2132 = vperm.xlu0 %9149, %v787_v53   ;;  %v11181_v49 = vmul.f32 %v9593_v59, %v11128_v8  ;;  %v11190_v53 = vpop.permute.xlu0 %888  ;;  %v792_v15 = vld [vmem:[#allocation2 + $0x2e0] sm:$0xf] }
 0x1d1   : > { %v3167_v44 = vadd.f32 %v3089_v31, %v2941_v38  ;;  %v2409_v54 = vsel %vm1173_vm2, %v2407_v34, %v15222_v58  ;;  %15223 = vst [vmem:[#allocation80_spill] sm:$0xff] %v11164_v63  ;;  %v11174_v38 = vmul.f32 %v9656_v28, %v11128_v8  ;;  %v3087_v35 = vsel %vm1854_vm5, %v3085_v2, %v3086_v36  ;;  %v791_v34 = vld [vmem:[#allocation2 + $0x2d8] sm:$0xff]  ;;  %v790_v23 = vld [vmem:[#allocation2 + $0x2d0] sm:$0xff] }
 0x1d2   : > { %v2187_v56 = vadd.f32 %v2157_v55, %v1976_v3  ;;  %v2635_v43 = vsel %vm1400_vm3, %v2633_v13, %v15225_v0  ;;  %v11186_v13 = vmul.f32 %v9667_v9, %v11128_v8  ;;  %v3208_v62 = vmul.f32 %v15148_v30, %v11166_v21  ;;  %15228 = vst [vmem:[#allocation84_spill] sm:$0xff] %v11190_v53 }
 0x1d3   : > { %15226 = vst [vmem:[#allocation82_spill] sm:$0xff] %v11174_v38  ;;  %v11195_v46 = vmul.f32 %v9670_v16, %v11128_v8  ;;  %v3282_v36 = vmul.f32 %v9651_v48, %v11166_v21  ;;  %v3508_v58 = vmul.f32 %v9656_v28, %v11166_v21  ;;  %v3734_v0 = vmul.f32 %v9667_v9, %v11166_v21 }
 0x1d4   : > { %v2488_v55 = vadd.f32 %v2409_v54, %v2187_v56  ;;  %15227 = vst [vmem:[#allocation83_spill] sm:$0xff] %v11186_v13  ;;  %v11199_v56 = vmul.f32 %v9670_v16, %v11082_v1  ;;  %v3238_v2 = vadd.f32 %v3208_v62, %v3167_v44  ;;  %v3960_v61 = vmul.f32 %v9670_v16, %v11166_v21  ;;  %v11228_v21 = vld [vmem:[#allocation3 + $0x90] sm:$0xff] }
 0x1d5   : > { %15229 = vst [vmem:[#allocation85_spill] sm:$0xff] %v11195_v46  ;;  %v3388_v54 = vrot.slane %v3282_v36, 1  ;;  %v3207_v60 = vmul.f32 %v15148_v30, %v11190_v53  ;;  %v3281_v44 = vmul.f32 %v9651_v48, %v11190_v53  ;;  %v3507_v62 = vmul.f32 %v9656_v28, %v11190_v53 }
 0x1d6   : > { %15230 = vst [vmem:[#allocation86_spill] sm:$0xff] %v11199_v56  ;;  %v2714_v31 = vadd.f32 %v2635_v43, %v2488_v55  ;;  %v11212_v43 = vpop.permute.xlu2 %1064  ;;  %v3614_v55 = vrot.slane %v3508_v58, 2  ;;  %3253 = vperm.xlu2 %9151, %v792_v15   ;;  %v15232_v3 = vrot.slane %v10939_v19, 1  ;;  %v3840_v38 = vrot.slane %v3734_v0, 3  ;;  %v11230_v15 = vld [vmem:[#allocation3 + $0x98] sm:$0xff]  ;;  %3187 = vperm.xlu1 %9150, %v791_v34  }
 0x1d7   : > { %15231 = vst [vmem:[#allocation87_spill] sm:$0xff] %v11212_v43  ;;  %v11226_v58 = vmul.f32 %v9670_v16, %v11110_v14  ;;  %v3387_v56 = vrot.slane %v3281_v44, 1  ;;  %v11234_v19 = vmul.f32 %v9556_v37, %v11212_v43  ;;  %v3613_v0 = vrot.slane %v3507_v62, 2 }
 0x1d8   : > { %v2940_v29 = vadd.f32 %v2861_v24, %v2714_v31  ;;  %v3391_v22 = vsel %vm1173_vm2, %v3388_v54, %v15232_v3  ;;  %v3733_v24 = vmul.f32 %v9667_v9, %v11190_v53  ;;  %3182 = vperm.xlu0 %9149, %v790_v23   ;;  %v15235_v3 = vrot.slane %v10944_v27, 2 }
 0x1d9   : > { %15233 = vst [vmem:[#allocation88_spill] sm:$0xff] %v11226_v58  ;;  %v3469_v63 = vadd.f32 %v3391_v22, %v3238_v2  ;;  %v3389_v22 = vsel %vm1173_vm2, %v3387_v56, %v3388_v54  ;;  %v3959_v2 = vmul.f32 %v9670_v16, %v11190_v53  ;;  %v15236_v23 = vrot.slane %v10970_v52, 3 }
 0x1da   : > { %v3166_v31 = vadd.f32 %v3087_v35, %v2940_v29  ;;  %15234 = vst [vmem:[#allocation89_spill] sm:$0xff] %v11234_v19  ;;  %v3617_v29 = vsel %vm1400_vm3, %v3614_v55, %v15235_v3  ;;  %v4066_v35 = vrot.slane %v3960_v61, 4  ;;  %v3839_v58 = vrot.slane %v3733_v24, 3 }
 0x1db   : > { %v3695_v36 = vadd.f32 %v3617_v29, %v3469_v63  ;;  %v3843_v44 = vsel %vm1627_vm4, %v3840_v38, %v15236_v23  ;;  %v11248_v27 = vpack.c.bf16 %v11230_v15, %v11228_v21  ;;  %v11252_v63 = vmul.f32 %v9574_v47, %v11212_v43 }
 0x1dc   : > { %v3237_v13 = vadd.f32 %v3207_v60, %v3166_v31  ;;  %v11256_v60 = vmul.f32 %v9593_v59, %v11212_v43  ;;  %v15240_v52 = vrot.slane %v11012_v6, 4  ;;  %v3615_v24 = vsel %vm1400_vm3, %v3613_v0, %v3614_v55 }
 0x1dd   : > { %15237 = vst [vmem:[#allocation90_spill] sm:$0xff] %v11248_v27  ;;  %v3921_v61 = vadd.f32 %v3843_v44, %v3695_v36  ;;  %v4065_v31 = vrot.slane %v3959_v2, 4  ;;  %8394 = vmatmul.msk.bf16.gmra.mxu1 %vm488_vm8, %v11248_v27  ;;  %v11267_v3 = vmul.f32 %v9651_v48, %v11212_v43  ;;  %v11271_v36 = vmul.f32 %v9656_v28, %v11212_v43 }
 0x1de   : > { %15238 = vst [vmem:[#allocation91_spill] sm:$0xff] %v11252_v63  ;;  %v3468_v56 = vadd.f32 %v3389_v22, %v3237_v13  ;;  %v4069_v62 = vsel %vm1854_vm5, %v4066_v35, %v15240_v52  ;;  %v11275_v6 = vmul.f32 %v9667_v9, %v11212_v43  ;;  %v3841_v55 = vsel %vm1627_vm4, %v3839_v58, %v3840_v38 }
 0x1df   : > { %15239 = vst [vmem:[#allocation92_spill] sm:$0xff] %v11256_v60  ;;  %v4147_v13 = vadd.f32 %v4069_v62, %v3921_v61  ;;  %v11280_v0 = vmul.f32 %v9556_v37, %v11082_v1  ;;  %v11284_v22 = vmul.f32 %v9574_v47, %v11082_v1  ;;  %v11290_v61 = vmul.f32 %v9593_v59, %v11082_v1 }
 0x1e0   : > { %v3694_v29 = vadd.f32 %v3615_v24, %v3468_v56  ;;  %v4067_v56 = vsel %vm1854_vm5, %v4065_v31, %v4066_v35  ;;  %v11297_v52 = vmul.f32 %v9618_v11, %v11082_v1  ;;  %v15241_v35 = vrot.slane %v10824_v12, 1 }
 0x1e1   : > { %v4181_v23 = vadd.f32 %v10975_v33, %v4147_v13  ;;  %v14962_v38 = vrot.slane %v11280_v0, 1  ;;  %v968_v13 = vmul.f32 %v15147_v40, %v11082_v1  ;;  %v14963_v34 = vrot.slane %v11290_v61, 3  ;;  %v15322_v1 = vld [vmem:[#allocation11_spill] sm:$0xff] }
 0x1e2   : > { %v3920_v44 = vadd.f32 %v3841_v55, %v3694_v29  ;;  %v2098_v29 = vpop.permute.xlu1 %2097  ;;  %v11303_v55 = vmul.f32 %v9670_v16, %v11212_v43  ;;  %v1796_v2 = vmul.f32 %v9618_v11, %v10796_v39  ;;  %v15242_v27 = vrot.slane %v10829_v4, 2 }
 0x1e3   : > { %vm4211_vm1 = vcmp.gt.f32.partialorder %v4181_v23, 0.0  ;;  %v4241_v62 = vmul.f32 0.1, %v4181_v23  ;;  %v1228_v31 = vsel %vm1173_vm2, %v14962_v38, %v15241_v35  ;;  %v15243_v12 = vrot.slane %v11284_v22, 2 }
 0x1e4   : > { %v4146_v24 = vadd.f32 %v4067_v56, %v3920_v44  ;;  %v1300_v58 = vadd.f32 %v1228_v31, %v968_v13  ;;  %v1681_v35 = vrot.slane %v10853_v32, 3  ;;  %v11324_v39 = vmul.f32 %v9564_v41, %v2098_v29  ;;  %v4334_v13 = vld [vmem:[#allocation3 + $0xa0] sm:$0xf] }
 0x1e5   : > { %v4271_v56 = vsel %vm4211_vm1, %v4181_v23, %v4241_v62  ;;  %v1455_v46 = vsel %vm1400_vm3, %v15243_v12, %v15242_v27  ;;  %v1908_v31 = vrot.slane %v1796_v2, 4  ;;  %v4462_v32 = vrot.slane %v11228_v21, 1 }
 0x1e6   : > { %v4180_v54 = vadd.f32 %v10975_v33, %v4146_v24  ;;  %4301 = vst.msk [vmem:[#allocation3 + $0xca] sm:$0xff] %vm488_vm8, %v4271_v56  ;;  %v1527_v62 = vadd.f32 %v1455_v46, %v1300_v58  ;;  %v11327_v24 = vmul.f32 %v9566_v42, %v2098_v29  ;;  %v1682_v4 = vsel %vm1627_vm4, %v14963_v34, %v1681_v35  ;;  %v11342_v34 = vpop.permute.xlu0 %2092 }
 0x1e7   : > { %v2162_v44 = vmul.f32 %v9576_v50, %v2098_v29  ;;  %v4463_v38 = vrot.slane %v11230_v15, 1  ;;  %v15244_v60 = vrot.slane %v11297_v52, 4  ;;  %v4465_v35 = vrot.slane %v4334_v13, 1 }
 0x1e8   : > { %vm4210_vm6 = vcmp.gt.f32.partialorder %v4180_v54, 0.0  ;;  %v4240_v23 = vmul.f32 0.1, %v4180_v54  ;;  %v1754_v12 = vadd.f32 %v1682_v4, %v1527_v62  ;;  %v4672_v62 = vrot.slane %v11228_v21, 2  ;;  %v2264_v4 = vpop.permute.xlu2 %2263 }
 0x1e9   : > { %v1909_v2 = vsel %vm1854_vm5, %v15244_v60, %v1908_v31  ;;  %v15245_v46 = vrot.slane %v11070_v17, 1  ;;  %v15246_v58 = vrot.slane %v11324_v39, 1  ;;  %v4466_v63 = vsel %vm1173_vm2, %v4463_v38, %v4465_v35 }
 0x1ea   : > { %v4270_v56 = vsel %vm4210_vm6, %v4180_v54, %v4240_v23  ;;  %v1981_v27 = vadd.f32 %v1909_v2, %v1754_v12  ;;  %v4464_v23 = vsel %vm1173_vm2, %v4462_v32, %v4463_v38  ;;  %v4673_v60 = vrot.slane %v11230_v15, 2 }
 0x1eb   : > { %4300 = vst.msk [vmem:[#allocation3 + $0xc2] sm:$0xff] %vm488_vm8, %v4270_v56  ;;  %v2421_v56 = vsel %vm1173_vm2, %v15246_v58, %v15245_v46  ;;  %v4675_v31 = vrot.slane %v4334_v13, 2  ;;  %v11354_v12 = vpack.c.bf16 %v4466_v63, %v4464_v23  ;;  %v4819_v2 = vrot.slane %v11228_v21, 3 }
 0x1ec   : > { %v2192_v43 = vadd.f32 %v2162_v44, %v1981_v27  ;;  %v4820_v32 = vrot.slane %v11230_v15, 3  ;;  %v11359_v54 = vmul.f32 %v9572_v45, %v2098_v29  ;;  %v4674_v17 = vsel %vm1400_vm3, %v4672_v62, %v4673_v60 }
 0x1ed   : > { %15247 = vst [vmem:[#allocation93_spill] sm:$0xff] %v11354_v12  ;;  %v4676_v19 = vsel %vm1400_vm3, %v4673_v60, %v4675_v31  ;;  %v4822_v46 = vrot.slane %v4334_v13, 3  ;;  %8379 = vmatmul.msk.bf16.gmra.mxu0 %vm488_vm8, %v11354_v12  ;;  %v1113_v21 = vmul.f32 %v9556_v37, %v11110_v14  ;;  %v11371_v15 = vmul.f32 %v9578_v51, %v2098_v29  ;;  %v11378_v13 = vpop.permute.xlu1 %923 }
 0x1ee   : > { %v2493_v58 = vadd.f32 %v2421_v56, %v2192_v43  ;;  %v11365_v38 = vpack.c.bf16 %v4676_v19, %v4674_v17  ;;  %v4821_v63 = vsel %vm1627_vm4, %v4819_v2, %v4820_v32  ;;  %v1340_v27 = vmul.f32 %v9574_v47, %v11110_v14  ;;  %15249 = vst [vmem:[#allocation95_spill] sm:$0xff] %v11378_v13 }
 0x1ef   : > { %v4823_v44 = vsel %vm1627_vm4, %v4820_v32, %v4822_v46  ;;  %v1567_v43 = vmul.f32 %v9593_v59, %v11110_v14  ;;  %v15250_v19 = vrot.slane %v11106_v26, 2  ;;  %v15251_v35 = vrot.slane %v11327_v24, 2 }
 0x1f0   : > { %15248 = vst [vmem:[#allocation94_spill] sm:$0xff] %v11365_v38  ;;  %8409 = vmatmul.msk.bf16.gmra.mxu2 %vm488_vm8, %v11365_v38  ;;  %v11387_v29 = vpack.c.bf16 %v4823_v44, %v4821_v63  ;;  %v1224_v62 = vrot.slane %v1113_v21, 1  ;;  %v1794_v56 = vmul.f32 %v9618_v11, %v11110_v14  ;;  %v2870_v31 = vrot.slane %v11359_v54, 3 }
 0x1f1   : > { %v2647_v23 = vsel %vm1400_vm3, %v15251_v35, %v15250_v19  ;;  %v967_v2 = vmul.f32 %v15147_v40, %v11110_v14  ;;  %v1451_v26 = vrot.slane %v1340_v27, 2  ;;  %v15253_v32 = vrot.slane %v11280_v0, 1  ;;  %v11409_v19 = vpop.permute.xlu0 %918 }
 0x1f2   : > { %15252 = vst [vmem:[#allocation96_spill] sm:$0xff] %v11387_v29  ;;  %v2719_v60 = vadd.f32 %v2647_v23, %v2493_v58  ;;  %8424 = vmatmul.msk.bf16.gmra.mxu3 %vm488_vm8, %v11387_v29  ;;  %v1678_v46 = vrot.slane %v1567_v43, 3  ;;  %v2307_v63 = vmul.f32 %v9564_v41, %v11342_v34  ;;  %v2533_v58 = vmul.f32 %v9566_v42, %v11342_v34  ;;  %v11427_v29 = vpop.permute.xlu2 %1074 }
 0x1f3   : > { %v1226_v17 = vsel %vm1173_vm2, %v1224_v62, %v15253_v32  ;;  %v11405_v21 = vmul.f32 %v9564_v41, %v2264_v4  ;;  %v2759_v27 = vmul.f32 %v9572_v45, %v11342_v34  ;;  %15254 = vst [vmem:[#allocation97_spill] sm:$0xff] %v11409_v19  ;;  %v11412_v0 = vmul.f32 %v9566_v42, %v2264_v4 }
 0x1f4   : > { %v1299_v44 = vadd.f32 %v1226_v17, %v967_v2  ;;  %v11415_v43 = vmul.f32 %v9572_v45, %v2264_v4  ;;  %v15255_v35 = vrot.slane %v11284_v22, 2  ;;  %v1905_v62 = vrot.slane %v1794_v56, 4  ;;  %15257 = vst [vmem:[#allocation98_spill] sm:$0xff] %v11427_v29 }
 0x1f5   : > { %v11421_v32 = vmul.f32 %v9578_v51, %v2264_v4  ;;  %v15256_v2 = vrot.slane %v11114_v10, 3  ;;  %v3096_v54 = vrot.slane %v11371_v15, 4  ;;  %v15258_v14 = vrot.slane %v11290_v61, 3  ;;  %v11512_v15 = vld [vmem:[#allocation3 + $0xc0] sm:$0xff] }
 0x1f6   : > { %v1453_v23 = vsel %vm1400_vm3, %v1451_v26, %v15255_v35  ;;  %v2417_v53 = vrot.slane %v2307_v63, 1  ;;  %v2643_v26 = vrot.slane %v2533_v58, 2  ;;  %v2161_v4 = vmul.f32 %v9576_v50, %v11342_v34 }
 0x1f7   : > { %v2873_v17 = vsel %vm1627_vm4, %v2870_v31, %v15256_v2  ;;  %v1526_v38 = vadd.f32 %v1453_v23, %v1299_v44  ;;  %v1680_v22 = vsel %vm1627_vm4, %v1678_v46, %v15258_v14  ;;  %v2869_v35 = vrot.slane %v2759_v27, 3  ;;  %v11453_v27 = vpop.permute.xlu1 %913 }
 0x1f8   : > { %v2945_v12 = vadd.f32 %v2873_v17, %v2719_v60  ;;  %v2985_v10 = vmul.f32 %v9578_v51, %v11342_v34  ;;  %v15259_v60 = vrot.slane %v11297_v52, 4  ;;  %v11443_v14 = vmul.f32 %v9556_v37, %v11427_v29  ;;  %15263 = vst [vmem:[#allocation101_spill] sm:$0xff] %v11453_v27 }
 0x1f9   : > { %v1753_v56 = vadd.f32 %v1680_v22, %v1526_v38  ;;  %v15261_v46 = vrot.slane %v11139_v5, 4  ;;  %v11451_v34 = vmul.f32 %v9574_v47, %v11427_v29  ;;  %v15265_v17 = vrot.slane %v11327_v24, 2 }
 0x1fa   : > { %v1907_v61 = vsel %vm1854_vm5, %v1905_v62, %v15259_v60  ;;  %15260 = vst [vmem:[#allocation99_spill] sm:$0xff] %v11443_v14  ;;  %v15264_v62 = vrot.slane %v11324_v39, 1  ;;  %v3095_v60 = vrot.slane %v2985_v10, 4  ;;  %v3514_v39 = vmul.f32 %v9656_v28, %v11453_v27 }
 0x1fb   : > { %v3099_v63 = vsel %vm1854_vm5, %v3096_v54, %v15261_v46  ;;  %v1980_v58 = vadd.f32 %v1907_v61, %v1753_v56  ;;  %15262 = vst [vmem:[#allocation100_spill] sm:$0xff] %v11451_v34  ;;  %v2645_v5 = vsel %vm1400_vm3, %v2643_v26, %v15265_v17  ;;  %v2871_v56 = vsel %vm1627_vm4, %v2869_v35, %v2870_v31  ;;  %v11483_v35 = vpop.permute.xlu0 %908  ;;  %v11514_v34 = vld [vmem:[#allocation3 + $0xc8] sm:$0xff] }
 0x1fc   : > { %v3171_v23 = vadd.f32 %v3099_v63, %v2945_v12  ;;  %v2419_v2 = vsel %vm1173_vm2, %v2417_v53, %v15264_v62  ;;  %v11465_v61 = vmul.f32 %v9593_v59, %v11427_v29  ;;  %v3212_v12 = vmul.f32 %v15148_v30, %v11453_v27  ;;  %15267 = vst [vmem:[#allocation103_spill] sm:$0xff] %v11483_v35 }
 0x1fd   : > { %v2191_v22 = vadd.f32 %v2161_v4, %v1980_v58  ;;  %v3288_v53 = vmul.f32 %v9651_v48, %v11453_v27  ;;  %v11477_v31 = vmul.f32 %v9651_v48, %v11427_v29  ;;  %v11481_v4 = vmul.f32 %v9656_v28, %v11427_v29 }
 0x1fe   : > { %15266 = vst [vmem:[#allocation102_spill] sm:$0xff] %v11465_v61  ;;  %v11487_v10 = vmul.f32 %v9667_v9, %v11427_v29  ;;  %v3242_v63 = vadd.f32 %v3212_v12, %v3171_v23  ;;  %v3624_v62 = vrot.slane %v3514_v39, 2  ;;  %v11491_v17 = vmul.f32 %v9670_v16, %v11427_v29 }
 0x1ff   : > { %v2492_v24 = vadd.f32 %v2419_v2, %v2191_v22  ;;  %v3398_v58 = vrot.slane %v3288_v53, 1  ;;  %v3740_v22 = vmul.f32 %v9667_v9, %v11453_v27  ;;  %v3966_v26 = vmul.f32 %v9670_v16, %v11453_v27 }
 0x200   : > { %v3097_v46 = vsel %vm1854_vm5, %v3095_v60, %v3096_v54  ;;  %v15268_v52 = vrot.slane %v11267_v3, 1  ;;  %v3287_v23 = vmul.f32 %v9651_v48, %v11483_v35  ;;  %v15269_v44 = vrot.slane %v11271_v36, 2 }
 0x201   : > { %v2718_v2 = vadd.f32 %v2645_v5, %v2492_v24  ;;  %v3513_v5 = vmul.f32 %v9656_v28, %v11483_v35  ;;  %v3850_v39 = vrot.slane %v3740_v22, 3  ;;  %v3211_v24 = vmul.f32 %v15148_v30, %v11483_v35 }
 0x202   : > { %v3401_v38 = vsel %vm1173_vm2, %v3398_v58, %v15268_v52  ;;  %v3627_v54 = vsel %vm1400_vm3, %v3624_v62, %v15269_v44  ;;  %v4076_v60 = vrot.slane %v3966_v26, 4  ;;  %v3397_v3 = vrot.slane %v3287_v23, 1  ;;  %v11524_v44 = vpop.permute.xlu2 %2208 }
 0x203   : > { %v2944_v12 = vadd.f32 %v2871_v56, %v2718_v2  ;;  %v3473_v53 = vadd.f32 %v3401_v38, %v3242_v63  ;;  %v3739_v52 = vmul.f32 %v9667_v9, %v11483_v35  ;;  %v11518_v38 = vmul.f32 %v9670_v16, %v11378_v13 }
 0x204   : > { %v11522_v56 = vmul.f32 %v9670_v16, %v11409_v19  ;;  %v15272_v26 = vrot.slane %v11275_v6, 3  ;;  %v3399_v2 = vsel %vm1173_vm2, %v3397_v3, %v3398_v58  ;;  %v3623_v22 = vrot.slane %v3513_v5, 2 }
 0x205   : > { %v3170_v61 = vadd.f32 %v3097_v46, %v2944_v12  ;;  %15270 = vst [vmem:[#allocation104_spill] sm:$0xff] %v11518_v38  ;;  %v3699_v36 = vadd.f32 %v3627_v54, %v3473_v53  ;;  %v3965_v46 = vmul.f32 %v9670_v16, %v11483_v35  ;;  %v3849_v14 = vrot.slane %v3739_v52, 3 }
 0x206   : > { %15271 = vst [vmem:[#allocation105_spill] sm:$0xff] %v11522_v56  ;;  %v3853_v63 = vsel %vm1627_vm4, %v3850_v39, %v15272_v26  ;;  %v11534_v29 = vpack.c.bf16 %v11514_v34, %v11512_v15  ;;  %v15274_v26 = vrot.slane %v11303_v55, 4  ;;  %v11551_v52 = vmul.f32 %v9566_v42, %v11524_v44 }
 0x207   : > { %v3925_v23 = vadd.f32 %v3853_v63, %v3699_v36  ;;  %v3241_v12 = vadd.f32 %v3211_v24, %v3170_v61  ;;  %v11545_v61 = vmul.f32 %v9564_v41, %v11524_v44  ;;  %v3625_v36 = vsel %vm1400_vm3, %v3623_v22, %v3624_v62 }
 0x208   : > { %15273 = vst [vmem:[#allocation106_spill] sm:$0xff] %v11534_v29  ;;  %v4079_v58 = vsel %vm1854_vm5, %v4076_v60, %v15274_v26  ;;  %8395 = vmatmul.msk.bf16.gmra.mxu1 %vm488_vm8, %v11534_v29  ;;  %v4075_v55 = vrot.slane %v3965_v46, 4  ;;  %v11556_v63 = vmul.f32 %v9556_v37, %v11378_v13  ;;  %v11569_v62 = vmul.f32 %v9593_v59, %v11378_v13 }
 0x209   : > { %v4151_v24 = vadd.f32 %v4079_v58, %v3925_v23  ;;  %v3472_v3 = vadd.f32 %v3399_v2, %v3241_v12  ;;  %v3851_v23 = vsel %vm1627_vm4, %v3849_v14, %v3850_v39  ;;  %v11562_v2 = vmul.f32 %v9574_v47, %v11378_v13 }
 0x20a   : > { %v972_v12 = vmul.f32 %v15147_v40, %v11378_v13  ;;  %v14984_v58 = vrot.slane %v11556_v63, 1  ;;  %v11573_v22 = vmul.f32 %v9618_v11, %v11378_v13  ;;  %v14982_v54 = vrot.slane %v11569_v62, 3 }
 0x20b   : > { %v4185_v26 = vadd.f32 %v10975_v33, %v4151_v24  ;;  %v3698_v5 = vadd.f32 %v3625_v36, %v3472_v3  ;;  %v14981_v39 = vrot.slane %v11562_v2, 2  ;;  %v2118_v24 = vpop.permute.xlu1 %2117  ;;  %v4077_v3 = vsel %vm1854_vm5, %v4075_v55, %v4076_v60  ;;  %v9030_v60 = vld [vmem:[%s14858_s3 + $0x60] sm:$0xff]  ;;  %v9028_v55 = vld [vmem:[%s14858_s3 + $0x50] sm:$0xff] }
 0x20c   : > { %v15275_v36 = vrot.slane %v11148_v20, 1  ;;  %v1802_v53 = vmul.f32 %v9618_v11, %v11128_v8  ;;  %v9026_v20 = vld [vmem:[%s14858_s3 + $0x40] sm:$0xff]  ;;  %v11597_v8 = vmul.f32 %v9572_v45, %v11524_v44  ;;  %5313 = vmatpush.bf16.msrb.mxu2 %v9030_v60  ;;  %5145 = vmatpush.bf16.msrb.mxu1 %v9028_v55  ;;  %v11630_v60 = vmul.f32 %v9578_v51, %v2118_v24 }
 0x20d   : > { %vm4215_vm7 = vcmp.gt.f32.partialorder %v4185_v26, 0.0  ;;  %v4245_v46 = vmul.f32 0.1, %v4185_v26  ;;  %v3924_v14 = vadd.f32 %v3851_v23, %v3698_v5  ;;  %v1691_v5 = vrot.slane %v11181_v49, 3  ;;  %5047 = vmatpush.bf16.msrb.mxu0 %v9026_v20 }
 0x20e   : > { %v1238_v6 = vsel %vm1173_vm2, %v14984_v58, %v15275_v36  ;;  %v15276_v49 = vrot.slane %v11152_v18, 2  ;;  %v11607_v23 = vmul.f32 %v9564_v41, %v2118_v24  ;;  %v1918_v18 = vrot.slane %v1802_v53, 4 }
 0x20f   : > { %v4275_v29 = vsel %vm4215_vm7, %v4185_v26, %v4245_v46  ;;  %v4150_v56 = vadd.f32 %v4077_v3, %v3924_v14  ;;  %v1304_v35 = vadd.f32 %v1238_v6, %v972_v12  ;;  %v14983_v26 = vrot.slane %v11573_v22, 4 }
 0x210   : > { %4305 = vst.msk [vmem:[#allocation3 + $0xfa] sm:$0xff] %vm488_vm8, %v4275_v29  ;;  %v1465_v6 = vsel %vm1400_vm3, %v14981_v39, %v15276_v49  ;;  %v1692_v14 = vsel %vm1627_vm4, %v14982_v54, %v1691_v5  ;;  %v11614_v29 = vmul.f32 %v9566_v42, %v2118_v24  ;;  %v14985_v3 = vrot.slane %v11607_v23, 1  ;;  %v4340_v49 = vld [vmem:[#allocation3 + $0xd0] sm:$0xf] }
 0x211   : > { %v4184_v12 = vadd.f32 %v10975_v33, %v4150_v56  ;;  %v1531_v46 = vadd.f32 %v1465_v6, %v1304_v35  ;;  %v11618_v36 = vmul.f32 %v9572_v45, %v2118_v24  ;;  %v4467_v39 = vrot.slane %v11512_v15, 1 }
 0x212   : > { %v2166_v56 = vmul.f32 %v9576_v50, %v2118_v24  ;;  %v11624_v5 = vmul.f32 %v9578_v51, %v11524_v44  ;;  %v1919_v53 = vsel %vm1854_vm5, %v14983_v26, %v1918_v18  ;;  %v4468_v6 = vrot.slane %v11514_v34, 1 }
 0x213   : > { %vm4214_vm9 = vcmp.gt.f32.partialorder %v4184_v12, 0.0  ;;  %v4244_v33 = vmul.f32 0.1, %v4184_v12  ;;  %v1758_v35 = vadd.f32 %v1692_v14, %v1531_v46  ;;  %v4470_v46 = vrot.slane %v4340_v49, 1 }
 0x214   : > { %v15277_v14 = vrot.slane %v11405_v21, 1  ;;  %v4469_v24 = vsel %vm1173_vm2, %v4467_v39, %v4468_v6  ;;  %v4677_v26 = vrot.slane %v11512_v15, 2  ;;  %v4824_v21 = vrot.slane %v11512_v15, 3 }
 0x215   : > { %v4274_v20 = vsel %vm4214_vm9, %v4184_v12, %v4244_v33  ;;  %v1985_v55 = vadd.f32 %v1919_v53, %v1758_v35  ;;  %v4471_v12 = vsel %vm1173_vm2, %v4468_v6, %v4470_v46  ;;  %v4678_v33 = vrot.slane %v11514_v34, 2 }
 0x216   : > { %4304 = vst.msk [vmem:[#allocation3 + $0xf2] sm:$0xff] %vm488_vm8, %v4274_v20  ;;  %v2431_v44 = vsel %vm1173_vm2, %v14985_v3, %v15277_v14  ;;  %v4680_v35 = vrot.slane %v4340_v49, 2  ;;  %v11645_v53 = vpack.c.bf16 %v4471_v12, %v4469_v24  ;;  %v4825_v20 = vrot.slane %v11514_v34, 3 }
 0x217   : > { %v2196_v58 = vadd.f32 %v2166_v56, %v1985_v55  ;;  %v4827_v54 = vrot.slane %v4340_v49, 3  ;;  %v15279_v3 = vrot.slane %v11412_v0, 2  ;;  %v15280_v39 = vrot.slane %v11614_v29, 2  ;;  %v2113_v55 = vpop.permute.xlu0 %2112 }
 0x218   : > { %15278 = vst [vmem:[#allocation107_spill] sm:$0xff] %v11645_v53  ;;  %v4679_v56 = vsel %vm1400_vm3, %v4677_v26, %v4678_v33  ;;  %v4681_v6 = vsel %vm1400_vm3, %v4678_v33, %v4680_v35  ;;  %8380 = vmatmul.msk.bf16.gmra.mxu0 %vm488_vm8, %v11645_v53  ;;  %v4826_v15 = vsel %vm1627_vm4, %v4824_v21, %v4825_v20  ;;  %v15284_v35 = vrot.slane %v11618_v36, 3 }
 0x219   : > { %v2497_v14 = vadd.f32 %v2431_v44, %v2196_v58  ;;  %v2657_v18 = vsel %vm1400_vm3, %v15280_v39, %v15279_v3  ;;  %v11658_v46 = vpack.c.bf16 %v4681_v6, %v4679_v56  ;;  %v4828_v34 = vsel %vm1627_vm4, %v4825_v20, %v4827_v54  ;;  %v2219_v58 = vpop.permute.xlu2 %2218 }
 0x21a   : > { %v1119_v0 = vmul.f32 %v9556_v37, %v11409_v19  ;;  %v11664_v3 = vpack.c.bf16 %v4828_v34, %v4826_v15  ;;  %v1346_v26 = vmul.f32 %v9574_v47, %v11409_v19  ;;  %v1573_v44 = vmul.f32 %v9593_v59, %v11409_v19 }
 0x21b   : > { %15281 = vst [vmem:[#allocation108_spill] sm:$0xff] %v11658_v46  ;;  %v2723_v49 = vadd.f32 %v2657_v18, %v2497_v14  ;;  %8410 = vmatmul.msk.bf16.gmra.mxu2 %vm488_vm8, %v11658_v46  ;;  %v1800_v54 = vmul.f32 %v9618_v11, %v11409_v19  ;;  %v2313_v33 = vmul.f32 %v9564_v41, %v2113_v55  ;;  %v15283_v18 = vrot.slane %v11415_v43, 3 }
 0x21c   : > { %15282 = vst [vmem:[#allocation109_spill] sm:$0xff] %v11664_v3  ;;  %v1234_v12 = vrot.slane %v1119_v0, 1  ;;  %8425 = vmatmul.msk.bf16.gmra.mxu3 %vm488_vm8, %v11664_v3  ;;  %v971_v14 = vmul.f32 %v15147_v40, %v11409_v19  ;;  %v1461_v39 = vrot.slane %v1346_v26, 2  ;;  %v11687_v56 = vmul.f32 %v9564_v41, %v2219_v58 }
 0x21d   : > { %v2883_v21 = vsel %vm1627_vm4, %v15284_v35, %v15283_v18  ;;  %v15285_v15 = vrot.slane %v11556_v63, 1  ;;  %v1688_v34 = vrot.slane %v1573_v44, 3  ;;  %v11695_v35 = vmul.f32 %v9566_v42, %v2219_v58 }
 0x21e   : > { %v2949_v6 = vadd.f32 %v2883_v21, %v2723_v49  ;;  %v15286_v26 = vrot.slane %v11562_v2, 2  ;;  %v1915_v49 = vrot.slane %v1800_v54, 4  ;;  %v2427_v21 = vrot.slane %v2313_v33, 1 }
 0x21f   : > { %v1236_v43 = vsel %vm1173_vm2, %v1234_v12, %v15285_v15  ;;  %v11702_v63 = vmul.f32 %v9572_v45, %v2219_v58  ;;  %v15287_v44 = vrot.slane %v11421_v32, 4  ;;  %v15288_v12 = vrot.slane %v11630_v60, 4 }
 0x220   : > { %v1303_v24 = vadd.f32 %v1236_v43, %v971_v14  ;;  %v1463_v46 = vsel %vm1400_vm3, %v1461_v39, %v15286_v26  ;;  %v2539_v14 = vmul.f32 %v9566_v42, %v2113_v55  ;;  %v11710_v43 = vpop.permute.xlu1 %933  ;;  %v11714_v39 = vmul.f32 %v9578_v51, %v2219_v58 }
 0x221   : > { %v3109_v15 = vsel %vm1854_vm5, %v15288_v12, %v15287_v44  ;;  %15289 = vst [vmem:[#allocation110_spill] sm:$0xff] %v11710_v43  ;;  %v15290_v33 = vrot.slane %v11569_v62, 3  ;;  %v2165_v44 = vmul.f32 %v9576_v50, %v2113_v55  ;;  %v15292_v2 = vrot.slane %v11607_v23, 1 }
 0x222   : > { %v1530_v18 = vadd.f32 %v1463_v46, %v1303_v24  ;;  %v3175_v54 = vadd.f32 %v3109_v15, %v2949_v6  ;;  %v2765_v46 = vmul.f32 %v9572_v45, %v2113_v55  ;;  %v15291_v24 = vrot.slane %v11573_v22, 4 }
 0x223   : > { %v1690_v26 = vsel %vm1627_vm4, %v1688_v34, %v15290_v33  ;;  %v2429_v58 = vsel %vm1173_vm2, %v2427_v21, %v15292_v2  ;;  %v3216_v62 = vmul.f32 %v15148_v30, %v11710_v43  ;;  %v3294_v6 = vmul.f32 %v9651_v48, %v11710_v43  ;;  %v2229_v21 = vpop.permute.xlu2 %2228 }
 0x224   : > { %v1757_v20 = vadd.f32 %v1690_v26, %v1530_v18  ;;  %v1917_v12 = vsel %vm1854_vm5, %v1915_v49, %v15291_v24  ;;  %v2653_v18 = vrot.slane %v2539_v14, 2  ;;  %v11734_v15 = vmul.f32 %v9656_v28, %v11710_v43  ;;  %v11740_v49 = vpop.permute.xlu0 %928 }
 0x225   : > { %v11738_v22 = vmul.f32 %v9667_v9, %v11710_v43  ;;  %15293 = vst [vmem:[#allocation111_spill] sm:$0xff] %v11740_v49  ;;  %v2991_v23 = vmul.f32 %v9578_v51, %v2113_v55  ;;  %v3246_v2 = vadd.f32 %v3216_v62, %v3175_v54  ;;  %v3408_v33 = vrot.slane %v3294_v6, 1 }
 0x226   : > { %v1984_v34 = vadd.f32 %v1917_v12, %v1757_v20  ;;  %v11745_v26 = vmul.f32 %v9670_v16, %v11710_v43  ;;  %v3634_v12 = vrot.slane %v11734_v15, 2  ;;  %v2879_v32 = vrot.slane %v2765_v46, 3 }
 0x227   : > { %v15294_v0 = vrot.slane %v11477_v31, 1  ;;  %v3860_v55 = vrot.slane %v11738_v22, 3  ;;  %v3293_v54 = vmul.f32 %v9651_v48, %v11740_v49  ;;  %v15295_v6 = vrot.slane %v11614_v29, 2 }
 0x228   : > { %v2195_v24 = vadd.f32 %v2165_v44, %v1984_v34  ;;  %v11760_v14 = vmul.f32 %v9564_v41, %v2229_v21  ;;  %v3105_v34 = vrot.slane %v2991_v23, 4  ;;  %v15296_v46 = vrot.slane %v11481_v4, 2  ;;  %v2008_v27 = vpop.permute.xlu1 %2007 }
 0x229   : > { %v3411_v3 = vsel %vm1173_vm2, %v3408_v33, %v15294_v0  ;;  %v2655_v20 = vsel %vm1400_vm3, %v2653_v18, %v15295_v6  ;;  %v4086_v0 = vrot.slane %v11745_v26, 4  ;;  %v3519_v15 = vmul.f32 %v9656_v28, %v11740_v49 }
 0x22a   : > { %v2496_v62 = vadd.f32 %v2429_v58, %v2195_v24  ;;  %v3477_v44 = vadd.f32 %v3411_v3, %v3246_v2  ;;  %v3637_v31 = vsel %vm1400_vm3, %v3634_v12, %v15296_v46  ;;  %v11769_v58 = vmul.f32 %v9566_v42, %v2229_v21 }
 0x22b   : > { %v3745_v18 = vmul.f32 %v9667_v9, %v11740_v49  ;;  %v15297_v3 = vrot.slane %v11618_v36, 3  ;;  %v11777_v4 = vmul.f32 %v9572_v45, %v2229_v21  ;;  %v15298_v2 = vrot.slane %v11487_v10, 3  ;;  %v11833_v38 = vpop.permute.xlu2 %2238 }
 0x22c   : > { %v2722_v22 = vadd.f32 %v2655_v20, %v2496_v62  ;;  %v3703_v29 = vadd.f32 %v3637_v31, %v3477_v44  ;;  %v3407_v24 = vrot.slane %v3293_v54, 1  ;;  %v11784_v6 = vmul.f32 %v9578_v51, %v2229_v21 }
 0x22d   : > { %v2881_v23 = vsel %vm1627_vm4, %v2879_v32, %v15297_v3  ;;  %v3863_v26 = vsel %vm1627_vm4, %v3860_v55, %v15298_v2  ;;  %v15299_v46 = vrot.slane %v11630_v60, 4  ;;  %v15300_v32 = vrot.slane %v11491_v17, 4  ;;  %v15301_v2 = vld [vmem:[#allocation25_spill] sm:$0xff] }
 0x22e   : > { %v2948_v20 = vadd.f32 %v2881_v23, %v2722_v22  ;;  %v3929_v44 = vadd.f32 %v3863_v26, %v3703_v29  ;;  %v3215_v10 = vmul.f32 %v15148_v30, %v11740_v49  ;;  %v3633_v3 = vrot.slane %v3519_v15, 2  ;;  %v11812_v15 = vld [vmem:[%s14857_s2] ss:$0 sm:$0xff] }
 0x22f   : > { %v3107_v36 = vsel %vm1854_vm5, %v3105_v34, %v15299_v46  ;;  %v4089_v31 = vsel %vm1854_vm5, %v4086_v0, %v15300_v32  ;;  %v3859_v23 = vrot.slane %v3745_v18, 3  ;;  %v11796_v21 = vmul.f32 %v9556_v37, %v15301_v2 }
 0x230   : > { %v3174_v54 = vadd.f32 %v3107_v36, %v2948_v20  ;;  %v4155_v22 = vadd.f32 %v4089_v31, %v3929_v44  ;;  %v3409_v29 = vsel %vm1173_vm2, %v3407_v24, %v3408_v33  ;;  %v3971_v60 = vmul.f32 %v9670_v16, %v11740_v49  ;;  %v15302_v36 = vld [vmem:[#allocation8_spill] sm:$0xff] }
 0x231   : > { %v11803_v17 = vmul.f32 %v9574_v47, %v15301_v2  ;;  %v11807_v34 = vmul.f32 %v9593_v59, %v15301_v2  ;;  %v950_v33 = vmul.f32 %v15147_v40, %v15301_v2  ;;  %v1180_v24 = vrot.slane %v11796_v21, 1  ;;  %v15305_v49 = vld [vmem:[#allocation16_spill] sm:$0xff] }
 0x232   : > { %v4189_v18 = vadd.f32 %v11812_v15, %v4155_v22  ;;  %v3245_v26 = vadd.f32 %v3215_v10, %v3174_v54  ;;  %v11822_v46 = vmul.f32 %v9618_v11, %v15301_v2  ;;  %v1769_v32 = vmul.f32 %v9618_v11, %v15302_v36  ;;  %v15303_v10 = vld [vmem:[#allocation14_spill] sm:$0xff]  ;;  %v15306_v36 = vld [vmem:[#allocation15_spill] sm:$0xff] }
 0x233   : > { %v15304_v54 = vrot.slane %v15303_v10, 1  ;;  %v3635_v20 = vsel %vm1400_vm3, %v3633_v3, %v3634_v12  ;;  %v4085_v53 = vrot.slane %v3971_v60, 4  ;;  %v1636_v43 = vrot.slane %v15305_v49, 3 }
 0x234   : > { %vm4219_vm10 = vcmp.gt.f32.partialorder %v4189_v18, 0.0  ;;  %v4249_v31 = vmul.f32 0.1, %v4189_v18  ;;  %v3476_v22 = vadd.f32 %v3409_v29, %v3245_v26  ;;  %v15307_v13 = vrot.slane %v15306_v36, 2 }
 0x235   : > { %v1183_v62 = vsel %vm1173_vm2, %v1180_v24, %v15304_v54  ;;  %v15308_v29 = vrot.slane %v11803_v17, 2  ;;  %v15000_v10 = vrot.slane %v11822_v46, 4  ;;  %v3861_v49 = vsel %vm1627_vm4, %v3859_v23, %v3860_v55 }
 0x236   : > { %v1282_v44 = vadd.f32 %v1183_v62, %v950_v33  ;;  %v4279_v2 = vsel %vm4219_vm10, %v4189_v18, %v4249_v31  ;;  %v3702_v19 = vadd.f32 %v3635_v20, %v3476_v22  ;;  %v15309_v18 = vrot.slane %v11807_v34, 3 }
 0x237   : > { %v1410_v26 = vsel %vm1400_vm3, %v15308_v29, %v15307_v13  ;;  %4309 = vst.msk [vmem:[#allocation3 + $0x12a] sm:$0xff] %vm488_vm8, %v4279_v2  ;;  %v1863_v13 = vrot.slane %v1769_v32, 4  ;;  %v4087_v20 = vsel %vm1854_vm5, %v4085_v53, %v4086_v0  ;;  %v11852_v31 = vmul.f32 %v9564_v41, %v11833_v38  ;;  %v15310_v53 = vld [vmem:[#allocation17_spill] sm:$0xff] }
 0x238   : > { %v1509_v62 = vadd.f32 %v1410_v26, %v1282_v44  ;;  %v3928_v60 = vadd.f32 %v3861_v49, %v3702_v19  ;;  %v1637_v33 = vsel %vm1627_vm4, %v15309_v18, %v1636_v43  ;;  %v2144_v2 = vmul.f32 %v9576_v50, %v2008_v27 }
 0x239   : > { %v1864_v55 = vsel %vm1854_vm5, %v15000_v10, %v1863_v13  ;;  %v11859_v19 = vmul.f32 %v9564_v41, %v2008_v27  ;;  %v11862_v43 = vmul.f32 %v9566_v42, %v2008_v27  ;;  %v11866_v0 = vmul.f32 %v9651_v48, %v15310_v53 }
 0x23a   : > { %v1736_v22 = vadd.f32 %v1637_v33, %v1509_v62  ;;  %v4154_v36 = vadd.f32 %v4087_v20, %v3928_v60  ;;  %v11870_v44 = vmul.f32 %v9656_v28, %v15310_v53  ;;  %v11874_v32 = vmul.f32 %v9667_v9, %v15310_v53  ;;  %v15311_v33 = vld [vmem:[#allocation26_spill] sm:$0xff] }
 0x23b   : > { %v2373_v26 = vrot.slane %v11859_v19, 1  ;;  %v15001_v49 = vrot.slane %v11862_v43, 2  ;;  %v11880_v62 = vmul.f32 %v9572_v45, %v2008_v27  ;;  %v11883_v18 = vmul.f32 %v9578_v51, %v2008_v27 }
 0x23c   : > { %v1963_v23 = vadd.f32 %v1864_v55, %v1736_v22  ;;  %v4188_v29 = vadd.f32 %v11812_v15, %v4154_v36  ;;  %v949_v13 = vmul.f32 %v15147_v40, %v15311_v33  ;;  %v1086_v20 = vmul.f32 %v9556_v37, %v15311_v33 }
 0x23d   : > { %v15312_v36 = vrot.slane %v11545_v61, 1  ;;  %v15313_v19 = vrot.slane %v11551_v52, 2  ;;  %v15007_v3 = vrot.slane %v11883_v18, 4  ;;  %v1313_v10 = vmul.f32 %v9574_v47, %v15311_v33 }
 0x23e   : > { %v2174_v60 = vadd.f32 %v2144_v2, %v1963_v23  ;;  %vm4218_vm11 = vcmp.gt.f32.partialorder %v4188_v29, 0.0  ;;  %v4248_v22 = vmul.f32 0.1, %v4188_v29  ;;  %v15002_v23 = vrot.slane %v11880_v62, 3 }
 0x23f   : > { %v2376_v55 = vsel %vm1173_vm2, %v2373_v26, %v15312_v36  ;;  %v2602_v2 = vsel %vm1400_vm3, %v15001_v49, %v15313_v19  ;;  %v1179_v12 = vrot.slane %v1086_v20, 1  ;;  %v1540_v61 = vmul.f32 %v9593_v59, %v15311_v33 }
 0x240   : > { %v2475_v27 = vadd.f32 %v2376_v55, %v2174_v60  ;;  %v4278_v54 = vsel %vm4218_vm11, %v4188_v29, %v4248_v22  ;;  %v1767_v52 = vmul.f32 %v9618_v11, %v15311_v33  ;;  %v15314_v20 = vrot.slane %v11597_v8, 3 }
 0x241   : > { %4308 = vst.msk [vmem:[#allocation3 + $0x122] sm:$0xff] %vm488_vm8, %v4278_v54  ;;  %v1181_v29 = vsel %vm1173_vm2, %v1179_v12, %v1180_v24  ;;  %v1406_v49 = vrot.slane %v1313_v10, 2  ;;  %v1633_v33 = vrot.slane %v1540_v61, 3  ;;  %v11919_v36 = vmul.f32 %v9566_v42, %v11833_v38  ;;  %v2003_v12 = vpop.permute.xlu0 %2002 }
 0x242   : > { %v2701_v55 = vadd.f32 %v2602_v2, %v2475_v27  ;;  %v2828_v22 = vsel %vm1627_vm4, %v15002_v23, %v15314_v20  ;;  %v1281_v19 = vadd.f32 %v1181_v29, %v949_v13  ;;  %v11923_v21 = vmul.f32 %v9572_v45, %v11833_v38  ;;  %v15318_v20 = vld [vmem:[#allocation29_spill] sm:$0xff]  ;;  %v15319_v23 = vld [vmem:[#allocation10_spill] sm:$0xff] }
 0x243   : > { %v3194_v8 = vmul.f32 %v15148_v30, %v15310_v53  ;;  %v15316_v2 = vrot.slane %v11624_v5, 4  ;;  %v15317_v13 = vrot.slane %v11803_v17, 2  ;;  %v1860_v61 = vrot.slane %v1767_v52, 4 }
 0x244   : > { %15315 = vst [vmem:[#allocation25_spill] sm:$0xff] %v11923_v21  ;;  %v2927_v24 = vadd.f32 %v2828_v22, %v2701_v55  ;;  %v15010_v29 = vrot.slane %v11874_v32, 3  ;;  %v15320_v60 = vrot.slane %v15319_v23, 1  ;;  %v15321_v53 = vrot.slane %v11866_v0, 1 }
 0x245   : > { %v3054_v10 = vsel %vm1854_vm5, %v15007_v3, %v15316_v2  ;;  %v1408_v27 = vsel %vm1400_vm3, %v1406_v49, %v15317_v13  ;;  %v15323_v16 = vrot.slane %v15322_v1, 2  ;;  %v15324_v2 = vrot.slane %v11870_v44, 2  ;;  %v11956_v1 = vld [vmem:[#allocation3 + $0xf8] sm:$0xff] }
 0x246   : > { %v3153_v55 = vadd.f32 %v3054_v10, %v2927_v24  ;;  %v1508_v22 = vadd.f32 %v1408_v27, %v1281_v19  ;;  %v3356_v5 = vsel %vm1173_vm2, %v15321_v53, %v15320_v60  ;;  %v15325_v49 = vrot.slane %v11807_v34, 3  ;;  %v15326_v10 = vld [vmem:[#allocation18_spill] sm:$0xff]  ;;  %v11954_v60 = vld [vmem:[#allocation3 + $0xf0] sm:$0xff] }
 0x247   : > { %v3582_v17 = vsel %vm1400_vm3, %v15324_v2, %v15323_v16  ;;  %v2280_v13 = vmul.f32 %v9564_v41, %v2003_v12  ;;  %v3260_v23 = vmul.f32 %v9651_v48, %v15326_v10  ;;  %v2143_v27 = vmul.f32 %v9576_v50, %v2003_v12 }
 0x248   : > { %v1635_v52 = vsel %vm1627_vm4, %v1633_v33, %v15325_v49  ;;  %v3224_v24 = vadd.f32 %v3194_v8, %v3153_v55  ;;  %v15327_v53 = vrot.slane %v11822_v46, 4  ;;  %v3486_v34 = vmul.f32 %v9656_v28, %v15326_v10 }
 0x249   : > { %v1735_v19 = vadd.f32 %v1635_v52, %v1508_v22  ;;  %v2372_v33 = vrot.slane %v2280_v13, 1  ;;  %v2506_v8 = vmul.f32 %v9566_v42, %v2003_v12  ;;  %v3712_v2 = vmul.f32 %v9667_v9, %v15326_v10 }
 0x24a   : > { %v1862_v16 = vsel %vm1854_vm5, %v1860_v61, %v15327_v53  ;;  %v3455_v55 = vadd.f32 %v3356_v5, %v3224_v24  ;;  %v2732_v49 = vmul.f32 %v9572_v45, %v2003_v12  ;;  %v2958_v46 = vmul.f32 %v9578_v51, %v2003_v12  ;;  %v15331_v12 = vld [vmem:[#allocation13_spill] sm:$0xff] }
 0x24b   : > { %v1962_v22 = vadd.f32 %v1862_v16, %v1735_v19  ;;  %v2374_v52 = vsel %vm1173_vm2, %v2372_v33, %v2373_v26  ;;  %v2598_v3 = vrot.slane %v2506_v8, 2  ;;  %v11971_v61 = vpack.c.bf16 %v11956_v1, %v11954_v60  ;;  %v15329_v16 = vld [vmem:[#allocation12_spill] sm:$0xff] }
 0x24c   : > { %v11976_v5 = vmul.f32 %v9578_v51, %v11833_v38  ;;  %v3681_v24 = vadd.f32 %v3582_v17, %v3455_v55  ;;  %v15330_v54 = vrot.slane %v15329_v16, 3  ;;  %v15332_v33 = vrot.slane %v15331_v12, 4 }
 0x24d   : > { %15328 = vst [vmem:[#allocation8_spill] sm:$0xff] %v11971_v61  ;;  %v2173_v19 = vadd.f32 %v2143_v27, %v1962_v22  ;;  %v15333_v8 = vrot.slane %v15318_v20, 4  ;;  %v2824_v57 = vrot.slane %v2732_v49, 3  ;;  %8396 = vmatmul.msk.bf16.gmra.mxu1 %vm488_vm8, %v11971_v61  ;;  %v3193_v17 = vmul.f32 %v15148_v30, %v15326_v10  ;;  %v15336_v10 = vld [vmem:[#allocation31_spill] sm:$0xff] }
 0x24e   : > { %v3808_v26 = vsel %vm1627_vm4, %v15010_v29, %v15330_v54  ;;  %v3352_v27 = vrot.slane %v3260_v23, 1  ;;  %v3578_v22 = vrot.slane %v3486_v34, 2  ;;  %v3804_v16 = vrot.slane %v3712_v2, 3 }
 0x24f   : > { %v4034_v13 = vsel %vm1854_vm5, %v15333_v8, %v15332_v33  ;;  %v3907_v38 = vadd.f32 %v3808_v26, %v3681_v24  ;;  %v2474_v55 = vadd.f32 %v2374_v52, %v2173_v19  ;;  %v15334_v54 = vrot.slane %v11862_v43, 2  ;;  %v15335_v33 = vld [vmem:[#allocation34_spill] sm:$0xff]  ;;  %v15344_v19 = vld [vmem:[#allocation28_spill] sm:$0xff] }
 0x250   : > { %v3050_v53 = vrot.slane %v2958_v46, 4  ;;  %v11998_v49 = vmul.f32 %v9556_v37, %v15335_v33  ;;  %v12002_v24 = vmul.f32 %v9574_v47, %v15335_v33  ;;  %v4030_v23 = vrot.slane %v15336_v10, 4 }
 0x251   : > { %v2600_v12 = vsel %vm1400_vm3, %v2598_v3, %v15334_v54  ;;  %v4133_v29 = vadd.f32 %v4034_v13, %v3907_v38  ;;  %v15337_v34 = vrot.slane %v11880_v62, 3  ;;  %v12010_v3 = vmul.f32 %v9593_v59, %v15335_v33  ;;  %v15339_v38 = vld [vmem:[#allocation24_spill] sm:$0xff] }
 0x252   : > { %v2700_v21 = vadd.f32 %v2600_v12, %v2474_v55  ;;  %v12014_v43 = vmul.f32 %v9618_v11, %v15335_v33  ;;  %v1190_v13 = vrot.slane %v11998_v49, 1  ;;  %v15338_v26 = vrot.slane %v11883_v18, 4 }
 0x253   : > { %v2826_v2 = vsel %vm1627_vm4, %v2824_v57, %v15337_v34  ;;  %v4167_v52 = vadd.f32 %v11812_v15, %v4133_v29  ;;  %v954_v57 = vmul.f32 %v15147_v40, %v15335_v33  ;;  %v1775_v55 = vmul.f32 %v9618_v11, %v15339_v38 }
 0x254   : > { %v2926_v46 = vadd.f32 %v2826_v2, %v2700_v21  ;;  %v3052_v62 = vsel %vm1854_vm5, %v3050_v53, %v15338_v26  ;;  %v15340_v21 = vld [vmem:[#allocation27_spill] sm:$0xff]  ;;  %v15342_v53 = vrot.slane %v11866_v0, 1  ;;  %v15343_v2 = vld [vmem:[#allocation30_spill] sm:$0xff]  ;;  %v15345_v61 = vrot.slane %v15344_v19, 2 }
 0x255   : > { %vm4197_vm12 = vcmp.gt.f32.partialorder %v4167_v52, 0.0  ;;  %v4227_v54 = vmul.f32 0.1, %v4167_v52  ;;  %v15341_v12 = vrot.slane %v15340_v21, 1  ;;  %v1646_v26 = vrot.slane %v15343_v2, 3 }
 0x256   : > { %v3152_v29 = vadd.f32 %v3052_v62, %v2926_v46  ;;  %v3354_v33 = vsel %vm1173_vm2, %v3352_v27, %v15342_v53  ;;  %v15346_v46 = vrot.slane %v12002_v24, 2  ;;  %v15015_v21 = vrot.slane %v12014_v43, 4 }
 0x257   : > { %v1193_v10 = vsel %vm1173_vm2, %v1190_v13, %v15341_v12  ;;  %v4257_v8 = vsel %vm4197_vm12, %v4167_v52, %v4227_v54  ;;  %v2028_v12 = vpop.permute.xlu1 %2027  ;;  %v15347_v0 = vrot.slane %v11870_v44, 2  ;;  %v1873_v53 = vrot.slane %v1775_v55, 4 }
 0x258   : > { %v1286_v34 = vadd.f32 %v1193_v10, %v954_v57  ;;  %v3223_v38 = vadd.f32 %v3193_v17, %v3152_v29  ;;  %v1420_v62 = vsel %vm1400_vm3, %v15346_v46, %v15345_v61  ;;  %4287 = vst.msk [vmem:[#allocation3 + $0x22] sm:$0xff] %vm488_vm8, %v4257_v8  ;;  %v15348_v57 = vrot.slane %v11874_v32, 3  ;;  %v15351_v8 = vld [vmem:[#allocation32_spill] sm:$0xff] }
 0x259   : > { %v3580_v27 = vsel %vm1400_vm3, %v3578_v22, %v15347_v0  ;;  %v15349_v17 = vrot.slane %v15318_v20, 4  ;;  %v15350_v61 = vrot.slane %v12010_v3, 3  ;;  %v12058_v44 = vmul.f32 %v15148_v30, %v15351_v8 }
 0x25a   : > { %v3806_v52 = vsel %vm1627_vm4, %v3804_v16, %v15348_v57  ;;  %v1513_v54 = vadd.f32 %v1420_v62, %v1286_v34  ;;  %v3454_v29 = vadd.f32 %v3354_v33, %v3223_v38  ;;  %v12062_v32 = vmul.f32 %v9651_v48, %v15351_v8  ;;  %v4346_v62 = vld [vmem:[#allocation3 + $0x100] sm:$0xf] }
 0x25b   : > { %v4032_v19 = vsel %vm1854_vm5, %v4030_v23, %v15349_v17  ;;  %v1647_v10 = vsel %vm1627_vm4, %v15350_v61, %v1646_v26  ;;  %v2148_v20 = vmul.f32 %v9576_v50, %v2028_v12  ;;  %v12066_v16 = vmul.f32 %v9564_v41, %v2028_v12 }
 0x25c   : > { %v1740_v22 = vadd.f32 %v1647_v10, %v1513_v54  ;;  %v3680_v23 = vadd.f32 %v3580_v27, %v3454_v29  ;;  %v1874_v33 = vsel %vm1854_vm5, %v15015_v21, %v1873_v53  ;;  %v12073_v55 = vmul.f32 %v9656_v28, %v15351_v8 }
 0x25d   : > { %v12076_v34 = vmul.f32 %v9566_v42, %v2028_v12  ;;  %v12080_v26 = vmul.f32 %v9667_v9, %v15351_v8  ;;  %v15014_v38 = vrot.slane %v12066_v16, 1  ;;  %v12084_v46 = vmul.f32 %v9572_v45, %v2028_v12 }
 0x25e   : > { %v1967_v2 = vadd.f32 %v1874_v33, %v1740_v22  ;;  %v3906_v0 = vadd.f32 %v3806_v52, %v3680_v23  ;;  %v12088_v57 = vmul.f32 %v9578_v51, %v2028_v12  ;;  %v4472_v17 = vrot.slane %v11954_v60, 1 }
 0x25f   : > { %v15013_v27 = vrot.slane %v12076_v34, 2  ;;  %v15352_v29 = vrot.slane %v11687_v56, 1  ;;  %v15018_v10 = vrot.slane %v12084_v46, 3  ;;  %v4473_v53 = vrot.slane %v11956_v1, 1 }
 0x260   : > { %v2178_v54 = vadd.f32 %v2148_v20, %v1967_v2  ;;  %v4132_v8 = vadd.f32 %v4032_v19, %v3906_v0  ;;  %v15017_v52 = vrot.slane %v12062_v32, 1  ;;  %v15353_v22 = vrot.slane %v11695_v35, 2 }
 0x261   : > { %v2386_v61 = vsel %vm1173_vm2, %v15014_v38, %v15352_v29  ;;  %v4475_v20 = vrot.slane %v4346_v62, 1  ;;  %v15016_v56 = vrot.slane %v12088_v57, 4  ;;  %v4474_v33 = vsel %vm1173_vm2, %v4472_v17, %v4473_v53 }
 0x262   : > { %v2612_v12 = vsel %vm1400_vm3, %v15013_v27, %v15353_v22  ;;  %v2479_v23 = vadd.f32 %v2386_v61, %v2178_v54  ;;  %v4682_v2 = vrot.slane %v11954_v60, 2  ;;  %v4166_v29 = vadd.f32 %v11812_v15, %v4132_v8 }
 0x263   : > { %v15354_v19 = vrot.slane %v11702_v63, 3  ;;  %v4476_v0 = vsel %vm1173_vm2, %v4473_v53, %v4475_v20  ;;  %v4683_v22 = vrot.slane %v11956_v1, 2  ;;  %v4685_v61 = vrot.slane %v4346_v62, 2 }
 0x264   : > { %v2705_v18 = vadd.f32 %v2612_v12, %v2479_v23  ;;  %v12115_v54 = vpack.c.bf16 %v4476_v0, %v4474_v33  ;;  %v4829_v17 = vrot.slane %v11954_v60, 3  ;;  %vm4196_vm13 = vcmp.gt.f32.partialorder %v4166_v29, 0.0  ;;  %v15360_v0 = vld [vmem:[#allocation42_spill] sm:$0xff] }
 0x265   : > { %v2838_v35 = vsel %vm1627_vm4, %v15018_v10, %v15354_v19  ;;  %v4226_v27 = vmul.f32 0.1, %v4166_v29  ;;  %v4684_v8 = vsel %vm1400_vm3, %v4682_v2, %v4683_v22  ;;  %v4830_v63 = vrot.slane %v11956_v1, 3  ;;  %v15358_v2 = vld [vmem:[#allocation38_spill] sm:$0xff] }
 0x266   : > { %15355 = vst [vmem:[#allocation14_spill] sm:$0xff] %v12115_v54  ;;  %v2931_v38 = vadd.f32 %v2838_v35, %v2705_v18  ;;  %v15356_v21 = vrot.slane %v11714_v39, 4  ;;  %8381 = vmatmul.msk.bf16.gmra.mxu0 %vm488_vm8, %v12115_v54  ;;  %v4686_v12 = vsel %vm1400_vm3, %v4683_v22, %v4685_v61  ;;  %v4832_v20 = vrot.slane %v4346_v62, 3  ;;  %v2249_v62 = vpop.permute.xlu2 %2248 }
 0x267   : > { %v4256_v60 = vsel %vm4196_vm13, %v4166_v29, %v4226_v27  ;;  %v12128_v23 = vpack.c.bf16 %v4686_v12, %v4684_v8  ;;  %v4831_v33 = vsel %vm1627_vm4, %v4829_v17, %v4830_v63  ;;  %v1092_v1 = vmul.f32 %v9556_v37, %v15358_v2 }
 0x268   : > { %v3064_v53 = vsel %vm1854_vm5, %v15016_v56, %v15356_v21  ;;  %4286 = vst.msk [vmem:[#allocation3 + $0x1a] sm:$0xff] %vm488_vm8, %v4256_v60  ;;  %v4833_v18 = vsel %vm1627_vm4, %v4830_v63, %v4832_v20  ;;  %v1319_v21 = vmul.f32 %v9574_v47, %v15358_v2  ;;  %v1546_v19 = vmul.f32 %v9593_v59, %v15358_v2  ;;  %v15361_v63 = vld [vmem:[#allocation20_spill] sm:$0xff] }
 0x269   : > { %15357 = vst [vmem:[#allocation16_spill] sm:$0xff] %v12128_v23  ;;  %v3157_v39 = vadd.f32 %v3064_v53, %v2931_v38  ;;  %v15019_v27 = vrot.slane %v12073_v55, 2  ;;  %8411 = vmatmul.msk.bf16.gmra.mxu2 %vm488_vm8, %v12128_v23  ;;  %v12142_v29 = vpack.c.bf16 %v4833_v18, %v4831_v33  ;;  %v1189_v35 = vrot.slane %v1092_v1, 1  ;;  %v2023_v18 = vpop.permute.xlu0 %2022 }
 0x26a   : > { %v1773_v38 = vmul.f32 %v9618_v11, %v15358_v2  ;;  %v15020_v22 = vrot.slane %v15360_v0, 4  ;;  %v953_v17 = vmul.f32 %v15147_v40, %v15358_v2  ;;  %v1416_v8 = vrot.slane %v1319_v21, 2 }
 0x26b   : > { %15359 = vst [vmem:[#allocation15_spill] sm:$0xff] %v12142_v29  ;;  %v3228_v61 = vadd.f32 %v12058_v44, %v3157_v39  ;;  %v15362_v53 = vrot.slane %v15361_v63, 1  ;;  %v3815_v20 = vrot.slane %v12080_v26, 3  ;;  %8426 = vmatmul.msk.bf16.gmra.mxu3 %vm488_vm8, %v12142_v29  ;;  %v1191_v60 = vsel %vm1173_vm2, %v1189_v35, %v1190_v13  ;;  %v15363_v63 = vld [vmem:[#allocation21_spill] sm:$0xff]  ;;  %v15388_v26 = vld [vmem:[#allocation47_spill] sm:$0xff] }
 0x26c   : > { %v1643_v44 = vrot.slane %v1546_v19, 3  ;;  %v12162_v33 = vmul.f32 %v9564_v41, %v2249_v62  ;;  %v12165_v2 = vmul.f32 %v9566_v42, %v2249_v62  ;;  %v1285_v39 = vadd.f32 %v1191_v60, %v953_v17 }
 0x26d   : > { %v3366_v12 = vsel %vm1173_vm2, %v15017_v52, %v15362_v53  ;;  %v12168_v21 = vmul.f32 %v9572_v45, %v2249_v62  ;;  %v15364_v53 = vrot.slane %v15363_v63, 2  ;;  %v15365_v13 = vrot.slane %v12002_v24, 2  ;;  %v15368_v52 = vld [vmem:[#allocation22_spill] sm:$0xff] }
 0x26e   : > { %v3459_v1 = vadd.f32 %v3366_v12, %v3228_v61  ;;  %v1870_v35 = vrot.slane %v1773_v38, 4  ;;  %v12179_v56 = vmul.f32 %v9578_v51, %v2249_v62  ;;  %v15366_v61 = vld [vmem:[#allocation23_spill] sm:$0xff]  ;;  %v15369_v10 = vrot.slane %v15368_v52, 3  ;;  %v15371_v62 = vld [vmem:[#allocation33_spill] sm:$0xff] }
 0x26f   : > { %v3592_v49 = vsel %vm1400_vm3, %v15019_v27, %v15364_v53  ;;  %v1418_v19 = vsel %vm1400_vm3, %v1416_v8, %v15365_v13  ;;  %v15367_v17 = vrot.slane %v15366_v61, 4  ;;  %v15370_v8 = vrot.slane %v12010_v3, 3 }
 0x270   : > { %v3685_v60 = vadd.f32 %v3592_v49, %v3459_v1  ;;  %v1512_v63 = vadd.f32 %v1418_v19, %v1285_v39  ;;  %v3818_v24 = vsel %vm1627_vm4, %v3815_v20, %v15369_v10  ;;  %v3266_v53 = vmul.f32 %v9651_v48, %v15371_v62 }
 0x271   : > { %v4044_v12 = vsel %vm1854_vm5, %v15020_v22, %v15367_v17  ;;  %v1645_v38 = vsel %vm1627_vm4, %v1643_v44, %v15370_v8  ;;  %v2286_v13 = vmul.f32 %v9564_v41, %v2023_v18  ;;  %v2147_v1 = vmul.f32 %v9576_v50, %v2023_v18 }
 0x272   : > { %v3911_v61 = vadd.f32 %v3818_v24, %v3685_v60  ;;  %v1739_v27 = vadd.f32 %v1645_v38, %v1512_v63  ;;  %v2512_v39 = vmul.f32 %v9566_v42, %v2023_v18  ;;  %v15372_v52 = vrot.slane %v12014_v43, 4 }
 0x273   : > { %v3492_v3 = vmul.f32 %v9656_v28, %v15371_v62  ;;  %v2382_v10 = vrot.slane %v2286_v13, 1  ;;  %v2738_v44 = vmul.f32 %v9572_v45, %v2023_v18  ;;  %v3718_v60 = vmul.f32 %v9667_v9, %v15371_v62  ;;  %v15375_v13 = vld [vmem:[#allocation58_spill] sm:$0xff] }
 0x274   : > { %v1872_v49 = vsel %vm1854_vm5, %v1870_v35, %v15372_v52  ;;  %v4137_v17 = vadd.f32 %v4044_v12, %v3911_v61  ;;  %v15373_v24 = vrot.slane %v12066_v16, 1  ;;  %v2608_v35 = vrot.slane %v2512_v39, 2 }
 0x275   : > { %v1966_v8 = vadd.f32 %v1872_v49, %v1739_v27  ;;  %v2964_v38 = vmul.f32 %v9578_v51, %v2023_v18  ;;  %v3197_v27 = vmul.f32 %v15148_v30, %v15371_v62  ;;  %v3362_v61 = vrot.slane %v3266_v53, 1  ;;  %v15376_v53 = vld [vmem:[#allocation43_spill] sm:$0xff] }
 0x276   : > { %v2384_v43 = vsel %vm1173_vm2, %v2382_v10, %v15373_v24  ;;  %v4171_v19 = vadd.f32 %v11812_v15, %v4137_v17  ;;  %v3588_v49 = vrot.slane %v3492_v3, 2  ;;  %v2834_v63 = vrot.slane %v2738_v44, 3 }
 0x277   : > { %v2177_v12 = vadd.f32 %v2147_v1, %v1966_v8  ;;  %v3814_v22 = vrot.slane %v3718_v60, 3  ;;  %v15374_v39 = vrot.slane %v12076_v34, 2  ;;  %v3060_v24 = vrot.slane %v2964_v38, 4 }
 0x278   : > { %vm4201_vm14 = vcmp.gt.f32.partialorder %v4171_v19, 0.0  ;;  %v4231_v16 = vmul.f32 0.1, %v4171_v19  ;;  %v12223_v52 = vmul.f32 %v9556_v37, %v15375_v13  ;;  %v12227_v1 = vmul.f32 %v9574_v47, %v15375_v13 }
 0x279   : > { %v2478_v10 = vadd.f32 %v2384_v43, %v2177_v12  ;;  %v2610_v18 = vsel %vm1400_vm3, %v2608_v35, %v15374_v39  ;;  %v4040_v3 = vrot.slane %v15376_v53, 4  ;;  %v12232_v17 = vmul.f32 %v9593_v59, %v15375_v13  ;;  %v15383_v53 = vld [vmem:[#allocation44_spill] sm:$0xff] }
 0x27a   : > { %v4261_v62 = vsel %vm4201_vm14, %v4171_v19, %v4231_v16  ;;  %v15377_v34 = vrot.slane %v12084_v46, 3  ;;  %v1200_v60 = vrot.slane %v12223_v52, 1  ;;  %v15024_v43 = vrot.slane %v12227_v1, 2  ;;  %v12250_v46 = vpop.permute.xlu2 %2258 }
 0x27b   : > { %v2704_v44 = vadd.f32 %v2610_v18, %v2478_v10  ;;  %4291 = vst.msk [vmem:[#allocation3 + $0x52] sm:$0xff] %vm488_vm8, %v4261_v62  ;;  %v12242_v19 = vmul.f32 %v9618_v11, %v15375_v13  ;;  %v15378_v35 = vrot.slane %v12062_v32, 1  ;;  %v15379_v12 = vrot.slane %v12073_v55, 2  ;;  %v15381_v18 = vld [vmem:[#allocation45_spill] sm:$0xff] }
 0x27c   : > { %v2836_v8 = vsel %vm1627_vm4, %v2834_v63, %v15377_v34  ;;  %v958_v63 = vmul.f32 %v15147_v40, %v15375_v13  ;;  %v15380_v52 = vrot.slane %v12088_v57, 4  ;;  %v15382_v62 = vrot.slane %v15381_v18, 1 }
 0x27d   : > { %v3364_v38 = vsel %vm1173_vm2, %v3362_v61, %v15378_v35  ;;  %v3590_v16 = vsel %vm1400_vm3, %v3588_v49, %v15379_v12  ;;  %v2930_v10 = vadd.f32 %v2836_v8, %v2704_v44  ;;  %v15022_v61 = vrot.slane %v12232_v17, 3  ;;  %v15386_v35 = vld [vmem:[#allocation46_spill] sm:$0xff] }
 0x27e   : > { %v3062_v39 = vsel %vm1854_vm5, %v3060_v24, %v15380_v52  ;;  %v1203_v32 = vsel %vm1173_vm2, %v1200_v60, %v15382_v62  ;;  %v1781_v55 = vmul.f32 %v9618_v11, %v15383_v53  ;;  %v3816_v49 = vsel %vm1627_vm4, %v3814_v22, %v3815_v20  ;;  %v2048_v24 = vpop.permute.xlu1 %2047 }
 0x27f   : > { %v15384_v44 = vrot.slane %v15360_v0, 4  ;;  %v3156_v57 = vadd.f32 %v3062_v39, %v2930_v10  ;;  %v1290_v34 = vadd.f32 %v1203_v32, %v958_v63  ;;  %v12271_v8 = vmul.f32 %v9564_v41, %v12250_v46  ;;  %v15389_v10 = vld [vmem:[#allocation48_spill] sm:$0xff] }
 0x280   : > { %v15387_v12 = vrot.slane %v15386_v35, 2  ;;  %v1656_v18 = vrot.slane %v15388_v26, 3  ;;  %v15021_v22 = vrot.slane %v12242_v19, 4  ;;  %v12282_v20 = vmul.f32 %v9566_v42, %v12250_v46  ;;  %v15391_v35 = vld [vmem:[#allocation7_spill] sm:$0xff] }
 0x281   : > { %v4042_v13 = vsel %vm1854_vm5, %v4040_v3, %v15384_v44  ;;  %15385 = vst [vmem:[#allocation17_spill] sm:$0xff] %v12271_v8  ;;  %v3227_v0 = vadd.f32 %v3197_v27, %v3156_v57  ;;  %v12286_v63 = vmul.f32 %v9651_v48, %v15389_v10  ;;  %v1883_v62 = vrot.slane %v1781_v55, 4 }
 0x282   : > { %v1430_v52 = vsel %vm1400_vm3, %v15024_v43, %v15387_v12  ;;  %v1657_v39 = vsel %vm1627_vm4, %v15022_v61, %v1656_v18  ;;  %v2152_v32 = vmul.f32 %v9576_v50, %v2048_v24  ;;  %v12293_v53 = vmul.f32 %v9564_v41, %v2048_v24 }
 0x283   : > { %v1517_v3 = vadd.f32 %v1430_v52, %v1290_v34  ;;  %v3458_v27 = vadd.f32 %v3364_v38, %v3227_v0  ;;  %v12296_v57 = vmul.f32 %v9566_v42, %v2048_v24  ;;  %v12299_v34 = vmul.f32 %v9572_v45, %v2048_v24 }
 0x284   : > { %v1884_v12 = vsel %vm1854_vm5, %v15021_v22, %v1883_v62  ;;  %v15023_v55 = vrot.slane %v12293_v53, 1  ;;  %v12307_v52 = vmul.f32 %v9578_v51, %v2048_v24  ;;  %v12311_v38 = vmul.f32 %v9572_v45, %v12250_v46 }
 0x285   : > { %v1744_v44 = vadd.f32 %v1657_v39, %v1517_v3  ;;  %v3684_v26 = vadd.f32 %v3590_v16, %v3458_v27  ;;  %v3202_v0 = vmul.f32 %v15148_v30, %v15389_v10  ;;  %v15390_v39 = vrot.slane %v11760_v14, 1 }
 0x286   : > { %v15026_v24 = vrot.slane %v12296_v57, 2  ;;  %v1098_v16 = vmul.f32 %v9556_v37, %v15391_v35  ;;  %v1325_v61 = vmul.f32 %v9574_v47, %v15391_v35 }
 0x287   : > { %v1971_v18 = vadd.f32 %v1884_v12, %v1744_v44  ;;  %v2396_v62 = vsel %vm1173_vm2, %v15023_v55, %v15390_v39  ;;  %v3910_v27 = vadd.f32 %v3816_v49, %v3684_v26  ;;  %v12326_v44 = vmul.f32 %v9656_v28, %v15389_v10 }
 0x288   : > { %v1199_v14 = vrot.slane %v1098_v16, 1  ;;  %v1552_v39 = vmul.f32 %v9593_v59, %v15391_v35  ;;  %v957_v49 = vmul.f32 %v15147_v40, %v15391_v35  ;;  %v1779_v26 = vmul.f32 %v9618_v11, %v15391_v35 }
 0x289   : > { %v2182_v12 = vadd.f32 %v2152_v32, %v1971_v18  ;;  %v4136_v55 = vadd.f32 %v4042_v13, %v3910_v27  ;;  %v15392_v32 = vrot.slane %v11769_v58, 2  ;;  %v1426_v3 = vrot.slane %v1325_v61, 2 }
 0x28a   : > { %v1201_v16 = vsel %vm1173_vm2, %v1199_v14, %v1200_v60  ;;  %v1653_v22 = vrot.slane %v1552_v39, 3  ;;  %v12347_v13 = vmul.f32 %v9667_v9, %v15389_v10  ;;  %v15029_v35 = vrot.slane %v12326_v44, 2 }
 0x28b   : > { %v2483_v43 = vadd.f32 %v2396_v62, %v2182_v12  ;;  %v2622_v18 = vsel %vm1400_vm3, %v15026_v24, %v15392_v32  ;;  %v4170_v23 = vadd.f32 %v11812_v15, %v4136_v55  ;;  %v1289_v27 = vadd.f32 %v1201_v16, %v957_v49  ;;  %v2043_v24 = vpop.permute.xlu0 %2042 }
 0x28c   : > { %v15393_v58 = vrot.slane %v11777_v4, 3  ;;  %v15394_v12 = vrot.slane %v12299_v34, 3  ;;  %v15395_v60 = vrot.slane %v12227_v1, 2  ;;  %v1880_v14 = vrot.slane %v1779_v26, 4 }
 0x28d   : > { %v2709_v62 = vadd.f32 %v2622_v18, %v2483_v43  ;;  %vm4200_vm15 = vcmp.gt.f32.partialorder %v4170_v23, 0.0  ;;  %v4230_v55 = vmul.f32 0.1, %v4170_v23  ;;  %v15396_v43 = vld [vmem:[#allocation56_spill] sm:$0xff]  ;;  %v15397_v18 = vrot.slane %v11784_v6, 4 }
 0x28e   : > { %v2848_v32 = vsel %vm1627_vm4, %v15394_v12, %v15393_v58  ;;  %v1428_v61 = vsel %vm1400_vm3, %v1426_v3, %v15395_v60  ;;  %v15398_v4 = vrot.slane %v12307_v52, 4  ;;  %v15399_v58 = vrot.slane %v12232_v17, 3  ;;  %v15400_v12 = vld [vmem:[#allocation49_spill] sm:$0xff] }
 0x28f   : > { %v2935_v39 = vadd.f32 %v2848_v32, %v2709_v62  ;;  %v1516_v10 = vadd.f32 %v1428_v61, %v1289_v27  ;;  %v3272_v3 = vmul.f32 %v9651_v48, %v15400_v12  ;;  %v4260_v26 = vsel %vm4200_vm15, %v4170_v23, %v4230_v55  ;;  %v15401_v60 = vld [vmem:[#allocation37_spill] sm:$0xff]  ;;  %v4545_v55 = vpop.f32.mrf.mxu0 }
 0x290   : > { %v3074_v16 = vsel %vm1854_vm5, %v15398_v4, %v15397_v18  ;;  %v1655_v1 = vsel %vm1627_vm4, %v1653_v22, %v15399_v58  ;;  %v15402_v62 = vrot.slane %v15401_v60, 1  ;;  %v15403_v27 = vrot.slane %v12286_v63, 1  ;;  %4290 = vst.msk [vmem:[#allocation3 + $0x4a] sm:$0xff] %vm488_vm8, %v4260_v26  ;;  %v15405_v58 = vld [vmem:[#allocation39_spill] sm:$0xff] }
 0x291   : > { %v3161_v61 = vadd.f32 %v3074_v16, %v2935_v39  ;;  %v1743_v6 = vadd.f32 %v1655_v1, %v1516_v10  ;;  %v15404_v17 = vrot.slane %v12242_v19, 4  ;;  %v2151_v4 = vmul.f32 %v9576_v50, %v2043_v24  ;;  %v12387_v26 = vld [vmem:[#allocation3 + $0x120] sm:$0xff]  ;;  %v12389_v19 = vld [vmem:[#allocation3 + $0x128] sm:$0xff] }
 0x292   : > { %v3376_v32 = vsel %vm1173_vm2, %v15403_v27, %v15402_v62  ;;  %v2292_v23 = vmul.f32 %v9564_v41, %v2043_v24  ;;  %v15406_v60 = vrot.slane %v15405_v58, 2  ;;  %v2518_v1 = vmul.f32 %v9566_v42, %v2043_v24  ;;  %v4755_v58 = vpop.f32.mrf.mxu2 }
 0x293   : > { %v1882_v22 = vsel %vm1854_vm5, %v1880_v14, %v15404_v17  ;;  %v3232_v10 = vadd.f32 %v3202_v0, %v3161_v61  ;;  %v4622_v14 = vpop.f32.mrf.mxu1  ;;  %v3372_v62 = vrot.slane %v3272_v3, 1  ;;  %v2744_v17 = vmul.f32 %v9572_v45, %v2043_v24 }
 0x294   : > { %v3602_v39 = vsel %vm1400_vm3, %v15029_v35, %v15406_v60  ;;  %v1970_v16 = vadd.f32 %v1882_v22, %v1743_v6  ;;  %v2392_v27 = vrot.slane %v2292_v23, 1  ;;  %v2970_v49 = vmul.f32 %v9578_v51, %v2043_v24 }
 0x295   : > { %v3463_v18 = vadd.f32 %v3376_v32, %v3232_v10  ;;  %v2618_v54 = vrot.slane %v2518_v1, 2  ;;  %v4623_v60 = vadd.f32 %v4622_v14, %v4545_v55  ;;  %v3498_v0 = vmul.f32 %v9656_v28, %v15400_v12  ;;  %v15409_v55 = vld [vmem:[#allocation40_spill] sm:$0xff] }
 0x296   : > { %v2181_v29 = vadd.f32 %v2151_v4, %v1970_v16  ;;  %v15407_v61 = vrot.slane %v12293_v53, 1  ;;  %v2844_v22 = vrot.slane %v2744_v17, 3  ;;  %v12400_v3 = vpack.c.bf16 %v12389_v19, %v12387_v26 }
 0x297   : > { %v12404_v24 = vmul.f32 %v9578_v51, %v12250_v46  ;;  %v3689_v32 = vadd.f32 %v3602_v39, %v3463_v18  ;;  %v4790_v23 = vadd.f32 %v4755_v58, %v4623_v60  ;;  %v15410_v10 = vrot.slane %v15409_v55, 3  ;;  %v4902_v46 = vpop.f32.mrf.mxu3 }
 0x298   : > { %v2394_v6 = vsel %vm1173_vm2, %v2392_v27, %v15407_v61  ;;  %15408 = vst [vmem:[#allocation26_spill] sm:$0xff] %v12400_v3  ;;  %v15411_v16 = vrot.slane %v12347_v13, 3  ;;  %v3724_v1 = vmul.f32 %v9667_v9, %v15400_v12  ;;  %v15412_v14 = vrot.slane %v12296_v57, 2  ;;  %8397 = vmatmul.msk.bf16.gmra.mxu1 %vm488_vm8, %v12400_v3 }
 0x299   : > { %v2482_v4 = vadd.f32 %v2394_v6, %v2181_v29  ;;  %v3070_v17 = vrot.slane %v2970_v49, 4  ;;  %v15413_v29 = vld [vmem:[#allocation41_spill] sm:$0xff]  ;;  %v15415_v39 = vrot.slane %v15396_v43, 4  ;;  %v12423_v6 = vadd.f32 %v4902_v46, %v4790_v23 }
 0x29a   : > { %v3828_v53 = vsel %vm1627_vm4, %v15411_v16, %v15410_v10  ;;  %v2620_v27 = vsel %vm1400_vm3, %v2618_v54, %v15412_v14  ;;  %v15414_v18 = vrot.slane %v15413_v29, 4  ;;  %v3201_v57 = vmul.f32 %v15148_v30, %v15400_v12  ;;  %v15419_v29 = vld [vmem:[#allocation57_spill] sm:$0xff] }
 0x29b   : > { %v3915_v60 = vadd.f32 %v3828_v53, %v3689_v32  ;;  %v2708_v61 = vadd.f32 %v2620_v27, %v2482_v4  ;;  %15416 = vst [vmem:[#allocation29_spill] sm:$0xff] %v12423_v6  ;;  %v15417_v54 = vrot.slane %v12286_v63, 1  ;;  %v3598_v55 = vrot.slane %v3498_v0, 2 }
 0x29c   : > { %v4054_v58 = vsel %vm1854_vm5, %v15415_v39, %v15414_v18  ;;  %v15418_v10 = vrot.slane %v12299_v34, 3  ;;  %v4050_v35 = vrot.slane %v15419_v29, 4  ;;  %v12436_v32 = vmul.f32 %v9556_v37, %v10848_v7 }
 0x29d   : > { %v3374_v49 = vsel %vm1173_vm2, %v3372_v62, %v15417_v54  ;;  %v4141_v14 = vadd.f32 %v4054_v58, %v3915_v60  ;;  %v3824_v4 = vrot.slane %v3724_v1, 3  ;;  %v15420_v12 = vrot.slane %v12307_v52, 4  ;;  %v12461_v60 = vpop.permute.xlu2 %2268 }
 0x29e   : > { %v2846_v16 = vsel %vm1627_vm4, %v2844_v22, %v15418_v10  ;;  %v12443_v62 = vmul.f32 %v9574_v47, %v10848_v7  ;;  %v12447_v34 = vmul.f32 %v9593_v59, %v10848_v7  ;;  %v1210_v23 = vrot.slane %v12436_v32, 1 }
 0x29f   : > { %v2934_v18 = vadd.f32 %v2846_v16, %v2708_v61  ;;  %v3072_v63 = vsel %vm1854_vm5, %v3070_v17, %v15420_v12  ;;  %v4175_v0 = vadd.f32 %v11812_v15, %v4141_v14  ;;  %v12453_v53 = vmul.f32 %v9618_v11, %v10848_v7  ;;  %v15421_v17 = vld [vmem:[#allocation19_spill] sm:$0xff]  ;;  %v15426_v12 = vld [vmem:[#allocation61_spill] sm:$0xff] }
 0x2a0   : > { %v962_v52 = vmul.f32 %v15147_v40, %v10848_v7  ;;  %v15033_v1 = vrot.slane %v12443_v62, 2  ;;  %v1787_v46 = vmul.f32 %v9618_v11, %v15421_v17  ;;  %v15422_v61 = vld [vmem:[#allocation59_spill] sm:$0xff]  ;;  %v15424_v7 = vrot.slane %v12326_v44, 2  ;;  %v15427_v17 = vld [vmem:[#allocation60_spill] sm:$0xff]  ;;  %v2068_v44 = vpop.permute.xlu1 %2067 }
 0x2a1   : > { %v3160_v22 = vadd.f32 %v3072_v63, %v2934_v18  ;;  %vm4205_vm1 = vcmp.gt.f32.partialorder %v4175_v0, 0.0  ;;  %v4235_v39 = vmul.f32 0.1, %v4175_v0  ;;  %v15423_v54 = vrot.slane %v15422_v61, 1 }
 0x2a2   : > { %v3600_v16 = vsel %vm1400_vm3, %v3598_v55, %v15424_v7  ;;  %v15425_v14 = vrot.slane %v15396_v43, 4  ;;  %v1666_v63 = vrot.slane %v15426_v12, 3  ;;  %v15428_v27 = vrot.slane %v15427_v17, 2 }
 0x2a3   : > { %v3231_v58 = vadd.f32 %v3201_v57, %v3160_v22  ;;  %v1213_v10 = vsel %vm1173_vm2, %v1210_v23, %v15423_v54  ;;  %v4265_v57 = vsel %vm4205_vm1, %v4175_v0, %v4235_v39  ;;  %v15030_v54 = vrot.slane %v12453_v53, 4 }
 0x2a4   : > { %v4052_v29 = vsel %vm1854_vm5, %v4050_v35, %v15425_v14  ;;  %v1294_v18 = vadd.f32 %v1213_v10, %v962_v52  ;;  %v1440_v61 = vsel %vm1400_vm3, %v15033_v1, %v15428_v27  ;;  %4295 = vst.msk [vmem:[#allocation3 + $0x82] sm:$0xff] %vm488_vm8, %v4265_v57  ;;  %v15429_v43 = vrot.slane %v12347_v13, 3 }
 0x2a5   : > { %v3462_v22 = vadd.f32 %v3374_v49, %v3231_v58  ;;  %v12487_v55 = vmul.f32 %v9564_v41, %v12461_v60  ;;  %v12491_v0 = vmul.f32 %v9651_v48, %v10753_v25  ;;  %v12495_v27 = vmul.f32 %v9566_v42, %v12461_v60 }
 0x2a6   : > { %v3826_v35 = vsel %vm1627_vm4, %v3824_v4, %v15429_v43  ;;  %v1521_v49 = vadd.f32 %v1440_v61, %v1294_v18  ;;  %v15430_v39 = vrot.slane %v12447_v34, 3  ;;  %v1893_v58 = vrot.slane %v1787_v46, 4 }
 0x2a7   : > { %v3688_v52 = vadd.f32 %v3600_v16, %v3462_v22  ;;  %v12502_v10 = vmul.f32 %v9656_v28, %v10753_v25  ;;  %v12506_v7 = vmul.f32 %v9667_v9, %v10753_v25  ;;  %v2156_v16 = vmul.f32 %v9576_v50, %v2068_v44  ;;  %v15431_v22 = vld [vmem:[#allocation69_spill] sm:$0xff] }
 0x2a8   : > { %v1667_v13 = vsel %vm1627_vm4, %v15430_v39, %v1666_v63  ;;  %v1894_v18 = vsel %vm1854_vm5, %v15030_v54, %v1893_v58  ;;  %v12513_v12 = vmul.f32 %v9564_v41, %v2068_v44  ;;  %v12516_v46 = vmul.f32 %v9566_v42, %v2068_v44 }
 0x2a9   : > { %v1748_v4 = vadd.f32 %v1667_v13, %v1521_v49  ;;  %v3914_v14 = vadd.f32 %v3826_v35, %v3688_v52  ;;  %v12521_v61 = vmul.f32 %v9572_v45, %v2068_v44  ;;  %v12526_v52 = vmul.f32 %v9578_v51, %v2068_v44 }
 0x2aa   : > { %v15031_v35 = vrot.slane %v12513_v12, 1  ;;  %v15032_v49 = vrot.slane %v12516_v46, 2  ;;  %v15433_v17 = vrot.slane %v11852_v31, 1  ;;  %v15434_v13 = vrot.slane %v11919_v36, 2 }
 0x2ab   : > { %v1975_v63 = vadd.f32 %v1894_v18, %v1748_v4  ;;  %v4140_v43 = vadd.f32 %v4052_v29, %v3914_v14  ;;  %v15432_v4 = vld [vmem:[#allocation70_spill] sm:$0xff]  ;;  %v15034_v14 = vrot.slane %v12521_v61, 3  ;;  %v12564_v32 = vmul.f32 %v9572_v45, %v12461_v60 }
 0x2ac   : > { %v1104_v18 = vmul.f32 %v9556_v37, %v15432_v4  ;;  %v2406_v29 = vsel %vm1173_vm2, %v15031_v35, %v15433_v17  ;;  %v961_v44 = vmul.f32 %v15147_v40, %v15432_v4 }
 0x2ad   : > { %v2186_v58 = vadd.f32 %v2156_v16, %v1975_v63  ;;  %v4174_v54 = vadd.f32 %v11812_v15, %v4140_v43  ;;  %v2632_v16 = vsel %vm1400_vm3, %v15032_v49, %v15434_v13  ;;  %v1331_v15 = vmul.f32 %v9574_v47, %v15432_v4 }
 0x2ae   : > { %v1209_v63 = vrot.slane %v1104_v18, 1  ;;  %v1558_v43 = vmul.f32 %v9593_v59, %v15432_v4  ;;  %v1785_v13 = vmul.f32 %v9618_v11, %v15432_v4 }
 0x2af   : > { %v2487_v39 = vadd.f32 %v2406_v29, %v2186_v58  ;;  %vm4204_vm6 = vcmp.gt.f32.partialorder %v4174_v54, 0.0  ;;  %v4234_v31 = vmul.f32 0.1, %v4174_v54  ;;  %v1436_v58 = vrot.slane %v1331_v15, 2  ;;  %v15435_v29 = vld [vmem:[#allocation25_spill] sm:$0xff] }
 0x2b0   : > { %v1211_v36 = vsel %vm1173_vm2, %v1209_v63, %v1210_v23  ;;  %v15436_v49 = vrot.slane %v15435_v29, 3  ;;  %v1663_v1 = vrot.slane %v1558_v43, 3  ;;  %v12571_v63 = vmul.f32 %v9578_v51, %v12461_v60 }
 0x2b1   : > { %v2713_v35 = vadd.f32 %v2632_v16, %v2487_v39  ;;  %v4264_v18 = vsel %vm4204_vm6, %v4174_v54, %v4234_v31  ;;  %v1293_v17 = vadd.f32 %v1211_v36, %v961_v44  ;;  %v15437_v39 = vrot.slane %v12443_v62, 2  ;;  %v2063_v16 = vpop.permute.xlu0 %2062 }
 0x2b2   : > { %v2858_v57 = vsel %vm1627_vm4, %v15034_v14, %v15436_v49  ;;  %4294 = vst.msk [vmem:[#allocation3 + $0x7a] sm:$0xff] %vm488_vm8, %v4264_v18  ;;  %v1890_v54 = vrot.slane %v1785_v13, 4  ;;  %v3206_v49 = vmul.f32 %v15148_v30, %v10753_v25  ;;  %v15438_v44 = vrot.slane %v11976_v5, 4 }
 0x2b3   : > { %v2939_v23 = vadd.f32 %v2858_v57, %v2713_v35  ;;  %v1438_v4 = vsel %vm1400_vm3, %v1436_v58, %v15437_v39  ;;  %v15439_v15 = vrot.slane %v12526_v52, 4  ;;  %v15440_v35 = vld [vmem:[#allocation51_spill] sm:$0xff]  ;;  %v15442_v43 = vrot.slane %v12491_v0, 1  ;;  %v15443_v58 = vld [vmem:[#allocation54_spill] sm:$0xff]  ;;  %v15447_v39 = vld [vmem:[#allocation52_spill] sm:$0xff] }
 0x2b4   : > { %v1520_v57 = vadd.f32 %v1438_v4, %v1293_v17  ;;  %v15441_v62 = vrot.slane %v15440_v35, 1  ;;  %v15444_v13 = vrot.slane %v15443_v58, 4  ;;  %v15445_v60 = vrot.slane %v15431_v22, 4 }
 0x2b5   : > { %v3084_v31 = vsel %vm1854_vm5, %v15439_v15, %v15438_v44  ;;  %v15446_v5 = vrot.slane %v12447_v34, 3  ;;  %v15448_v44 = vrot.slane %v15447_v39, 2  ;;  %v15449_v17 = vrot.slane %v12502_v10, 2  ;;  %v15450_v15 = vld [vmem:[#allocation53_spill] sm:$0xff] }
 0x2b6   : > { %v3386_v36 = vsel %vm1173_vm2, %v15442_v43, %v15441_v62  ;;  %v4064_v18 = vsel %vm1854_vm5, %v15445_v60, %v15444_v13  ;;  %v3165_v25 = vadd.f32 %v3084_v31, %v2939_v23  ;;  %v15451_v35 = vrot.slane %v15450_v15, 3  ;;  %v15454_v31 = vld [vmem:[#allocation64_spill] sm:$0xff] }
 0x2b7   : > { %v1665_v29 = vsel %vm1627_vm4, %v1663_v1, %v15446_v5  ;;  %v3612_v4 = vsel %vm1400_vm3, %v15449_v17, %v15448_v44  ;;  %v15452_v62 = vrot.slane %v12506_v7, 3  ;;  %v2155_v13 = vmul.f32 %v9576_v50, %v2063_v16  ;;  %v4352_v17 = vld [vmem:[#allocation3 + $0x130] sm:$0xf] }
 0x2b8   : > { %v1747_v58 = vadd.f32 %v1665_v29, %v1520_v57  ;;  %v3236_v23 = vadd.f32 %v3206_v49, %v3165_v25  ;;  %v15453_v34 = vrot.slane %v12453_v53, 4  ;;  %v12609_v60 = vmul.f32 %v9651_v48, %v15454_v31 }
 0x2b9   : > { %v3838_v43 = vsel %vm1627_vm4, %v15452_v62, %v15451_v35  ;;  %v2298_v5 = vmul.f32 %v9564_v41, %v2063_v16  ;;  %v3205_v44 = vmul.f32 %v15148_v30, %v15454_v31  ;;  %v12616_v57 = vmul.f32 %v9656_v28, %v15454_v31 }
 0x2ba   : > { %v1892_v1 = vsel %vm1854_vm5, %v1890_v54, %v15453_v34  ;;  %v2524_v49 = vmul.f32 %v9566_v42, %v2063_v16  ;;  %v3467_v25 = vadd.f32 %v3386_v36, %v3236_v23  ;;  %v2750_v54 = vmul.f32 %v9572_v45, %v2063_v16 }
 0x2bb   : > { %v1974_v39 = vadd.f32 %v1892_v1, %v1747_v58  ;;  %v2402_v53 = vrot.slane %v2298_v5, 1  ;;  %v2976_v29 = vmul.f32 %v9578_v51, %v2063_v16  ;;  %v12623_v15 = vmul.f32 %v9667_v9, %v15454_v31 }
 0x2bc   : > { %v2628_v62 = vrot.slane %v2524_v49, 2  ;;  %v4477_v58 = vrot.slane %v12387_v26, 1  ;;  %v3693_v34 = vadd.f32 %v3612_v4, %v3467_v25  ;;  %v3382_v1 = vrot.slane %v12609_v60, 1 }
 0x2bd   : > { %v2185_v35 = vadd.f32 %v2155_v13, %v1974_v39  ;;  %v15455_v14 = vrot.slane %v12513_v12, 1  ;;  %v2854_v23 = vrot.slane %v2750_v54, 3  ;;  %v3080_v3 = vrot.slane %v2976_v29, 4 }
 0x2be   : > { %v4478_v16 = vrot.slane %v12389_v19, 1  ;;  %v4480_v6 = vrot.slane %v4352_v17, 1  ;;  %v3919_v8 = vadd.f32 %v3838_v43, %v3693_v34  ;;  %v15456_v31 = vrot.slane %v12516_v46, 2  ;;  %v15459_v34 = vld [vmem:[#allocation72_spill] sm:$0xff] }
 0x2bf   : > { %v2404_v36 = vsel %vm1173_vm2, %v2402_v53, %v15455_v14  ;;  %v15457_v39 = vrot.slane %v12521_v61, 3  ;;  %v4687_v60 = vrot.slane %v12387_v26, 2  ;;  %v4688_v25 = vrot.slane %v12389_v19, 2 }
 0x2c0   : > { %v2486_v5 = vadd.f32 %v2404_v36, %v2185_v35  ;;  %v2630_v13 = vsel %vm1400_vm3, %v2628_v62, %v15456_v31  ;;  %v4479_v14 = vsel %vm1173_vm2, %v4477_v58, %v4478_v16  ;;  %v4481_v49 = vsel %vm1173_vm2, %v4478_v16, %v4480_v6  ;;  %v12649_v58 = vld [vmem:[%s14857_s2] ss:$0 sm:$0xff]  ;;  %v12663_v16 = vpop.permute.xlu2 %1079 }
 0x2c1   : > { %v2856_v4 = vsel %vm1627_vm4, %v2854_v23, %v15457_v39  ;;  %v4145_v53 = vadd.f32 %v4064_v18, %v3919_v8  ;;  %v12641_v54 = vpack.c.bf16 %v4481_v49, %v4479_v14  ;;  %v4690_v43 = vrot.slane %v4352_v17, 2  ;;  %15462 = vst [vmem:[#allocation18_spill] sm:$0xff] %v12663_v16 }
 0x2c2   : > { %v2712_v12 = vadd.f32 %v2630_v13, %v2486_v5  ;;  %v4834_v46 = vrot.slane %v12387_v26, 3  ;;  %v4689_v61 = vsel %vm1400_vm3, %v4687_v60, %v4688_v25  ;;  %v4835_v35 = vrot.slane %v12389_v19, 3 }
 0x2c3   : > { %15458 = vst [vmem:[#allocation10_spill] sm:$0xff] %v12641_v54  ;;  %v4837_v62 = vrot.slane %v4352_v17, 3  ;;  %v4179_v6 = vadd.f32 %v12649_v58, %v4145_v53  ;;  %v4060_v8 = vrot.slane %v15459_v34, 4  ;;  %v15460_v18 = vrot.slane %v12526_v52, 4  ;;  %8382 = vmatmul.msk.bf16.gmra.mxu0 %vm488_vm8, %v12641_v54  ;;  %v15483_v53 = vld [vmem:[#allocation78_spill] sm:$0xff] }
 0x2c4   : > { %v2938_v29 = vadd.f32 %v2856_v4, %v2712_v12  ;;  %v4691_v26 = vsel %vm1400_vm3, %v4688_v25, %v4690_v43  ;;  %v4836_v23 = vsel %vm1627_vm4, %v4834_v46, %v4835_v35  ;;  %v3608_v52 = vrot.slane %v12616_v57, 2 }
 0x2c5   : > { %v3082_v36 = vsel %vm1854_vm5, %v3080_v3, %v15460_v18  ;;  %v12659_v17 = vpack.c.bf16 %v4691_v26, %v4689_v61  ;;  %v4838_v5 = vsel %vm1627_vm4, %v4835_v35, %v4837_v62  ;;  %vm4209_vm7 = vcmp.gt.f32.partialorder %v4179_v6, 0.0  ;;  %v15468_v35 = vld [vmem:[#allocation81_spill] sm:$0xff] }
 0x2c6   : > { %v3164_v19 = vadd.f32 %v3082_v36, %v2938_v29  ;;  %v4239_v31 = vmul.f32 0.1, %v4179_v6  ;;  %v12666_v13 = vpack.c.bf16 %v4838_v5, %v4836_v23  ;;  %v3834_v4 = vrot.slane %v12623_v15, 3 }
 0x2c7   : > { %15461 = vst [vmem:[#allocation11_spill] sm:$0xff] %v12659_v17  ;;  %8412 = vmatmul.msk.bf16.gmra.mxu2 %vm488_vm8, %v12659_v17  ;;  %v15464_v49 = vrot.slane %v12491_v0, 1  ;;  %v12681_v57 = vmul.f32 %v9556_v37, %v12663_v16  ;;  %v15467_v29 = vrot.slane %v15431_v22, 4  ;;  %v12696_v62 = vmul.f32 %v9556_v37, %v15468_v35  ;;  %v15481_v0 = vld [vmem:[#allocation9_spill] sm:$0xff] }
 0x2c8   : > { %15463 = vst [vmem:[#allocation12_spill] sm:$0xff] %v12666_v13  ;;  %v3235_v60 = vadd.f32 %v3205_v44, %v3164_v19  ;;  %v4269_v14 = vsel %vm4209_vm7, %v4179_v6, %v4239_v31  ;;  %8427 = vmatmul.msk.bf16.gmra.mxu3 %vm488_vm8, %v12666_v13  ;;  %v15469_v6 = vrot.slane %v12506_v7, 3  ;;  %v12703_v36 = vmul.f32 %v9574_v47, %v15468_v35 }
 0x2c9   : > { %v3384_v25 = vsel %vm1173_vm2, %v3382_v1, %v15464_v49  ;;  %15465 = vst [vmem:[#allocation13_spill] sm:$0xff] %v12681_v57  ;;  %v15466_v1 = vrot.slane %v12502_v10, 2  ;;  %v4062_v61 = vsel %vm1854_vm5, %v4060_v8, %v15467_v29  ;;  %v12707_v10 = vmul.f32 %v9593_v59, %v15468_v35  ;;  %v15492_v57 = vld [vmem:[#allocation86_spill] sm:$0xff] }
 0x2ca   : > { %4299 = vst.msk [vmem:[#allocation3 + $0xb2] sm:$0xff] %vm488_vm8, %v4269_v14  ;;  %v3466_v43 = vadd.f32 %v3384_v25, %v3235_v60  ;;  %v3836_v34 = vsel %vm1627_vm4, %v3834_v4, %v15469_v6  ;;  %v12712_v8 = vmul.f32 %v9574_v47, %v12663_v16  ;;  %v1220_v26 = vrot.slane %v12696_v62, 1  ;;  %v15473_v4 = vld [vmem:[#allocation73_spill] sm:$0xff]  ;;  %v15475_v25 = vld [vmem:[#allocation71_spill] sm:$0xff]  ;;  %v2088_v62 = vpop.permute.xlu1 %2087 }
 0x2cb   : > { %v3610_v46 = vsel %vm1400_vm3, %v3608_v52, %v15466_v1  ;;  %v12717_v7 = vmul.f32 %v9618_v11, %v15468_v35  ;;  %v12721_v23 = vmul.f32 %v9651_v48, %v12663_v16  ;;  %v966_v5 = vmul.f32 %v15147_v40, %v15468_v35 }
 0x2cc   : > { %v3692_v18 = vadd.f32 %v3610_v46, %v3466_v43  ;;  %15470 = vst [vmem:[#allocation34_spill] sm:$0xff] %v12712_v8  ;;  %v15040_v31 = vrot.slane %v12703_v36, 2  ;;  %v12728_v52 = vmul.f32 %v9593_v59, %v12663_v16  ;;  %v15474_v60 = vrot.slane %v15473_v4, 1 }
 0x2cd   : > { %15471 = vst [vmem:[#allocation31_spill] sm:$0xff] %v12721_v23  ;;  %v15039_v49 = vrot.slane %v12707_v10, 3  ;;  %v1793_v43 = vmul.f32 %v9618_v11, %v15475_v25  ;;  %v12738_v46 = vmul.f32 %v9656_v28, %v12663_v16  ;;  %v12742_v29 = vmul.f32 %v9667_v9, %v12663_v16 }
 0x2ce   : > { %v3918_v19 = vadd.f32 %v3836_v34, %v3692_v18  ;;  %15472 = vst [vmem:[#allocation24_spill] sm:$0xff] %v12728_v52  ;;  %v1223_v14 = vsel %vm1173_vm2, %v1220_v26, %v15474_v60  ;;  %v15478_v34 = vld [vmem:[#allocation75_spill] sm:$0xff]  ;;  %v15480_v60 = vld [vmem:[#allocation76_spill] sm:$0xff]  ;;  %v2160_v44 = vmul.f32 %v9576_v50, %v2088_v62  ;;  %v12779_v3 = vmul.f32 %v9572_v45, %v2088_v62  ;;  %v2083_v52 = vpop.permute.xlu0 %2082 }
 0x2cf   : > { %15476 = vst [vmem:[#allocation27_spill] sm:$0xff] %v12738_v46  ;;  %v1298_v35 = vadd.f32 %v1223_v14, %v966_v5  ;;  %v15479_v18 = vrot.slane %v15478_v34, 2  ;;  %v12756_v5 = vmul.f32 %v15481_v0, %v12663_v16  ;;  %v1903_v6 = vrot.slane %v1793_v43, 4 }
 0x2d0   : > { %v4144_v1 = vadd.f32 %v4062_v61, %v3918_v19  ;;  %15477 = vst [vmem:[#allocation30_spill] sm:$0xff] %v12742_v29  ;;  %v1676_v61 = vrot.slane %v15480_v60, 3  ;;  %v15038_v19 = vrot.slane %v12717_v7, 4  ;;  %v12766_v60 = vmul.f32 %v9564_v41, %v2088_v62 }
 0x2d1   : > { %v1450_v4 = vsel %vm1400_vm3, %v15040_v31, %v15479_v18  ;;  %15482 = vst [vmem:[#allocation28_spill] sm:$0xff] %v12756_v5  ;;  %v12763_v18 = vmul.f32 %v9651_v48, %v15483_v53  ;;  %v12789_v15 = vmul.f32 %v9578_v51, %v2088_v62  ;;  %v12811_v31 = vmul.f32 %v9667_v9, %v15483_v53 }
 0x2d2   : > { %v4178_v25 = vadd.f32 %v12649_v58, %v4144_v1  ;;  %v1525_v14 = vadd.f32 %v1450_v4, %v1298_v35  ;;  %v1677_v34 = vsel %vm1627_vm4, %v15039_v49, %v1676_v61  ;;  %v1904_v35 = vsel %vm1854_vm5, %v15038_v19, %v1903_v6  ;;  %v12807_v49 = vpop.f32.mrf.mxu1 }
 0x2d3   : > { %v15037_v43 = vrot.slane %v12766_v60, 1  ;;  %v12775_v4 = vmul.f32 %v9566_v42, %v2088_v62  ;;  %15487 = vst [vmem:[#allocation38_spill] sm:$0xff] %v12807_v49  ;;  %v15488_v12 = vrot.slane %v12165_v2, 2  ;;  %v15047_v17 = vrot.slane %v12789_v15, 4 }
 0x2d4   : > { %vm4208_vm9 = vcmp.gt.f32.partialorder %v4178_v25, 0.0  ;;  %v4238_v1 = vmul.f32 0.1, %v4178_v25  ;;  %v1752_v22 = vadd.f32 %v1677_v34, %v1525_v14  ;;  %v15484_v14 = vrot.slane %v12162_v33, 1 }
 0x2d5   : > { %v15046_v34 = vrot.slane %v12775_v4, 2  ;;  %v15491_v2 = vrot.slane %v12763_v18, 1  ;;  %vm538_vm7 = vcmask 523264  }
 0x2d6   : > { %v4268_v61 = vsel %vm4208_vm9, %v4178_v25, %v4238_v1  ;;  %v1979_v39 = vadd.f32 %v1904_v35, %v1752_v22  ;;  %v2416_v6 = vsel %vm1173_vm2, %v15037_v43, %v15484_v14  ;;  %v15485_v25 = vld [vmem:[#allocation84_spill] sm:$0xff]  ;;  %v12793_v22 = vpop.f32.mrf.mxu0  ;;  %vm541_vm9 = vcmask 519168  }
 0x2d7   : > { %4298 = vst.msk [vmem:[#allocation3 + $0xaa] sm:$0xff] %vm488_vm8, %v4268_v61  ;;  %v1110_v1 = vmul.f32 %v9556_v37, %v15485_v25  ;;  %v12798_v61 = vmul.f32 %v9656_v28, %v15483_v53  ;;  %v1337_v14 = vmul.f32 %v9574_v47, %v15485_v25  ;;  %v1564_v62 = vmul.f32 %v9593_v59, %v15485_v25 }
 0x2d8   : > { %15486 = vst [vmem:[#allocation32_spill] sm:$0xff] %v12793_v22  ;;  %v2190_v33 = vadd.f32 %v2160_v44, %v1979_v39  ;;  %v1791_v19 = vmul.f32 %v9618_v11, %v15485_v25  ;;  %v965_v39 = vmul.f32 %v15147_v40, %v15485_v25  ;;  %v3210_v22 = vmul.f32 %v15148_v30, %v15483_v53  ;;  %v15489_v25 = vld [vmem:[#allocation65_spill] sm:$0xff] }
 0x2d9   : > { %v1219_v43 = vrot.slane %v1110_v1, 1  ;;  %v1446_v44 = vrot.slane %v1337_v14, 2  ;;  %v2642_v1 = vsel %vm1400_vm3, %v15046_v34, %v15488_v12  ;;  %v1673_v49 = vrot.slane %v1564_v62, 3 }
 0x2da   : > { %v2491_v35 = vadd.f32 %v2416_v6, %v2190_v33  ;;  %v1900_v33 = vrot.slane %v1791_v19, 4  ;;  %v15490_v14 = vrot.slane %v15489_v25, 1  ;;  %v4071_v12 = vrot.slane %v15492_v57, 4  ;;  %v9033_v19 = vld [vmem:[%s14858_s3 + $0x78] sm:$0xff] }
 0x2db   : > { %v1221_v13 = vsel %vm1173_vm2, %v1219_v43, %v1220_v26  ;;  %v15493_v34 = vrot.slane %v12168_v21, 3  ;;  %v15494_v26 = vrot.slane %v12779_v3, 3  ;;  %v15495_v53 = vrot.slane %v12703_v36, 2  ;;  %5459 = vmatpush.bf16.msrb.mxu3 %v9033_v19 }
 0x2dc   : > { %v2717_v54 = vadd.f32 %v2642_v1, %v2491_v35  ;;  %v1297_v6 = vadd.f32 %v1221_v13, %v965_v39  ;;  %v3396_v8 = vsel %vm1173_vm2, %v15491_v2, %v15490_v14  ;;  %v3619_v35 = vrot.slane %v12798_v61, 2  ;;  %v15498_v1 = vld [vmem:[#allocation79_spill] sm:$0xff] }
 0x2dd   : > { %v2868_v43 = vsel %vm1627_vm4, %v15494_v26, %v15493_v34  ;;  %v1448_v13 = vsel %vm1400_vm3, %v1446_v44, %v15495_v53  ;;  %v3845_v62 = vrot.slane %v12811_v31, 3  ;;  %v15496_v21 = vrot.slane %v12179_v56, 4  ;;  %v12863_v26 = vld [vmem:[#allocation3 + $0x20] sm:$0xff] }
 0x2de   : > { %v2943_v39 = vadd.f32 %v2868_v43, %v2717_v54  ;;  %v1524_v57 = vadd.f32 %v1448_v13, %v1297_v6  ;;  %v15497_v36 = vrot.slane %v12707_v10, 3  ;;  %v3284_v25 = vmul.f32 %v9651_v48, %v15498_v1  ;;  %v9032_v54 = vld [vmem:[%s14858_s3 + $0x70] sm:$0xff]  ;;  %v4550_v2 = vpop.f32.mrf.mxu0 }
 0x2df   : > { %v3094_v34 = vsel %vm1854_vm5, %v15047_v17, %v15496_v21  ;;  %v2304_v14 = vmul.f32 %v9564_v41, %v2083_v52  ;;  %v15499_v61 = vrot.slane %v12717_v7, 4  ;;  %v2159_v10 = vmul.f32 %v9576_v50, %v2083_v52  ;;  %v4627_v21 = vpop.f32.mrf.mxu1  ;;  %5460 = vmatpush.bf16.msrb.mxu3 %v9032_v54  ;;  %v15504_v54 = vld [vmem:[#allocation67_spill] sm:$0xff] }
 0x2e0   : > { %v1675_v44 = vsel %vm1627_vm4, %v1673_v49, %v15497_v36  ;;  %v3169_v31 = vadd.f32 %v3094_v34, %v2943_v39  ;;  %v12861_v49 = vld [vmem:[#allocation3 + $0x18] sm:$0xff]  ;;  %v3510_v43 = vmul.f32 %v9656_v28, %v15498_v1  ;;  %v3736_v53 = vmul.f32 %v9667_v9, %v15498_v1 }
 0x2e1   : > { %v1751_v56 = vadd.f32 %v1675_v44, %v1524_v57  ;;  %v1902_v6 = vsel %vm1854_vm5, %v1900_v33, %v15499_v61  ;;  %v2412_v13 = vrot.slane %v2304_v14, 1  ;;  %v2530_v19 = vmul.f32 %v9566_v42, %v2083_v52 }
 0x2e2   : > { %v3240_v39 = vadd.f32 %v3210_v22, %v3169_v31  ;;  %v2756_v33 = vmul.f32 %v9572_v45, %v2083_v52  ;;  %v2982_v57 = vmul.f32 %v9578_v51, %v2083_v52  ;;  %v15500_v34 = vrot.slane %v12766_v60, 1  ;;  %v15501_v22 = vld [vmem:[#allocation88_spill] sm:$0xff] }
 0x2e3   : > { %v1978_v7 = vadd.f32 %v1902_v6, %v1751_v56  ;;  %v2638_v44 = vrot.slane %v2530_v19, 2  ;;  %v12875_v61 = vadd.f32 %v4627_v21, %v4550_v2  ;;  %v5098_v17 = vpack.c.bf16 %v12863_v26, %v12861_v49  ;;  %v15502_v6 = vld [vmem:[#allocation66_spill] sm:$0xff] }
 0x2e4   : > { %v2414_v36 = vsel %vm1173_vm2, %v2412_v13, %v15500_v34  ;;  %v3471_v14 = vadd.f32 %v3396_v8, %v3240_v39  ;;  %v3392_v16 = vrot.slane %v3284_v25, 1  ;;  %v4070_v31 = vrot.slane %v15501_v22, 4  ;;  %v15506_v39 = vld [vmem:[#allocation68_spill] sm:$0xff] }
 0x2e5   : > { %v2189_v56 = vadd.f32 %v2159_v10, %v1978_v7  ;;  %v15503_v29 = vrot.slane %v15502_v6, 2  ;;  %v3618_v46 = vrot.slane %v3510_v43, 2  ;;  %v3844_v60 = vrot.slane %v3736_v53, 3  ;;  %8451 = vmatmul.msk.bf16.vlgmr.msrb.gmra.mxu1 %vm488_vm8, %v5098_v17 }
 0x2e6   : > { %v2864_v23 = vrot.slane %v2756_v33, 3  ;;  %v3090_v21 = vrot.slane %v2982_v57, 4  ;;  %v15505_v8 = vrot.slane %v15504_v54, 3  ;;  %v15507_v10 = vrot.slane %v15506_v39, 4  ;;  %v15517_v39 = vld [vmem:[#allocation87_spill] sm:$0xff] }
 0x2e7   : > { %v3622_v52 = vsel %vm1400_vm3, %v3619_v35, %v15503_v29  ;;  %v2490_v19 = vadd.f32 %v2414_v36, %v2189_v56  ;;  %v3209_v29 = vmul.f32 %v15148_v30, %v15498_v1  ;;  %v15508_v43 = vrot.slane %v12775_v4, 2  ;;  %v15511_v4 = vld [vmem:[#allocation101_spill] sm:$0xff] }
 0x2e8   : > { %v3697_v13 = vadd.f32 %v3622_v52, %v3471_v14  ;;  %v3848_v25 = vsel %vm1627_vm4, %v3845_v62, %v15505_v8  ;;  %v4074_v7 = vsel %vm1854_vm5, %v4071_v12, %v15507_v10  ;;  %v15509_v33 = vrot.slane %v12763_v18, 1  ;;  %v2274_v14 = vpop.permute.xlu2 %2273 }
 0x2e9   : > { %v2640_v17 = vsel %vm1400_vm3, %v2638_v44, %v15508_v43  ;;  %v4072_v34 = vsel %vm1854_vm5, %v4070_v31, %v4071_v12  ;;  %v3620_v22 = vsel %vm1400_vm3, %v3618_v46, %v3619_v35  ;;  %v3846_v56 = vsel %vm1627_vm4, %v3844_v60, %v3845_v62 }
 0x2ea   : > { %v3923_v53 = vadd.f32 %v3848_v25, %v3697_v13  ;;  %v3394_v57 = vsel %vm1173_vm2, %v3392_v16, %v15509_v33  ;;  %v2716_v36 = vadd.f32 %v2640_v17, %v2490_v19  ;;  %v15510_v6 = vrot.slane %v12779_v3, 3  ;;  %v15518_v33 = vld [vmem:[#allocation91_spill] sm:$0xff] }
 0x2eb   : > { %v12907_v44 = vmul.f32 %v9556_v37, %v15511_v4  ;;  %v15512_v16 = vrot.slane %v12789_v15, 4  ;;  %v12914_v31 = vmul.f32 %v9574_v47, %v15511_v4  ;;  %v12917_v46 = vmul.f32 %v9564_v41, %v2274_v14 }
 0x2ec   : > { %v2866_v1 = vsel %vm1627_vm4, %v2864_v23, %v15510_v6  ;;  %v4149_v52 = vadd.f32 %v4074_v7, %v3923_v53  ;;  %v12922_v23 = vmul.f32 %v9593_v59, %v15511_v4  ;;  %v12926_v35 = vmul.f32 %v9618_v11, %v15511_v4 }
 0x2ed   : > { %v2942_v18 = vadd.f32 %v2866_v1, %v2716_v36  ;;  %v3092_v12 = vsel %vm1854_vm5, %v3090_v21, %v15512_v16  ;;  %15513 = vst [vmem:[#allocation42_spill] sm:$0xff] %v12917_v46  ;;  %v1230_v3 = vrot.slane %v12907_v44, 1  ;;  %v970_v60 = vmul.f32 %v15147_v40, %v15511_v4  ;;  %v15515_v21 = vld [vmem:[#allocation89_spill] sm:$0xff]  ;;  %v15520_v1 = vld [vmem:[#allocation92_spill] sm:$0xff] }
 0x2ee   : > { %v4183_v15 = vadd.f32 %v12649_v58, %v4149_v52  ;;  %v15055_v13 = vrot.slane %v12914_v31, 2  ;;  %v12933_v19 = vmul.f32 %v9566_v42, %v2274_v14  ;;  %v15516_v54 = vrot.slane %v15515_v21, 1  ;;  %v9170_v46 = vld [vmem:[#allocation3 + $0x8] sm:$0xff] }
 0x2ef   : > { %v3168_v62 = vadd.f32 %v3092_v12, %v2942_v18  ;;  %v15053_v25 = vrot.slane %v12922_v23, 3  ;;  %v1799_v10 = vmul.f32 %v9618_v11, %v15517_v39  ;;  %v12944_v53 = vmul.f32 %v9572_v45, %v2274_v14  ;;  %v2108_v18 = vpop.permute.xlu1 %2107 }
 0x2f0   : > { %15514 = vst [vmem:[#allocation20_spill] sm:$0xff] %v12933_v19  ;;  %v1233_v8 = vsel %vm1173_vm2, %v1230_v3, %v15516_v54  ;;  %vm4213_vm10 = vcmp.gt.f32.partialorder %v4183_v15, 0.0  ;;  %v4243_v7 = vmul.f32 0.1, %v4183_v15  ;;  %v15519_v36 = vrot.slane %v15518_v33, 2  ;;  %v15521_v54 = vld [vmem:[#allocation95_spill] sm:$0xff] }
 0x2f1   : > { %v3239_v43 = vadd.f32 %v3209_v29, %v3168_v62  ;;  %v1302_v17 = vadd.f32 %v1233_v8, %v970_v60  ;;  %v1686_v4 = vrot.slane %v15520_v1, 3  ;;  %v15052_v52 = vrot.slane %v12926_v35, 4 }
 0x2f2   : > { %v1460_v6 = vsel %vm1400_vm3, %v15055_v13, %v15519_v36  ;;  %v4273_v16 = vsel %vm4213_vm10, %v4183_v15, %v4243_v7  ;;  %v12955_v29 = vmul.f32 %v9651_v48, %v15521_v54  ;;  %v12960_v60 = vmul.f32 %v9578_v51, %v2274_v14 }
 0x2f3   : > { %v3470_v12 = vadd.f32 %v3394_v57, %v3239_v43  ;;  %v1529_v21 = vadd.f32 %v1460_v6, %v1302_v17  ;;  %4303 = vst.msk [vmem:[#allocation3 + $0xe2] sm:$0xff] %vm488_vm8, %v4273_v16  ;;  %v1687_v8 = vsel %vm1627_vm4, %v15053_v25, %v1686_v4  ;;  %v1913_v39 = vrot.slane %v1799_v10, 4  ;;  %v15522_v4 = vld [vmem:[#allocation104_spill] sm:$0xff]  ;;  %v15525_v25 = vld [vmem:[#allocation103_spill] sm:$0xff] }
 0x2f4   : > { %v12967_v57 = vmul.f32 %v9656_v28, %v15521_v54  ;;  %v2164_v7 = vmul.f32 %v9576_v50, %v2108_v18  ;;  %v3214_v14 = vmul.f32 %v15148_v30, %v15521_v54  ;;  %v12977_v17 = vmul.f32 %v9667_v9, %v15521_v54  ;;  %v15528_v16 = vld [vmem:[#allocation80_spill] sm:$0xff] }
 0x2f5   : > { %v3696_v33 = vadd.f32 %v3620_v22, %v3470_v12  ;;  %v1756_v15 = vadd.f32 %v1687_v8, %v1529_v21  ;;  %v1914_v43 = vsel %vm1854_vm5, %v15052_v52, %v1913_v39  ;;  %v12980_v22 = vmul.f32 %v9564_v41, %v2108_v18 }
 0x2f6   : > { %v12984_v1 = vmul.f32 %v9566_v42, %v2108_v18  ;;  %v12989_v21 = vmul.f32 %v9572_v45, %v2108_v18  ;;  %v12992_v54 = vmul.f32 %v9578_v51, %v2108_v18  ;;  %v1116_v18 = vmul.f32 %v9556_v37, %v15525_v25 }
 0x2f7   : > { %v3922_v10 = vadd.f32 %v3846_v56, %v3696_v33  ;;  %v1983_v36 = vadd.f32 %v1914_v43, %v1756_v15  ;;  %v15054_v12 = vrot.slane %v12980_v22, 1  ;;  %v15523_v43 = vld [vmem:[#allocation17_spill] sm:$0xff]  ;;  %v1570_v39 = vmul.f32 %v9593_v59, %v15525_v25 }
 0x2f8   : > { %v15056_v33 = vrot.slane %v12984_v1, 2  ;;  %v15524_v62 = vrot.slane %v15523_v43, 1  ;;  %v15057_v52 = vrot.slane %v12989_v21, 3  ;;  %v15526_v43 = vrot.slane %v12282_v20, 2 }
 0x2f9   : > { %v4148_v8 = vadd.f32 %v4072_v34, %v3922_v10  ;;  %v2194_v56 = vadd.f32 %v2164_v7, %v1983_v36  ;;  %v969_v7 = vmul.f32 %v15147_v40, %v15525_v25  ;;  %v1343_v36 = vmul.f32 %v9574_v47, %v15525_v25 }
 0x2fa   : > { %v2426_v2 = vsel %vm1173_vm2, %v15054_v12, %v15524_v62  ;;  %v2652_v62 = vsel %vm1400_vm3, %v15056_v33, %v15526_v43  ;;  %v1229_v15 = vrot.slane %v1116_v18, 1  ;;  %v15527_v13 = vrot.slane %v12311_v38, 3 }
 0x2fb   : > { %v4182_v34 = vadd.f32 %v12649_v58, %v4148_v8  ;;  %v2495_v10 = vadd.f32 %v2426_v2, %v2194_v56  ;;  %v1456_v56 = vrot.slane %v1343_v36, 2  ;;  %v1683_v33 = vrot.slane %v1570_v39, 3 }
 0x2fc   : > { %v2878_v20 = vsel %vm1627_vm4, %v15057_v52, %v15527_v13  ;;  %v1231_v43 = vsel %vm1173_vm2, %v1229_v15, %v1230_v3  ;;  %v1797_v18 = vmul.f32 %v9618_v11, %v15525_v25  ;;  %v15529_v6 = vrot.slane %v15528_v16, 1  ;;  %v15531_v13 = vld [vmem:[#allocation85_spill] sm:$0xff] }
 0x2fd   : > { %vm4212_vm11 = vcmp.gt.f32.partialorder %v4182_v34, 0.0  ;;  %v4242_v2 = vmul.f32 0.1, %v4182_v34  ;;  %v2721_v8 = vadd.f32 %v2652_v62, %v2495_v10  ;;  %v15530_v10 = vrot.slane %v12955_v29, 1 }
 0x2fe   : > { %v1301_v62 = vadd.f32 %v1231_v43, %v969_v7  ;;  %v15532_v52 = vrot.slane %v15531_v13, 4  ;;  %v15533_v44 = vrot.slane %v15522_v4, 4  ;;  %v15534_v39 = vrot.slane %v12404_v24, 4  ;;  %v2103_v7 = vpop.permute.xlu0 %2102  ;;  %v15540_v43 = vld [vmem:[#allocation83_spill] sm:$0xff] }
 0x2ff   : > { %v4272_v12 = vsel %vm4212_vm11, %v4182_v34, %v4242_v2  ;;  %v3406_v36 = vsel %vm1173_vm2, %v15530_v10, %v15529_v6  ;;  %v2947_v38 = vadd.f32 %v2878_v20, %v2721_v8  ;;  %v15535_v25 = vrot.slane %v12992_v54, 4  ;;  %v15537_v2 = vld [vmem:[#allocation82_spill] sm:$0xff] }
 0x300   : > { %4302 = vst.msk [vmem:[#allocation3 + $0xda] sm:$0xff] %vm488_vm8, %v4272_v12  ;;  %v4084_v3 = vsel %vm1854_vm5, %v15533_v44, %v15532_v52  ;;  %v15536_v15 = vrot.slane %v12914_v31, 2  ;;  %v1910_v34 = vrot.slane %v1797_v18, 4  ;;  %v9039_v12 = vld [vmem:[%s14858_s3 + $0xa8] sm:$0xff]  ;;  %v15538_v24 = vrot.slane %v15537_v2, 2  ;;  %v9037_v44 = vld [vmem:[%s14858_s3 + $0x98] sm:$0xff] }
 0x301   : > { %v3104_v16 = vsel %vm1854_vm5, %v15535_v25, %v15534_v39  ;;  %v9035_v52 = vld [vmem:[%s14858_s3 + $0x88] sm:$0xff]  ;;  %v15539_v8 = vrot.slane %v12967_v57, 2  ;;  %v15541_v31 = vrot.slane %v15540_v43, 3  ;;  %v15543_v25 = vrot.slane %v12922_v23, 3  ;;  %v15544_v2 = vld [vmem:[#allocation97_spill] sm:$0xff]  ;;  %5827 = vmatpush.bf16.msra.mxu2 %v9039_v12  ;;  %5753 = vmatpush.bf16.msra.mxu1 %v9037_v44  ;;  %v9169_v39 = vld [vmem:[#allocation3] sm:$0xff] }
 0x302   : > { %v1458_v6 = vsel %vm1400_vm3, %v1456_v56, %v15536_v15  ;;  %v15542_v56 = vrot.slane %v12977_v17, 3  ;;  %v3173_v10 = vadd.f32 %v3104_v16, %v2947_v38  ;;  %5606 = vmatpush.bf16.msra.mxu0 %v9035_v52  ;;  %v13078_v38 = vpop.f32.mrf.mxu2  ;;  %v2163_v23 = vmul.f32 %v9576_v50, %v2103_v7 }
 0x303   : > { %v3632_v20 = vsel %vm1400_vm3, %v15539_v8, %v15538_v24  ;;  %v1528_v13 = vadd.f32 %v1458_v6, %v1301_v62  ;;  %v1685_v15 = vsel %vm1627_vm4, %v1683_v33, %v15543_v25  ;;  %v13072_v24 = vmul.f32 %v15148_v30, %v15544_v2  ;;  %15545 = vst [vmem:[#allocation21_spill] sm:$0xff] %v13078_v38 }
 0x304   : > { %v3858_v18 = vsel %vm1627_vm4, %v15542_v56, %v15541_v31  ;;  %v13076_v8 = vmul.f32 %v9651_v48, %v15544_v2  ;;  %v3244_v62 = vadd.f32 %v3214_v14, %v3173_v10  ;;  %v13082_v6 = vmul.f32 %v9656_v28, %v15544_v2  ;;  %v15547_v10 = vld [vmem:[#allocation105_spill] sm:$0xff] }
 0x305   : > { %v1755_v16 = vadd.f32 %v1685_v15, %v1528_v13  ;;  %v15546_v33 = vrot.slane %v12926_v35, 4  ;;  %v13090_v31 = vmul.f32 %v9667_v9, %v15544_v2  ;;  %v2310_v12 = vmul.f32 %v9564_v41, %v2103_v7 }
 0x306   : > { %v2536_v14 = vmul.f32 %v9566_v42, %v2103_v7  ;;  %v3475_v52 = vadd.f32 %v3406_v36, %v3244_v62  ;;  %v2762_v25 = vmul.f32 %v9572_v45, %v2103_v7  ;;  %v2988_v35 = vmul.f32 %v9578_v51, %v2103_v7  ;;  %v13104_v7 = vld [vmem:[#allocation3 + $0x28] sm:$0xf] }
 0x307   : > { %v1912_v43 = vsel %vm1854_vm5, %v1910_v34, %v15546_v33  ;;  %v2422_v15 = vrot.slane %v2310_v12, 1  ;;  %v4951_v34 = vrot.slane %v9169_v39, 4  ;;  %v13097_v33 = vpop.f32.mrf.mxu3  ;;  %v3402_v38 = vrot.slane %v13076_v8, 1  ;;  %v9171_v12 = vld [vmem:[#allocation3 + $0x10] sm:$0xf] }
 0x308   : > { %v1982_v56 = vadd.f32 %v1912_v43, %v1755_v16  ;;  %v2648_v44 = vrot.slane %v2536_v14, 2  ;;  %15548 = vst [vmem:[#allocation23_spill] sm:$0xff] %v13097_v33  ;;  %v3701_v2 = vadd.f32 %v3632_v20, %v3475_v52  ;;  %v4952_v5 = vrot.slane %v9170_v46, 4 }
 0x309   : > { %v3628_v36 = vrot.slane %v13082_v6, 2  ;;  %v15549_v62 = vrot.slane %v12980_v22, 1  ;;  %v2874_v43 = vrot.slane %v2762_v25, 3  ;;  %v4954_v14 = vrot.slane %v9171_v12, 4 }
 0x30a   : > { %v2193_v19 = vadd.f32 %v2163_v23, %v1982_v56  ;;  %v3927_v39 = vadd.f32 %v3858_v18, %v3701_v2  ;;  %v15550_v20 = vrot.slane %v12984_v1, 2  ;;  %v4953_v23 = vsel %vm1854_vm5, %v4951_v34, %v4952_v5  ;;  %v4760_v18 = vpop.f32.mrf.mxu2 }
 0x30b   : > { %v2424_v16 = vsel %vm1173_vm2, %v2422_v15, %v15549_v62  ;;  %v3100_v46 = vrot.slane %v2988_v35, 4  ;;  %v4955_v6 = vsel %vm1854_vm5, %v4952_v5, %v4954_v14  ;;  %v5217_v22 = vrot.slane %v12861_v49, 1 }
 0x30c   : > { %v2494_v13 = vadd.f32 %v2424_v16, %v2193_v19  ;;  %v2650_v8 = vsel %vm1400_vm3, %v2648_v44, %v15550_v20  ;;  %v5218_v52 = vrot.slane %v12863_v26, 1  ;;  %v4153_v56 = vadd.f32 %v4084_v3, %v3927_v39  ;;  %v3254_v16 = vpop.permute.xlu2 %3253 }
 0x30d   : > { %v5000_v15 = vpack.c.bf16 %v4955_v6, %v4953_v23  ;;  %v5220_v62 = vrot.slane %v13104_v7, 1  ;;  %v3854_v19 = vrot.slane %v13090_v31, 3  ;;  %v15551_v1 = vrot.slane %v12989_v21, 3 }
 0x30e   : > { %v2720_v25 = vadd.f32 %v2650_v8, %v2494_v13  ;;  %v5219_v35 = vsel %vm1173_vm2, %v5217_v22, %v5218_v52  ;;  %v5364_v5 = vrot.slane %v12861_v49, 2  ;;  %v4187_v34 = vadd.f32 %v12649_v58, %v4153_v56 }
 0x30f   : > { %v2876_v44 = vsel %vm1627_vm4, %v2874_v43, %v15551_v1  ;;  %8436 = vmatmul.msk.bf16.vlgmr.msrb.gmra.mxu0 %vm488_vm8, %v5000_v15  ;;  %v5221_v3 = vsel %vm1173_vm2, %v5218_v52, %v5220_v62  ;;  %v5365_v13 = vrot.slane %v12863_v26, 2  ;;  %v15552_v31 = vrot.slane %v12992_v54, 4  ;;  %v4907_v8 = vpop.f32.mrf.mxu3 }
 0x310   : > { %v2946_v2 = vadd.f32 %v2876_v44, %v2720_v25  ;;  %v5266_v12 = vpack.c.bf16 %v5221_v3, %v5219_v35  ;;  %v5367_v43 = vrot.slane %v13104_v7, 2  ;;  %v4792_v14 = vadd.f32 %v4760_v18, %v12875_v61 }
 0x311   : > { %v3102_v21 = vsel %vm1854_vm5, %v3100_v46, %v15552_v31  ;;  %vm4217_vm12 = vcmp.gt.f32.partialorder %v4187_v34, 0.0  ;;  %v4247_v49 = vmul.f32 0.1, %v4187_v34  ;;  %v5366_v20 = vsel %vm1400_vm3, %v5364_v5, %v5365_v13  ;;  %v15559_v31 = vld [vmem:[#allocation98_spill] sm:$0xff] }
 0x312   : > { %v3172_v39 = vadd.f32 %v3102_v21, %v2946_v2  ;;  %8466 = vmatmul.msk.bf16.vlgmr.msrb.gmra.mxu2 %vm488_vm8, %v5266_v12  ;;  %v5368_v26 = vsel %vm1400_vm3, %v5365_v13, %v5367_v43  ;;  %v13133_v54 = vadd.f32 %v4907_v8, %v4792_v14  ;;  %v13136_v46 = vmul.f32 %v9651_v48, %v3254_v16  ;;  %v15560_v8 = vld [vmem:[#allocation99_spill] sm:$0xff] }
 0x313   : > { %v4277_v61 = vsel %vm4217_vm12, %v4187_v34, %v4247_v49  ;;  %v5413_v52 = vpack.c.bf16 %v5368_v26, %v5366_v20  ;;  %v15553_v56 = vrot.slane %v12955_v29, 1  ;;  %v15554_v15 = vrot.slane %v12967_v57, 2  ;;  %v9174_v12 = vld [vmem:[#allocation3 + $0x40] sm:$0xf] }
 0x314   : > { %v3243_v22 = vadd.f32 %v13072_v24, %v3172_v39  ;;  %4307 = vst.msk [vmem:[#allocation3 + $0x112] sm:$0xff] %vm488_vm8, %v4277_v61  ;;  %v15555_v18 = vrot.slane %v15522_v4, 4  ;;  %v15556_v1 = vrot.slane %v15547_v10, 4  ;;  %v13153_v35 = vmul.f32 %v9656_v28, %v3254_v16  ;;  %v2128_v10 = vpop.permute.xlu1 %2127 }
 0x315   : > { %v3404_v25 = vsel %vm1173_vm2, %v3402_v38, %v15553_v56  ;;  %v3630_v62 = vsel %vm1400_vm3, %v3628_v36, %v15554_v15  ;;  %v15557_v24 = vrot.slane %v12977_v17, 3  ;;  %8481 = vmatmul.msk.bf16.vlgmr.msrb.gmra.mxu3 %vm488_vm8, %v5413_v52  ;;  %v15558_v38 = vld [vmem:[#allocation110_spill] sm:$0xff]  ;;  %v13167_v34 = vmul.f32 %v9667_v9, %v3254_v16 }
 0x316   : > { %v4082_v44 = vsel %vm1854_vm5, %v15556_v1, %v15555_v18  ;;  %v3474_v29 = vadd.f32 %v3404_v25, %v3243_v22  ;;  %v1123_v57 = vmul.f32 %v9556_v37, %v15558_v38  ;;  %v13163_v4 = vmul.f32 %v9574_v47, %v15558_v38  ;;  %v15562_v25 = vld [vmem:[#allocation102_spill] sm:$0xff]  ;;  %v15563_v1 = vld [vmem:[#allocation100_spill] sm:$0xff] }
 0x317   : > { %v3856_v5 = vsel %vm1627_vm4, %v3854_v19, %v15557_v24  ;;  %v13171_v17 = vmul.f32 %v9593_v59, %v15558_v38  ;;  %v13175_v19 = vmul.f32 %v9618_v11, %v15558_v38  ;;  %v1805_v21 = vmul.f32 %v9618_v11, %v15559_v31  ;;  %v15565_v31 = vld [vmem:[#allocation111_spill] sm:$0xff] }
 0x318   : > { %v3700_v2 = vadd.f32 %v3630_v62, %v3474_v29  ;;  %v1240_v3 = vrot.slane %v1123_v57, 1  ;;  %v1467_v13 = vrot.slane %v13163_v4, 2  ;;  %v974_v43 = vmul.f32 %v15147_v40, %v15558_v38 }
 0x319   : > { %v1694_v14 = vrot.slane %v13171_v17, 3  ;;  %v13185_v49 = vmul.f32 %v9564_v41, %v2128_v10  ;;  %v13188_v20 = vmul.f32 %v15481_v0, %v3254_v16  ;;  %v15561_v26 = vrot.slane %v15560_v8, 1 }
 0x31a   : > { %v3926_v39 = vadd.f32 %v3856_v5, %v3700_v2  ;;  %v1921_v22 = vrot.slane %v13175_v19, 4  ;;  %v1696_v15 = vrot.slane %v15562_v25, 3  ;;  %v2543_v62 = vmul.f32 %v9566_v42, %v2128_v10 }
 0x31b   : > { %v1243_v61 = vsel %vm1173_vm2, %v1240_v3, %v15561_v26  ;;  %v15564_v24 = vrot.slane %v15563_v1, 2  ;;  %v1923_v16 = vrot.slane %v1805_v21, 4  ;;  %v2433_v29 = vrot.slane %v13185_v49, 1 }
 0x31c   : > { %v1306_v56 = vadd.f32 %v1243_v61, %v974_v43  ;;  %v4152_v18 = vadd.f32 %v4082_v44, %v3926_v39  ;;  %v1697_v57 = vsel %vm1627_vm4, %v1694_v14, %v1696_v15  ;;  %v2168_v4 = vmul.f32 %v9576_v50, %v2128_v10  ;;  %v2123_v43 = vpop.permute.xlu0 %2122 }
 0x31d   : > { %v1470_v5 = vsel %vm1400_vm3, %v1467_v13, %v15564_v24  ;;  %v13204_v17 = vmul.f32 %v9572_v45, %v2128_v10  ;;  %v1924_v2 = vsel %vm1854_vm5, %v1921_v22, %v1923_v16  ;;  %v13209_v44 = vmul.f32 %v9578_v51, %v2128_v10 }
 0x31e   : > { %v1533_v38 = vadd.f32 %v1470_v5, %v1306_v56  ;;  %v4186_v19 = vadd.f32 %v12649_v58, %v4152_v18  ;;  %v1122_v21 = vmul.f32 %v9556_v37, %v15565_v31  ;;  %v2659_v39 = vrot.slane %v2543_v62, 2 }
 0x31f   : > { %v1349_v8 = vmul.f32 %v9574_v47, %v15565_v31  ;;  %v1576_v26 = vmul.f32 %v9593_v59, %v15565_v31  ;;  %v15566_v56 = vrot.slane %v12487_v55, 1  ;;  %v973_v10 = vmul.f32 %v15147_v40, %v15565_v31 }
 0x320   : > { %v1760_v49 = vadd.f32 %v1697_v57, %v1533_v38  ;;  %vm4216_vm13 = vcmp.gt.f32.partialorder %v4186_v19, 0.0  ;;  %v4246_v61 = vmul.f32 0.1, %v4186_v19  ;;  %v2885_v18 = vrot.slane %v13204_v17, 3 }
 0x321   : > { %v2436_v25 = vsel %vm1173_vm2, %v2433_v29, %v15566_v56  ;;  %v1239_v1 = vrot.slane %v1122_v21, 1  ;;  %v1466_v62 = vrot.slane %v1349_v8, 2  ;;  %v3111_v5 = vrot.slane %v13209_v44, 4 }
 0x322   : > { %v1987_v15 = vadd.f32 %v1924_v2, %v1760_v49  ;;  %v4276_v24 = vsel %vm4216_vm13, %v4186_v19, %v4246_v61  ;;  %v1803_v16 = vmul.f32 %v9618_v11, %v15565_v31  ;;  %v2316_v38 = vmul.f32 %v9564_v41, %v2123_v43 }
 0x323   : > { %4306 = vst.msk [vmem:[#allocation3 + $0x10a] sm:$0xff] %vm488_vm8, %v4276_v24  ;;  %v15567_v57 = vrot.slane %v12495_v27, 2  ;;  %v1241_v2 = vsel %vm1173_vm2, %v1239_v1, %v1240_v3  ;;  %v1693_v17 = vrot.slane %v1576_v26, 3  ;;  %v2542_v44 = vmul.f32 %v9566_v42, %v2123_v43  ;;  %v13238_v27 = vld [vmem:[#allocation3 + $0x50] sm:$0xff] }
 0x324   : > { %v2198_v55 = vadd.f32 %v2168_v4, %v1987_v15  ;;  %v1305_v21 = vadd.f32 %v1241_v2, %v973_v10  ;;  %v1920_v49 = vrot.slane %v1803_v16, 4  ;;  %v2432_v19 = vrot.slane %v2316_v38, 1  ;;  %v13236_v4 = vld [vmem:[#allocation3 + $0x48] sm:$0xff]  ;;  %v13246_v16 = vpop.permute.xlu1 %943 }
 0x325   : > { %v2662_v56 = vsel %vm1400_vm3, %v2659_v39, %v15567_v57  ;;  %v1468_v31 = vsel %vm1400_vm3, %v1466_v62, %v1467_v13  ;;  %v2768_v61 = vmul.f32 %v9572_v45, %v2123_v43  ;;  %v2994_v24 = vmul.f32 %v9578_v51, %v2123_v43 }
 0x326   : > { %v2499_v8 = vadd.f32 %v2436_v25, %v2198_v55  ;;  %v15568_v15 = vrot.slane %v12564_v32, 3  ;;  %v15569_v26 = vrot.slane %v12571_v63, 4  ;;  %v1532_v1 = vadd.f32 %v1468_v31, %v1305_v21 }
 0x327   : > { %v2658_v25 = vrot.slane %v2542_v44, 2  ;;  %v1695_v62 = vsel %vm1627_vm4, %v1693_v17, %v1694_v14  ;;  %v1922_v38 = vsel %vm1854_vm5, %v1920_v49, %v1921_v22  ;;  %v2167_v55 = vmul.f32 %v9576_v50, %v2123_v43  ;;  %v13270_v17 = vpop.f32.mrf.mxu0 }
 0x328   : > { %v2888_v3 = vsel %vm1627_vm4, %v2885_v18, %v15568_v15  ;;  %v3114_v10 = vsel %vm1854_vm5, %v3111_v5, %v15569_v26  ;;  %v2725_v13 = vadd.f32 %v2662_v56, %v2499_v8  ;;  %v1759_v57 = vadd.f32 %v1695_v62, %v1532_v1  ;;  %v13254_v15 = vpop.permute.xlu0 %938  ;;  %15570 = vst [vmem:[#allocation22_spill] sm:$0xff] %v13270_v17  ;;  %v13278_v1 = vpop.f32.mrf.mxu1 }
 0x329   : > { %v2434_v32 = vsel %vm1173_vm2, %v2432_v19, %v2433_v29  ;;  %v2884_v2 = vrot.slane %v2768_v61, 3  ;;  %v5099_v63 = vpack.c.bf16 %v13238_v27, %v13236_v4  ;;  %v2660_v44 = vsel %vm1400_vm3, %v2658_v25, %v2659_v39  ;;  %15571 = vst [vmem:[#allocation33_spill] sm:$0xff] %v13278_v1 }
 0x32a   : > { %v2951_v21 = vadd.f32 %v2888_v3, %v2725_v13  ;;  %v3110_v31 = vrot.slane %v2994_v24, 4  ;;  %v3297_v14 = vmul.f32 %v9651_v48, %v13246_v16  ;;  %v1986_v56 = vadd.f32 %v1922_v38, %v1759_v57 }
 0x32b   : > { %8452 = vmatmul.msk.bf16.gmra.mxu1 %vm488_vm8, %v5099_v63  ;;  %v3523_v22 = vmul.f32 %v9656_v28, %v13246_v16  ;;  %v13264_v29 = vmul.f32 %v9667_v9, %v13246_v16  ;;  %v13268_v43 = vmul.f32 %v15481_v0, %v13246_v16  ;;  %v3218_v49 = vmul.f32 %v15148_v30, %v13246_v16  ;;  %v15572_v63 = vld [vmem:[#allocation31_spill] sm:$0xff] }
 0x32c   : > { %v3177_v39 = vadd.f32 %v3114_v10, %v2951_v21  ;;  %v3413_v19 = vrot.slane %v3297_v14, 1  ;;  %v3296_v8 = vmul.f32 %v9651_v48, %v13254_v15  ;;  %v2197_v61 = vadd.f32 %v2167_v55, %v1986_v56  ;;  %v15574_v14 = vld [vmem:[#allocation27_spill] sm:$0xff] }
 0x32d   : > { %v2886_v24 = vsel %vm1627_vm4, %v2884_v2, %v2885_v18  ;;  %v3639_v3 = vrot.slane %v3523_v22, 2  ;;  %v3865_v26 = vrot.slane %v13264_v29, 3  ;;  %v4091_v13 = vrot.slane %v13268_v43, 4  ;;  %v2138_v29 = vpop.permute.xlu1 %2137 }
 0x32e   : > { %v3248_v25 = vadd.f32 %v3218_v49, %v3177_v39  ;;  %v3412_v62 = vrot.slane %v3296_v8, 1  ;;  %v3522_v10 = vmul.f32 %v9656_v28, %v13254_v15  ;;  %v2498_v38 = vadd.f32 %v2434_v32, %v2197_v61  ;;  %v15576_v39 = vld [vmem:[#allocation30_spill] sm:$0xff]  ;;  %v9172_v61 = vld [vmem:[#allocation3 + $0x30] sm:$0xff] }
 0x32f   : > { %v3112_v57 = vsel %vm1854_vm5, %v3110_v31, %v3111_v5  ;;  %v15573_v21 = vrot.slane %v15572_v63, 1  ;;  %v3217_v18 = vmul.f32 %v15148_v30, %v13254_v15  ;;  %v15575_v56 = vrot.slane %v15574_v14, 2 }
 0x330   : > { %v15577_v49 = vrot.slane %v15576_v39, 3  ;;  %v3638_v8 = vrot.slane %v3522_v10, 2  ;;  %v2724_v5 = vadd.f32 %v2660_v44, %v2498_v38  ;;  %v3748_v31 = vmul.f32 %v9667_v9, %v13254_v15  ;;  %v13305_v10 = vld [vmem:[#allocation3 + $0x58] sm:$0xf]  ;;  %v4632_v6 = vpop.f32.mrf.mxu1 }
 0x331   : > { %v3416_v55 = vsel %vm1173_vm2, %v3413_v19, %v15573_v21  ;;  %v3642_v22 = vsel %vm1400_vm3, %v3639_v3, %v15575_v56  ;;  %v4956_v63 = vrot.slane %v9172_v61, 4  ;;  %v9173_v21 = vld [vmem:[#allocation3 + $0x38] sm:$0xff]  ;;  %v3414_v39 = vsel %vm1173_vm2, %v3412_v62, %v3413_v19  ;;  %v4555_v19 = vpop.f32.mrf.mxu0 }
 0x332   : > { %v3479_v2 = vadd.f32 %v3416_v55, %v3248_v25  ;;  %v3868_v32 = vsel %vm1627_vm4, %v3865_v26, %v15577_v49  ;;  %v4957_v52 = vrot.slane %v9173_v21, 4  ;;  %v15578_v55 = vld [vmem:[#allocation28_spill] sm:$0xff]  ;;  %v4959_v49 = vrot.slane %v9174_v12, 4 }
 0x333   : > { %v15579_v14 = vrot.slane %v15578_v55, 4  ;;  %v2950_v44 = vadd.f32 %v2886_v24, %v2724_v5  ;;  %v3974_v38 = vmul.f32 %v15481_v0, %v13254_v15  ;;  %v3640_v21 = vsel %vm1400_vm3, %v3638_v8, %v3639_v3 }
 0x334   : > { %v3705_v25 = vadd.f32 %v3642_v22, %v3479_v2  ;;  %v4958_v61 = vsel %vm1854_vm5, %v4956_v63, %v4957_v52  ;;  %v5222_v2 = vrot.slane %v13236_v4, 1  ;;  %v4960_v55 = vsel %vm1854_vm5, %v4957_v52, %v4959_v49 }
 0x335   : > { %v4094_v56 = vsel %vm1854_vm5, %v4091_v13, %v15579_v14  ;;  %v5223_v14 = vrot.slane %v13238_v27, 1  ;;  %v3176_v62 = vadd.f32 %v3112_v57, %v2950_v44  ;;  %v3864_v12 = vrot.slane %v3748_v31, 3 }
 0x336   : > { %v3931_v22 = vadd.f32 %v3868_v32, %v3705_v25  ;;  %v13314_v36 = vpack.c.bf16 %v4960_v55, %v4958_v61  ;;  %v5225_v24 = vrot.slane %v13305_v10, 1  ;;  %v5369_v23 = vrot.slane %v13236_v4, 2 }
 0x337   : > { %v5224_v63 = vsel %vm1173_vm2, %v5222_v2, %v5223_v14  ;;  %v5370_v32 = vrot.slane %v13238_v27, 2  ;;  %v3247_v3 = vadd.f32 %v3217_v18, %v3176_v62  ;;  %v5372_v57 = vrot.slane %v13305_v10, 2 }
 0x338   : > { %15580 = vst [vmem:[#allocation58_spill] sm:$0xff] %v13314_v36  ;;  %v4157_v5 = vadd.f32 %v4094_v56, %v3931_v22  ;;  %8437 = vmatmul.msk.bf16.gmra.mxu0 %vm488_vm8, %v13314_v36  ;;  %v5226_v52 = vsel %vm1173_vm2, %v5223_v14, %v5225_v24  ;;  %v13324_v8 = vadd.f32 %v4632_v6, %v4555_v19  ;;  %v4090_v25 = vrot.slane %v3974_v38, 4 }
 0x339   : > { %v5267_v56 = vpack.c.bf16 %v5226_v52, %v5224_v63  ;;  %v5371_v49 = vsel %vm1400_vm3, %v5369_v23, %v5370_v32  ;;  %v3478_v44 = vadd.f32 %v3414_v39, %v3247_v3  ;;  %v5373_v61 = vsel %vm1400_vm3, %v5370_v32, %v5372_v57  ;;  %v13342_v23 = vpop.f32.mrf.mxu2  ;;  %v15583_v63 = vld [vmem:[#allocation13_spill] sm:$0xff] }
 0x33a   : > { %v4191_v31 = vadd.f32 %v12649_v58, %v4157_v5  ;;  %v13331_v18 = vmul.f32 %v9556_v37, %v13246_v16  ;;  %v13335_v2 = vmul.f32 %v9574_v47, %v13246_v16  ;;  %v5414_v58 = vpack.c.bf16 %v5373_v61, %v5371_v49  ;;  %15581 = vst [vmem:[#allocation43_spill] sm:$0xff] %v13342_v23  ;;  %v15582_v5 = vld [vmem:[#allocation18_spill] sm:$0xff]  ;;  %v15587_v49 = vld [vmem:[#allocation24_spill] sm:$0xff] }
 0x33b   : > { %8467 = vmatmul.msk.bf16.gmra.mxu2 %vm488_vm8, %v5267_v56  ;;  %v13340_v38 = vmul.f32 %v9593_v59, %v13246_v16  ;;  %v3704_v39 = vadd.f32 %v3640_v21, %v3478_v44  ;;  %v3866_v22 = vsel %vm1627_vm4, %v3864_v12, %v3865_v26  ;;  %v976_v62 = vmul.f32 %v15147_v40, %v13246_v16 }
 0x33c   : > { %vm4221_vm14 = vcmp.gt.f32.partialorder %v4191_v31, 0.0  ;;  %v4251_v6 = vmul.f32 0.1, %v4191_v31  ;;  %v1245_v55 = vrot.slane %v13331_v18, 1  ;;  %v1472_v14 = vrot.slane %v13335_v2, 2  ;;  %8482 = vmatmul.msk.bf16.gmra.mxu3 %vm488_vm8, %v5414_v58 }
 0x33d   : > { %v13354_v24 = vmul.f32 %v9618_v11, %v13246_v16  ;;  %v1808_v21 = vmul.f32 %v9618_v11, %v15582_v5  ;;  %v3930_v26 = vadd.f32 %v3866_v22, %v3704_v39  ;;  %v4092_v12 = vsel %vm1854_vm5, %v4090_v25, %v4091_v13  ;;  %v15585_v16 = vld [vmem:[#allocation34_spill] sm:$0xff] }
 0x33e   : > { %v4281_v19 = vsel %vm4221_vm14, %v4191_v31, %v4251_v6  ;;  %v15584_v32 = vrot.slane %v15583_v63, 1  ;;  %v1699_v52 = vrot.slane %v13340_v38, 3  ;;  %v15586_v31 = vrot.slane %v15585_v16, 2  ;;  %v13378_v6 = vpop.f32.mrf.mxu3  ;;  %v13387_v22 = vld [vmem:[%s14857_s2] ss:$0 sm:$0xff]  ;;  %v2133_v16 = vpop.permute.xlu0 %2132 }
 0x33f   : > { %4311 = vst.msk [vmem:[#allocation3 + $0x142] sm:$0xff] %vm488_vm8, %v4281_v19  ;;  %v1701_v44 = vrot.slane %v15587_v49, 3  ;;  %v1926_v61 = vrot.slane %v13354_v24, 4  ;;  %v4156_v18 = vadd.f32 %v4092_v12, %v3930_v26  ;;  %v1928_v2 = vrot.slane %v1808_v21, 4 }
 0x340   : > { %v1248_v3 = vsel %vm1173_vm2, %v1245_v55, %v15584_v32  ;;  %v1475_v56 = vsel %vm1400_vm3, %v1472_v14, %v15586_v31  ;;  %v13372_v43 = vmul.f32 %v9564_v41, %v2138_v29  ;;  %v13375_v13 = vmul.f32 %v9566_v42, %v2138_v29  ;;  %15588 = vst [vmem:[#allocation45_spill] sm:$0xff] %v13378_v6 }
 0x341   : > { %v1308_v57 = vadd.f32 %v1248_v3, %v976_v62  ;;  %v2170_v38 = vmul.f32 %v9576_v50, %v2138_v29  ;;  %v13382_v39 = vmul.f32 %v9572_v45, %v2138_v29  ;;  %v4190_v19 = vadd.f32 %v13387_v22, %v4156_v18  ;;  %v4765_v31 = vpop.f32.mrf.mxu2  ;;  %v13404_v18 = vpop.f32.mrf.mxu1 }
 0x342   : > { %v1702_v62 = vsel %vm1627_vm4, %v1699_v52, %v1701_v44  ;;  %v1929_v24 = vsel %vm1854_vm5, %v1926_v61, %v1928_v2  ;;  %v13393_v5 = vmul.f32 %v9578_v51, %v2138_v29  ;;  %v2438_v26 = vrot.slane %v13372_v43, 1 }
 0x343   : > { %v1535_v58 = vadd.f32 %v1475_v56, %v1308_v57  ;;  %v1125_v12 = vmul.f32 %v9556_v37, %v13254_v15  ;;  %v1352_v63 = vmul.f32 %v9574_v47, %v13254_v15  ;;  %vm4220_vm15 = vcmp.gt.f32.partialorder %v4190_v19, 0.0 }
 0x344   : > { %v4250_v32 = vmul.f32 0.1, %v4190_v19  ;;  %v2664_v3 = vrot.slane %v13375_v13, 2  ;;  %v975_v57 = vmul.f32 %v15147_v40, %v13254_v15  ;;  %v1579_v47 = vmul.f32 %v9593_v59, %v13254_v15 }
 0x345   : > { %v1762_v21 = vadd.f32 %v1702_v62, %v1535_v58  ;;  %v1244_v49 = vrot.slane %v1125_v12, 1  ;;  %v1471_v44 = vrot.slane %v1352_v63, 2  ;;  %v1806_v58 = vmul.f32 %v9618_v11, %v13254_v15  ;;  %v13411_v62 = vpop.f32.mrf.mxu0 }
 0x346   : > { %v4280_v37 = vsel %vm4220_vm15, %v4190_v19, %v4250_v32  ;;  %v2319_v63 = vmul.f32 %v9564_v41, %v2133_v16  ;;  %v1698_v59 = vrot.slane %v1579_v47, 3  ;;  %v2545_v11 = vmul.f32 %v9566_v42, %v2133_v16 }
 0x347   : > { %v1989_v29 = vadd.f32 %v1929_v24, %v1762_v21  ;;  %4310 = vst.msk [vmem:[#allocation3 + $0x13a] sm:$0xff] %vm488_vm8, %v4280_v37  ;;  %v15589_v24 = vld [vmem:[#allocation42_spill] sm:$0xff]  ;;  %v1246_v19 = vsel %vm1173_vm2, %v1244_v49, %v1245_v55  ;;  %v1925_v25 = vrot.slane %v1806_v58, 4  ;;  %v1473_v2 = vsel %vm1400_vm3, %v1471_v44, %v1472_v14  ;;  %v4912_v37 = vpop.f32.mrf.mxu3 }
 0x348   : > { %v15590_v21 = vrot.slane %v15589_v24, 1  ;;  %v1307_v32 = vadd.f32 %v1246_v19, %v975_v57  ;;  %v15591_v24 = vld [vmem:[#allocation20_spill] sm:$0xff]  ;;  %v15593_v41 = vrot.slane %v12944_v53, 3  ;;  %v15594_v57 = vrot.slane %v13382_v39, 3  ;;  %v13436_v44 = vld [vmem:[#allocation3 + $0x78] sm:$0xff] }
 0x349   : > { %v2200_v40 = vadd.f32 %v2170_v38, %v1989_v29  ;;  %v2771_v38 = vmul.f32 %v9572_v45, %v2133_v16  ;;  %v2997_v29 = vmul.f32 %v9578_v51, %v2133_v16  ;;  %v15592_v56 = vrot.slane %v15591_v24, 2  ;;  %v13438_v45 = vld [vmem:[#allocation3 + $0x80] sm:$0xff] }
 0x34a   : > { %v2441_v12 = vsel %vm1173_vm2, %v2438_v26, %v15590_v21  ;;  %v2893_v42 = vsel %vm1627_vm4, %v15594_v57, %v15593_v41  ;;  %v1534_v49 = vadd.f32 %v1473_v2, %v1307_v32  ;;  %v2169_v14 = vmul.f32 %v9576_v50, %v2133_v16 }
 0x34b   : > { %v2501_v15 = vadd.f32 %v2441_v12, %v2200_v40  ;;  %v2667_v55 = vsel %vm1400_vm3, %v2664_v3, %v15592_v56  ;;  %v1700_v47 = vsel %vm1627_vm4, %v1698_v59, %v1699_v52  ;;  %v1927_v58 = vsel %vm1854_vm5, %v1925_v25, %v1926_v61  ;;  %v3188_v56 = vpop.permute.xlu1 %3187  ;;  %v13450_v59 = vpop.f32.mrf.mxu1 }
 0x34c   : > { %v2437_v40 = vrot.slane %v2319_v63, 1  ;;  %v1761_v21 = vadd.f32 %v1700_v47, %v1534_v49  ;;  %v2663_v53 = vrot.slane %v2545_v11, 2  ;;  %v2889_v12 = vrot.slane %v2771_v38, 3  ;;  %v9038_v49 = vld [vmem:[%s14858_s3 + $0xa0] sm:$0xff] }
 0x34d   : > { %v2727_v51 = vadd.f32 %v2667_v55, %v2501_v15  ;;  %v4794_v19 = vadd.f32 %v4765_v31, %v13324_v8  ;;  %v3115_v24 = vrot.slane %v2997_v29, 4  ;;  %v5100_v50 = vpack.c.bf16 %v13438_v45, %v13436_v44  ;;  %v13456_v31 = vpop.f32.mrf.mxu2  ;;  %v13458_v11 = vpop.f32.mrf.mxu0  ;;  %5828 = vmatpush.bf16.msra.mxu2 %v9038_v49 }
 0x34e   : > { %v15595_v2 = vrot.slane %v12960_v60, 4  ;;  %v15596_v32 = vrot.slane %v13393_v5, 4  ;;  %v1988_v61 = vadd.f32 %v1927_v58, %v1761_v21  ;;  %v3220_v63 = vmul.f32 %v15148_v30, %v3188_v56  ;;  %v13681_v6 = vld [vmem:[#allocation3 + $0x140] sm:$0xff] }
 0x34f   : > { %v2953_v16 = vadd.f32 %v2893_v42, %v2727_v51  ;;  %v13452_v25 = vadd.f32 %v4912_v37, %v4794_v19  ;;  %v3300_v8 = vmul.f32 %v9651_v48, %v3188_v56  ;;  %8453 = vmatmul.msk.bf16.gmra.mxu1 %vm488_vm8, %v5100_v50  ;;  %v3526_v15 = vmul.f32 %v9656_v28, %v3188_v56  ;;  %v3183_v37 = vpop.permute.xlu0 %3182  ;;  %v9034_v51 = vld [vmem:[%s14858_s3 + $0x80] sm:$0xff] }
 0x350   : > { %v3119_v52 = vsel %vm1854_vm5, %v15596_v32, %v15595_v2  ;;  %v13463_v38 = vmul.f32 %v9667_v9, %v3188_v56  ;;  %v13466_v29 = vmul.f32 %v15481_v0, %v3188_v56  ;;  %v2199_v55 = vadd.f32 %v2169_v14, %v1988_v61  ;;  %v9036_v14 = vld [vmem:[%s14858_s3 + $0x90] sm:$0xff]  ;;  %5607 = vmatpush.bf16.msra.mxu0 %v9034_v51 }
 0x351   : > { %v3179_v60 = vadd.f32 %v3119_v52, %v2953_v16  ;;  %v2439_v41 = vsel %vm1173_vm2, %v2437_v40, %v2438_v26  ;;  %v2665_v57 = vsel %vm1400_vm3, %v2663_v53, %v2664_v3  ;;  %v3418_v42 = vrot.slane %v3300_v8, 1  ;;  %v13497_v52 = vpop.f32.mrf.mxu3  ;;  %5754 = vmatpush.bf16.msra.mxu1 %v9036_v14  ;;  %v9176_v8 = vld [vmem:[#allocation3 + $0x60] sm:$0xff] }
 0x352   : > { %v3644_v47 = vrot.slane %v3526_v15, 2  ;;  %v3870_v26 = vrot.slane %v13463_v38, 3  ;;  %v4096_v13 = vrot.slane %v13466_v29, 4  ;;  %v2500_v3 = vadd.f32 %v2439_v41, %v2199_v55 }
 0x353   : > { %v3250_v43 = vadd.f32 %v3220_v63, %v3179_v60  ;;  %v15597_v58 = vrot.slane %v13136_v46, 1  ;;  %v3299_v56 = vmul.f32 %v9651_v48, %v3183_v37  ;;  %v3525_v21 = vmul.f32 %v9656_v28, %v3183_v37  ;;  %v9177_v60 = vld [vmem:[#allocation3 + $0x68] sm:$0xff] }
 0x354   : > { %v15598_v53 = vrot.slane %v13382_v39, 3  ;;  %v15599_v16 = vmov %v15596_v32  ;;  %v3219_v32 = vmul.f32 %v15148_v30, %v3183_v37  ;;  %v2726_v46 = vadd.f32 %v2665_v57, %v2500_v3 }
 0x355   : > { %v3421_v40 = vsel %vm1173_vm2, %v3418_v42, %v15597_v58  ;;  %v3117_v2 = vsel %vm1854_vm5, %v3115_v24, %v15599_v16  ;;  %v15600_v48 = vrot.slane %v13153_v35, 2  ;;  %v3417_v61 = vrot.slane %v3299_v56, 1  ;;  %v4770_v49 = vpop.f32.mrf.mxu2  ;;  %v13518_v58 = vpop.f32.mrf.mxu1 }
 0x356   : > { %v2891_v19 = vsel %vm1627_vm4, %v2889_v12, %v15598_v53  ;;  %v3481_v50 = vadd.f32 %v3421_v40, %v3250_v43  ;;  %v3643_v63 = vrot.slane %v3525_v21, 2  ;;  %v3751_v12 = vmul.f32 %v9667_v9, %v3183_v37  ;;  %v13514_v9 = vld [vmem:[#allocation3 + $0x88] sm:$0xf]  ;;  %v9178_v43 = vld [vmem:[#allocation3 + $0x70] sm:$0xf] }
 0x357   : > { %v3647_v28 = vsel %vm1400_vm3, %v3644_v47, %v15600_v48  ;;  %v4961_v5 = vrot.slane %v9176_v8, 4  ;;  %v4962_v24 = vrot.slane %v9177_v60, 4  ;;  %v15601_v30 = vrot.slane %v13167_v34, 3 }
 0x358   : > { %v3707_v39 = vadd.f32 %v3647_v28, %v3481_v50  ;;  %v15602_v35 = vrot.slane %v13188_v20, 4  ;;  %v2952_v41 = vadd.f32 %v2891_v19, %v2726_v46  ;;  %v3977_v57 = vmul.f32 %v15481_v0, %v3183_v37  ;;  %v13523_v0 = vpop.f32.mrf.mxu0 }
 0x359   : > { %v3873_v15 = vsel %vm1627_vm4, %v3870_v26, %v15601_v30  ;;  %v3419_v14 = vsel %vm1173_vm2, %v3417_v61, %v3418_v42  ;;  %v4963_v34 = vsel %vm1854_vm5, %v4961_v5, %v4962_v24  ;;  %v4964_v3 = vrot.slane %v9178_v43, 4 }
 0x35a   : > { %v4099_v55 = vsel %vm1854_vm5, %v4096_v13, %v15602_v35  ;;  %v3933_v51 = vadd.f32 %v3873_v15, %v3707_v39  ;;  %v3178_v20 = vadd.f32 %v3117_v2, %v2952_v41  ;;  %v3645_v40 = vsel %vm1400_vm3, %v3643_v63, %v3644_v47  ;;  %v13535_v63 = vld [vmem:[#allocation3 + $0xa8] sm:$0xff]  ;;  %v13537_v39 = vld [vmem:[#allocation3 + $0xb0] sm:$0xff] }
 0x35b   : > { %v5227_v56 = vrot.slane %v13436_v44, 1  ;;  %v5228_v21 = vrot.slane %v13438_v45, 1  ;;  %v3869_v53 = vrot.slane %v3751_v12, 3  ;;  %v4965_v19 = vsel %vm1854_vm5, %v4962_v24, %v4964_v3  ;;  %v4917_v12 = vpop.f32.mrf.mxu3 }
 0x35c   : > { %v4159_v37 = vadd.f32 %v4099_v55, %v3933_v51  ;;  %v5230_v42 = vrot.slane %v13514_v9, 1  ;;  %v3249_v50 = vadd.f32 %v3219_v32, %v3178_v20  ;;  %v13527_v16 = vpack.c.bf16 %v4965_v19, %v4963_v34  ;;  %v9179_v20 = vld [vmem:[#allocation3 + $0x90] sm:$0xff] }
 0x35d   : > { %v5229_v46 = vsel %vm1173_vm2, %v5227_v56, %v5228_v21  ;;  %v5374_v2 = vrot.slane %v13436_v44, 2  ;;  %v5375_v28 = vrot.slane %v13438_v45, 2  ;;  %v5377_v61 = vrot.slane %v13514_v9, 2  ;;  %v13559_v56 = vld [vmem:[#allocation3 + $0xb8] sm:$0xf] }
 0x35e   : > { %15603 = vst [vmem:[#allocation44_spill] sm:$0xff] %v13527_v16  ;;  %v4193_v47 = vadd.f32 %v13387_v22, %v4159_v37  ;;  %v5231_v48 = vsel %vm1173_vm2, %v5228_v21, %v5230_v42  ;;  %v3480_v32 = vadd.f32 %v3419_v14, %v3249_v50  ;;  %v4095_v8 = vrot.slane %v3977_v57, 4  ;;  %8438 = vmatmul.msk.bf16.gmra.mxu0 %vm488_vm8, %v13527_v16  ;;  %v4642_v14 = vpop.f32.mrf.mxu1  ;;  %v9181_v21 = vld [vmem:[#allocation3 + $0xa0] sm:$0xf] }
 0x35f   : > { %v5268_v5 = vpack.c.bf16 %v5231_v48, %v5229_v46  ;;  %v4638_v60 = vadd.f32 %v13450_v59, %v13458_v11  ;;  %v5376_v30 = vsel %vm1400_vm3, %v5374_v2, %v5375_v28  ;;  %v5378_v15 = vsel %vm1400_vm3, %v5375_v28, %v5377_v61  ;;  %v13554_v11 = vpop.f32.mrf.mxu2 }
 0x360   : > { %vm4223_vm1 = vcmp.gt.f32.partialorder %v4193_v47, 0.0  ;;  %v4253_v24 = vmul.f32 0.1, %v4193_v47  ;;  %v3706_v35 = vadd.f32 %v3645_v40, %v3480_v32  ;;  %v5415_v55 = vpack.c.bf16 %v5378_v15, %v5376_v30  ;;  %v4565_v34 = vpop.f32.mrf.mxu0  ;;  %v9180_v40 = vld [vmem:[#allocation3 + $0x98] sm:$0xff] }
 0x361   : > { %8468 = vmatmul.msk.bf16.gmra.mxu2 %vm488_vm8, %v5268_v5  ;;  %v5101_v41 = vpack.c.bf16 %v13537_v39, %v13535_v63  ;;  %v3871_v51 = vsel %vm1627_vm4, %v3869_v53, %v3870_v26  ;;  %v4097_v43 = vsel %vm1854_vm5, %v4095_v8, %v4096_v13  ;;  %v4966_v38 = vrot.slane %v9179_v20, 4 }
 0x362   : > { %v4283_v57 = vsel %vm4223_vm1, %v4193_v47, %v4253_v24  ;;  %v3932_v59 = vadd.f32 %v3871_v51, %v3706_v35  ;;  %8483 = vmatmul.msk.bf16.gmra.mxu3 %vm488_vm8, %v5415_v55  ;;  %v4967_v26 = vrot.slane %v9180_v40, 4  ;;  %v4969_v37 = vrot.slane %v9181_v21, 4  ;;  %v13585_v55 = vld [vmem:[#allocation3 + $0xd8] sm:$0xff] }
 0x363   : > { %4313 = vst.msk [vmem:[#allocation3 + $0x15a] sm:$0xff] %vm488_vm8, %v4283_v57  ;;  %8454 = vmatmul.msk.bf16.gmra.mxu1 %vm488_vm8, %v5101_v41  ;;  %v4796_v53 = vadd.f32 %v4770_v49, %v4638_v60  ;;  %v5232_v42 = vrot.slane %v13535_v63, 1  ;;  %v5233_v50 = vrot.slane %v13537_v39, 1  ;;  %v5235_v29 = vrot.slane %v13559_v56, 1  ;;  %v13567_v13 = vpop.f32.mrf.mxu3  ;;  %v13587_v41 = vld [vmem:[#allocation3 + $0xe0] sm:$0xff] }
 0x364   : > { %v4158_v3 = vadd.f32 %v4097_v43, %v3932_v59  ;;  %v4968_v47 = vsel %vm1854_vm5, %v4966_v38, %v4967_v26  ;;  %v4970_v48 = vsel %vm1854_vm5, %v4967_v26, %v4969_v37  ;;  %v5379_v49 = vrot.slane %v13535_v63, 2  ;;  %v9182_v38 = vld [vmem:[#allocation3 + $0xc0] sm:$0xff]  ;;  %v9183_v26 = vld [vmem:[#allocation3 + $0xc8] sm:$0xff] }
 0x365   : > { %v13565_v46 = vadd.f32 %v4917_v12, %v4796_v53  ;;  %v5382_v28 = vrot.slane %v13559_v56, 2  ;;  %v5234_v12 = vsel %vm1173_vm2, %v5232_v42, %v5233_v50  ;;  %v5236_v8 = vsel %vm1173_vm2, %v5233_v50, %v5235_v29  ;;  %v13598_v37 = vld [vmem:[#allocation3 + $0xe8] sm:$0xf] }
 0x366   : > { %v4192_v19 = vadd.f32 %v13387_v22, %v4158_v3  ;;  %v5380_v22 = vrot.slane %v13537_v39, 2  ;;  %v13577_v5 = vpop.f32.mrf.mxu1  ;;  %v13581_v24 = vpack.c.bf16 %v4970_v48, %v4968_v47  ;;  %v4643_v30 = vadd.f32 %v4642_v14, %v4565_v34 }
 0x367   : > { %v4775_v32 = vpop.f32.mrf.mxu2  ;;  %v5269_v57 = vpack.c.bf16 %v5236_v8, %v5234_v12  ;;  %v5102_v14 = vpack.c.bf16 %v13587_v41, %v13585_v55  ;;  %v4971_v40 = vrot.slane %v9182_v38, 4  ;;  %v4972_v21 = vrot.slane %v9183_v26, 4 }
 0x368   : > { %vm4222_vm6 = vcmp.gt.f32.partialorder %v4192_v19, 0.0  ;;  %v4252_v2 = vmul.f32 0.1, %v4192_v19  ;;  %v13579_v60 = vpop.f32.mrf.mxu0  ;;  %15604 = vst [vmem:[#allocation46_spill] sm:$0xff] %v13581_v24  ;;  %v5381_v15 = vsel %vm1400_vm3, %v5379_v49, %v5380_v22  ;;  %v5383_v35 = vsel %vm1400_vm3, %v5380_v22, %v5382_v28 }
 0x369   : > { %v4798_v51 = vadd.f32 %v4775_v32, %v4643_v30  ;;  %v5416_v43 = vpack.c.bf16 %v5383_v35, %v5381_v15  ;;  %v5237_v50 = vrot.slane %v13585_v55, 1  ;;  %v5238_v29 = vrot.slane %v13587_v41, 1 }
 0x36a   : > { %v4282_v61 = vsel %vm4222_vm6, %v4192_v19, %v4252_v2  ;;  %v9184_v19 = vld [vmem:[#allocation3 + $0xd0] sm:$0xf]  ;;  %v5240_v2 = vrot.slane %v13598_v37, 1  ;;  %v4973_v47 = vsel %vm1854_vm5, %v4971_v40, %v4972_v21  ;;  %v5384_v49 = vrot.slane %v13585_v55, 2 }
 0x36b   : > { %4312 = vst.msk [vmem:[#allocation3 + $0x152] sm:$0xff] %vm488_vm8, %v4282_v61  ;;  %v4922_v59 = vpop.f32.mrf.mxu3  ;;  %v4974_v42 = vrot.slane %v9184_v19, 4  ;;  %v5385_v22 = vrot.slane %v13587_v41, 2  ;;  %v5387_v28 = vrot.slane %v13598_v37, 2  ;;  %v5239_v12 = vsel %vm1173_vm2, %v5237_v50, %v5238_v29 }
 0x36c   : > { %v13594_v34 = vadd.f32 %v4922_v59, %v4798_v51  ;;  %v5241_v8 = vsel %vm1173_vm2, %v5238_v29, %v5240_v2  ;;  %v13620_v51 = vld [vmem:[#allocation3 + $0x110] sm:$0xff]  ;;  %v5661_v40 = vrot.slane %v13104_v7, 4 }
 0x36d   : > { %v4975_v48 = vsel %vm1854_vm5, %v4972_v21, %v4974_v42  ;;  %v5386_v15 = vsel %vm1400_vm3, %v5384_v49, %v5385_v22  ;;  %v5388_v35 = vsel %vm1400_vm3, %v5385_v22, %v5387_v28  ;;  %v5270_v59 = vpack.c.bf16 %v5241_v8, %v5239_v12  ;;  %v9188_v8 = vld [vmem:[#allocation3 + $0xf8] sm:$0xff] }
 0x36e   : > { %8439 = vmatmul.msk.bf16.gmra.mxu0 %vm488_vm8, %v13581_v24  ;;  %v4647_v3 = vpop.f32.mrf.mxu1  ;;  %v13614_v30 = vpack.c.bf16 %v4975_v48, %v4973_v47  ;;  %v5514_v21 = vrot.slane %v13104_v7, 3  ;;  %v5417_v19 = vpack.c.bf16 %v5388_v35, %v5386_v15  ;;  %v9041_v47 = vld [vmem:[%s14858_s3 + $0xb8] sm:$0xff]  ;;  %v9187_v48 = vld [vmem:[#allocation3 + $0xf0] sm:$0xff]  ;;  %v4977_v15 = vrot.slane %v9188_v8, 4 }
 0x36f   : > { %v13608_v61 = vpop.f32.mrf.mxu2  ;;  %v4976_v7 = vrot.slane %v9187_v48, 4  ;;  %v13644_v35 = vld [vmem:[#allocation3 + $0x118] sm:$0xf]  ;;  %5911 = vmatpush.bf16.msra.mxu3 %v9041_v47 }
 0x370   : > { %v4570_v20 = vpop.f32.mrf.mxu0  ;;  %15605 = vst [vmem:[#allocation47_spill] sm:$0xff] %v13614_v30  ;;  %v5245_v47 = vrot.slane %v13644_v35, 1  ;;  %v13679_v24 = vld [vmem:[#allocation3 + $0x138] sm:$0xff] }
 0x371   : > { %8469 = vmatmul.msk.bf16.gmra.mxu2 %vm488_vm8, %v5269_v57  ;;  %v4648_v53 = vadd.f32 %v4647_v3, %v4570_v20  ;;  %v13618_v57 = vld [vmem:[#allocation3 + $0x108] sm:$0xff]  ;;  %v9186_v20 = vld [vmem:[#allocation3 + $0x20] sm:$0xff]  ;;  %v4978_v48 = vsel %vm1854_vm5, %v4976_v7, %v4977_v15  ;;  %v5247_v23 = vrot.slane %v13679_v24, 1 }
 0x372   : > { %8484 = vmatmul.msk.bf16.gmra.mxu3 %vm488_vm8, %v5416_v43  ;;  %v9185_v43 = vld [vmem:[#allocation3 + $0x18] sm:$0xff]  ;;  %v5659_v38 = vrot.slane %v9186_v20, 4  ;;  %v5512_v26 = vrot.slane %v9186_v20, 3  ;;  %v5103_v42 = vpack.c.bf16 %v13620_v51, %v13618_v57  ;;  %v9189_v20 = vld [vmem:[#allocation3 + $0x100] sm:$0xf] }
 0x373   : > { %8455 = vmatmul.msk.bf16.gmra.mxu1 %vm488_vm8, %v5102_v14  ;;  %v13610_v32 = vpop.f32.mrf.mxu3  ;;  %v5511_v14 = vrot.slane %v9185_v43, 3  ;;  %v5658_v3 = vrot.slane %v9185_v43, 4 }
 0x374   : > { %v13642_v12 = vsel %vm1854_vm5, %v5659_v38, %v5661_v40 }
 0x375   : > { %v13639_v28 = vsel %vm1854_vm5, %v5658_v3, %v5659_v38  ;;  %v13652_v43 = vsel %vm1627_vm4, %v5511_v14, %v5512_v26  ;;  %v13655_v3 = vsel %vm1627_vm4, %v5512_v26, %v5514_v21  ;;  %v4979_v38 = vrot.slane %v9189_v20, 4 }
 0x376   : > { %v13629_v50 = vpop.f32.mrf.mxu1  ;;  %v5389_v26 = vrot.slane %v13618_v57, 2  ;;  %v5390_v21 = vrot.slane %v13620_v51, 2 }
 0x377   : > { %v4780_v29 = vpop.f32.mrf.mxu2  ;;  %v4980_v14 = vsel %vm1854_vm5, %v4977_v15, %v4979_v38 }
 0x378   : > { %v4800_v49 = vadd.f32 %v4780_v29, %v4648_v53  ;;  %v13636_v22 = vpop.f32.mrf.mxu0  ;;  %v9040_v53 = vld [vmem:[%s14858_s3 + $0xb0] sm:$0xff]  ;;  %v5243_v29 = vrot.slane %v13620_v51, 1  ;;  %v13675_v7 = vpack.c.bf16 %v4980_v14, %v4978_v48  ;;  %v5391_v15 = vsel %vm1400_vm3, %v5389_v26, %v5390_v21  ;;  %v9043_v48 = vld [vmem:[%s14858_s3 + $0xc8] sm:$0xff] }
 0x379   : > { %5912 = vmatpush.bf16.msra.mxu3 %v9040_v53  ;;  %5992 = vmatpush.bf16.msrb.mxu0 %v9043_v48  ;;  %v5395_v48 = vrot.slane %v13681_v6, 2 }
 0x37a   : > { %15606 = vst [vmem:[#allocation48_spill] sm:$0xff] %v13675_v7 }
 0x37b   : > { %v4927_v2 = vpop.f32.mrf.mxu3 }
 0x37c   : > { %v13657_v40 = vadd.f32 %v4927_v2, %v4800_v49  ;;  %v5392_v2 = vrot.slane %v13644_v35, 2 }
 0x37e   : > { %8440 = vmatmul.msk.bf16.gmra.mxu0 %vm488_vm8, %v13614_v30  ;;  %v4652_v8 = vpop.f32.mrf.mxu1  ;;  %v5393_v38 = vsel %vm1400_vm3, %v5390_v21, %v5392_v2 }
 0x37f   : > { %v13669_v49 = vpop.f32.mrf.mxu2 }
 0x380   : > { %v4575_v30 = vpop.f32.mrf.mxu0 }
 0x381   : > { %8470 = vmatmul.msk.bf16.gmra.mxu2 %vm488_vm8, %v5270_v59  ;;  %v4653_v53 = vadd.f32 %v4652_v8, %v4575_v30  ;;  %v9047_v30 = vld [vmem:[%s14858_s3 + $0xe8] sm:$0xff]  ;;  %v9190_v8 = vld [vmem:[#allocation3 + $0x120] sm:$0xff] }
 0x382   : > { %8485 = vmatmul.msk.bf16.gmra.mxu3 %vm488_vm8, %v5417_v19  ;;  %v5246_v19 = vsel %vm1173_vm2, %v5243_v29, %v5245_v47  ;;  %v5104_v47 = vpack.c.bf16 %v13681_v6, %v13679_v24  ;;  %6154 = vmatpush.bf16.msrb.mxu2 %v9047_v30  ;;  %v5394_v30 = vrot.slane %v13679_v24, 2 }
 0x383   : > { %8456 = vmatmul.msk.bf16.gmra.mxu1 %vm488_vm8, %v5103_v42  ;;  %v5242_v42 = vrot.slane %v13618_v57, 1  ;;  %v13673_v59 = vpop.f32.mrf.mxu3 }
 0x385   : > { %v5244_v20 = vsel %vm1173_vm2, %v5242_v42, %v5243_v29  ;;  %v5418_v29 = vpack.c.bf16 %v5393_v38, %v5391_v15  ;;  %v9191_v15 = vld [vmem:[#allocation3 + $0x128] sm:$0xff] }
 0x386   : > { %v5271_v42 = vpack.c.bf16 %v5246_v19, %v5244_v20  ;;  %v9045_v19 = vld [vmem:[%s14858_s3 + $0xd8] sm:$0xff]  ;;  %v4981_v20 = vrot.slane %v9190_v8, 4  ;;  %v4982_v38 = vrot.slane %v9191_v15, 4  ;;  %v13708_v16 = vpop.f32.mrf.mxu1 }
 0x387   : > { %v4785_v14 = vpop.f32.mrf.mxu2  ;;  %6073 = vmatpush.bf16.msrb.mxu1 %v9045_v19 }
 0x388   : > { %v4802_v26 = vadd.f32 %v4785_v14, %v4653_v53  ;;  %v13699_v2 = vpop.f32.mrf.mxu0  ;;  %v5248_v53 = vrot.slane %v13681_v6, 1  ;;  %v4983_v8 = vsel %vm1854_vm5, %v4981_v20, %v4982_v38  ;;  %v15609_v20 = vld [vmem:[#allocation29_spill] sm:$0xff] }
 0x38a   : > { %v5249_v19 = vsel %vm1173_vm2, %v5247_v23, %v5248_v53 }
 0x38b   : > { %v4932_v21 = vpop.f32.mrf.mxu3 }
 0x38e   : > { %8441 = vmatmul.msk.bf16.gmra.mxu0 %vm488_vm8, %v13675_v7  ;;  %v13703_v7 = vadd.f32 %v4932_v21, %v4802_v26 }
 0x38f   : > { %v13715_v21 = vpop.f32.mrf.mxu2 }
 0x390   : > { %15607 = vst [vmem:[#allocation7_spill] sm:$0xff] %v13703_v7  ;;  %v5049_v17 = vpop.f32.mrf.mxu0 }
 0x391   : > { %8471 = vmatmul.msk.bf16.gmra.mxu2 %vm488_vm8, %v5271_v42  ;;  %v13701_v42 = vld [vmem:[#allocation3 + $0x148] sm:$0xf]  ;;  %15608 = vst [vmem:[#allocation56_spill] sm:$0xff] %v13715_v21  ;;  %v5084_v36 = vadd.f32 %v5049_v17, %v15609_v20  ;;  %v5147_v21 = vpop.f32.mrf.mxu1 }
 0x392   : > { %8486 = vmatmul.msk.bf16.gmra.mxu3 %vm488_vm8, %v5418_v29  ;;  %v9192_v29 = vld [vmem:[#allocation3 + $0x130] sm:$0xf]  ;;  %v5250_v14 = vrot.slane %v13701_v42, 1  ;;  %v5397_v26 = vrot.slane %v13701_v42, 2 }
 0x393   : > { %8457 = vmatmul.msk.bf16.gmra.mxu1 %vm488_vm8, %v5104_v47  ;;  %v4984_v47 = vrot.slane %v9192_v29, 4  ;;  %v13719_v1 = vpop.f32.mrf.mxu3  ;;  %v5182_v17 = vadd.f32 %v5147_v21, %v5084_v36  ;;  %v15611_v36 = vpack.c.bf16 %v13655_v3, %v13652_v43 }
 0x394   : > { %v5251_v29 = vsel %vm1173_vm2, %v5248_v53, %v5250_v14  ;;  %v15610_v53 = vpack.c.bf16 %v13642_v12, %v13639_v28  ;;  %v15612_v12 = vld [vmem:[#allocation35_spill] sm:$0xff] }
 0x395   : > { %v4985_v15 = vsel %vm1854_vm5, %v4982_v38, %v4984_v47  ;;  %v5396_v38 = vsel %vm1400_vm3, %v5394_v30, %v5395_v48  ;;  %v5398_v47 = vsel %vm1400_vm3, %v5395_v48, %v5397_v26  ;;  %v5272_v7 = vpack.c.bf16 %v5251_v29, %v5249_v19 }
 0x396   : > { %v13721_v33 = vpack.c.bf16 %v4985_v15, %v4983_v8  ;;  %v5419_v23 = vpack.c.bf16 %v5398_v47, %v5396_v38  ;;  %v5663_v48 = vrot.slane %v13236_v4, 4  ;;  %v5664_v26 = vrot.slane %v13238_v27, 4  ;;  %v15613_v38 = vld [vmem:[#allocation36_spill] sm:$0xff] }
 0x397   : > { %v5315_v14 = vpop.f32.mrf.mxu2  ;;  %v5516_v47 = vrot.slane %v13236_v4, 3  ;;  %v5669_v4 = vrot.slane %v13438_v45, 4 }
 0x398   : > { %v5350_v8 = vadd.f32 %v5315_v14, %v5182_v17  ;;  %v5665_v19 = vsel %vm1854_vm5, %v5663_v48, %v5664_v26  ;;  %v13741_v20 = vpop.f32.mrf.mxu0 }
 0x399   : > { %v13747_v28 = vpop.f32.mrf.mxu1 }
 0x39b   : > { %v5462_v15 = vpop.f32.mrf.mxu3 }
 0x39c   : > { %v13734_v30 = vadd.f32 %v5462_v15, %v5350_v8 }
 0x39e   : > { %8442 = vmatmul.msk.bf16.gmra.mxu0 %vm488_vm8, %v13721_v33 }
 0x39f   : > { %v13757_v43 = vpop.f32.mrf.mxu2 }
 0x3a1   : > { %8472 = vmatmul.msk.bf16.gmra.mxu2 %vm488_vm8, %v5272_v7  ;;  %v5666_v7 = vrot.slane %v13305_v10, 4 }
 0x3a2   : > { %8487 = vmatmul.msk.bf16.gmra.mxu3 %vm488_vm8, %v5419_v23  ;;  %v5517_v23 = vrot.slane %v13238_v27, 3  ;;  %v5671_v27 = vrot.slane %v13514_v9, 4 }
 0x3a3   : > { %8511 = vmatmul.msk.bf16.vlgmr.msra.gmra.mxu1 %vm488_vm8, %v15610_v53  ;;  %v5667_v29 = vsel %vm1854_vm5, %v5664_v26, %v5666_v7  ;;  %v5519_v53 = vrot.slane %v13305_v10, 3  ;;  %v13760_v14 = vpop.f32.mrf.mxu3  ;;  %v5668_v26 = vrot.slane %v13436_v44, 4 }
 0x3a4   : > { %v5708_v21 = vpack.c.bf16 %v5667_v29, %v5665_v19  ;;  %v5518_v17 = vsel %vm1627_vm4, %v5516_v47, %v5517_v23  ;;  %v5672_v29 = vsel %vm1854_vm5, %v5669_v4, %v5671_v27 }
 0x3a5   : > { %v5520_v15 = vsel %vm1627_vm4, %v5517_v23, %v5519_v53  ;;  %v5670_v19 = vsel %vm1854_vm5, %v5668_v26, %v5669_v4  ;;  %v5521_v53 = vrot.slane %v13436_v44, 3  ;;  %v5674_v4 = vrot.slane %v13537_v39, 4 }
 0x3a6   : > { %v5561_v10 = vpack.c.bf16 %v5520_v15, %v5518_v17  ;;  %v9046_v15 = vld [vmem:[%s14858_s3 + $0xe0] sm:$0xff] }
 0x3a7   : > { %6155 = vmatpush.bf16.msrb.mxu2 %v9046_v15 }
 0x3a8   : > { %v5152_v48 = vpop.f32.mrf.mxu1 }
 0x3ae   : > { %8496 = vmatmul.msk.bf16.vlgmr.msra.gmra.mxu0 %vm488_vm8, %v15611_v36  ;;  %v15614_v36 = vld [vmem:[#allocation74_spill] sm:$0xff] }
 0x3b0   : > { %v13779_v17 = vpop.f32.mrf.mxu1 }
 0x3b1   : > { %8526 = vmatmul.msk.bf16.vlgmr.msra.gmra.mxu2 %vm488_vm8, %v15612_v12 }
 0x3b2   : > { %8541 = vmatmul.msk.bf16.vlgmr.msra.gmra.mxu3 %vm488_vm8, %v15613_v38  ;;  %v15615_v38 = vld [vmem:[#allocation50_spill] sm:$0xff] }
 0x3b3   : > { %8512 = vmatmul.msk.bf16.gmra.mxu1 %vm488_vm8, %v5708_v21 }
 0x3b5   : > { %v5054_v3 = vpop.f32.mrf.mxu0 }
 0x3b6   : > { %v5086_v8 = vadd.f32 %v5054_v3, %v13133_v54  ;;  %v5709_v54 = vpack.c.bf16 %v5672_v29, %v5670_v19  ;;  %v5522_v3 = vrot.slane %v13438_v45, 3  ;;  %v5673_v45 = vrot.slane %v13535_v63, 4  ;;  %v9044_v29 = vld [vmem:[%s14858_s3 + $0xd0] sm:$0xff] }
 0x3b7   : > { %6074 = vmatpush.bf16.msrb.mxu1 %v9044_v29 }
 0x3b8   : > { %v5184_v7 = vadd.f32 %v5152_v48, %v5086_v8  ;;  %v5524_v8 = vrot.slane %v13514_v9, 3  ;;  %v9042_v48 = vld [vmem:[%s14858_s3 + $0xc0] sm:$0xff]  ;;  %v5523_v26 = vsel %vm1627_vm4, %v5521_v53, %v5522_v3  ;;  %v5676_v9 = vrot.slane %v13559_v56, 4 }
 0x3b9   : > { %5993 = vmatpush.bf16.msrb.mxu0 %v9042_v48  ;;  %v5529_v53 = vrot.slane %v13559_v56, 3 }
 0x3ba   : > { %v5525_v44 = vsel %vm1627_vm4, %v5522_v3, %v5524_v8 }
 0x3bb   : > { %v5562_v27 = vpack.c.bf16 %v5525_v44, %v5523_v26  ;;  %v5678_v26 = vrot.slane %v13585_v55, 4  ;;  %v5679_v44 = vrot.slane %v13587_v41, 4 }
 0x3be   : > { %8497 = vmatmul.msk.bf16.gmra.mxu0 %vm488_vm8, %v5561_v10  ;;  %v5320_v12 = vpop.f32.mrf.mxu2  ;;  %v5677_v10 = vsel %vm1854_vm5, %v5674_v4, %v5676_v9 }
 0x3bf   : > { %v5352_v21 = vadd.f32 %v5320_v12, %v5184_v7  ;;  %v5467_v47 = vpop.f32.mrf.mxu3  ;;  %v5675_v7 = vsel %vm1854_vm5, %v5673_v45, %v5674_v4  ;;  %v13801_v12 = vpop.f32.mrf.mxu0  ;;  %v5681_v45 = vrot.slane %v13598_v37, 4 }
 0x3c1   : > { %8527 = vmatmul.msk.bf16.gmra.mxu2 %vm488_vm8, %v15614_v36  ;;  %v13775_v23 = vadd.f32 %v5467_v47, %v5352_v21  ;;  %v15616_v36 = vld [vmem:[#allocation90_spill] sm:$0xff]  ;;  %v15617_v21 = vld [vmem:[#allocation93_spill] sm:$0xff]  ;;  %v5527_v47 = vrot.slane %v13537_v39, 3  ;;  %v4635_v39 = vadd.f32 %v13404_v18, %v13411_v62  ;;  %v5532_v18 = vrot.slane %v13587_v41, 3 }
 0x3c2   : > { %8542 = vmatmul.msk.bf16.gmra.mxu3 %vm488_vm8, %v15615_v38  ;;  %v5526_v38 = vrot.slane %v13535_v63, 3  ;;  %v5534_v62 = vrot.slane %v13598_v37, 3 }
 0x3c3   : > { %8513 = vmatmul.msk.bf16.gmra.mxu1 %vm488_vm8, %v5709_v54  ;;  %v5710_v54 = vpack.c.bf16 %v5677_v10, %v5675_v7  ;;  %v5530_v48 = vsel %vm1627_vm4, %v5527_v47, %v5529_v53  ;;  %v5682_v7 = vsel %vm1854_vm5, %v5679_v44, %v5681_v45  ;;  %v4795_v10 = vadd.f32 %v13456_v31, %v4635_v39 }
 0x3c4   : > { %v5528_v8 = vsel %vm1627_vm4, %v5526_v38, %v5527_v47  ;;  %v5531_v38 = vrot.slane %v13585_v55, 3  ;;  %v15619_v47 = vld [vmem:[#allocation107_spill] sm:$0xff] }
 0x3c5   : > { %v5563_v9 = vpack.c.bf16 %v5530_v48, %v5528_v8  ;;  %v13834_v48 = vld [vmem:[#allocation3 + $0x150] sm:$0xff]  ;;  %v13838_v55 = vld [vmem:[#allocation3 + $0x160] sm:$0xf] }
 0x3c6   : > { %v13810_v15 = vpop.f32.mrf.mxu2  ;;  %v5533_v37 = vsel %vm1627_vm4, %v5531_v38, %v5532_v18 }
 0x3c7   : > { %v13816_v4 = vpop.f32.mrf.mxu3 }
 0x3cc   : > { %v5157_v19 = vpop.f32.mrf.mxu1 }
 0x3ce   : > { %8498 = vmatmul.msk.bf16.gmra.mxu0 %vm488_vm8, %v5562_v27  ;;  %v5680_v27 = vsel %vm1854_vm5, %v5678_v26, %v5679_v44  ;;  %v13836_v26 = vld [vmem:[#allocation3 + $0x158] sm:$0xff] }
 0x3cf   : > { %v6045_v39 = vrot.slane %v13836_v26, 3 }
 0x3d1   : > { %8528 = vmatmul.msk.bf16.gmra.mxu2 %vm488_vm8, %v15616_v36 }
 0x3d2   : > { %8543 = vmatmul.msk.bf16.gmra.mxu3 %vm488_vm8, %v15617_v21  ;;  %v5711_v21 = vpack.c.bf16 %v5682_v7, %v5680_v27  ;;  %v5684_v27 = vrot.slane %v13620_v51, 4  ;;  %v6047_v7 = vrot.slane %v13838_v55, 3 }
 0x3d3   : > { %8514 = vmatmul.msk.bf16.gmra.mxu1 %vm488_vm8, %v5710_v54  ;;  %v15618_v54 = vld [vmem:[#allocation106_spill] sm:$0xff] }
 0x3d4   : > { %v5159_v3 = vpop.f32.mrf.mxu1  ;;  %v13857_v38 = vsel %vm1627_vm4, %v6045_v39, %v6047_v7 }
 0x3db   : > { %v5059_v63 = vpop.f32.mrf.mxu0 }
 0x3dc   : > { %v5088_v56 = vadd.f32 %v5059_v63, %v13452_v25  ;;  %v4942_v25 = vadd.f32 %v13497_v52, %v4795_v10  ;;  %v5535_v52 = vsel %vm1627_vm4, %v5532_v18, %v5534_v62  ;;  %v6044_v63 = vrot.slane %v13834_v48, 3 }
 0x3dd   : > { %v5963_v10 = vrot.slane %v13834_v48, 2  ;;  %v6125_v18 = vrot.slane %v13834_v48, 4  ;;  %v6126_v62 = vrot.slane %v13836_v26, 4 }
 0x3de   : > { %8499 = vmatmul.msk.bf16.gmra.mxu0 %vm488_vm8, %v5563_v9  ;;  %v5186_v29 = vadd.f32 %v5157_v19, %v5088_v56  ;;  %v5683_v9 = vrot.slane %v13618_v57, 4 }
 0x3e0   : > { %v5162_v36 = vpop.f32.mrf.mxu1 }
 0x3e1   : > { %8529 = vmatmul.msk.bf16.gmra.mxu2 %vm488_vm8, %v15618_v54  ;;  %v13852_v54 = vsel %vm1627_vm4, %v6044_v63, %v6045_v39  ;;  %v13875_v39 = vsel %vm1854_vm5, %v6125_v18, %v6126_v62 }
 0x3e2   : > { %8544 = vmatmul.msk.bf16.gmra.mxu3 %vm488_vm8, %v15619_v47 }
 0x3e3   : > { %8515 = vmatmul.msk.bf16.gmra.mxu1 %vm488_vm8, %v5711_v21  ;;  %v5061_v19 = vpop.f32.mrf.mxu0  ;;  %v5966_v21 = vrot.slane %v13838_v55, 2 }
 0x3e4   : > { %v5325_v31 = vpop.f32.mrf.mxu2  ;;  %v5089_v8 = vadd.f32 %v5061_v19, %v4942_v25  ;;  %v6128_v25 = vrot.slane %v13838_v55, 4 }
 0x3e5   : > { %v5354_v53 = vadd.f32 %v5325_v31, %v5186_v29  ;;  %v5472_v41 = vpop.f32.mrf.mxu3  ;;  %v5686_v29 = vrot.slane %v13644_v35, 4 }
 0x3e6   : > { %v5187_v45 = vadd.f32 %v5159_v3, %v5089_v8  ;;  %v5964_v3 = vrot.slane %v13836_v26, 2  ;;  %v13878_v7 = vsel %vm1854_vm5, %v6126_v62, %v6128_v25 }
 0x3e7   : > { %v13842_v44 = vadd.f32 %v5472_v41, %v5354_v53  ;;  %v4640_v53 = vadd.f32 %v13518_v58, %v13523_v0  ;;  %v5685_v0 = vsel %vm1854_vm5, %v5683_v9, %v5684_v27  ;;  %v5687_v63 = vsel %vm1854_vm5, %v5684_v27, %v5686_v29 }
 0x3e8   : > { %v5164_v56 = vpop.f32.mrf.mxu1  ;;  %v13865_v31 = vsel %vm1400_vm3, %v5963_v10, %v5964_v3  ;;  %v13868_v19 = vsel %vm1400_vm3, %v5964_v3, %v5966_v21  ;;  %v5564_v3 = vpack.c.bf16 %v5535_v52, %v5533_v37  ;;  %v6132_v21 = vpack.c.bf16 %v13878_v7, %v13875_v39  ;;  %v15621_v52 = vld [vmem:[#allocation14_spill] sm:$0xff] }
 0x3e9   : > { %v4797_v18 = vadd.f32 %v13554_v11, %v4640_v53  ;;  %v5536_v11 = vrot.slane %v13618_v57, 3 }
 0x3eb   : > { %v5064_v41 = vpop.f32.mrf.mxu0  ;;  %v4944_v37 = vadd.f32 %v13567_v13, %v4797_v18  ;;  %v5688_v18 = vrot.slane %v13679_v24, 4 }
 0x3ec   : > { %v5327_v8 = vpop.f32.mrf.mxu2  ;;  %v5090_v10 = vadd.f32 %v5064_v41, %v13565_v46  ;;  %v5712_v46 = vpack.c.bf16 %v5687_v63, %v5685_v0  ;;  %v5539_v41 = vrot.slane %v13644_v35, 3 }
 0x3ed   : > { %v13880_v47 = vadd.f32 %v5327_v8, %v5187_v45  ;;  %v13885_v58 = vpop.f32.mrf.mxu3  ;;  %v15620_v45 = vld [vmem:[#allocation8_spill] sm:$0xff] }
 0x3ee   : > { %8500 = vmatmul.msk.bf16.gmra.mxu0 %vm488_vm8, %v5564_v3  ;;  %v5188_v62 = vadd.f32 %v5162_v36, %v5090_v10  ;;  %v5537_v36 = vrot.slane %v13620_v51, 3  ;;  %v4645_v51 = vadd.f32 %v13577_v5, %v13579_v60 }
 0x3f0   : > { %v5167_v25 = vpop.f32.mrf.mxu1  ;;  %v5538_v3 = vsel %vm1627_vm4, %v5536_v11, %v5537_v36  ;;  %v5540_v0 = vsel %vm1627_vm4, %v5537_v36, %v5539_v41  ;;  %v15622_v36 = vld [vmem:[#allocation26_spill] sm:$0xff] }
 0x3f1   : > { %8530 = vmatmul.msk.bf16.gmra.mxu2 %vm488_vm8, %v15620_v45  ;;  %v5691_v45 = vrot.slane %v13701_v42, 4 }
 0x3f2   : > { %8545 = vmatmul.msk.bf16.gmra.mxu3 %vm488_vm8, %v15621_v52 }
 0x3f3   : > { %8516 = vmatmul.msk.bf16.gmra.mxu1 %vm488_vm8, %v5712_v46  ;;  %v5066_v8 = vpop.f32.mrf.mxu0 }
 0x3f4   : > { %v5330_v9 = vpop.f32.mrf.mxu2  ;;  %v5091_v29 = vadd.f32 %v5066_v8, %v4944_v37  ;;  %v5565_v37 = vpack.c.bf16 %v5540_v0, %v5538_v3 }
 0x3f5   : > { %v5356_v27 = vadd.f32 %v5330_v9, %v5188_v62  ;;  %v5477_v53 = vpop.f32.mrf.mxu3  ;;  %v5689_v62 = vrot.slane %v13681_v6, 4 }
 0x3f6   : > { %v5189_v63 = vadd.f32 %v5164_v56, %v5091_v29 }
 0x3f7   : > { %v13900_v10 = vadd.f32 %v5477_v53, %v5356_v27  ;;  %v5690_v9 = vsel %vm1854_vm5, %v5688_v18, %v5689_v62  ;;  %v5692_v8 = vsel %vm1854_vm5, %v5689_v62, %v5691_v45  ;;  %v4799_v27 = vadd.f32 %v13608_v61, %v4645_v51 }
 0x3f8   : > { %v5169_v13 = vpop.f32.mrf.mxu1  ;;  %v5713_v5 = vpack.c.bf16 %v5692_v8, %v5690_v9  ;;  %v5541_v61 = vrot.slane %v13679_v24, 3  ;;  %v5544_v18 = vrot.slane %v13701_v42, 3  ;;  %v5882_v51 = vrot.slane %v13834_v48, 1 }
 0x3f9   : > { %v4946_v60 = vadd.f32 %v13610_v32, %v4799_v27 }
 0x3fb   : > { %v5069_v46 = vpop.f32.mrf.mxu0 }
 0x3fc   : > { %v5332_v57 = vpop.f32.mrf.mxu2  ;;  %v5092_v56 = vadd.f32 %v5069_v46, %v13594_v34  ;;  %v15623_v34 = vld [vmem:[#allocation10_spill] sm:$0xff] }
 0x3fd   : > { %v13909_v35 = vadd.f32 %v5332_v57, %v5189_v63  ;;  %v13912_v52 = vpop.f32.mrf.mxu3 }
 0x3fe   : > { %8501 = vmatmul.msk.bf16.gmra.mxu0 %vm488_vm8, %v5565_v37  ;;  %v5190_v29 = vadd.f32 %v5167_v25, %v5092_v56  ;;  %v5542_v25 = vrot.slane %v13681_v6, 3  ;;  %v5883_v56 = vrot.slane %v13836_v26, 1  ;;  %v5885_v37 = vrot.slane %v13838_v55, 1 }
 0x3ff   : > { %v4650_v6 = vadd.f32 %v13629_v50, %v13636_v22  ;;  %v5805_v55 = vpack.c.bf16 %v13836_v26, %v13834_v48 }
 0x400   : > { %v5172_v11 = vpop.f32.mrf.mxu1  ;;  %v5543_v57 = vsel %vm1627_vm4, %v5541_v61, %v5542_v25  ;;  %v5545_v46 = vsel %vm1627_vm4, %v5542_v25, %v5544_v18  ;;  %v15625_v18 = vld [vmem:[#allocation7_spill] sm:$0xff] }
 0x401   : > { %8531 = vmatmul.msk.bf16.gmra.mxu2 %vm488_vm8, %v15622_v36  ;;  %v5566_v8 = vpack.c.bf16 %v5545_v46, %v5543_v57  ;;  %v5886_v36 = vsel %vm1173_vm2, %v5883_v56, %v5885_v37  ;;  %v15626_v46 = vld [vmem:[#allocation56_spill] sm:$0xff] }
 0x402   : > { %8546 = vmatmul.msk.bf16.gmra.mxu3 %vm488_vm8, %v15623_v34  ;;  %v15624_v34 = vld [vmem:[#allocation63_spill] sm:$0xff] }
 0x403   : > { %8517 = vmatmul.msk.bf16.gmra.mxu1 %vm488_vm8, %v5713_v5  ;;  %v5071_v41 = vpop.f32.mrf.mxu0  ;;  %v4801_v5 = vadd.f32 %v13669_v49, %v4650_v6 }
 0x404   : > { %v5335_v53 = vpop.f32.mrf.mxu2  ;;  %v5093_v3 = vadd.f32 %v5071_v41, %v4946_v60 }
 0x405   : > { %v5358_v63 = vadd.f32 %v5335_v53, %v5190_v29  ;;  %v5482_v0 = vpop.f32.mrf.mxu3  ;;  %v5884_v29 = vsel %vm1173_vm2, %v5882_v51, %v5883_v56  ;;  %v15627_v56 = vld [vmem:[#allocation62_spill] sm:$0xff] }
 0x406   : > { %v5191_v45 = vadd.f32 %v5169_v13, %v5093_v3  ;;  %v5889_v22 = vpack.c.bf16 %v5886_v36, %v5884_v29  ;;  %v15632_v29 = vld [vmem:[#allocation77_spill] sm:$0xff] }
 0x407   : > { %v13927_v62 = vadd.f32 %v5482_v0, %v5358_v63  ;;  %v4655_v0 = vadd.f32 %v13708_v16, %v13699_v2  ;;  %v15631_v16 = vld [vmem:[#allocation21_spill] sm:$0xff] }
 0x408   : > { %v5174_v32 = vpop.f32.mrf.mxu1 }
 0x409   : > { %v4803_v51 = vadd.f32 %v15626_v46, %v4655_v0  ;;  %v15634_v0 = vld [vmem:[#allocation55_spill] sm:$0xff]  ;;  %v15635_v46 = vld [vmem:[#allocation22_spill] sm:$0xff] }
 0x40b   : > { %v5074_v9 = vpop.f32.mrf.mxu0 }
 0x40c   : > { %v5337_v24 = vpop.f32.mrf.mxu2  ;;  %v5094_v13 = vadd.f32 %v5074_v9, %v13657_v40  ;;  %v4948_v40 = vadd.f32 %v13673_v59, %v4801_v5  ;;  %v15629_v9 = vld [vmem:[#allocation38_spill] sm:$0xff] }
 0x40d   : > { %v13936_v42 = vadd.f32 %v5337_v24, %v5191_v45  ;;  %v13939_v27 = vpop.f32.mrf.mxu3 }
 0x40e   : > { %8502 = vmatmul.msk.bf16.gmra.mxu0 %vm488_vm8, %v5566_v8  ;;  %v5192_v60 = vadd.f32 %v5172_v11, %v5094_v13  ;;  %v15630_v13 = vld [vmem:[#allocation58_spill] sm:$0xff]  ;;  %v4950_v8 = vadd.f32 %v13719_v1, %v4803_v51 }
 0x410   : > { %v5177_v50 = vpop.f32.mrf.mxu1 }
 0x411   : > { %8532 = vmatmul.msk.bf16.gmra.mxu2 %vm488_vm8, %v5805_v55 }
 0x412   : > { %8547 = vmatmul.msk.bf16.gmra.mxu3 %vm488_vm8, %v5889_v22 }
 0x413   : > { %8571 = vmatmul.msk.bf16.vlgmr.msrb.gmra.mxu1 %vm488_vm8, %v15624_v34  ;;  %v5076_v41 = vpop.f32.mrf.mxu0 }
 0x414   : > { %v5340_v53 = vpop.f32.mrf.mxu2  ;;  %v5095_v63 = vadd.f32 %v5076_v41, %v4948_v40 }
 0x415   : > { %v5360_v49 = vadd.f32 %v5340_v53, %v5192_v60  ;;  %v5487_v3 = vpop.f32.mrf.mxu3 }
 0x416   : > { %v5193_v48 = vadd.f32 %v5174_v32, %v5095_v63  ;;  %v15628_v32 = vld [vmem:[#allocation32_spill] sm:$0xff] }
 0x417   : > { %v13952_v61 = vadd.f32 %v5487_v3, %v5360_v49  ;;  %v4625_v6 = vadd.f32 %v15629_v9, %v15628_v32  ;;  %v15639_v32 = vld [vmem:[#allocation96_spill] sm:$0xff] }
 0x418   : > { %v5179_v26 = vpop.f32.mrf.mxu1 }
 0x419   : > { %v4791_v2 = vadd.f32 %v15631_v16, %v4625_v6 }
 0x41b   : > { %v5079_v25 = vpop.f32.mrf.mxu0 }
 0x41c   : > { %v5342_v11 = vpop.f32.mrf.mxu2  ;;  %v5096_v45 = vadd.f32 %v5079_v25, %v15625_v18 }
 0x41d   : > { %v13956_v59 = vadd.f32 %v5342_v11, %v5193_v48  ;;  %v13959_v57 = vpop.f32.mrf.mxu3 }
 0x41e   : > { %8556 = vmatmul.msk.bf16.vlgmr.msrb.gmra.mxu0 %vm488_vm8, %v15627_v56  ;;  %v5194_v37 = vadd.f32 %v5177_v50, %v5096_v45  ;;  %v15633_v50 = vld [vmem:[#allocation23_spill] sm:$0xff]  ;;  %v15637_v56 = vld [vmem:[#allocation44_spill] sm:$0xff] }
 0x41f   : > { %v4938_v40 = vadd.f32 %v15633_v50, %v4791_v2 }
 0x420   : > { %v5756_v24 = vpop.f32.mrf.mxu1 }
 0x421   : > { %8586 = vmatmul.msk.bf16.vlgmr.msrb.gmra.mxu2 %vm488_vm8, %v15630_v13  ;;  %v5085_v49 = vadd.f32 %v13741_v20, %v4938_v40  ;;  %v15638_v20 = vld [vmem:[#allocation43_spill] sm:$0xff] }
 0x423   : > { %8572 = vmatmul.msk.bf16.gmra.mxu1 %vm488_vm8, %v15632_v29  ;;  %v5081_v5 = vpop.f32.mrf.mxu0  ;;  %v5183_v1 = vadd.f32 %v13747_v28, %v5085_v49 }
 0x424   : > { %v5345_v36 = vpop.f32.mrf.mxu2  ;;  %v5097_v60 = vadd.f32 %v5081_v5, %v4950_v8 }
 0x425   : > { %v5362_v55 = vadd.f32 %v5345_v36, %v5194_v37  ;;  %v5492_v22 = vpop.f32.mrf.mxu3  ;;  %v5351_v25 = vadd.f32 %v13757_v43, %v5183_v1 }
 0x426   : > { %v5195_v53 = vadd.f32 %v5179_v26, %v5097_v60  ;;  %v15636_v26 = vld [vmem:[#allocation33_spill] sm:$0xff] }
 0x427   : > { %v13973_v34 = vadd.f32 %v5492_v22, %v5362_v55  ;;  %v4630_v51 = vadd.f32 %v15636_v26, %v15635_v46  ;;  %v5498_v28 = vadd.f32 %v13760_v14, %v5351_v25  ;;  %v15641_v22 = vld [vmem:[#allocation94_spill] sm:$0xff]  ;;  %v15645_v46 = vld [vmem:[#allocation47_spill] sm:$0xff] }
 0x428   : > { %v5758_v41 = vpop.f32.mrf.mxu1  ;;  %v9055_v26 = vld [vmem:[%s14860_s5 + $0x38] sm:$0xff] }
 0x429   : > { %v4793_v37 = vadd.f32 %v15638_v20, %v4630_v51  ;;  %v15646_v51 = vld [vmem:[#allocation15_spill] sm:$0xff]  ;;  %6494 = vmatpush.bf16.msrb.mxu3 %v9055_v26 }
 0x42b   : > { %v5609_v3 = vpop.f32.mrf.mxu0 }
 0x42c   : > { %v5347_v63 = vpop.f32.mrf.mxu2  ;;  %v5644_v11 = vadd.f32 %v5609_v3, %v13734_v30 }
 0x42d   : > { %v13977_v48 = vadd.f32 %v5347_v63, %v5195_v53  ;;  %v15642_v53 = vld [vmem:[#allocation46_spill] sm:$0xff] }
 0x42e   : > { %8557 = vmatmul.msk.bf16.gmra.mxu0 %vm488_vm8, %v15634_v0  ;;  %v5791_v18 = vadd.f32 %v5756_v24, %v5644_v11  ;;  %v15640_v24 = vld [vmem:[#allocation45_spill] sm:$0xff] }
 0x42f   : > { %v4940_v13 = vadd.f32 %v15640_v24, %v4793_v37 }
 0x430   : > { %v5761_v45 = vpop.f32.mrf.mxu1 }
 0x431   : > { %8587 = vmatmul.msk.bf16.gmra.mxu2 %vm488_vm8, %v15637_v56  ;;  %v5087_v8 = vadd.f32 %v13801_v12, %v4940_v13  ;;  %v15648_v13 = vld [vmem:[#allocation48_spill] sm:$0xff] }
 0x433   : > { %8573 = vmatmul.msk.bf16.gmra.mxu1 %vm488_vm8, %v15639_v32  ;;  %v5611_v43 = vpop.f32.mrf.mxu0  ;;  %v5185_v5 = vadd.f32 %v13779_v17, %v5087_v8 }
 0x434   : > { %v5830_v30 = vpop.f32.mrf.mxu2  ;;  %v5645_v6 = vadd.f32 %v5611_v43, %v5498_v28  ;;  %v15647_v43 = vld [vmem:[#allocation16_spill] sm:$0xff] }
 0x435   : > { %v13991_v9 = vadd.f32 %v5830_v30, %v5791_v18  ;;  %v5353_v60 = vadd.f32 %v13810_v15, %v5185_v5  ;;  %v15644_v18 = vld [vmem:[#allocation108_spill] sm:$0xff] }
 0x436   : > { %v5792_v16 = vadd.f32 %v5758_v41, %v5645_v6  ;;  %v15643_v41 = vld [vmem:[#allocation109_spill] sm:$0xff] }
 0x437   : > { %v5500_v12 = vadd.f32 %v13816_v4, %v5353_v60  ;;  %v15650_v60 = vld [vmem:[#allocation11_spill] sm:$0xff] }
 0x438   : > { %v5763_v2 = vpop.f32.mrf.mxu1 }
 0x43b   : > { %v5614_v36 = vpop.f32.mrf.mxu0 }
 0x43c   : > { %v5832_v29 = vpop.f32.mrf.mxu2  ;;  %v5646_v14 = vadd.f32 %v5614_v36, %v13775_v23 }
 0x43d   : > { %v13996_v55 = vadd.f32 %v5832_v29, %v5792_v16  ;;  %v15649_v16 = vld [vmem:[#allocation12_spill] sm:$0xff] }
 0x43e   : > { %8558 = vmatmul.msk.bf16.gmra.mxu0 %vm488_vm8, %v15641_v22  ;;  %v5793_v50 = vadd.f32 %v5761_v45, %v5646_v14 }
 0x440   : > { %v5766_v40 = vpop.f32.mrf.mxu1 }
 0x441   : > { %8588 = vmatmul.msk.bf16.gmra.mxu2 %vm488_vm8, %v15642_v53  ;;  %v15651_v53 = vpack.c.bf16 %v13857_v38, %v13852_v54 }
 0x443   : > { %8574 = vmatmul.msk.bf16.gmra.mxu1 %vm488_vm8, %v15643_v41  ;;  %v5616_v49 = vpop.f32.mrf.mxu0 }
 0x444   : > { %v5835_v17 = vpop.f32.mrf.mxu2  ;;  %v5647_v23 = vadd.f32 %v5616_v49, %v5500_v12 }
 0x445   : > { %v14007_v63 = vadd.f32 %v5835_v17, %v5793_v50  ;;  %v9054_v50 = vld [vmem:[%s14860_s5 + $0x30] sm:$0xff]  ;;  %v14062_v17 = vpop.f32.mrf.mxu3 }
 0x446   : > { %v5794_v3 = vadd.f32 %v5763_v2, %v5647_v23  ;;  %6495 = vmatpush.bf16.msrb.mxu3 %v9054_v50 }
 0x448   : > { %v14009_v15 = vpop.f32.mrf.mxu1 }
 0x44b   : > { %v5619_v11 = vpop.f32.mrf.mxu0 }
 0x44c   : > { %v5837_v1 = vpop.f32.mrf.mxu2  ;;  %v5648_v0 = vadd.f32 %v5619_v11, %v13842_v44  ;;  %v15653_v11 = vmov 0.0  }
 0x44d   : > { %v14011_v25 = vadd.f32 %v5837_v1, %v5794_v3  ;;  %v15652_v1 = vpack.c.bf16 %v13868_v19, %v13865_v31  ;;  %539 = vst.msk [vmem:[#allocation4] sm:$0xff] %vm538_vm7, %v15653_v11 }
 0x44e   : > { %8559 = vmatmul.msk.bf16.gmra.mxu0 %vm488_vm8, %v15644_v18  ;;  %v5795_v4 = vadd.f32 %v5766_v40, %v5648_v0  ;;  %v5914_v0 = vpop.f32.mrf.mxu3  ;;  %540 = vst.msk [vmem:[#allocation4 + $0x8] sm:$0xff] %vm538_vm7, %v15653_v11 }
 0x44f   : > { %543 = vst.msk [vmem:[#allocation4 + $0x18] sm:$0xff] %vm538_vm7, %v15653_v11 }
 0x450   : > { %v5771_v45 = vpop.f32.mrf.mxu1  ;;  %544 = vst.msk [vmem:[#allocation4 + $0x20] sm:$0xff] %vm538_vm7, %v15653_v11 }
 0x451   : > { %8589 = vmatmul.msk.bf16.gmra.mxu2 %vm488_vm8, %v15645_v46  ;;  %546 = vst.msk [vmem:[#allocation4 + $0x30] sm:$0xff] %vm538_vm7, %v15653_v11 }
 0x452   : > { %547 = vst.msk [vmem:[#allocation4 + $0x38] sm:$0xff] %vm538_vm7, %v15653_v11 }
 0x453   : > { %8575 = vmatmul.msk.bf16.gmra.mxu1 %vm488_vm8, %v15646_v51  ;;  %v14023_v20 = vpop.f32.mrf.mxu0  ;;  %549 = vst.msk [vmem:[#allocation4 + $0x48] sm:$0xff] %vm538_vm7, %v15653_v11 }
 0x454   : > { %v5840_v56 = vpop.f32.mrf.mxu2  ;;  %550 = vst.msk [vmem:[#allocation4 + $0x50] sm:$0xff] %vm538_vm7, %v15653_v11 }
 0x455   : > { %v14025_v44 = vadd.f32 %v5840_v56, %v5795_v4  ;;  %552 = vst.msk [vmem:[#allocation4 + $0x60] sm:$0xff] %vm538_vm7, %v15653_v11  ;;  %v9053_v4 = vld [vmem:[%s14860_s5 + $0x28] sm:$0xff] }
 0x456   : > { %553 = vst.msk [vmem:[#allocation4 + $0x68] sm:$0xff] %vm538_vm7, %v15653_v11  ;;  %v5916_v7 = vpop.f32.mrf.mxu3  ;;  %6496 = vmatpush.bf16.msrb.mxu3 %v9053_v4  ;;  %v9070_v4 = vld [vmem:[%s14860_s5 + $0xb0] sm:$0xff] }
 0x457   : > { %555 = vst.msk [vmem:[#allocation4 + $0x78] sm:$0xff] %vm538_vm7, %v15653_v11 }
 0x458   : > { %v14027_v37 = vpop.f32.mrf.mxu1  ;;  %556 = vst.msk [vmem:[#allocation4 + $0x80] sm:$0xff] %vm538_vm7, %v15653_v11 }
 0x459   : > { %558 = vst.msk [vmem:[#allocation4 + $0x90] sm:$0xff] %vm538_vm7, %v15653_v11 }
 0x45a   : > { %559 = vst.msk [vmem:[#allocation4 + $0x98] sm:$0xff] %vm538_vm7, %v15653_v11 }
 0x45b   : > { %v5624_v32 = vpop.f32.mrf.mxu0  ;;  %542 = vst.msk [vmem:[#allocation4 + $0x10] sm:$0xf] %vm541_vm9, %v15653_v11 }
 0x45c   : > { %v14029_v28 = vpop.f32.mrf.mxu2  ;;  %v5650_v30 = vadd.f32 %v5624_v32, %v13900_v10  ;;  %545 = vst.msk [vmem:[#allocation4 + $0x28] sm:$0xf] %vm541_vm9, %v15653_v11  ;;  %v9067_v32 = vld [vmem:[%s14860_s5 + $0x98] sm:$0xff] }
 0x45d   : > { %548 = vst.msk [vmem:[#allocation4 + $0x40] sm:$0xf] %vm541_vm9, %v15653_v11  ;;  %6806 = vmatpush.bf16.msra.mxu1 %v9067_v32  ;;  %v9069_v32 = vld [vmem:[%s14860_s5 + $0xa8] sm:$0xff] }
 0x45e   : > { %8560 = vmatmul.msk.bf16.gmra.mxu0 %vm488_vm8, %v15647_v43  ;;  %v5797_v6 = vadd.f32 %v5771_v45, %v5650_v30  ;;  %551 = vst.msk [vmem:[#allocation4 + $0x58] sm:$0xf] %vm541_vm9, %v15653_v11  ;;  %v5919_v30 = vpop.f32.mrf.mxu3 }
 0x45f   : > { %554 = vst.msk [vmem:[#allocation4 + $0x70] sm:$0xf] %vm541_vm9, %v15653_v11 }
 0x460   : > { %v5776_v24 = vpop.f32.mrf.mxu1  ;;  %557 = vst.msk [vmem:[#allocation4 + $0x88] sm:$0xf] %vm541_vm9, %v15653_v11 }
 0x461   : > { %8590 = vmatmul.msk.bf16.gmra.mxu2 %vm488_vm8, %v15648_v13  ;;  %560 = vst.msk [vmem:[#allocation4 + $0xa0] sm:$0xf] %vm541_vm9, %v15653_v11 }
 0x463   : > { %8576 = vmatmul.msk.bf16.gmra.mxu1 %vm488_vm8, %v15649_v16  ;;  %v14038_v8 = vpop.f32.mrf.mxu0  ;;  %v9062_v16 = vld [vmem:[%s14860_s5 + $0x70] sm:$0xff] }
 0x464   : > { %v5845_v2 = vpop.f32.mrf.mxu2 }
 0x465   : > { %v14040_v29 = vadd.f32 %v5845_v2, %v5797_v6  ;;  %v9066_v2 = vld [vmem:[%s14860_s5 + $0x90] sm:$0xff] }
 0x466   : > { %6807 = vmatpush.bf16.msra.mxu1 %v9066_v2 }
 0x468   : > { %v14042_v36 = vpop.f32.mrf.mxu1 }
 0x46b   : > { %v5629_v10 = vpop.f32.mrf.mxu0 }
 0x46c   : > { %v14044_v5 = vpop.f32.mrf.mxu2  ;;  %v5652_v14 = vadd.f32 %v5629_v10, %v13927_v62  ;;  %v5949_v10 = vadd.f32 %v5914_v0, %v13991_v9  ;;  %v14159_v9 = vld [vmem:[%s14859_s4] ss:$0 sm:$0xff]  ;;  %v9071_v0 = vld [vmem:[%s14860_s5 + $0xb8] sm:$0xff] }
 0x46d   : > { %6872 = vmatpush.bf16.msra.mxu2 %v9071_v0 }
 0x46e   : > { %8561 = vmatmul.msk.bf16.gmra.mxu0 %vm488_vm8, %v15650_v60  ;;  %v5799_v22 = vadd.f32 %v5776_v24, %v5652_v14  ;;  %v9061_v14 = vld [vmem:[%s14860_s5 + $0x68] sm:$0xff] }
 0x46f   : > { %v9065_v60 = vld [vmem:[%s14860_s5 + $0x88] sm:$0xff] }
 0x470   : > { %v5781_v40 = vpop.f32.mrf.mxu1  ;;  %6808 = vmatpush.bf16.msra.mxu1 %v9065_v60 }
 0x471   : > { %8591 = vmatmul.msk.bf16.gmra.mxu2 %vm488_vm8, %v13721_v33 }
 0x472   : > { %6873 = vmatpush.bf16.msra.mxu2 %v9070_v4 }
 0x473   : > { %8577 = vmatmul.msk.bf16.gmra.mxu1 %vm488_vm8, %v15651_v53  ;;  %v14058_v62 = vpop.f32.mrf.mxu0 }
 0x474   : > { %v5850_v12 = vpop.f32.mrf.mxu2 }
 0x475   : > { %v14060_v41 = vadd.f32 %v5850_v12, %v5799_v22  ;;  %v5921_v22 = vpop.f32.mrf.mxu3 }
 0x476   : > { %6874 = vmatpush.bf16.msra.mxu2 %v9069_v32 }
 0x478   : > { %v14064_v49 = vpop.f32.mrf.mxu1 }
 0x47b   : > { %v5634_v3 = vpop.f32.mrf.mxu0 }
 0x47c   : > { %v14066_v23 = vpop.f32.mrf.mxu2  ;;  %v5654_v33 = vadd.f32 %v5634_v3, %v13952_v61 }
 0x47e   : > { %8562 = vmatmul.msk.bf16.gmra.mxu0 %vm488_vm8, %v15652_v1  ;;  %v5801_v54 = vadd.f32 %v5781_v40, %v5654_v33  ;;  %v9052_v33 = vld [vmem:[%s14860_s5 + $0x20] sm:$0xff] }
 0x47f   : > { %v9060_v1 = vld [vmem:[%s14860_s5 + $0x60] sm:$0xff]  ;;  %6497 = vmatpush.bf16.msrb.mxu3 %v9052_v33  ;;  %v5952_v33 = vadd.f32 %v5921_v22, %v14011_v25 }
 0x480   : > { %v5786_v38 = vpop.f32.mrf.mxu1 }
 0x481   : > { %8592 = vmatmul.msk.bf16.gmra.mxu2 %vm488_vm8, %v6132_v21 }
 0x483   : > { %v14085_v19 = vpop.f32.mrf.mxu0 }
 0x484   : > { %v5855_v31 = vpop.f32.mrf.mxu2 }
 0x485   : > { %v14089_v61 = vadd.f32 %v5855_v31, %v5801_v54  ;;  %v9064_v54 = vld [vmem:[%s14860_s5 + $0x80] sm:$0xff] }
 0x486   : > { %6809 = vmatpush.bf16.msra.mxu1 %v9064_v54 }
 0x488   : > { %v14097_v39 = vpop.f32.mrf.mxu1 }
 0x48b   : > { %v5639_v18 = vpop.f32.mrf.mxu0 }
 0x48c   : > { %v14107_v21 = vpop.f32.mrf.mxu2  ;;  %v5656_v45 = vadd.f32 %v5639_v18, %v13973_v34  ;;  %v9063_v34 = vld [vmem:[%s14860_s5 + $0x78] sm:$0xff] }
 0x48d   : > { %6719 = vmatpush.bf16.msra.mxu0 %v9063_v34 }
 0x48e   : > { %v5803_v46 = vadd.f32 %v5786_v38, %v5656_v45  ;;  %v5950_v38 = vadd.f32 %v5916_v7, %v13996_v55 }
 0x490   : > { %v6076_v26 = vpop.f32.mrf.mxu1 }
 0x491   : > { %6720 = vmatpush.bf16.msra.mxu0 %v9062_v16 }
 0x493   : > { %v14123_v56 = vpop.f32.mrf.mxu0 }
 0x494   : > { %v5860_v51 = vpop.f32.mrf.mxu2 }
 0x495   : > { %v14133_v43 = vadd.f32 %v5860_v51, %v5803_v46  ;;  %6721 = vmatpush.bf16.msra.mxu0 %v9061_v14  ;;  %v5924_v46 = vpop.f32.mrf.mxu3 }
 0x498   : > { %v6078_v6 = vpop.f32.mrf.mxu1 }
 0x499   : > { %6722 = vmatpush.bf16.msra.mxu0 %v9060_v1 }
 0x49b   : > { %v5995_v13 = vpop.f32.mrf.mxu0 }
 0x49c   : > { %v14141_v24 = vpop.f32.mrf.mxu2  ;;  %v6030_v50 = vadd.f32 %v5995_v13, %v5949_v10  ;;  %v5951_v13 = vadd.f32 %v5919_v30, %v14007_v63 }
 0x49e   : > { %v6111_v53 = vadd.f32 %v6076_v26, %v6030_v50  ;;  %v5926_v50 = vpop.f32.mrf.mxu3 }
 0x4a0   : > { %v6081_v40 = vpop.f32.mrf.mxu1 }
 0x4a3   : > { %v5997_v3 = vpop.f32.mrf.mxu0 }
 0x4a4   : > { %v6157_v12 = vpop.f32.mrf.mxu2  ;;  %v6031_v18 = vadd.f32 %v5997_v3, %v5950_v38  ;;  %v5502_v3 = vadd.f32 %v13885_v58, %v13880_v47 }
 0x4a5   : > { %v6192_v11 = vadd.f32 %v6157_v12, %v6111_v53 }
 0x4a6   : > { %v6112_v26 = vadd.f32 %v6078_v6, %v6031_v18  ;;  %v9068_v6 = vld [vmem:[%s14860_s5 + $0xa0] sm:$0xff]  ;;  %v5649_v54 = vadd.f32 %v14023_v20, %v5502_v3  ;;  %v5953_v18 = vadd.f32 %v5924_v46, %v14025_v44 }
 0x4a7   : > { %v6210_v31 = vadd.f32 %v14159_v9, %v6192_v11  ;;  %6875 = vmatpush.bf16.msra.mxu2 %v9068_v6 }
 0x4a8   : > { %v6083_v45 = vpop.f32.mrf.mxu1  ;;  %v5796_v47 = vadd.f32 %v14009_v15, %v5649_v54 }
 0x4a9   : > { %vm6224_vm10 = vcmp.gt.f32.partialorder %v6210_v31, 0.0  ;;  %v6238_v55 = vmul.f32 0.1, %v6210_v31 }
 0x4ab   : > { %v6252_v7 = vsel %vm6224_vm10, %v6210_v31, %v6238_v55  ;;  %v6000_v34 = vpop.f32.mrf.mxu0 }
 0x4ac   : > { %6266 = vst.msk [vmem:[#allocation4 + $0x2] sm:$0xff] %vm538_vm7, %v6252_v7  ;;  %v6159_v51 = vpop.f32.mrf.mxu2  ;;  %v6032_v10 = vadd.f32 %v6000_v34, %v5951_v13  ;;  %v5929_v34 = vpop.f32.mrf.mxu3 }
 0x4ad   : > { %v6193_v16 = vadd.f32 %v6159_v51, %v6112_v26 }
 0x4ae   : > { %v6113_v12 = vadd.f32 %v6081_v40, %v6032_v10 }
 0x4af   : > { %v6211_v2 = vadd.f32 %v14159_v9, %v6193_v16 }
 0x4b0   : > { %v6086_v14 = vpop.f32.mrf.mxu1 }
 0x4b1   : > { %vm6225_vm11 = vcmp.gt.f32.partialorder %v6211_v2, 0.0  ;;  %v6239_v60 = vmul.f32 0.1, %v6211_v2 }
 0x4b3   : > { %v6253_v53 = vsel %vm6225_vm11, %v6211_v2, %v6239_v60  ;;  %v6002_v30 = vpop.f32.mrf.mxu0  ;;  %v14193_v0 = vld [vmem:[#allocation4] sm:$0xff] }
 0x4b4   : > { %6267 = vst.msk [vmem:[#allocation4 + $0xa] sm:$0xff] %vm538_vm7, %v6253_v53  ;;  %v6162_v63 = vpop.f32.mrf.mxu2  ;;  %v6033_v11 = vadd.f32 %v6002_v30, %v5952_v33  ;;  %v6433_v58 = vrot.slane %v14193_v0, 1  ;;  %v6658_v20 = vrot.slane %v14193_v0, 3  ;;  %v6745_v7 = vrot.slane %v14193_v0, 4 }
 0x4b5   : > { %v6194_v1 = vadd.f32 %v6162_v63, %v6113_v12 }
 0x4b6   : > { %v6114_v55 = vadd.f32 %v6083_v45, %v6033_v11 }
 0x4b7   : > { %v6212_v38 = vadd.f32 %v14159_v9, %v6194_v1  ;;  %v5870_v1 = vadd.f32 %v14029_v28, %v5796_v47  ;;  %v9051_v28 = vld [vmem:[%s14860_s5 + $0x18] sm:$0xff] }
 0x4b8   : > { %v6088_v31 = vpop.f32.mrf.mxu1  ;;  %6551 = vmatpush.bf16.msra.mxu3 %v9051_v28 }
 0x4b9   : > { %vm6226_vm12 = vcmp.gt.f32.partialorder %v6212_v38, 0.0  ;;  %v6240_v40 = vmul.f32 0.1, %v6212_v38  ;;  %v5954_v47 = vadd.f32 %v5926_v50, %v5870_v1 }
 0x4bb   : > { %v6254_v4 = vsel %vm6226_vm12, %v6212_v38, %v6240_v40  ;;  %v14198_v25 = vld [vmem:[#allocation4 + $0x8] sm:$0xff]  ;;  %v14200_v22 = vld [vmem:[#allocation4 + $0x10] sm:$0xf]  ;;  %v6005_v51 = vpop.f32.mrf.mxu0 }
 0x4bc   : > { %6268 = vst.msk [vmem:[#allocation4 + $0x1a] sm:$0xff] %vm538_vm7, %v6254_v4  ;;  %v6164_v26 = vpop.f32.mrf.mxu2  ;;  %v6434_v44 = vrot.slane %v14198_v25, 1  ;;  %v6436_v15 = vrot.slane %v14200_v22, 1  ;;  %v6659_v46 = vrot.slane %v14198_v25, 3  ;;  %v6661_v45 = vrot.slane %v14200_v22, 3 }
 0x4bd   : > { %v6195_v32 = vadd.f32 %v6164_v26, %v6114_v55  ;;  %v6034_v13 = vadd.f32 %v6005_v51, %v5953_v18  ;;  %v6746_v16 = vrot.slane %v14198_v25, 4  ;;  %v6748_v2 = vrot.slane %v14200_v22, 4 }
 0x4be   : > { %v6435_v10 = vsel %vm1173_vm2, %v6433_v58, %v6434_v44  ;;  %v6437_v6 = vsel %vm1173_vm2, %v6434_v44, %v6436_v15  ;;  %v6660_v60 = vsel %vm1627_vm4, %v6658_v20, %v6659_v46  ;;  %v6662_v53 = vsel %vm1627_vm4, %v6659_v46, %v6661_v45  ;;  %v5931_v20 = vpop.f32.mrf.mxu3 }
 0x4bf   : > { %v6213_v12 = vadd.f32 %v14159_v9, %v6195_v32  ;;  %v6454_v3 = vpack.c.bf16 %v6437_v6, %v6435_v10  ;;  %v6679_v63 = vpack.c.bf16 %v6662_v53, %v6660_v60  ;;  %v6747_v30 = vsel %vm1854_vm5, %v6745_v7, %v6746_v16 }
 0x4c0   : > { %v6749_v33 = vsel %vm1854_vm5, %v6746_v16, %v6748_v2  ;;  %v6115_v40 = vadd.f32 %v6086_v14, %v6034_v13  ;;  %v6091_v18 = vpop.f32.mrf.mxu1  ;;  %v5504_v51 = vadd.f32 %v13912_v52, %v13909_v35  ;;  %v5955_v2 = vadd.f32 %v5929_v34, %v14040_v29 }
 0x4c1   : > { %vm6227_vm13 = vcmp.gt.f32.partialorder %v6213_v12, 0.0  ;;  %v6241_v54 = vmul.f32 0.1, %v6213_v12  ;;  %8609 = vmatmul.msk.bf16.vlgmr.msrb.gmra.mxu3 %vm538_vm7, %v6454_v3  ;;  %8666 = vmatmul.msk.bf16.vlgmr.msra.gmra.mxu0 %vm538_vm7, %v6679_v63  ;;  %v6766_v38 = vpack.c.bf16 %v6749_v33, %v6747_v30  ;;  %v5506_v63 = vadd.f32 %v13939_v27, %v13936_v42 }
 0x4c2   : > { %v5651_v44 = vadd.f32 %v14038_v8, %v5504_v51 }
 0x4c3   : > { %v6255_v11 = vsel %vm6227_vm13, %v6213_v12, %v6241_v54  ;;  %8685 = vmatmul.msk.bf16.vlgmr.msra.gmra.mxu1 %vm538_vm7, %v6766_v38  ;;  %v6007_v4 = vpop.f32.mrf.mxu0  ;;  %v14230_v45 = vld [vmem:[#allocation4 + $0x18] sm:$0xff] }
 0x4c4   : > { %6269 = vst.msk [vmem:[#allocation4 + $0x22] sm:$0xff] %vm538_vm7, %v6255_v11  ;;  %v6167_v58 = vpop.f32.mrf.mxu2  ;;  %v6035_v26 = vadd.f32 %v6007_v4, %v5954_v47  ;;  %v5798_v8 = vadd.f32 %v14027_v37, %v5651_v44  ;;  %v9050_v37 = vld [vmem:[%s14860_s5 + $0x10] sm:$0xff] }
 0x4c5   : > { %v6196_v55 = vadd.f32 %v6167_v58, %v6115_v40  ;;  %6552 = vmatpush.bf16.msra.mxu3 %v9050_v37 }
 0x4c6   : > { %v6116_v46 = vadd.f32 %v6088_v31, %v6035_v26  ;;  %v5872_v6 = vadd.f32 %v14044_v5, %v5798_v8  ;;  %v5934_v60 = vpop.f32.mrf.mxu3  ;;  %v5653_v5 = vadd.f32 %v14058_v62, %v5506_v63 }
 0x4c7   : > { %v6214_v7 = vadd.f32 %v14159_v9, %v6196_v55  ;;  %v5957_v27 = vadd.f32 %v5934_v60, %v14060_v41 }
 0x4c8   : > { %v6093_v52 = vpop.f32.mrf.mxu1  ;;  %v5956_v30 = vadd.f32 %v5931_v20, %v5872_v6  ;;  %v5800_v40 = vadd.f32 %v14042_v36, %v5653_v5 }
 0x4c9   : > { %vm6228_vm14 = vcmp.gt.f32.partialorder %v6214_v7, 0.0  ;;  %v6242_v14 = vmul.f32 0.1, %v6214_v7 }
 0x4cb   : > { %v6256_v15 = vsel %vm6228_vm14, %v6214_v7, %v6242_v14  ;;  %v14232_v32 = vld [vmem:[#allocation4 + $0x20] sm:$0xff]  ;;  %v6010_v13 = vpop.f32.mrf.mxu0  ;;  %v9049_v14 = vld [vmem:[%s14860_s5 + $0x8] sm:$0xff] }
 0x4cc   : > { %6270 = vst.msk [vmem:[#allocation4 + $0x32] sm:$0xff] %vm538_vm7, %v6256_v15  ;;  %v6169_v50 = vpop.f32.mrf.mxu2  ;;  %v6832_v16 = vpack.c.bf16 %v14232_v32, %v14230_v45  ;;  %v6036_v10 = vadd.f32 %v6010_v13, %v5955_v2  ;;  %6553 = vmatpush.bf16.msra.mxu3 %v9049_v14 }
 0x4cd   : > { %v6197_v35 = vadd.f32 %v6169_v50, %v6116_v46 }
 0x4ce   : > { %8704 = vmatmul.msk.bf16.vlgmr.msra.gmra.mxu2 %vm538_vm7, %v6832_v16  ;;  %v6117_v3 = vadd.f32 %v6091_v18, %v6036_v10  ;;  %v5936_v18 = vpop.f32.mrf.mxu3 }
 0x4cf   : > { %v6215_v31 = vadd.f32 %v14159_v9, %v6197_v35 }
 0x4d0   : > { %v6096_v38 = vpop.f32.mrf.mxu1 }
 0x4d1   : > { %vm6229_vm15 = vcmp.gt.f32.partialorder %v6215_v31, 0.0  ;;  %v6243_v53 = vmul.f32 0.1, %v6215_v31 }
 0x4d3   : > { %v6257_v12 = vsel %vm6229_vm15, %v6215_v31, %v6243_v53  ;;  %v6012_v34 = vpop.f32.mrf.mxu0  ;;  %v14250_v11 = vld [vmem:[#allocation4 + $0x30] sm:$0xff]  ;;  %v5874_v53 = vadd.f32 %v14066_v23, %v5800_v40 }
 0x4d4   : > { %6271 = vst.msk [vmem:[#allocation4 + $0x3a] sm:$0xff] %vm538_vm7, %v6257_v12  ;;  %v6172_v29 = vpop.f32.mrf.mxu2  ;;  %v6037_v54 = vadd.f32 %v6012_v34, %v5956_v30  ;;  %v6438_v62 = vrot.slane %v14250_v11, 1  ;;  %v6663_v55 = vrot.slane %v14250_v11, 3  ;;  %v6750_v51 = vrot.slane %v14250_v11, 4  ;;  %v9079_v30 = vld [vmem:[%s14860_s5 + $0xf8] sm:$0xff] }
 0x4d5   : > { %v6198_v33 = vadd.f32 %v6172_v29, %v6117_v3  ;;  %v5958_v5 = vadd.f32 %v5936_v18, %v5874_v53  ;;  %7055 = vmatpush.bf16.msrb.mxu0 %v9079_v30  ;;  %v9058_v30 = vld [vmem:[%s14860_s5 + $0x50] sm:$0xff] }
 0x4d6   : > { %v6118_v4 = vadd.f32 %v6093_v52, %v6037_v54 }
 0x4d7   : > { %v6216_v1 = vadd.f32 %v14159_v9, %v6198_v33  ;;  %v9083_v33 = vld [vmem:[%s14860_s5 + $0x118] sm:$0xff] }
 0x4d8   : > { %v6098_v63 = vpop.f32.mrf.mxu1  ;;  %7142 = vmatpush.bf16.msrb.mxu1 %v9083_v33 }
 0x4d9   : > { %vm6230_vm1 = vcmp.gt.f32.partialorder %v6216_v1, 0.0  ;;  %v6244_v42 = vmul.f32 0.1, %v6216_v1 }
 0x4db   : > { %v6258_v58 = vsel %vm6230_vm1, %v6216_v1, %v6244_v42  ;;  %v14254_v28 = vld [vmem:[#allocation4 + $0x38] sm:$0xff]  ;;  %v14256_v47 = vld [vmem:[#allocation4 + $0x40] sm:$0xf]  ;;  %v6015_v7 = vpop.f32.mrf.mxu0  ;;  %v5939_v1 = vpop.f32.mrf.mxu3  ;;  %vm7681_vm1 = vsmask.f32 7424 }
 0x4dc   : > { %6272 = vst.msk [vmem:[#allocation4 + $0x4a] sm:$0xff] %vm538_vm7, %v6258_v58  ;;  %v6174_v20 = vpop.f32.mrf.mxu2  ;;  %v6439_v26 = vrot.slane %v14254_v28, 1  ;;  %v6441_v41 = vrot.slane %v14256_v47, 1  ;;  %v6664_v36 = vrot.slane %v14254_v28, 3  ;;  %v6038_v15 = vadd.f32 %v6015_v7, %v5957_v27 }
 0x4dd   : > { %v6199_v44 = vadd.f32 %v6174_v20, %v6118_v4  ;;  %v6666_v46 = vrot.slane %v14256_v47, 3  ;;  %v6751_v50 = vrot.slane %v14254_v28, 4  ;;  %v6753_v35 = vrot.slane %v14256_v47, 4 }
 0x4de   : > { %v6440_v13 = vsel %vm1173_vm2, %v6438_v62, %v6439_v26  ;;  %v6442_v16 = vsel %vm1173_vm2, %v6439_v26, %v6441_v41  ;;  %v6665_v2 = vsel %vm1627_vm4, %v6663_v55, %v6664_v36  ;;  %v6119_v34 = vadd.f32 %v6096_v38, %v6038_v15 }
 0x4df   : > { %v6217_v52 = vadd.f32 %v14159_v9, %v6199_v44  ;;  %v14275_v8 = vpack.c.bf16 %v6442_v16, %v6440_v13  ;;  %v6667_v31 = vsel %vm1627_vm4, %v6664_v36, %v6666_v46  ;;  %v6752_v10 = vsel %vm1854_vm5, %v6750_v51, %v6751_v50 }
 0x4e0   : > { %v14279_v6 = vpack.c.bf16 %v6667_v31, %v6665_v2  ;;  %v6754_v60 = vsel %vm1854_vm5, %v6751_v50, %v6753_v35  ;;  %v5508_v27 = vadd.f32 %v13959_v57, %v13956_v59  ;;  %v6101_v62 = vpop.f32.mrf.mxu1  ;;  %v9048_v59 = vld [vmem:[%s14860_s5] sm:$0xff]  ;;  %v9078_v57 = vld [vmem:[%s14860_s5 + $0xf0] sm:$0xff]  ;;  %v5959_v36 = vadd.f32 %v5939_v1, %v14089_v61  ;;  %v9077_v50 = vld [vmem:[%s14860_s5 + $0xe8] sm:$0xff] }
 0x4e1   : > { %vm6231_vm6 = vcmp.gt.f32.partialorder %v6217_v52, 0.0  ;;  %v6245_v12 = vmul.f32 0.1, %v6217_v52  ;;  %8610 = vmatmul.msk.bf16.gmra.mxu3 %vm538_vm7, %v14275_v8  ;;  %v14285_v3 = vpack.c.bf16 %v6754_v60, %v6752_v10  ;;  %7056 = vmatpush.bf16.msrb.mxu0 %v9078_v57  ;;  %v9081_v61 = vld [vmem:[%s14860_s5 + $0x108] sm:$0xff]  ;;  %v5510_v35 = vadd.f32 %v14062_v17, %v13977_v48  ;;  %v9076_v10 = vld [vmem:[%s14860_s5 + $0xe0] sm:$0xff]  ;;  %v9059_v48 = vld [vmem:[%s14860_s5 + $0x58] sm:$0xff] }
 0x4e2   : > { %8667 = vmatmul.msk.bf16.gmra.mxu0 %vm538_vm7, %v14279_v6  ;;  %v5655_v58 = vadd.f32 %v14085_v19, %v5508_v27  ;;  %v9082_v19 = vld [vmem:[%s14860_s5 + $0x110] sm:$0xff]  ;;  %6554 = vmatpush.bf16.msra.mxu3 %v9048_v59 }
 0x4e3   : > { %v6259_v29 = vsel %vm6231_vm6, %v6217_v52, %v6245_v12  ;;  %8686 = vmatmul.msk.bf16.gmra.mxu1 %vm538_vm7, %v14285_v3  ;;  %v6017_v23 = vpop.f32.mrf.mxu0  ;;  %v14302_v20 = vld [vmem:[#allocation4 + $0x48] sm:$0xff]  ;;  %v5941_v44 = vpop.f32.mrf.mxu3  ;;  %v9087_v12 = vld [vmem:[%s14860_s5 + $0x138] sm:$0xff]  ;;  %v5657_v17 = vadd.f32 %v14123_v56, %v5510_v35 }
 0x4e4   : > { %6273 = vst.msk [vmem:[#allocation4 + $0x52] sm:$0xff] %vm538_vm7, %v6259_v29  ;;  %v6177_v37 = vpop.f32.mrf.mxu2  ;;  %v6039_v38 = vadd.f32 %v6017_v23, %v5958_v5  ;;  %v5802_v14 = vadd.f32 %v14064_v49, %v5655_v58  ;;  %7143 = vmatpush.bf16.msrb.mxu1 %v9082_v19  ;;  %7229 = vmatpush.bf16.msrb.mxu2 %v9087_v12  ;;  %v9086_v23 = vld [vmem:[%s14860_s5 + $0x130] sm:$0xff] }
 0x4e5   : > { %v6200_v54 = vadd.f32 %v6177_v37, %v6119_v34  ;;  %7057 = vmatpush.bf16.msrb.mxu0 %v9077_v50  ;;  %v5804_v1 = vadd.f32 %v14097_v39, %v5657_v17 }
 0x4e6   : > { %v6120_v55 = vadd.f32 %v6098_v63, %v6039_v38  ;;  %v5876_v13 = vadd.f32 %v14107_v21, %v5802_v14  ;;  %v9080_v21 = vld [vmem:[%s14860_s5 + $0x100] sm:$0xff]  ;;  %6632 = vmatpush.bf16.msrb.mxu3 %v9059_v48 }
 0x4e7   : > { %v6218_v42 = vadd.f32 %v14159_v9, %v6200_v54  ;;  %v5878_v35 = vadd.f32 %v14141_v24, %v5804_v1  ;;  %v9057_v24 = vld [vmem:[%s14860_s5 + $0x48] sm:$0xff]  ;;  %v7082_v1 = vrot.slane %v14232_v32, 3 }
 0x4e8   : > { %7144 = vmatpush.bf16.msrb.mxu1 %v9081_v61  ;;  %v5960_v60 = vadd.f32 %v5941_v44, %v5876_v13  ;;  %v6103_v63 = vpop.f32.mrf.mxu1  ;;  %7230 = vmatpush.bf16.msrb.mxu2 %v9086_v23  ;;  %v6995_v23 = vrot.slane %v14232_v32, 2 }
 0x4e9   : > { %vm6232_vm9 = vcmp.gt.f32.partialorder %v6218_v42, 0.0  ;;  %v6246_v40 = vmul.f32 0.1, %v6218_v42  ;;  %7058 = vmatpush.bf16.msrb.mxu0 %v9076_v10 }
 0x4ea   : > { %6633 = vmatpush.bf16.msrb.mxu3 %v9058_v30 }
 0x4eb   : > { %v6260_v4 = vsel %vm6232_vm9, %v6218_v42, %v6246_v40  ;;  %v14304_v18 = vld [vmem:[#allocation4 + $0x50] sm:$0xff]  ;;  %v6020_v26 = vpop.f32.mrf.mxu0  ;;  %v5944_v33 = vpop.f32.mrf.mxu3 }
 0x4ec   : > { %6274 = vst.msk [vmem:[#allocation4 + $0x62] sm:$0xff] %vm538_vm7, %v6260_v4  ;;  %v6179_v7 = vpop.f32.mrf.mxu2  ;;  %v6833_v41 = vpack.c.bf16 %v14304_v18, %v14302_v20  ;;  %v6040_v46 = vadd.f32 %v6020_v26, %v5959_v36  ;;  %7145 = vmatpush.bf16.msrb.mxu1 %v9080_v21  ;;  %v5961_v5 = vadd.f32 %v5944_v33, %v14133_v43 }
 0x4ed   : > { %v6201_v51 = vadd.f32 %v6179_v7, %v6120_v55 }
 0x4ee   : > { %8705 = vmatmul.msk.bf16.gmra.mxu2 %vm538_vm7, %v6833_v41  ;;  %v6121_v49 = vadd.f32 %v6101_v62, %v6040_v46  ;;  %v9085_v41 = vld [vmem:[%s14860_s5 + $0x128] sm:$0xff]  ;;  %6634 = vmatpush.bf16.msrb.mxu3 %v9057_v24 }
 0x4ef   : > { %v6219_v15 = vadd.f32 %v14159_v9, %v6201_v51  ;;  %7231 = vmatpush.bf16.msrb.mxu2 %v9085_v41 }
 0x4f1   : > { %vm6233_vm10 = vcmp.gt.f32.partialorder %v6219_v15, 0.0  ;;  %v6247_v16 = vmul.f32 0.1, %v6219_v15 }
 0x4f3   : > { %v6261_v2 = vsel %vm6233_vm10, %v6219_v15, %v6247_v16  ;;  %v6022_v31 = vpop.f32.mrf.mxu0  ;;  %v14346_v37 = vld [vmem:[#allocation4 + $0x60] sm:$0xff]  ;;  %v6106_v16 = vpop.f32.mrf.mxu1  ;;  %vm7788_vm10 = vsmask.f32 6400 }
 0x4f4   : > { %6275 = vst.msk [vmem:[#allocation4 + $0x6a] sm:$0xff] %vm538_vm7, %v6261_v2  ;;  %v6182_v52 = vpop.f32.mrf.mxu2  ;;  %v6041_v34 = vadd.f32 %v6022_v31, %v5960_v60  ;;  %v6443_v54 = vrot.slane %v14346_v37, 1  ;;  %v6668_v58 = vrot.slane %v14346_v37, 3  ;;  %v6755_v4 = vrot.slane %v14346_v37, 4  ;;  %v5946_v10 = vpop.f32.mrf.mxu3 }
 0x4f5   : > { %v6202_v53 = vadd.f32 %v6182_v52, %v6121_v49  ;;  %v9084_v49 = vld [vmem:[%s14860_s5 + $0x120] sm:$0xff]  ;;  %v5962_v48 = vadd.f32 %v5946_v10, %v5878_v35  ;;  %v9098_v35 = vld [vmem:[%s14860_s5 + $0x190] sm:$0xff]  ;;  %v7000_v10 = vrot.slane %v14304_v18, 2 }
 0x4f6   : > { %v6122_v38 = vadd.f32 %v6103_v63, %v6041_v34  ;;  %7232 = vmatpush.bf16.msrb.mxu2 %v9084_v49  ;;  %v14400_v63 = vld [vmem:[#allocation4 + $0x28] sm:$0xf]  ;;  %v9094_v49 = vld [vmem:[%s14860_s5 + $0x170] sm:$0xff] }
 0x4f7   : > { %v6220_v29 = vadd.f32 %v14159_v9, %v6202_v53  ;;  %v6997_v30 = vrot.slane %v14400_v63, 2 }
 0x4f9   : > { %vm6234_vm11 = vcmp.gt.f32.partialorder %v6220_v29, 0.0  ;;  %v6248_v56 = vmul.f32 0.1, %v6220_v29 }
 0x4fb   : > { %v6262_v42 = vsel %vm6234_vm11, %v6220_v29, %v6248_v56  ;;  %v14357_v27 = vld [vmem:[#allocation4 + $0x68] sm:$0xff]  ;;  %v14359_v40 = vld [vmem:[#allocation4 + $0x70] sm:$0xf]  ;;  %v6025_v55 = vpop.f32.mrf.mxu0  ;;  %v6108_v56 = vpop.f32.mrf.mxu1 }
 0x4fc   : > { %6276 = vst.msk [vmem:[#allocation4 + $0x7a] sm:$0xff] %vm538_vm7, %v6262_v42  ;;  %v6184_v62 = vpop.f32.mrf.mxu2  ;;  %v6444_v43 = vrot.slane %v14357_v27, 1  ;;  %v6446_v39 = vrot.slane %v14359_v40, 1  ;;  %v6669_v7 = vrot.slane %v14357_v27, 3  ;;  %v6671_v26 = vrot.slane %v14359_v40, 3 }
 0x4fd   : > { %v6203_v59 = vadd.f32 %v6184_v62, %v6122_v38  ;;  %v6042_v57 = vadd.f32 %v6025_v55, %v5961_v5  ;;  %v6756_v19 = vrot.slane %v14357_v27, 4  ;;  %v6758_v36 = vrot.slane %v14359_v40, 4 }
 0x4fe   : > { %v6445_v51 = vsel %vm1173_vm2, %v6443_v54, %v6444_v43  ;;  %v6447_v14 = vsel %vm1173_vm2, %v6444_v43, %v6446_v39  ;;  %v6670_v44 = vsel %vm1627_vm4, %v6668_v58, %v6669_v7  ;;  %v6672_v15 = vsel %vm1627_vm4, %v6669_v7, %v6671_v26 }
 0x4ff   : > { %v6221_v46 = vadd.f32 %v14159_v9, %v6203_v59  ;;  %v14378_v50 = vpack.c.bf16 %v6447_v14, %v6445_v51  ;;  %v14380_v61 = vpack.c.bf16 %v6672_v15, %v6670_v44  ;;  %v6757_v13 = vsel %vm1854_vm5, %v6755_v4, %v6756_v19  ;;  %v9095_v15 = vld [vmem:[%s14860_s5 + $0x178] sm:$0xff] }
 0x500   : > { %v6759_v2 = vsel %vm1854_vm5, %v6756_v19, %v6758_v36  ;;  %v6123_v60 = vadd.f32 %v6106_v16, %v6042_v57  ;;  %v6994_v5 = vrot.slane %v14230_v45, 2  ;;  %v7084_v54 = vrot.slane %v14400_v63, 3  ;;  %7355 = vmatpush.bf16.msra.mxu0 %v9095_v15 }
 0x501   : > { %vm6235_vm12 = vcmp.gt.f32.partialorder %v6221_v46, 0.0  ;;  %v6249_v52 = vmul.f32 0.1, %v6221_v46  ;;  %8611 = vmatmul.msk.bf16.gmra.mxu3 %vm538_vm7, %v14378_v50  ;;  %8668 = vmatmul.msk.bf16.gmra.mxu0 %vm538_vm7, %v14380_v61  ;;  %v14392_v31 = vpack.c.bf16 %v6759_v2, %v6757_v13  ;;  %v6998_v39 = vsel %vm1400_vm3, %v6995_v23, %v6997_v30  ;;  %v14439_v2 = vld [vmem:[#allocation4 + $0x58] sm:$0xf] }
 0x502   : > { %v6996_v43 = vsel %vm1400_vm3, %v6994_v5, %v6995_v23  ;;  %v7081_v7 = vrot.slane %v14230_v45, 3  ;;  %v7085_v59 = vsel %vm1627_vm4, %v7082_v1, %v7084_v54  ;;  %v6421_v19 = vpack.c.bf16 %v14198_v25, %v14193_v0 }
 0x503   : > { %v6263_v21 = vsel %vm6235_vm12, %v6221_v46, %v6249_v52  ;;  %8687 = vmatmul.msk.bf16.gmra.mxu1 %vm538_vm7, %v14392_v31  ;;  %v6027_v12 = vpop.f32.mrf.mxu0  ;;  %v14408_v58 = vld [vmem:[#allocation4 + $0x78] sm:$0xff]  ;;  %v7015_v36 = vpack.c.bf16 %v6998_v39, %v6996_v43  ;;  %v9056_v46 = vld [vmem:[%s14860_s5 + $0x40] sm:$0xff]  ;;  %v7169_v13 = vrot.slane %v14232_v32, 4  ;;  %v7171_v16 = vrot.slane %v14400_v63, 4  ;;  %v9102_v39 = vld [vmem:[%s14860_s5 + $0x1b0] sm:$0xff] }
 0x504   : > { %6277 = vst.msk [vmem:[#allocation4 + $0x82] sm:$0xff] %vm538_vm7, %v6263_v21  ;;  %v6187_v53 = vpop.f32.mrf.mxu2  ;;  %v6043_v34 = vadd.f32 %v6027_v12, %v5962_v48  ;;  %v7083_v41 = vsel %vm1627_vm4, %v7081_v7, %v7082_v1  ;;  %6635 = vmatpush.bf16.msrb.mxu3 %v9056_v46  ;;  %v7168_v52 = vrot.slane %v14230_v45, 4  ;;  %v7002_v21 = vrot.slane %v14439_v2, 2  ;;  %7356 = vmatpush.bf16.msra.mxu0 %v9094_v49  ;;  %v9097_v12 = vld [vmem:[%s14860_s5 + $0x188] sm:$0xff]  ;;  %v9075_v43 = vld [vmem:[%s14860_s5 + $0xd8] sm:$0xff]  ;;  %v9100_v46 = vld [vmem:[%s14860_s5 + $0x1a0] sm:$0xff] }
 0x505   : > { %v6204_v17 = vadd.f32 %v6187_v53, %v6123_v60  ;;  %v7102_v14 = vpack.c.bf16 %v7085_v59, %v7083_v41  ;;  %v7172_v24 = vsel %vm1854_vm5, %v7169_v13, %v7171_v16  ;;  %v9093_v53 = vld [vmem:[%s14860_s5 + $0x168] sm:$0xff]  ;;  %v6999_v48 = vrot.slane %v14302_v20, 2 }
 0x506   : > { %v6124_v38 = vadd.f32 %v6108_v56, %v6043_v34  ;;  %v7170_v60 = vsel %vm1854_vm5, %v7168_v52, %v7169_v13  ;;  %v7003_v30 = vsel %vm1400_vm3, %v7000_v10, %v7002_v21  ;;  %v14469_v1 = vpack.c.bf16 %v14254_v28, %v14250_v11  ;;  %v9074_v52 = vld [vmem:[%s14860_s5 + $0xd0] sm:$0xff] }
 0x507   : > { %v6222_v29 = vadd.f32 %v14159_v9, %v6204_v17  ;;  %v7087_v17 = vrot.slane %v14304_v18, 3  ;;  %v7189_v34 = vpack.c.bf16 %v7172_v24, %v7170_v60  ;;  %v7001_v23 = vsel %vm1400_vm3, %v6999_v48, %v7000_v10 }
 0x508   : > { %7357 = vmatpush.bf16.msra.mxu0 %v9093_v53  ;;  %v7016_v54 = vpack.c.bf16 %v7003_v30, %v7001_v23  ;;  %v7174_v7 = vrot.slane %v14304_v18, 4  ;;  %v7173_v59 = vrot.slane %v14302_v20, 4  ;;  %v14519_v60 = vpack.c.bf16 %v14357_v27, %v14346_v37 }
 0x509   : > { %vm6236_vm13 = vcmp.gt.f32.partialorder %v6222_v29, 0.0  ;;  %v6250_v33 = vmul.f32 0.1, %v6222_v29  ;;  %v6582_v48 = vrot.slane %v14357_v27, 2 }
 0x50b   : > { %v6264_v42 = vsel %vm6236_vm13, %v6222_v29, %v6250_v33  ;;  %v14410_v4 = vld [vmem:[#allocation4 + $0x80] sm:$0xff]  ;;  %v7089_v29 = vrot.slane %v14439_v2, 3  ;;  %v7086_v33 = vrot.slane %v14302_v20, 3  ;;  %v14492_v41 = vld [vmem:[#allocation4 + $0x88] sm:$0xf] }
 0x50c   : > { %6278 = vst.msk [vmem:[#allocation4 + $0x92] sm:$0xff] %vm538_vm7, %v6264_v42  ;;  %v6189_v62 = vpop.f32.mrf.mxu2  ;;  %v6834_v55 = vpack.c.bf16 %v14410_v4, %v14408_v58  ;;  %v9092_v42 = vld [vmem:[%s14860_s5 + $0x160] sm:$0xff]  ;;  %v7092_v15 = vrot.slane %v14410_v4, 3  ;;  %v7179_v30 = vrot.slane %v14410_v4, 4 }
 0x50d   : > { %v6205_v26 = vadd.f32 %v6189_v62, %v6124_v38  ;;  %v7088_v56 = vsel %vm1627_vm4, %v7086_v33, %v7087_v17  ;;  %v7090_v5 = vsel %vm1627_vm4, %v7087_v17, %v7089_v29  ;;  %v9096_v38 = vld [vmem:[%s14860_s5 + $0x180] sm:$0xff]  ;;  %v9103_v62 = vld [vmem:[%s14860_s5 + $0x1b8] sm:$0xff]  ;;  %7358 = vmatpush.bf16.msra.mxu0 %v9092_v42  ;;  %v6584_v17 = vrot.slane %v14359_v40, 2 }
 0x50e   : > { %8706 = vmatmul.msk.bf16.gmra.mxu2 %vm538_vm7, %v6834_v55  ;;  %v7103_v55 = vpack.c.bf16 %v7090_v5, %v7088_v56  ;;  %v7181_v33 = vrot.slane %v14492_v41, 4  ;;  %v7178_v56 = vrot.slane %v14408_v58, 4  ;;  %v6572_v5 = vrot.slane %v14198_v25, 2 }
 0x50f   : > { %v6223_v57 = vadd.f32 %v14159_v9, %v6205_v26  ;;  %v9099_v9 = vld [vmem:[%s14860_s5 + $0x198] sm:$0xff]  ;;  %7485 = vmatpush.bf16.msra.mxu2 %v9103_v62  ;;  %v7176_v26 = vrot.slane %v14439_v2, 4  ;;  %v6579_v42 = vrot.slane %v14256_v47, 2  ;;  %v6577_v62 = vrot.slane %v14254_v28, 2  ;;  %v9072_v28 = vld [vmem:[%s14860_s5 + $0xc0] sm:$0xff] }
 0x510   : > { %7420 = vmatpush.bf16.msra.mxu1 %v9099_v9  ;;  %v7094_v9 = vrot.slane %v14492_v41, 3  ;;  %v7180_v27 = vsel %vm1854_vm5, %v7178_v56, %v7179_v30  ;;  %v7182_v40 = vsel %vm1854_vm5, %v7179_v30, %v7181_v33  ;;  %v9088_v30 = vld [vmem:[%s14860_s5 + $0x140] sm:$0xff]  ;;  %v6913_v33 = vrot.slane %v14304_v18, 1 }
 0x511   : > { %vm6237_vm14 = vcmp.gt.f32.partialorder %v6223_v57, 0.0  ;;  %v6251_v51 = vmul.f32 0.1, %v6223_v57  ;;  %8628 = vmatmul.msk.bf16.vlgmr.msra.gmra.mxu3 %vm538_vm7, %v6421_v19  ;;  %8742 = vmatmul.msk.bf16.vlgmr.msrb.gmra.mxu0 %vm538_vm7, %v7015_v36  ;;  %v7007_v19 = vrot.slane %v14492_v41, 2  ;;  %v9101_v36 = vld [vmem:[%s14860_s5 + $0x1a8] sm:$0xff]  ;;  %v6912_v56 = vrot.slane %v14302_v20, 1 }
 0x512   : > { %6968 = vmatpush.bf16.msra.mxu3 %v9075_v43  ;;  %v7095_v21 = vsel %vm1627_vm4, %v7092_v15, %v7094_v9  ;;  %v6576_v43 = vrot.slane %v14250_v11, 2  ;;  %v9091_v11 = vld [vmem:[%s14860_s5 + $0x158] sm:$0xff]  ;;  %v6918_v18 = vrot.slane %v14410_v4, 1  ;;  %v6917_v20 = vrot.slane %v14408_v58, 1 }
 0x513   : > { %v6265_v44 = vsel %vm6237_vm14, %v6223_v57, %v6251_v51  ;;  %8761 = vmatmul.msk.bf16.vlgmr.msrb.gmra.mxu1 %vm538_vm7, %v7102_v14  ;;  %7486 = vmatpush.bf16.msra.mxu2 %v9102_v39  ;;  %v7005_v57 = vrot.slane %v14410_v4, 2  ;;  %v7175_v51 = vsel %vm1854_vm5, %v7173_v59, %v7174_v7  ;;  %v7177_v14 = vsel %vm1854_vm5, %v7174_v7, %v7176_v26  ;;  %v14569_v59 = vld [vmem:[#allocation4 + $0x90] sm:$0xff]  ;;  %v9105_v4 = vld [vmem:[%s14860_s5 + $0x1c8] sm:$0xff] }
 0x514   : > { %6279 = vst.msk [vmem:[#allocation4 + $0x9a] sm:$0xff] %vm538_vm7, %v6265_v44  ;;  %7421 = vmatpush.bf16.msra.mxu1 %v9098_v35  ;;  %v7004_v44 = vrot.slane %v14408_v58, 2  ;;  %v7190_v13 = vpack.c.bf16 %v7177_v14, %v7175_v51  ;;  %v7091_v35 = vrot.slane %v14408_v58, 3  ;;  %v6578_v39 = vsel %vm1400_vm3, %v6576_v43, %v6577_v62 }
 0x515   : > { %v7008_v49 = vsel %vm1400_vm3, %v7005_v57, %v7007_v19  ;;  %v6580_v7 = vsel %vm1400_vm3, %v6577_v62, %v6579_v42  ;;  %v7316_v19 = vrot.slane %v14569_v59, 1  ;;  %v6919_v62 = vsel %vm1173_vm2, %v6917_v20, %v6918_v18 }
 0x516   : > { %v7006_v16 = vsel %vm1400_vm3, %v7004_v44, %v7005_v57  ;;  %v7093_v10 = vsel %vm1627_vm4, %v7091_v35, %v7092_v15  ;;  %6969 = vmatpush.bf16.msra.mxu3 %v9074_v52  ;;  %v7381_v15 = vrot.slane %v14569_v59, 2 }
 0x517   : > { %7487 = vmatpush.bf16.msra.mxu2 %v9101_v36  ;;  %v7017_v24 = vpack.c.bf16 %v7008_v49, %v7006_v16  ;;  %v7104_v53 = vpack.c.bf16 %v7095_v21, %v7093_v10  ;;  %v6908_v10 = vrot.slane %v14232_v32, 1  ;;  %v6910_v21 = vrot.slane %v14400_v63, 1 }
 0x518   : > { %7422 = vmatpush.bf16.msra.mxu1 %v9097_v12  ;;  %v6581_v12 = vrot.slane %v14346_v37, 2  ;;  %v6574_v37 = vrot.slane %v14200_v22, 2 }
 0x51a   : > { %v6583_v29 = vsel %vm1400_vm3, %v6581_v12, %v6582_v48  ;;  %v6575_v22 = vsel %vm1400_vm3, %v6572_v5, %v6574_v37  ;;  %v6914_v37 = vsel %vm1173_vm2, %v6912_v56, %v6913_v33 }
 0x51b   : > { %7488 = vmatpush.bf16.msra.mxu2 %v9100_v46  ;;  %v14565_v47 = vld [vmem:[#allocation4 + $0x98] sm:$0xff] }
 0x51c   : > { %7423 = vmatpush.bf16.msra.mxu1 %v9096_v38  ;;  %v6571_v38 = vrot.slane %v14193_v0, 2  ;;  %v6593_v0 = vpack.c.bf16 %v6580_v7, %v6578_v39  ;;  %v7382_v36 = vrot.slane %v14565_v47, 2  ;;  %v7447_v35 = vrot.slane %v14565_v47, 3 }
 0x51e   : > { %8780 = vmatmul.msk.bf16.vlgmr.msrb.gmra.mxu2 %vm538_vm7, %v7189_v34  ;;  %v6585_v34 = vsel %vm1400_vm3, %v6582_v48, %v6584_v17  ;;  %v6573_v25 = vsel %vm1400_vm3, %v6571_v38, %v6572_v5  ;;  %v7383_v9 = vsel %vm1400_vm3, %v7381_v15, %v7382_v36  ;;  %v6907_v17 = vrot.slane %v14230_v45, 1 }
 0x51f   : > { %v6594_v23 = vpack.c.bf16 %v6585_v34, %v6583_v29  ;;  %v6592_v26 = vpack.c.bf16 %v6575_v22, %v6573_v25  ;;  %v6915_v45 = vrot.slane %v14439_v2, 1  ;;  %v6920_v2 = vrot.slane %v14492_v41, 1  ;;  %v9106_v25 = vld [vmem:[%s14860_s5 + $0x1d0] sm:$0xff] }
 0x520   : > { %v6909_v34 = vsel %vm1173_vm2, %v6907_v17, %v6908_v10 }
 0x521   : > { %8629 = vmatmul.msk.bf16.gmra.mxu3 %vm538_vm7, %v14469_v1  ;;  %8743 = vmatmul.msk.bf16.gmra.mxu0 %vm538_vm7, %v7016_v54  ;;  %v9073_v54 = vld [vmem:[%s14860_s5 + $0xc8] sm:$0xff] }
 0x522   : > { %6970 = vmatpush.bf16.msra.mxu3 %v9073_v54  ;;  %v9107_v54 = vld [vmem:[%s14860_s5 + $0x1d8] sm:$0xff] }
 0x523   : > { %8762 = vmatmul.msk.bf16.gmra.mxu1 %vm538_vm7, %v7103_v55  ;;  %v7191_v55 = vpack.c.bf16 %v7182_v40, %v7180_v27  ;;  %v6916_v27 = vsel %vm1173_vm2, %v6913_v33, %v6915_v45 }
 0x524   : > { %v6929_v40 = vpack.c.bf16 %v6916_v27, %v6914_v37 }
 0x526   : > { %6971 = vmatpush.bf16.msra.mxu3 %v9072_v28 }
 0x52e   : > { %8781 = vmatmul.msk.bf16.gmra.mxu2 %vm538_vm7, %v7190_v13 }
 0x531   : > { %8630 = vmatmul.msk.bf16.gmra.mxu3 %vm538_vm7, %v14519_v60  ;;  %8744 = vmatmul.msk.bf16.gmra.mxu0 %vm538_vm7, %v7017_v24  ;;  %v9089_v24 = vld [vmem:[%s14860_s5 + $0x148] sm:$0xff] }
 0x533   : > { %8763 = vmatmul.msk.bf16.gmra.mxu1 %vm538_vm7, %v7104_v53 }
 0x53e   : > { %8782 = vmatmul.msk.bf16.gmra.mxu2 %vm538_vm7, %v7191_v55  ;;  %v6921_v55 = vsel %vm1173_vm2, %v6918_v18, %v6920_v2 }
 0x53f   : > { %v6930_v22 = vpack.c.bf16 %v6921_v55, %v6919_v62 }
 0x540   : > { %v6811_v15 = vpop.f32.mrf.mxu1 }
 0x541   : > { %8647 = vmatmul.msk.bf16.vlgmr.msrb.gmra.mxu3 %vm538_vm7, %v6592_v26  ;;  %8818 = vmatmul.msk.bf16.vlgmr.msra.gmra.mxu0 %vm538_vm7, %v14275_v8  ;;  %v14567_v8 = vld [vmem:[#allocation4 + $0xa0] sm:$0xf] }
 0x542   : > { %7287 = vmatpush.bf16.msrb.mxu3 %v9091_v11  ;;  %v7319_v57 = vrot.slane %v14567_v8, 1  ;;  %v7384_v51 = vrot.slane %v14567_v8, 2  ;;  %v7449_v52 = vrot.slane %v14567_v8, 3  ;;  %v9104_v26 = vld [vmem:[%s14860_s5 + $0x1c0] sm:$0xff] }
 0x543   : > { %8837 = vmatmul.msk.bf16.vlgmr.msra.gmra.mxu1 %vm538_vm7, %v6593_v0 }
 0x544   : > { %v7385_v46 = vsel %vm1400_vm3, %v7382_v36, %v7384_v51  ;;  %v14586_v16 = vpop.f32.mrf.mxu3  ;;  %v7450_v12 = vsel %vm1627_vm4, %v7447_v35, %v7449_v52 }
 0x545   : > { %v7388_v49 = vpack.c.bf16 %v7385_v46, %v7383_v9 }
 0x54c   : > { %v6501_v48 = vpop.f32.mrf.mxu3 }
 0x54e   : > { %8856 = vmatmul.msk.bf16.vlgmr.msra.gmra.mxu2 %vm538_vm7, %v14279_v6  ;;  %v7317_v6 = vrot.slane %v14565_v47, 1 }
 0x550   : > { %v7318_v14 = vsel %vm1173_vm2, %v7316_v19, %v7317_v6  ;;  %v7320_v44 = vsel %vm1173_vm2, %v7317_v6, %v7319_v57  ;;  %v7255_v19 = vpack.c.bf16 %v14565_v47, %v14569_v59 }
 0x551   : > { %8648 = vmatmul.msk.bf16.gmra.mxu3 %vm538_vm7, %v6593_v0  ;;  %8819 = vmatmul.msk.bf16.gmra.mxu0 %vm538_vm7, %v14378_v50  ;;  %v9090_v50 = vld [vmem:[%s14860_s5 + $0x150] sm:$0xff]  ;;  %v7323_v13 = vpack.c.bf16 %v7320_v44, %v7318_v14  ;;  %v6724_v14 = vpop.f32.mrf.mxu0 }
 0x552   : > { %7288 = vmatpush.bf16.msrb.mxu3 %v9090_v50 }
 0x553   : > { %8838 = vmatmul.msk.bf16.gmra.mxu1 %vm538_vm7, %v6594_v23 }
 0x556   : > { %7289 = vmatpush.bf16.msrb.mxu3 %v9089_v24 }
 0x55a   : > { %7290 = vmatpush.bf16.msrb.mxu3 %v9088_v30 }
 0x55e   : > { %8857 = vmatmul.msk.bf16.gmra.mxu2 %vm538_vm7, %v14380_v61  ;;  %v7446_v61 = vrot.slane %v14569_v59, 3 }
 0x560   : > { %v7448_v53 = vsel %vm1627_vm4, %v7446_v61, %v7447_v35 }
 0x561   : > { %8649 = vmatmul.msk.bf16.gmra.mxu3 %vm538_vm7, %v6594_v23  ;;  %8820 = vmatmul.msk.bf16.gmra.mxu0 %vm538_vm7, %v7323_v13  ;;  %v7453_v29 = vpack.c.bf16 %v7450_v12, %v7448_v53  ;;  %v6911_v23 = vsel %vm1173_vm2, %v6908_v10, %v6910_v21  ;;  %v6726_v13 = vpop.f32.mrf.mxu0  ;;  %v7512_v12 = vrot.slane %v14565_v47, 4 }
 0x562   : > { %v6928_v32 = vpack.c.bf16 %v6911_v23, %v6909_v34 }
 0x563   : > { %8839 = vmatmul.msk.bf16.gmra.mxu1 %vm538_vm7, %v7388_v49  ;;  %v6813_v49 = vpop.f32.mrf.mxu1 }
 0x564   : > { %v6504_v63 = vpop.f32.mrf.mxu3 }
 0x569   : > { %v6729_v61 = vpop.f32.mrf.mxu0 }
 0x56c   : > { %v6506_v5 = vpop.f32.mrf.mxu3 }
 0x56e   : > { %8858 = vmatmul.msk.bf16.gmra.mxu2 %vm538_vm7, %v7453_v29 }
 0x571   : > { %8723 = vmatmul.msk.bf16.vlgmr.msra.gmra.mxu3 %vm538_vm7, %v6928_v32  ;;  %v6731_v53 = vpop.f32.mrf.mxu0 }
 0x572   : > { %7550 = vmatpush.bf16.msra.mxu3 %v9107_v54 }
 0x576   : > { %7551 = vmatpush.bf16.msra.mxu3 %v9106_v25 }
 0x57a   : > { %7552 = vmatpush.bf16.msra.mxu3 %v9105_v4 }
 0x57e   : > { %7553 = vmatpush.bf16.msra.mxu3 %v9104_v26  ;;  %v6734_v56 = vpop.f32.mrf.mxu0 }
 0x581   : > { %8724 = vmatmul.msk.bf16.gmra.mxu3 %vm538_vm7, %v6929_v40 }
 0x584   : > { %v6509_v42 = vpop.f32.mrf.mxu3 }
 0x586   : > { %v6736_v54 = vpop.f32.mrf.mxu0 }
 0x58c   : > { %v6511_v38 = vpop.f32.mrf.mxu3 }
 0x58e   : > { %v7060_v4 = vpop.f32.mrf.mxu0 }
 0x591   : > { %8725 = vmatmul.msk.bf16.gmra.mxu3 %vm538_vm7, %v6930_v22 }
 0x594   : > { %v6556_v43 = vpop.f32.mrf.mxu3 }
 0x59c   : > { %v6558_v58 = vpop.f32.mrf.mxu3 }
 0x59d   : > { %v6559_v41 = vadd.f32 %v6558_v58, %v6501_v48  ;;  %v7511_v48 = vrot.slane %v14569_v59, 4 }
 0x59f   : > { %v7513_v23 = vsel %vm1854_vm5, %v7511_v48, %v7512_v12 }
 0x5a1   : > { %8799 = vmatmul.msk.bf16.vlgmr.msrb.gmra.mxu3 %vm538_vm7, %v14469_v1  ;;  %v6557_v1 = vadd.f32 %v6556_v43, %v14586_v16  ;;  %v6816_v16 = vpop.f32.mrf.mxu1 }
 0x5a4   : > { %v6561_v39 = vpop.f32.mrf.mxu3 }
 0x5a5   : > { %v6562_v7 = vadd.f32 %v6561_v39, %v6504_v63 }
 0x5a9   : > { %v6818_v29 = vpop.f32.mrf.mxu1 }
 0x5ac   : > { %v6563_v0 = vpop.f32.mrf.mxu3 }
 0x5ad   : > { %v6564_v28 = vadd.f32 %v6563_v0, %v6506_v5 }
 0x5b1   : > { %8800 = vmatmul.msk.bf16.gmra.mxu3 %vm538_vm7, %v14519_v60  ;;  %v6877_v60 = vpop.f32.mrf.mxu2 }
 0x5b4   : > { %v6566_v11 = vpop.f32.mrf.mxu3 }
 0x5b5   : > { %v6567_v6 = vadd.f32 %v6566_v11, %v6509_v42 }
 0x5b9   : > { %v6879_v52 = vpop.f32.mrf.mxu2 }
 0x5bc   : > { %v6568_v57 = vpop.f32.mrf.mxu3 }
 0x5bd   : > { %v6569_v50 = vadd.f32 %v6568_v57, %v6511_v38 }
 0x5c1   : > { %8801 = vmatmul.msk.bf16.gmra.mxu3 %vm538_vm7, %v7255_v19  ;;  %v6882_v24 = vpop.f32.mrf.mxu2 }
 0x5c4   : > { %v6637_v36 = vpop.f32.mrf.mxu3 }
 0x5c5   : > { %v6652_v51 = vadd.f32 %v6637_v36, %v6557_v1 }
 0x5c7   : > { %v6739_v17 = vadd.f32 %v6724_v14, %v6652_v51 }
 0x5c9   : > { %v6826_v33 = vadd.f32 %v6811_v15, %v6739_v17  ;;  %v6884_v45 = vpop.f32.mrf.mxu2 }
 0x5cb   : > { %v6892_v5 = vadd.f32 %v6877_v60, %v6826_v33 }
 0x5cc   : > { %v6639_v44 = vpop.f32.mrf.mxu3 }
 0x5d1   : > { %8875 = vmatmul.msk.bf16.vlgmr.msra.gmra.mxu3 %vm538_vm7, %v14285_v3  ;;  %v7514_v3 = vrot.slane %v14567_v8, 4  ;;  %v6821_v8 = vpop.f32.mrf.mxu1  ;;  %v6887_v40 = vpop.f32.mrf.mxu2 }
 0x5d3   : > { %v7515_v32 = vsel %vm1854_vm5, %v7512_v12, %v7514_v3  ;;  %v9109_v3 = vld [vmem:[%s14862_s7 + $0x8] sm:$0xff] }
 0x5d4   : > { %v6642_v9 = vpop.f32.mrf.mxu3  ;;  %v7518_v30 = vpack.c.bf16 %v7515_v32, %v7513_v23  ;;  %7743 = vmatpush.bf16.msrb.mxu1 %v9109_v3 }
 0x5d5   : > { %v6654_v46 = vadd.f32 %v6642_v9, %v6562_v7 }
 0x5d7   : > { %v6741_v42 = vadd.f32 %v6729_v61, %v6654_v46 }
 0x5d9   : > { %v6823_v38 = vpop.f32.mrf.mxu1  ;;  %v6828_v55 = vadd.f32 %v6816_v16, %v6741_v42  ;;  %v6889_v25 = vpop.f32.mrf.mxu2 }
 0x5db   : > { %v6894_v43 = vadd.f32 %v6882_v24, %v6828_v55 }
 0x5dc   : > { %v6644_v35 = vpop.f32.mrf.mxu3 }
 0x5dd   : > { %v6655_v62 = vadd.f32 %v6644_v35, %v6564_v28 }
 0x5df   : > { %v6742_v22 = vadd.f32 %v6731_v53, %v6655_v62 }
 0x5e1   : > { %8876 = vmatmul.msk.bf16.gmra.mxu3 %vm538_vm7, %v14392_v31  ;;  %v6653_v31 = vadd.f32 %v6639_v44, %v6559_v41  ;;  %v6829_v39 = vadd.f32 %v6818_v29, %v6742_v22  ;;  %v7147_v7 = vpop.f32.mrf.mxu1  ;;  %v7234_v11 = vpop.f32.mrf.mxu2 }
 0x5e3   : > { %v6740_v47 = vadd.f32 %v6726_v13, %v6653_v31  ;;  %v6895_v0 = vadd.f32 %v6884_v45, %v6829_v39  ;;  %v14696_v39 = vld [vmem:[%s14861_s6] ss:$0 sm:$0xff] }
 0x5e4   : > { %v6647_v10 = vpop.f32.mrf.mxu3 }
 0x5e5   : > { %v6656_v21 = vadd.f32 %v6647_v10, %v6567_v6  ;;  %v6827_v27 = vadd.f32 %v6813_v49, %v6740_v47  ;;  %v9111_v10 = vld [vmem:[%s14862_s7 + $0x18] sm:$0xff]  ;;  %v9110_v47 = vld [vmem:[%s14862_s7 + $0x10] sm:$0xff] }
 0x5e6   : > { %7715 = vmatpush.bf16.msrb.mxu0 %v9111_v10 }
 0x5e7   : > { %v6893_v18 = vadd.f32 %v6879_v52, %v6827_v27  ;;  %v6743_v26 = vadd.f32 %v6734_v56, %v6656_v21  ;;  %v9113_v21 = vld [vmem:[%s14862_s7 + $0x28] sm:$0xff] }
 0x5e8   : > { %7778 = vmatpush.bf16.msrb.mxu2 %v9113_v21  ;;  %v9116_v21 = vld [vmem:[%s14862_s7 + $0x40] sm:$0xff] }
 0x5e9   : > { %v6830_v19 = vadd.f32 %v6821_v8, %v6743_v26  ;;  %v7149_v1 = vpop.f32.mrf.mxu1  ;;  %v7236_v44 = vpop.f32.mrf.mxu2 }
 0x5ea   : > { %7716 = vmatpush.bf16.msrb.mxu0 %v9110_v47  ;;  %v9118_v47 = vld [vmem:[%s14862_s7 + $0x50] sm:$0xff] }
 0x5eb   : > { %v6896_v28 = vadd.f32 %v6887_v40, %v6830_v19 }
 0x5ec   : > { %v6649_v34 = vpop.f32.mrf.mxu3 }
 0x5ed   : > { %v6657_v63 = vadd.f32 %v6649_v34, %v6569_v50  ;;  %v7062_v50 = vpop.f32.mrf.mxu0 }
 0x5ef   : > { %v6744_v36 = vadd.f32 %v6736_v54, %v6657_v63 }
 0x5f1   : > { %8877 = vmatmul.msk.bf16.gmra.mxu3 %vm538_vm7, %v7518_v30  ;;  %v6831_v15 = vadd.f32 %v6823_v38, %v6744_v36  ;;  %v7152_v46 = vpop.f32.mrf.mxu1  ;;  %v7239_v35 = vpop.f32.mrf.mxu2 }
 0x5f3   : > { %v6897_v9 = vadd.f32 %v6889_v25, %v6831_v15 }
 0x5f4   : > { %v6973_v37 = vpop.f32.mrf.mxu3 }
 0x5f5   : > { %v6988_v59 = vadd.f32 %v6973_v37, %v6892_v5  ;;  %v7065_v60 = vpop.f32.mrf.mxu0  ;;  %v9112_v5 = vld [vmem:[%s14862_s7 + $0x20] sm:$0xff] }
 0x5f6   : > { %7779 = vmatpush.bf16.msrb.mxu2 %v9112_v5 }
 0x5f7   : > { %v7075_v63 = vadd.f32 %v7060_v4, %v6988_v59 }
 0x5f9   : > { %v7154_v16 = vpop.f32.mrf.mxu1  ;;  %v14663_v24 = vpop.f32.mrf.mxu2  ;;  %v7162_v33 = vadd.f32 %v7147_v7, %v7075_v63 }
 0x5fb   : > { %v7249_v37 = vadd.f32 %v7234_v11, %v7162_v33 }
 0x5fc   : > { %v6975_v2 = vpop.f32.mrf.mxu3 }
 0x5fd   : > { %v6989_v20 = vadd.f32 %v6975_v2, %v6893_v18  ;;  %v7067_v52 = vpop.f32.mrf.mxu0  ;;  %v9108_v2 = vld [vmem:[%s14862_s7] sm:$0xff] }
 0x5fe   : > { %7744 = vmatpush.bf16.msrb.mxu1 %v9108_v2 }
 0x5ff   : > { %v7076_v8 = vadd.f32 %v7062_v50, %v6989_v20 }
 0x601   : > { %v14670_v48 = vpop.f32.mrf.mxu1  ;;  %v14672_v17 = vpop.f32.mrf.mxu2  ;;  %v7163_v40 = vadd.f32 %v7149_v1, %v7076_v8 }
 0x603   : > { %v7250_v62 = vadd.f32 %v7236_v44, %v7163_v40 }
 0x604   : > { %v6978_v58 = vpop.f32.mrf.mxu3 }
 0x605   : > { %v6990_v41 = vadd.f32 %v6978_v58, %v6894_v43  ;;  %v14665_v53 = vpop.f32.mrf.mxu0 }
 0x607   : > { %v7077_v38 = vadd.f32 %v7065_v60, %v6990_v41  ;;  %v9127_v41 = vld [vmem:[%s14862_s7 + $0x98] sm:$0xff] }
 0x608   : > { %8039 = vmatpush.bf16.msrb.mxu3 %v9127_v41 }
 0x609   : > { %v14676_v23 = vpop.f32.mrf.mxu1  ;;  %v14678_v31 = vpop.f32.mrf.mxu2  ;;  %v7164_v22 = vadd.f32 %v7152_v46, %v7077_v38 }
 0x60b   : > { %v7251_v11 = vadd.f32 %v7239_v35, %v7164_v22  ;;  %v9119_v35 = vld [vmem:[%s14862_s7 + $0x58] sm:$0xff] }
 0x60c   : > { %v6980_v6 = vpop.f32.mrf.mxu3  ;;  %7886 = vmatpush.bf16.msra.mxu2 %v9119_v35 }
 0x60d   : > { %v14651_v57 = vadd.f32 %v6980_v6, %v6895_v0  ;;  %v14674_v34 = vpop.f32.mrf.mxu0 }
 0x60f   : > { %v7078_v0 = vadd.f32 %v7067_v52, %v14651_v57  ;;  %v9115_v57 = vld [vmem:[%s14862_s7 + $0x38] sm:$0xff] }
 0x610   : > { %7819 = vmatpush.bf16.msra.mxu0 %v9115_v57  ;;  %7887 = vmatpush.bf16.msra.mxu2 %v9118_v47  ;;  %v9121_v57 = vld [vmem:[%s14862_s7 + $0x68] sm:$0xff] }
 0x611   : > { %v7425_v45 = vpop.f32.mrf.mxu1  ;;  %v7490_v27 = vpop.f32.mrf.mxu2 }
 0x614   : > { %v6983_v51 = vpop.f32.mrf.mxu3 }
 0x615   : > { %v14653_v14 = vadd.f32 %v6983_v51, %v6896_v28  ;;  %v7360_v30 = vpop.f32.mrf.mxu0  ;;  %v7165_v28 = vadd.f32 %v7154_v16, %v7078_v0  ;;  %v9125_v0 = vld [vmem:[%s14862_s7 + $0x88] sm:$0xff] }
 0x617   : > { %v7079_v52 = vadd.f32 %v14665_v53, %v14653_v14 }
 0x619   : > { %v7427_v55 = vpop.f32.mrf.mxu1  ;;  %v7492_v43 = vpop.f32.mrf.mxu2  ;;  %v7166_v63 = vadd.f32 %v14670_v48, %v7079_v52  ;;  %v9126_v48 = vld [vmem:[%s14862_s7 + $0x90] sm:$0xff] }
 0x61a   : > { %8040 = vmatpush.bf16.msrb.mxu3 %v9126_v48 }
 0x61b   : > { %v7253_v8 = vadd.f32 %v14672_v17, %v7166_v63 }
 0x61c   : > { %v6985_v13 = vpop.f32.mrf.mxu3 }
 0x61d   : > { %v14655_v49 = vadd.f32 %v6985_v13, %v6897_v9  ;;  %v7362_v54 = vpop.f32.mrf.mxu0  ;;  %v9117_v13 = vld [vmem:[%s14862_s7 + $0x48] sm:$0xff] }
 0x61e   : > { %7854 = vmatpush.bf16.msra.mxu1 %v9117_v13  ;;  %v9124_v13 = vld [vmem:[%s14862_s7 + $0x80] sm:$0xff] }
 0x61f   : > { %v7080_v5 = vadd.f32 %v14674_v34, %v14655_v49 }
 0x621   : > { %v7430_v36 = vpop.f32.mrf.mxu1  ;;  %v7495_v9 = vpop.f32.mrf.mxu2  ;;  %v7167_v2 = vadd.f32 %v14676_v23, %v7080_v5 }
 0x622   : > { %7855 = vmatpush.bf16.msra.mxu1 %v9116_v21 }
 0x623   : > { %v7254_v23 = vadd.f32 %v14678_v31, %v7167_v2 }
 0x624   : > { %v7292_v61 = vpop.f32.mrf.mxu3 }
 0x625   : > { %v7307_v59 = vadd.f32 %v7292_v61, %v7249_v37  ;;  %v7365_v7 = vpop.f32.mrf.mxu0  ;;  %v7252_v61 = vadd.f32 %v14663_v24, %v7165_v28 }
 0x627   : > { %v7375_v42 = vadd.f32 %v7360_v30, %v7307_v59 }
 0x629   : > { %v7440_v20 = vadd.f32 %v7425_v45, %v7375_v42  ;;  %v7432_v14 = vpop.f32.mrf.mxu1  ;;  %v7497_v59 = vpop.f32.mrf.mxu2 }
 0x62b   : > { %v7505_v58 = vadd.f32 %v7490_v27, %v7440_v20  ;;  %v9123_v20 = vld [vmem:[%s14862_s7 + $0x78] sm:$0xff] }
 0x62c   : > { %v7294_v12 = vpop.f32.mrf.mxu3 }
 0x62d   : > { %v7308_v25 = vadd.f32 %v7294_v12, %v7250_v62  ;;  %v7367_v10 = vpop.f32.mrf.mxu0 }
 0x62f   : > { %v7376_v4 = vadd.f32 %v7362_v54, %v7308_v25 }
 0x631   : > { %v7441_v1 = vadd.f32 %v7427_v55, %v7376_v4 }
 0x633   : > { %v7506_v60 = vadd.f32 %v7492_v43, %v7441_v1  ;;  %v9122_v1 = vld [vmem:[%s14862_s7 + $0x70] sm:$0xff] }
 0x634   : > { %v7297_v29 = vpop.f32.mrf.mxu3 }
 0x635   : > { %v7309_v50 = vadd.f32 %v7297_v29, %v7251_v11  ;;  %v7370_v42 = vpop.f32.mrf.mxu0  ;;  %v9135_v11 = vld [vmem:[%s14862_s7 + $0xd8] sm:$0xff] }
 0x636   : > { %8190 = vmatpush.bf16.msra.mxu3 %v9135_v11  ;;  %v9128_v11 = vld [vmem:[%s14862_s7 + $0xa0] sm:$0xff] }
 0x637   : > { %v7377_v44 = vadd.f32 %v7365_v7, %v7309_v50 }
 0x639   : > { %v7442_v29 = vadd.f32 %v7430_v36, %v7377_v44  ;;  %v7500_v36 = vpop.f32.mrf.mxu2 }
 0x63b   : > { %v7507_v33 = vadd.f32 %v7495_v9, %v7442_v29 }
 0x63c   : > { %v7299_v32 = vpop.f32.mrf.mxu3 }
 0x63d   : > { %v7310_v12 = vadd.f32 %v7299_v32, %v7252_v61  ;;  %v9114_v32 = vld [vmem:[%s14862_s7 + $0x30] sm:$0xff] }
 0x63e   : > { %7820 = vmatpush.bf16.msra.mxu0 %v9114_v32 }
 0x63f   : > { %v7378_v24 = vadd.f32 %v7367_v10, %v7310_v12 }
 0x641   : > { %v7443_v54 = vadd.f32 %v7432_v14, %v7378_v24 }
 0x643   : > { %v7508_v34 = vadd.f32 %v7497_v59, %v7443_v54  ;;  %v9131_v59 = vld [vmem:[%s14862_s7 + $0xb8] sm:$0xff] }
 0x644   : > { %v14680_v56 = vpop.f32.mrf.mxu3 }
 0x645   : > { %v7311_v27 = vadd.f32 %v14680_v56, %v7253_v8  ;;  %v7435_v56 = vpop.f32.mrf.mxu1 }
 0x647   : > { %v7379_v55 = vadd.f32 %v7370_v42, %v7311_v27 }
 0x649   : > { %v7444_v50 = vadd.f32 %v7435_v56, %v7379_v55 }
 0x64b   : > { %v7509_v61 = vadd.f32 %v7500_v36, %v7444_v50 }
 0x64c   : > { %v14688_v18 = vpop.f32.mrf.mxu3 }
 0x64d   : > { %v7312_v31 = vadd.f32 %v14688_v18, %v7254_v23  ;;  %v9134_v18 = vld [vmem:[%s14862_s7 + $0xd0] sm:$0xff]  ;;  %v7437_v12 = vpop.f32.mrf.mxu1  ;;  %v9132_v23 = vld [vmem:[%s14862_s7 + $0xc0] sm:$0xff] }
 0x64e   : > { %8191 = vmatpush.bf16.msra.mxu3 %v9134_v18 }
 0x654   : > { %v7555_v26 = vpop.f32.mrf.mxu3 }
 0x655   : > { %v7570_v6 = vadd.f32 %v7555_v26, %v7505_v58 }
 0x657   : > { %v7580_v19 = vadd.f32 %v14696_v39, %v7570_v6 }
 0x659   : > { %vm7586_vm4 = vcmp.gt.f32.partialorder %v7580_v19, 0.0  ;;  %v7592_v51 = vmul.f32 0.1, %v7580_v19 }
 0x65b   : > { %v7598_v15 = vsel %vm7586_vm4, %v7580_v19, %v7592_v51 }
 0x65c   : > { %7604 = vst.msk [vmem:[#allocation5 + $0x2] sm:$0xff] %vm488_vm8, %v7598_v15  ;;  %v7557_v46 = vpop.f32.mrf.mxu3 }
 0x65d   : > { %v7571_v16 = vadd.f32 %v7557_v46, %v7506_v60  ;;  %v7372_v60 = vpop.f32.mrf.mxu0 }
 0x65e   : > { %v7380_v35 = vadd.f32 %v7372_v60, %v7312_v31 }
 0x65f   : > { %v7581_v3 = vadd.f32 %v14696_v39, %v7571_v16 }
 0x660   : > { %v7445_v63 = vadd.f32 %v7437_v12, %v7380_v35 }
 0x661   : > { %vm7587_vm5 = vcmp.gt.f32.partialorder %v7581_v3, 0.0  ;;  %v7593_v30 = vmul.f32 0.1, %v7581_v3 }
 0x663   : > { %v7599_v53 = vsel %vm7587_vm5, %v7581_v3, %v7593_v30  ;;  %v7610_v62 = vld [vmem:[#allocation5] sm:$0xff] }
 0x664   : > { %7605 = vst.msk [vmem:[#allocation5 + $0xa] sm:$0xff] %vm488_vm8, %v7599_v53  ;;  %v7560_v45 = vpop.f32.mrf.mxu3  ;;  %v9120_v3 = vld [vmem:[%s14862_s7 + $0x60] sm:$0xff] }
 0x665   : > { %v7572_v37 = vadd.f32 %v7560_v45, %v7507_v33  ;;  %v7502_v33 = vpop.f32.mrf.mxu2 }
 0x666   : > { %v7510_v47 = vadd.f32 %v7502_v33, %v7445_v63 }
 0x667   : > { %v7582_v40 = vadd.f32 %v14696_v39, %v7572_v37 }
 0x669   : > { %vm7588_vm7 = vcmp.gt.f32.partialorder %v7582_v40, 0.0  ;;  %v7594_v38 = vmul.f32 0.1, %v7582_v40 }
 0x66b   : > { %v7600_v49 = vsel %vm7588_vm7, %v7582_v40, %v7594_v38  ;;  %v7611_v17 = vld [vmem:[#allocation5 + $0x8] sm:$0xff]  ;;  %v7612_v25 = vld [vmem:[#allocation5 + $0x10] sm:$0xf] }
 0x66c   : > { %7606 = vst.msk [vmem:[#allocation5 + $0x1a] sm:$0xff] %vm488_vm8, %v7600_v49  ;;  %v7562_v22 = vpop.f32.mrf.mxu3  ;;  %v14741_v43 = vpack.c.bf16 %v7611_v17, %v7610_v62  ;;  %v14743_v4 = vpack.c.bf16 %v7612_v25, %v7612_v25  ;;  %v9130_v25 = vld [vmem:[%s14862_s7 + $0xb0] sm:$0xff] }
 0x66d   : > { %v7573_v58 = vadd.f32 %v7562_v22, %v7508_v34  ;;  %v9133_v34 = vld [vmem:[%s14862_s7 + $0xc8] sm:$0xff] }
 0x66e   : > { %8895 = vmatmul.msk.bf16.vlgmr.msrb.gmra.mxu1 %vm488_vm8, %v14741_v43  ;;  %v7754_v7 = vrot.slane %v14741_v43, 1  ;;  %v7755_v26 = vrot.slane %v14743_v4, 1  ;;  %v7685_v41 = vshll.u32 %v14741_v43, 16  ;;  %v7690_v19 = vshll.u32 %v14743_v4, 16 }
 0x66f   : > { %v7583_v6 = vadd.f32 %v14696_v39, %v7573_v58  ;;  %7965 = vmatpush.bf16.msrb.mxu1 %v9123_v20  ;;  %v7683_v51 = vshrl.u32 %v14741_v43, 16  ;;  %v7792_v30 = vshrl.u32 %v14743_v4, 16  ;;  %v7830_v24 = vrot.slane %v14741_v43, 2 }
 0x670   : > { %v7756_v28 = vsel %vm1173_vm2, %v7754_v7, %v7755_v26  ;;  %v7687_v44 = vrot.slane %v7685_v41, 1  ;;  %v7692_v46 = vrot.slane %v7690_v19, 1  ;;  %v7831_v53 = vrot.slane %v14743_v4, 2 }
 0x671   : > { %vm7589_vm15 = vcmp.gt.f32.partialorder %v7583_v6, 0.0  ;;  %v7595_v15 = vmul.f32 0.1, %v7583_v6  ;;  %8904 = vmatmul.msk.bf16.vlgmr.msrb.gmra.mxu2 %vm488_vm8, %v7756_v28  ;;  %v7789_v8 = vrot.slane %v7683_v51, 1  ;;  %v7790_v37 = vrot.slane %v7685_v41, 2 }
 0x672   : > { %v7688_v9 = vor.u32 %v7687_v44, %v7683_v51  ;;  %8005 = vmatpush.bf16.msrb.mxu2 %v9125_v0  ;;  %v7794_v42 = vrot.slane %v7792_v30, 1  ;;  %v7795_v2 = vrot.slane %v7690_v19, 2  ;;  %v7832_v62 = vsel %vm1400_vm3, %v7830_v24, %v7831_v53  ;;  %v9137_v24 = vld [vmem:[%s14862_s7 + $0xe8] sm:$0xff] }
 0x673   : > { %v7601_v52 = vsel %vm7589_vm15, %v7583_v6, %v7595_v15  ;;  %7966 = vmatpush.bf16.msrb.mxu1 %v9122_v1  ;;  %v7613_v45 = vld [vmem:[#allocation5 + $0x18] sm:$0xff]  ;;  %v7791_v56 = vor.u32 %v7790_v37, %v7789_v8 }
 0x674   : > { %7607 = vst.msk [vmem:[#allocation5 + $0x22] sm:$0xff] %vm488_vm8, %v7601_v52  ;;  %v7565_v16 = vpop.f32.mrf.mxu3  ;;  %v7693_v10 = vsel %vm7681_vm1, %v7688_v9, %v7692_v46  ;;  %v7796_v22 = vor.u32 %v7795_v2, %v7794_v42 }
 0x675   : > { %v7574_v21 = vadd.f32 %v7565_v16, %v7509_v61  ;;  %8886 = vmatmul.msk.bf16.vlgmr.msrb.gmra.mxu0 %vm488_vm8, %v7693_v10 }
 0x676   : > { %7929 = vmatpush.bf16.msrb.mxu0 %v9121_v57  ;;  %8006 = vmatpush.bf16.msrb.mxu2 %v9124_v13  ;;  %v7797_v0 = vsel %vm7788_vm10, %v7791_v56, %v7796_v22 }
 0x677   : > { %v7584_v29 = vadd.f32 %v14696_v39, %v7574_v21 }
 0x679   : > { %vm7590_vm6 = vcmp.gt.f32.partialorder %v7584_v29, 0.0  ;;  %v7596_v14 = vmul.f32 0.1, %v7584_v29 }
 0x67a   : > { %7930 = vmatpush.bf16.msrb.mxu0 %v9120_v3 }
 0x67b   : > { %v7602_v32 = vsel %vm7590_vm6, %v7584_v29, %v7596_v14  ;;  %v7614_v48 = vld [vmem:[#allocation5 + $0x20] sm:$0xff]  ;;  %v7615_v5 = vld [vmem:[#allocation5 + $0x28] sm:$0xf] }
 0x67c   : > { %7608 = vst.msk [vmem:[#allocation5 + $0x32] sm:$0xff] %vm488_vm8, %v7602_v32  ;;  %v7567_v27 = vpop.f32.mrf.mxu3  ;;  %v7864_v40 = vpack.c.bf16 %v7614_v48, %v7613_v45  ;;  %v14789_v54 = vpack.c.bf16 %v7615_v5, %v7615_v5  ;;  %v9136_v32 = vld [vmem:[%s14862_s7 + $0xe0] sm:$0xff] }
 0x67d   : > { %v7575_v38 = vadd.f32 %v7567_v27, %v7510_v47 }
 0x67e   : > { %8922 = vmatmul.msk.bf16.vlgmr.msra.gmra.mxu1 %vm488_vm8, %v7832_v62  ;;  %v8015_v55 = vrot.slane %v7864_v40, 2  ;;  %v8016_v49 = vrot.slane %v14789_v54, 2  ;;  %v7897_v4 = vshrl.u32 %v7864_v40, 16  ;;  %v7899_v7 = vshll.u32 %v7864_v40, 16 }
 0x67f   : > { %v7585_v17 = vadd.f32 %v14696_v39, %v7575_v38  ;;  %8114 = vmatpush.bf16.msra.mxu1 %v9131_v59  ;;  %v9129_v39 = vld [vmem:[%s14862_s7 + $0xa8] sm:$0xff]  ;;  %v7904_v26 = vshll.u32 %v14789_v54, 16  ;;  %v7978_v41 = vshrl.u32 %v14789_v54, 16  ;;  %v7941_v1 = vrot.slane %v7864_v40, 1 }
 0x680   : > { %v8017_v20 = vsel %vm1400_vm3, %v8015_v55, %v8016_v49  ;;  %v7975_v31 = vrot.slane %v7897_v4, 1  ;;  %v7976_v6 = vrot.slane %v7899_v7, 2  ;;  %v7942_v36 = vrot.slane %v14789_v54, 1 }
 0x681   : > { %vm7591_vm9 = vcmp.gt.f32.partialorder %v7585_v17, 0.0  ;;  %v7597_v43 = vmul.f32 0.1, %v7585_v17  ;;  %8931 = vmatmul.msk.bf16.vlgmr.msra.gmra.mxu2 %vm488_vm8, %v7864_v40  ;;  %8967 = vmatmul.msk.bf16.vlgmr.msrb.gmra.mxu3 %vm488_vm8, %v8017_v20  ;;  %v7980_v50 = vrot.slane %v7978_v41, 1  ;;  %v7981_v19 = vrot.slane %v7904_v26, 2 }
 0x682   : > { %8150 = vmatpush.bf16.msra.mxu2 %v9133_v34  ;;  %v7977_v28 = vor.u32 %v7976_v6, %v7975_v31  ;;  %v7901_v44 = vrot.slane %v7899_v7, 1  ;;  %v7943_v57 = vsel %vm1173_vm2, %v7941_v1, %v7942_v36  ;;  %v7906_v63 = vrot.slane %v7904_v26, 1 }
 0x683   : > { %v7603_v58 = vsel %vm7591_vm9, %v7585_v17, %v7597_v43  ;;  %8115 = vmatpush.bf16.msra.mxu1 %v9130_v25  ;;  %v7982_v51 = vor.u32 %v7981_v19, %v7980_v50  ;;  %v7616_v15 = vld [vmem:[#allocation5 + $0x30] sm:$0xff] }
 0x684   : > { %7609 = vst.msk [vmem:[#allocation5 + $0x3a] sm:$0xff] %vm488_vm8, %v7603_v58  ;;  %v7902_v10 = vor.u32 %v7901_v44, %v7897_v4 }
 0x685   : > { %8913 = vmatmul.msk.bf16.vlgmr.msra.gmra.mxu0 %vm488_vm8, %v7797_v0  ;;  %v7983_v16 = vsel %vm7788_vm10, %v7977_v28, %v7982_v51 }
 0x686   : > { %8071 = vmatpush.bf16.msra.mxu0 %v9129_v39  ;;  %8151 = vmatpush.bf16.msra.mxu2 %v9132_v23  ;;  %v7907_v53 = vsel %vm7681_vm1, %v7902_v10, %v7906_v63 }
 0x68a   : > { %8072 = vmatpush.bf16.msra.mxu0 %v9128_v11 }
 0x68b   : > { %v7617_v18 = vld [vmem:[#allocation5 + $0x38] sm:$0xff]  ;;  %v7618_v60 = vld [vmem:[#allocation5 + $0x40] sm:$0xf] }
 0x68c   : > { %v8049_v9 = vpack.c.bf16 %v7617_v18, %v7616_v15  ;;  %v8081_v46 = vpack.c.bf16 %v7618_v60, %v7618_v60 }
 0x68e   : > { %8949 = vmatmul.msk.bf16.vlgmr.msrb.gmra.mxu1 %vm488_vm8, %v7943_v57  ;;  %v8082_v13 = vshrl.u32 %v8049_v9, 16  ;;  %v8084_v35 = vshll.u32 %v8049_v9, 16  ;;  %v8089_v52 = vshll.u32 %v8081_v46, 16  ;;  %v8163_v61 = vshrl.u32 %v8081_v46, 16 }
 0x68f   : > { %v8126_v5 = vrot.slane %v8049_v9, 1  ;;  %v8127_v8 = vrot.slane %v8081_v46, 1  ;;  %v8200_v27 = vrot.slane %v8049_v9, 2  ;;  %v8201_v40 = vrot.slane %v8081_v46, 2 }
 0x690   : > { %v8160_v21 = vrot.slane %v8082_v13, 1  ;;  %v8161_v12 = vrot.slane %v8084_v35, 2  ;;  %v8165_v3 = vrot.slane %v8163_v61, 1  ;;  %v8166_v29 = vrot.slane %v8089_v52, 2 }
 0x691   : > { %8958 = vmatmul.msk.bf16.vlgmr.msrb.gmra.mxu2 %vm488_vm8, %v7983_v16  ;;  %v8086_v45 = vrot.slane %v8084_v35, 1  ;;  %v8091_v48 = vrot.slane %v8089_v52, 1  ;;  %v8128_v59 = vsel %vm1173_vm2, %v8126_v5, %v8127_v8  ;;  %v8202_v54 = vsel %vm1400_vm3, %v8200_v27, %v8201_v40 }
 0x692   : > { %v8162_v30 = vor.u32 %v8161_v12, %v8160_v21  ;;  %v8167_v14 = vor.u32 %v8166_v29, %v8165_v3  ;;  %vm8252_vm3 = vcmask 130048  }
 0x693   : > { %v8087_v47 = vor.u32 %v8086_v45, %v8082_v13 }
 0x694   : > { %v8168_v33 = vsel %vm7788_vm10, %v8162_v30, %v8167_v14 }
 0x695   : > { %8940 = vmatmul.msk.bf16.vlgmr.msrb.gmra.mxu0 %vm488_vm8, %v7907_v53  ;;  %9003 = vmatmul.msk.bf16.vlgmr.msra.gmra.mxu3 %vm488_vm8, %v8168_v33  ;;  %v8092_v37 = vsel %vm7681_vm1, %v8087_v47, %v8091_v48  ;;  %v9156_v48 = vld [vmem:[%s14864_s9] ss:$0 sm:$0xff] }
 0x696   : > { %8224 = vmatpush.bf16.msrb.mxu0 %v9137_v24  ;;  %v9155_v24 = vld [vmem:[%s14863_s8] ss:$0 sm:$0xff] }
 0x69a   : > { %8225 = vmatpush.bf16.msrb.mxu0 %v9136_v32 }
 0x69e   : > { %8985 = vmatmul.msk.bf16.vlgmr.msra.gmra.mxu1 %vm488_vm8, %v8092_v37 }
 0x6a1   : > { %8994 = vmatmul.msk.bf16.vlgmr.msra.gmra.mxu2 %vm488_vm8, %v8128_v59 }
 0x6a5   : > { %8976 = vmatmul.msk.bf16.vlgmr.msra.gmra.mxu0 %vm488_vm8, %v8049_v9 }
 0x6b5   : > { %9012 = vmatmul.msk.bf16.vlgmr.msrb.gmra.mxu0 %vm488_vm8, %v8202_v54 }
 0x6eb   : > { %v7746_v42 = vpop.f32.mrf.mxu1 }
 0x6f2   : > { %v7718_v2 = vpop.f32.mrf.mxu0 }
 0x6f3   : > { %v7748_v38 = vpop.f32.mrf.mxu1  ;;  %v7747_v20 = vadd.f32 %v7746_v42, %v7718_v2 }
 0x6f4   : > { %v7781_v62 = vpop.f32.mrf.mxu2 }
 0x6f5   : > { %v7786_v43 = vadd.f32 %v7781_v62, %v7747_v20 }
 0x6fa   : > { %v7720_v55 = vpop.f32.mrf.mxu0 }
 0x6fb   : > { %v7857_v34 = vpop.f32.mrf.mxu1  ;;  %v7749_v23 = vadd.f32 %v7748_v38, %v7720_v55 }
 0x6fc   : > { %v7783_v49 = vpop.f32.mrf.mxu2 }
 0x6fd   : > { %v7787_v41 = vadd.f32 %v7783_v49, %v7749_v23 }
 0x702   : > { %v7822_v17 = vpop.f32.mrf.mxu0 }
 0x703   : > { %v7859_v56 = vpop.f32.mrf.mxu1  ;;  %v7827_v39 = vadd.f32 %v7822_v17, %v7786_v43 }
 0x704   : > { %v7889_v25 = vpop.f32.mrf.mxu2  ;;  %v8042_v36 = vpop.f32.mrf.mxu3 }
 0x705   : > { %v7862_v58 = vadd.f32 %v7857_v34, %v7827_v39  ;;  %v9157_v34 = vld [vmem:[#allocation6] ss:$0 sm:$0xff] }
 0x707   : > { %v7894_v0 = vadd.f32 %v7889_v25, %v7862_v58 }
 0x70a   : > { %v7824_v22 = vpop.f32.mrf.mxu0 }
 0x70b   : > { %v7968_v7 = vpop.f32.mrf.mxu1  ;;  %v7828_v11 = vadd.f32 %v7824_v22, %v7787_v41 }
 0x70c   : > { %v7891_v4 = vpop.f32.mrf.mxu2  ;;  %v8044_v13 = vpop.f32.mrf.mxu3 }
 0x70d   : > { %v7863_v50 = vadd.f32 %v7859_v56, %v7828_v11 }
 0x70f   : > { %v7895_v51 = vadd.f32 %v7891_v4, %v7863_v50 }
 0x712   : > { %v7932_v26 = vpop.f32.mrf.mxu0 }
 0x713   : > { %v7937_v6 = vadd.f32 %v7932_v26, %v7894_v0  ;;  %v7970_v28 = vpop.f32.mrf.mxu1 }
 0x714   : > { %v8008_v31 = vpop.f32.mrf.mxu2 }
 0x715   : > { %v7973_v1 = vadd.f32 %v7968_v7, %v7937_v6 }
 0x717   : > { %v8013_v44 = vadd.f32 %v8008_v31, %v7973_v1 }
 0x718   : > { %v8193_v29 = vpop.f32.mrf.mxu3 }
 0x719   : > { %v8047_v46 = vadd.f32 %v8042_v36, %v8013_v44 }
 0x71a   : > { %v7934_v19 = vpop.f32.mrf.mxu0 }
 0x71b   : > { %v7938_v15 = vadd.f32 %v7934_v19, %v7895_v51  ;;  %v8117_v35 = vpop.f32.mrf.mxu1 }
 0x71c   : > { %v8010_v18 = vpop.f32.mrf.mxu2 }
 0x71d   : > { %v7974_v9 = vadd.f32 %v7970_v28, %v7938_v15 }
 0x71f   : > { %v8014_v52 = vadd.f32 %v8010_v18, %v7974_v9 }
 0x720   : > { %v8195_v8 = vpop.f32.mrf.mxu3 }
 0x721   : > { %v8048_v21 = vadd.f32 %v8044_v13, %v8014_v52 }
 0x722   : > { %v8074_v60 = vpop.f32.mrf.mxu0 }
 0x723   : > { %v8079_v57 = vadd.f32 %v8074_v60, %v8047_v46  ;;  %v8119_v63 = vpop.f32.mrf.mxu1 }
 0x724   : > { %v8153_v16 = vpop.f32.mrf.mxu2 }
 0x725   : > { %v8122_v61 = vadd.f32 %v8117_v35, %v8079_v57 }
 0x727   : > { %v8158_v12 = vadd.f32 %v8153_v16, %v8122_v61 }
 0x729   : > { %v8198_v14 = vadd.f32 %v8193_v29, %v8158_v12 }
 0x72a   : > { %v8076_v10 = vpop.f32.mrf.mxu0 }
 0x72b   : > { %v8080_v3 = vadd.f32 %v8076_v10, %v8048_v21 }
 0x72c   : > { %v8155_v45 = vpop.f32.mrf.mxu2 }
 0x72d   : > { %v8123_v30 = vadd.f32 %v8119_v63, %v8080_v3 }
 0x72f   : > { %v8159_v32 = vadd.f32 %v8155_v45, %v8123_v30 }
 0x731   : > { %v8199_v37 = vadd.f32 %v8195_v8, %v8159_v32 }
 0x732   : > { %v8227_v53 = vpop.f32.mrf.mxu0 }
 0x733   : > { %v8232_v33 = vadd.f32 %v8227_v53, %v8198_v14 }
 0x735   : > { %v8238_v47 = vadd.f32 %v9155_v24, %v8232_v33 }
 0x737   : > { %v8242_v5 = vmul.f32 0.1, %v8238_v47  ;;  %vm8240_vm2 = vcmp.gt.f32.partialorder %v8238_v47, 0.0 }
 0x739   : > { %v8244_v59 = vsel %vm8240_vm2, %v8238_v47, %v8242_v5 }
 0x73a   : > { %v8229_v27 = vpop.f32.mrf.mxu0  ;;  %v8250_v40 = vmul.f32 %v9156_v48, %v8244_v59 }
 0x73b   : > { %v8233_v54 = vadd.f32 %v8229_v27, %v8199_v37 }
 0x73c   : > { %v8253_v42 = vsel %vm8252_vm3, %v8250_v40, 0.0 }
 0x73d   : > { %v8239_v2 = vadd.f32 %v9155_v24, %v8233_v54  ;;  %8254 = vadd.xlane.f32.xlu0 %v8253_v42 }
 0x73f   : > { %v8243_v38 = vmul.f32 0.1, %v8239_v2  ;;  %vm8241_vm8 = vcmp.gt.f32.partialorder %v8239_v2, 0.0 }
 0x741   : > { %v8245_v62 = vsel %vm8241_vm8, %v8239_v2, %v8243_v38 }
 0x742   : > { %v8251_v55 = vmul.f32 %v9156_v48, %v8245_v62 }
 0x744   : > { %v8256_v49 = vsel %vm8252_vm3, %v8251_v55, 0.0 }
 0x745   : > { %8257 = vadd.xlane.f32.xlu1 %v8256_v49 }
 0x7b0   : > { %v8255_v17 = vpop.xlane.xlu0 %8254 }
 0x7b1   : > { %v8263_v25 = vadd.f32 %v9157_v34, %v8255_v17 }
 0x7b3   : > { %v9013_v20 = vmul.f32 -1.442695, %v8263_v25 }
 0x7b5   : > { %9158 = vpow2.f32 %v9013_v20 }
 0x7b8   : > { %v8258_v56 = vpop.xlane.xlu1 %8257 }
 0x7b9   : > { %v8264_v22 = vadd.f32 %v9157_v34, %v8258_v56 }
 0x7bb   : > { %v9159_v43 = vpop.eup %9158  ;;  %v9014_v4 = vmul.f32 -1.442695, %v8264_v22 }
 0x7bc   : > { %v8271_v39 = vadd.f32 1.0, %v9159_v43 }
 0x7bd   : > { %9160 = vpow2.f32 %v9014_v4 }
 0x7be   : > { %9162 = vrcp.f32 %v8271_v39  ;;  %v8284_v0 = vand.u32 2147483648, %v8271_v39  ;;  %v8282_v31 = vand.u32 2147483647, %v8271_v39  ;;  %vm8278_vm12 = vweird.f32 %v8271_v39 }
 0x7c0   : > { %v8285_v19 = vor.u32 1.1754944e-38, %v8284_v0  ;;  %vm8283_vm14 = vcmp.eq.f32.partialorder %v8282_v31, 8.507059e+37 }
 0x7c3   : > { %v9161_v23 = vpop.eup %9160 }
 0x7c4   : > { %v9163_v58 = vpop.eup %9162  ;;  %v8272_v7 = vadd.f32 1.0, %v9161_v23 }
 0x7c5   : > { %v8274_v26 = vmul.f32 %v9163_v58, %v8271_v39  ;;  %vm8279_vm11 = vweird.f32 %v9163_v58 }
 0x7c6   : > { %9164 = vrcp.f32 %v8272_v7  ;;  %vm8280_vm13 = vmor %vm8278_vm12, %vm8279_vm11  ;;  %v8299_v44 = vand.u32 2147483648, %v8272_v7  ;;  %v8297_v18 = vand.u32 2147483647, %v8272_v7  ;;  %vm8293_vm5 = vweird.f32 %v8272_v7 }
 0x7c7   : > { %v8275_v41 = vsub.f32 1.0, %v8274_v26 }
 0x7c8   : > { %v8300_v9 = vor.u32 1.1754944e-38, %v8299_v44  ;;  %vm8298_vm15 = vcmp.eq.f32.partialorder %v8297_v18, 8.507059e+37 }
 0x7c9   : > { %v8276_v11 = vmul.f32 %v9163_v58, %v8275_v41 }
 0x7cb   : > { %v8277_v6 = vadd.f32 %v9163_v58, %v8276_v11 }
 0x7cc   : > { %v9165_v50 = vpop.eup %9164 }
 0x7cd   : > { %v8281_v1 = vsel %vm8280_vm13, %v9163_v58, %v8277_v6  ;;  %v8289_v36 = vmul.f32 %v9165_v50, %v8272_v7  ;;  %vm8294_vm4 = vweird.f32 %v9165_v50 }
 0x7ce   : > { %v8286_v28 = vsel %vm8283_vm14, %v8285_v19, %v8281_v1  ;;  %vm8295_vm7 = vmor %vm8293_vm5, %vm8294_vm4 }
 0x7cf   : > { %8303 = vst.msk [vmem:[%s388_s21] sm:$0xff] %vm390_vm0, %v8286_v28  ;;  %v8290_v51 = vsub.f32 1.0, %v8289_v36 }
 0x7d1   : > { %v8291_v15 = vmul.f32 %v9165_v50, %v8290_v51 }
 0x7d3   : > { %v8292_v60 = vadd.f32 %v9165_v50, %v8291_v15 }
 0x7d5   : > { %v8296_v46 = vsel %vm8295_vm7, %v9165_v50, %v8292_v60 }
 0x7d6   : > { %v8301_v57 = vsel %vm8298_vm15, %v8300_v9, %v8296_v46 }
 0x7d7   : > { %8304 = vst.msk [vmem:[%s388_s21 + $0x8] sm:$0xff] %vm390_vm0, %v8301_v57 }
 0x7d8 PF: > { %s23_s19 = sadd.s32 1, %s9199_s19  }
 0x7d9   : > { %p20_p4 = scmp.ge.s32.totalorder %s23_s19, 4  }
 0x7db   :  { %22 = sbr.rel (!%p20_p4) target bundleno = 3 (0x3), region = 94 }

</bundles_post_ra>
